<compile_context>
chip_gen: v7x
topology: tpu7x:2x2x1
jax: 0.10.0
libtpu: 0.0.40
codegen_flags: <defaults>
</compile_context>

<pallas_src>
import jax
import jax.numpy as jnp
from jax.experimental import pallas as pl
from jax.experimental.pallas import tpu as pltpu

NC = 1
NDF = 64
K, S, P = 4, 2, 1
BN_EPS = 1e-5
LRELU_SLOPE = 0.2
LANE = 128


# ----------------------------------------------------------------------------
# small helpers
# ----------------------------------------------------------------------------
def _round_up(x, m):
    return (x + m - 1) // m * m


def _largest_divisor_leq(n, cap):
    cap = max(1, min(n, cap))
    for d in range(cap, 0, -1):
        if n % d == 0:
            return d
    return 1


def _vmem_capacity_bytes():
    try:
        return int(pltpu.get_tpu_info().vmem_capacity_bytes)
    except Exception:
        return 128 << 20          # v5e/v6e default if the query is unavailable


def _clamp_vmem_limit(est, vmem_cap):
    cap_limit = max(24 << 20, int(0.6 * vmem_cap))   # ~38 MB on v7x, ~76 MB else
    return max(16 << 20, min(max(int(est), 32 << 20), cap_limit))


def _pick_tiles(n, oh, ow, c4, budget_bytes):
    """Pick (images per step, s2d rows per step) from a tile byte budget,
    keeping the in-kernel unroll bounded and output blocks 8-row aligned."""
    row_bytes = (ow + 1) * c4 * 2
    rows_target = max(1, min(budget_bytes // row_bytes, 32))
    if rows_target >= oh:
        tr = oh
        nb = _largest_divisor_leq(n, min(16, max(1, rows_target // oh)))
        return nb, tr
    tr0 = _largest_divisor_leq(oh, rows_target)
    if (tr0 * ow) % 8 == 0:
        return 1, tr0
    for d in range(tr0 + 1, oh):
        if oh % d == 0 and (d * ow) % 8 == 0:
            return 1, d
    return 1, oh


# ----------------------------------------------------------------------------
# fused conv kernel (layers 2-4): in-VMEM patch assembly + MXU matmul
# ----------------------------------------------------------------------------
def _make_fused_conv_kernel(nb, tr, ow, act, emit_stats):
    ow1 = ow + 1

    def kernel(*refs):
        if emit_stats:
            a_ref, b_ref, w_ref, y_ref, st_ref, p_ref = refs
        else:
            a_ref, b_ref, w_ref, y_ref, p_ref = refs

        a = a_ref[...]            # (nb, tr, ow+1, 4*cin) bf16 space-to-depth rows
        b = b_ref[...]            # (nb, 1,  ow+1, 4*cin) bf16 halo row

        # Build im2col rows in VMEM scratch: output row t needs s2d rows t,t+1
        # and cell columns ow, ow+1 (handled by the lane-dim concatenate).
        for t in range(tr):                               # static unroll
            r0 = a[:, t]                                  # (nb, ow+1, 4*cin)
            r1 = a[:, t + 1] if t + 1 < tr else b[:, 0]
            rowp = jnp.concatenate(
                [r0[:, 0:ow], r0[:, 1:ow1], r1[:, 0:ow], r1[:, 1:ow1]],
                axis=-1)                                  # (nb, ow, 16*cin)
            p_ref[:, t * ow:(t + 1) * ow, :] = rowp

        w = w_ref[...]
        sums = None
        for ib in range(nb):                              # one MXU pass / image
            y = jnp.dot(p_ref[ib], w, preferred_element_type=jnp.float32)
            if emit_stats:
                s = jnp.concatenate(
                    [jnp.sum(y, axis=0, keepdims=True),
                     jnp.sum(y * y, axis=0, keepdims=True)], axis=0)
                sums = s if sums is None else sums + s
            if act == "lrelu":
                y = jnp.where(y >= 0.0, y, LRELU_SLOPE * y)
            elif act == "sigmoid":
                y = 1.0 / (1.0 + jnp.exp(-y))             # exact, in (0, 1)
            y_ref[ib, :, :] = y.astype(y_ref.dtype)

        if emit_stats:
            st_ref[0, 0, :, :] = sums                     # per-tile partial stats

    return kernel


def conv4x4s2(x, w, *, act=None, emit_stats=False, out_dtype=jnp.bfloat16,
              tile_budget_bytes, vmem_cap):
    """Fused Conv2d(k=4, s=2, p=1, bias=False) for Cin >= 64.

    x: NHWC (N, H, W, Cin); w: (Cout, Cin, 4, 4).
    Returns y of shape (N, OH*OW, Cout_p) [+ per-tile (sum, sumsq) stats].
    """
    n, h, wdim, cin = x.shape
    assert h % 2 == 0 and wdim % 2 == 0
    oh, ow = h // 2, wdim // 2
    cout = int(w.shape[0])
    c4 = 4 * cin
    kd = 16 * cin

    # Space-to-depth of the zero-padded input: (N, OH+1, OW+1, 4*Cin),
    # cell order (ph, pw, c).  Same HBM byte count as the activation.
    xb = x.astype(jnp.bfloat16)
    xp = jnp.pad(xb, ((0, 0), (1, 1), (1, 1), (0, 0)))
    s2d = xp.reshape(n, oh + 1, 2, ow + 1, 2, cin)
    s2d = s2d.transpose(0, 1, 3, 2, 4, 5).reshape(n, oh + 1, ow + 1, c4)

    # Weight rows ordered (di, dj, ph, pw, c) to match in-kernel assembly.
    wt = jnp.transpose(w, (2, 3, 1, 0)).reshape(2, 2, 2, 2, cin, cout)
    wt = jnp.transpose(wt, (0, 2, 1, 3, 4, 5)).reshape(kd, cout)
    cout_p = cout if cout >= 64 else _round_up(cout, LANE)   # lane-dense store
    if cout_p > cout:
        wt = jnp.pad(wt, ((0, 0), (0, cout_p - cout)))
    wt = wt.astype(jnp.bfloat16)

    nb, tr = _pick_tiles(n, oh, ow, c4, tile_budget_bytes)
    grid = (n // nb, oh // tr)
    m_t = nb * tr * ow

    a_spec = pl.BlockSpec((nb, tr, ow + 1, c4), lambda g, r: (g, r, 0, 0))
    halo_spec = pl.BlockSpec((nb, 1, ow + 1, c4),
                             lambda g, r: (g, (r + 1) * tr, 0, 0))
    w_spec = pl.BlockSpec((kd, cout_p), lambda g, r: (0, 0))
    y_spec = pl.BlockSpec((nb, tr * ow, cout_p), lambda g, r: (g, r, 0))

    out_bytes = jnp.dtype(out_dtype).itemsize
    est = (2 * nb * tr * (ow + 1) * c4 * 2          # double-buffered input tiles
           + 2 * nb * (ow + 1) * c4 * 2             # halo tiles
           + 2 * kd * cout_p * 2                    # resident weight
           + 2 * m_t * cout_p * out_bytes           # output tiles
           + m_t * kd * 2                           # patch scratch
           + nb * tr * (ow + 1) * c4 * 2            # loaded input value
           + 2 * tr * ow * cout_p * 4)              # f32 matmul result
    limit = _clamp_vmem_limit(int(est * 1.5) + (4 << 20), vmem_cap)

    kernel = _make_fused_conv_kernel(nb, tr, ow, act, emit_stats)
    scratch = [pltpu.VMEM((nb, tr * ow, kd), jnp.bfloat16)]
    cparams = pltpu.CompilerParams(
        dimension_semantics=("parallel", "parallel"),    # per-tile stats keep
        vmem_limit_bytes=limit)                          # both axes parallel

    if emit_stats:
        out_shape = (jax.ShapeDtypeStruct((n, oh * ow, cout_p), out_dtype),
                     jax.ShapeDtypeStruct((grid[0], grid[1], 2, cout_p),
                                          jnp.float32))
        out_specs = (y_spec,
                     pl.BlockSpec((1, 1, 2, cout_p), lambda g, r: (g, r, 0, 0)))
        y, st = pl.pallas_call(kernel, grid=grid,
                               in_specs=[a_spec, halo_spec, w_spec],
                               out_specs=out_specs, out_shape=out_shape,
                               scratch_shapes=scratch,
                               compiler_params=cparams)(s2d, s2d, wt)
        return y, st

    y = pl.pallas_call(kernel, grid=grid,
                       in_specs=[a_spec, halo_spec, w_spec],
                       out_specs=y_spec,
                       out_shape=jax.ShapeDtypeStruct((n, oh * ow, cout_p),
                                                      out_dtype),
                       scratch_shapes=scratch,
                       compiler_params=cparams)(s2d, s2d, wt)
    return y


# ----------------------------------------------------------------------------
# layer-1 kernel (Cin = 1): wrapper-side im2col + tiled matmul + LeakyReLU
# ----------------------------------------------------------------------------
def _conv_lrelu_kernel(p_ref, w_ref, o_ref):
    y = jnp.dot(p_ref[...], w_ref[...], preferred_element_type=jnp.float32)
    o_ref[...] = jnp.where(y >= 0.0, y, LRELU_SLOPE * y).astype(o_ref.dtype)


def conv4x4s2_im2col_lrelu(x, w, *, tile_budget_bytes, vmem_cap,
                           out_dtype=jnp.bfloat16):
    """Layer-1 path: Cin=1 so the im2col matrix is small relative to the
    64-channel output; keep it wrapper-side and use a large, budget-sized TM.
    TODO(synk): pull layer-1 patch extraction in-kernel as well (secondary)."""
    n, h, wdim, cin = x.shape
    oh, ow = h // 2, wdim // 2
    cout = int(w.shape[0])
    kd = K * K * cin

    xp = jnp.pad(x.astype(jnp.bfloat16), ((0, 0), (1, 1), (1, 1), (0, 0)))
    cols = [xp[:, kh:kh + 2 * oh:2, kw:kw + 2 * ow:2, :]
            for kh in range(K) for kw in range(K)]
    patches = jnp.concatenate(cols, axis=-1).reshape(n * oh * ow, kd)
    m = n * oh * ow

    wmat = jnp.transpose(w, (2, 3, 1, 0)).reshape(kd, cout)
    cout_p = cout if cout >= 64 else _round_up(cout, LANE)
    if cout_p > cout:
        wmat = jnp.pad(wmat, ((0, 0), (0, cout_p - cout)))
    wmat = wmat.astype(jnp.bfloat16)

    per_row = kd * 2 + cout_p * 2
    tm = max(8, min(8192, tile_budget_bytes // per_row))
    tm = (tm // 8) * 8
    tm = min(tm, _round_up(m, 8))
    mp = _round_up(m, tm)
    if mp > m:
        patches = jnp.pad(patches, ((0, mp - m), (0, 0)))   # zero rows: harmless

    est = (2 * tm * kd * 2 + 2 * kd * cout_p * 2 + 2 * tm * cout_p * 2
           + 2 * tm * cout_p * 4)
    limit = _clamp_vmem_limit(int(est * 1.5) + (4 << 20), vmem_cap)

    out = pl.pallas_call(
        _conv_lrelu_kernel,
        grid=(mp // tm,),
        in_specs=[pl.BlockSpec((tm, kd), lambda i: (i, 0)),
                  pl.BlockSpec((kd, cout_p), lambda i: (0, 0))],
        out_specs=pl.BlockSpec((tm, cout_p), lambda i: (i, 0)),
        out_shape=jax.ShapeDtypeStruct((mp, cout_p), out_dtype),
        compiler_params=pltpu.CompilerParams(
            dimension_semantics=("parallel",), vmem_limit_bytes=limit),
    )(patches, wmat)
    return out[:m, :cout].reshape(n, oh, ow, cout)


# ----------------------------------------------------------------------------
# BatchNorm epilogue (folded into the next layer's producer by XLA)
# ----------------------------------------------------------------------------
def _bn_scale_shift(stats, m, gamma, beta):
    s = jnp.sum(stats, axis=(0, 1))                     # (2, Cout) f32
    mean = s[0] / m
    var = jnp.maximum(s[1] / m - mean * mean, 0.0)      # biased var (train mode)
    inv_std = jax.lax.rsqrt(var + BN_EPS)
    scale = gamma.astype(jnp.float32) * inv_std
    shift = beta.astype(jnp.float32) - mean * scale
    return scale, shift


def _bn_lrelu(y, scale, shift):
    z = y.astype(jnp.float32) * scale + shift           # single FMA epilogue
    return jnp.where(z >= 0.0, z, LRELU_SLOPE * z)


# ----------------------------------------------------------------------------
# Discriminator forward
# ----------------------------------------------------------------------------
def init_params(key):
    k1, k2, k3, k4 = jax.random.split(key, 4)
    std = 0.02  # DCGAN-style normal init
    return {
        "w1": jax.random.normal(k1, (NDF, NC, K, K), jnp.float32) * std,
        "w2": jax.random.normal(k2, (NDF * 2, NDF, K, K), jnp.float32) * std,
        "w3": jax.random.normal(k3, (NDF * 4, NDF * 2, K, K), jnp.float32) * std,
        "w4": jax.random.normal(k4, (1, NDF * 4, K, K), jnp.float32) * std,
        # BatchNorm2d default init: weight = 1, bias = 0
        "g2": jnp.ones((NDF * 2,), jnp.float32),
        "b2": jnp.zeros((NDF * 2,), jnp.float32),
        "g3": jnp.ones((NDF * 4,), jnp.float32),
        "b3": jnp.zeros((NDF * 4,), jnp.float32),
    }


@jax.jit
def discriminator_forward(params, x):
    # TODO(synk): only training-mode BatchNorm (batch statistics) is
    # implemented; eval-mode running_mean/var are not tracked.
    vmem_cap = _vmem_capacity_bytes()
    small_vmem = vmem_cap <= (64 << 20)               # v7x: 64 MiB / TensorCore
    fused_budget = (1 << 20) if small_vmem else (2 << 20)
    im2col_budget = (2 << 20) if small_vmem else (4 << 20)

    n = x.shape[0]
    # NCHW f32 -> NHWC bf16 once; stay NHWC/bf16 between layers.
    h = jnp.transpose(x, (0, 2, 3, 1)).astype(jnp.bfloat16)

    # Layer 1: Conv(1->64) + LeakyReLU
    h = conv4x4s2_im2col_lrelu(h, params["w1"], tile_budget_bytes=im2col_budget,
                               vmem_cap=vmem_cap)            # (N, H/2, W/2, 64)

    # Layer 2: Conv(64->128) + per-tile batch stats; BN + LeakyReLU folded into
    # the next layer's space-to-depth producer (no standalone elementwise pass).
    y2, st2 = conv4x4s2(h, params["w2"], emit_stats=True,
                        tile_budget_bytes=fused_budget, vmem_cap=vmem_cap)
    oh2, ow2 = h.shape[1] // 2, h.shape[2] // 2
    sc2, sh2 = _bn_scale_shift(st2, n * oh2 * ow2, params["g2"], params["b2"])
    h = _bn_lrelu(y2, sc2, sh2).reshape(n, oh2, ow2, NDF * 2)

    # Layer 3: Conv(128->256) + BN + LeakyReLU (same scheme)
    y3, st3 = conv4x4s2(h, params["w3"], emit_stats=True,
                        tile_budget_bytes=fused_budget, vmem_cap=vmem_cap)
    oh3, ow3 = oh2 // 2, ow2 // 2
    sc3, sh3 = _bn_scale_shift(st3, n * oh3 * ow3, params["g3"], params["b3"])
    h = _bn_lrelu(y3, sc3, sh3).reshape(n, oh3, ow3, NDF * 4)

    # Layer 4: Conv(256->1) + Sigmoid (weight lane-padded to 128 in-kernel)
    y4 = conv4x4s2(h, params["w4"], act="sigmoid", out_dtype=jnp.float32,
                   tile_budget_bytes=fused_budget, vmem_cap=vmem_cap)
    oh4, ow4 = oh3 // 2, ow3 // 2
    out = y4[:, :, 0:1].reshape(n, oh4, ow4, 1)
    return jnp.transpose(out, (0, 3, 1, 2))          # NCHW (N, 1, H/16, W/16)


# ----------------------------------------------------------------------------
# pure-XLA f32 reference (for a loose bf16-tolerance sanity check)
# ----------------------------------------------------------------------------
def _reference_forward(params, x):
    dn = ("NCHW", "OIHW", "NCHW")

    def conv(h, w):
        return jax.lax.conv_general_dilated(
            h, w, (S, S), ((P, P), (P, P)), dimension_numbers=dn,
            precision=jax.lax.Precision.HIGHEST)

    def bn(h, g, b):
        mu = jnp.mean(h, axis=(0, 2, 3), keepdims=True)
        var = jnp.mean(jnp.square(h - mu), axis=(0, 2, 3), keepdims=True)
        return ((h - mu) * jax.lax.rsqrt(var + BN_EPS)
                * g.reshape(1, -1, 1, 1) + b.reshape(1, -1, 1, 1))

    def lrelu(h):
        return jnp.where(h >= 0.0, h, LRELU_SLOPE * h)

    h = lrelu(conv(x, params["w1"]))
    h = lrelu(bn(conv(h, params["w2"]), params["g2"], params["b2"]))
    h = lrelu(bn(conv(h, params["w3"]), params["g3"], params["b3"]))
    z = conv(h, params["w4"])
    return 1.0 / (1.0 + jnp.exp(-z))


if __name__ == "__main__":
    key = jax.random.PRNGKey(0)
    pkey, xkey = jax.random.split(key)
    params = init_params(pkey)

    # small deterministic input: batch=2, nc=1 channel, 16x16 spatial
    x = jax.random.normal(xkey, (2, NC, 16, 16), jnp.float32)

    out = jax.block_until_ready(discriminator_forward(params, x))
    assert out.shape == (2, 1, 1, 1), out.shape
    assert bool(jnp.all((out >= 0.0) & (out <= 1.0))), "sigmoid output out of range"

    ref = jax.block_until_ready(_reference_forward(params, x))
    err = float(jnp.max(jnp.abs(out - ref)))
    assert err < 8e-2, f"max |pallas - f32 reference| = {err}"   # bf16 internals

    print("KERNEL_OK")
</pallas_src>

<mosaic_0001>
module attributes {stable_mosaic.version = 11 : i64} {
  func.func @_conv_lrelu_kernel(%arg0: i32, %arg1: memref<128x16xbf16, #tpu.memory_space<vmem>>, %arg2: memref<16x64xbf16, #tpu.memory_space<vmem>>, %arg3: memref<128x64xbf16, #tpu.memory_space<vmem>>) attributes {dimension_semantics = [#tpu.dimension_semantics<parallel>], iteration_bounds = array<i64: 1>, scalar_prefetch = 0 : i64, scratch_operands = 0 : i64, tpu.core_type = #tpu.core_type<tc>, window_params = [{transform_indices = @transform_0, window_bounds = array<i64: 128, 16>}, {pipeline_mode = #tpu.pipeline_mode<synchronous>, transform_indices = @transform_1, window_bounds = array<i64: 16, 64>}, {transform_indices = @transform_2, window_bounds = array<i64: 128, 64>}]} {
    %c0 = arith.constant 0 : index
    %c0_0 = arith.constant 0 : index
    %0 = vector.load %arg1[%c0, %c0_0] : memref<128x16xbf16, #tpu.memory_space<vmem>>, vector<128x16xbf16>
    %c0_1 = arith.constant 0 : index
    %c0_2 = arith.constant 0 : index
    %1 = vector.load %arg2[%c0_1, %c0_2] : memref<16x64xbf16, #tpu.memory_space<vmem>>, vector<16x64xbf16>
    %cst = arith.constant dense<0.000000e+00> : vector<128x64xf32>
    %2 = tpu.matmul %0, %1, %cst {dimension_numbers = #tpu.dot_dimension_numbers<[1], [0], [0], [1], [0, 0, 1, 1], [], []>} : vector<128x16xbf16>, vector<16x64xbf16>, vector<128x64xf32> -> vector<128x64xf32>
    %cst_3 = arith.constant 0.000000e+00 : f32
    %3 = vector.broadcast %cst_3 : f32 to vector<128x64xf32>
    %4 = arith.cmpf oge, %2, %3 : vector<128x64xf32>
    %cst_4 = arith.constant 2.000000e-01 : f32
    %5 = vector.broadcast %cst_4 : f32 to vector<128x64xf32>
    %6 = arith.mulf %5, %2 : vector<128x64xf32>
    %7 = arith.select %4, %2, %6 : vector<128x64xi1>, vector<128x64xf32>
    %8 = arith.truncf %7 : vector<128x64xf32> to vector<128x64xbf16>
    %c0_5 = arith.constant 0 : index
    %c0_6 = arith.constant 0 : index
    %9 = vector.load %arg3[%c0_5, %c0_6] : memref<128x64xbf16, #tpu.memory_space<vmem>>, vector<128x64xbf16>
    tpu.vector_store %arg3[%c0_5, %c0_6], %8 {strides = array<i32>} : memref<128x64xbf16, #tpu.memory_space<vmem>>, vector<128x64xbf16>,
    return
  }
  func.func @transform_0(%arg0: i32) -> (i32, i32) {
    %c0_i32 = arith.constant 0 : i32
    %c0_i32_0 = arith.constant 0 : i32
    return %arg0, %c0_i32 : i32, i32
  }
  func.func @transform_1(%arg0: i32) -> (i32, i32) {
    %c0_i32 = arith.constant 0 : i32
    %c0_i32_0 = arith.constant 0 : i32
    %c0_i32_1 = arith.constant 0 : i32
    return %c0_i32, %c0_i32_0 : i32, i32
  }
  func.func @transform_2(%arg0: i32) -> (i32, i32) {
    %c0_i32 = arith.constant 0 : i32
    %c0_i32_0 = arith.constant 0 : i32
    return %arg0, %c0_i32 : i32, i32
  }
}

module attributes {stable_mosaic.version = 11 : i64} {
  func.func @kernel(%arg0: i32, %arg1: i32, %arg2: memref<2x4x5x256xbf16, #tpu.memory_space<vmem>>, %arg3: memref<2x1x5x256xbf16, #tpu.memory_space<vmem>>, %arg4: memref<1024x128xbf16, #tpu.memory_space<vmem>>, %arg5: memref<2x16x128xbf16, #tpu.memory_space<vmem>>, %arg6: memref<1x1x2x128xf32, #tpu.memory_space<vmem>>, %arg7: memref<2x16x1024xbf16, #tpu.memory_space<vmem>>) attributes {dimension_semantics = [#tpu.dimension_semantics<parallel>, #tpu.dimension_semantics<parallel>], iteration_bounds = array<i64: 1, 1>, scalar_prefetch = 0 : i64, scratch_operands = 1 : i64, tpu.core_type = #tpu.core_type<tc>, window_params = [{transform_indices = @transform_0, window_bounds = array<i64: 2, 4, 5, 256>}, {transform_indices = @transform_1, window_bounds = array<i64: 2, 1, 5, 256>}, {pipeline_mode = #tpu.pipeline_mode<synchronous>, transform_indices = @transform_2, window_bounds = array<i64: 1024, 128>}, {transform_indices = @transform_3, window_bounds = array<i64: 2, 16, 128>}, {transform_indices = @transform_4, window_bounds = array<i64: 1, 1, 2, 128>}]} {
    %c0 = arith.constant 0 : index
    %c0_0 = arith.constant 0 : index
    %c0_1 = arith.constant 0 : index
    %c0_2 = arith.constant 0 : index
    %0 = vector.load %arg2[%c0, %c0_0, %c0_1, %c0_2] : memref<2x4x5x256xbf16, #tpu.memory_space<vmem>>, vector<2x4x5x256xbf16>
    %c0_3 = arith.constant 0 : index
    %c0_4 = arith.constant 0 : index
    %c0_5 = arith.constant 0 : index
    %c0_6 = arith.constant 0 : index
    %1 = vector.load %arg3[%c0_3, %c0_4, %c0_5, %c0_6] : memref<2x1x5x256xbf16, #tpu.memory_space<vmem>>, vector<2x1x5x256xbf16>
    %2 = vector.extract_strided_slice %0 {offsets = [0, 0, 0, 0], sizes = [2, 1, 5, 256], strides = [1, 1, 1, 1]} : vector<2x4x5x256xbf16> to vector<2x1x5x256xbf16>
    %3 = vector.shape_cast %2 : vector<2x1x5x256xbf16> to vector<2x5x256xbf16>
    %4 = vector.extract_strided_slice %0 {offsets = [0, 1, 0, 0], sizes = [2, 1, 5, 256], strides = [1, 1, 1, 1]} : vector<2x4x5x256xbf16> to vector<2x1x5x256xbf16>
    %5 = vector.shape_cast %4 : vector<2x1x5x256xbf16> to vector<2x5x256xbf16>
    %6 = vector.extract_strided_slice %3 {offsets = [0, 0, 0], sizes = [2, 4, 256], strides = [1, 1, 1]} : vector<2x5x256xbf16> to vector<2x4x256xbf16>
    %7 = vector.extract_strided_slice %3 {offsets = [0, 1, 0], sizes = [2, 4, 256], strides = [1, 1, 1]} : vector<2x5x256xbf16> to vector<2x4x256xbf16>
    %8 = vector.extract_strided_slice %5 {offsets = [0, 0, 0], sizes = [2, 4, 256], strides = [1, 1, 1]} : vector<2x5x256xbf16> to vector<2x4x256xbf16>
    %9 = vector.extract_strided_slice %5 {offsets = [0, 1, 0], sizes = [2, 4, 256], strides = [1, 1, 1]} : vector<2x5x256xbf16> to vector<2x4x256xbf16>
    %10 = tpu.concatenate %6, %7, %8, %9 in 2 : vector<2x4x256xbf16>, vector<2x4x256xbf16>, vector<2x4x256xbf16>, vector<2x4x256xbf16> -> vector<2x4x1024xbf16>
    %c0_7 = arith.constant 0 : index
    %c0_8 = arith.constant 0 : index
    %c0_9 = arith.constant 0 : index
    %11 = vector.load %arg7[%c0_7, %c0_8, %c0_9] : memref<2x16x1024xbf16, #tpu.memory_space<vmem>>, vector<2x4x1024xbf16>
    tpu.vector_store %arg7[%c0_7, %c0_8, %c0_9], %10 {strides = array<i32>} : memref<2x16x1024xbf16, #tpu.memory_space<vmem>>, vector<2x4x1024xbf16>,
    %12 = vector.extract_strided_slice %0 {offsets = [0, 1, 0, 0], sizes = [2, 1, 5, 256], strides = [1, 1, 1, 1]} : vector<2x4x5x256xbf16> to vector<2x1x5x256xbf16>
    %13 = vector.shape_cast %12 : vector<2x1x5x256xbf16> to vector<2x5x256xbf16>
    %14 = vector.extract_strided_slice %0 {offsets = [0, 2, 0, 0], sizes = [2, 1, 5, 256], strides = [1, 1, 1, 1]} : vector<2x4x5x256xbf16> to vector<2x1x5x256xbf16>
    %15 = vector.shape_cast %14 : vector<2x1x5x256xbf16> to vector<2x5x256xbf16>
    %16 = vector.extract_strided_slice %13 {offsets = [0, 0, 0], sizes = [2, 4, 256], strides = [1, 1, 1]} : vector<2x5x256xbf16> to vector<2x4x256xbf16>
    %17 = vector.extract_strided_slice %13 {offsets = [0, 1, 0], sizes = [2, 4, 256], strides = [1, 1, 1]} : vector<2x5x256xbf16> to vector<2x4x256xbf16>
    %18 = vector.extract_strided_slice %15 {offsets = [0, 0, 0], sizes = [2, 4, 256], strides = [1, 1, 1]} : vector<2x5x256xbf16> to vector<2x4x256xbf16>
    %19 = vector.extract_strided_slice %15 {offsets = [0, 1, 0], sizes = [2, 4, 256], strides = [1, 1, 1]} : vector<2x5x256xbf16> to vector<2x4x256xbf16>
    %20 = tpu.concatenate %16, %17, %18, %19 in 2 : vector<2x4x256xbf16>, vector<2x4x256xbf16>, vector<2x4x256xbf16>, vector<2x4x256xbf16> -> vector<2x4x1024xbf16>
    %c0_10 = arith.constant 0 : index
    %c4 = arith.constant 4 : index
    %c0_11 = arith.constant 0 : index
    %21 = vector.load %arg7[%c0_10, %c4, %c0_11] : memref<2x16x1024xbf16, #tpu.memory_space<vmem>>, vector<2x4x1024xbf16>
    tpu.vector_store %arg7[%c0_10, %c4, %c0_11], %20 {strides = array<i32>} : memref<2x16x1024xbf16, #tpu.memory_space<vmem>>, vector<2x4x1024xbf16>,
    %22 = vector.extract_strided_slice %0 {offsets = [0, 2, 0, 0], sizes = [2, 1, 5, 256], strides = [1, 1, 1, 1]} : vector<2x4x5x256xbf16> to vector<2x1x5x256xbf16>
    %23 = vector.shape_cast %22 : vector<2x1x5x256xbf16> to vector<2x5x256xbf16>
    %24 = vector.extract_strided_slice %0 {offsets = [0, 3, 0, 0], sizes = [2, 1, 5, 256], strides = [1, 1, 1, 1]} : vector<2x4x5x256xbf16> to vector<2x1x5x256xbf16>
    %25 = vector.shape_cast %24 : vector<2x1x5x256xbf16> to vector<2x5x256xbf16>
    %26 = vector.extract_strided_slice %23 {offsets = [0, 0, 0], sizes = [2, 4, 256], strides = [1, 1, 1]} : vector<2x5x256xbf16> to vector<2x4x256xbf16>
    %27 = vector.extract_strided_slice %23 {offsets = [0, 1, 0], sizes = [2, 4, 256], strides = [1, 1, 1]} : vector<2x5x256xbf16> to vector<2x4x256xbf16>
    %28 = vector.extract_strided_slice %25 {offsets = [0, 0, 0], sizes = [2, 4, 256], strides = [1, 1, 1]} : vector<2x5x256xbf16> to vector<2x4x256xbf16>
    %29 = vector.extract_strided_slice %25 {offsets = [0, 1, 0], sizes = [2, 4, 256], strides = [1, 1, 1]} : vector<2x5x256xbf16> to vector<2x4x256xbf16>
    %30 = tpu.concatenate %26, %27, %28, %29 in 2 : vector<2x4x256xbf16>, vector<2x4x256xbf16>, vector<2x4x256xbf16>, vector<2x4x256xbf16> -> vector<2x4x1024xbf16>
    %c0_12 = arith.constant 0 : index
    %c8 = arith.constant 8 : index
    %c0_13 = arith.constant 0 : index
    %31 = vector.load %arg7[%c0_12, %c8, %c0_13] : memref<2x16x1024xbf16, #tpu.memory_space<vmem>>, vector<2x4x1024xbf16>
    tpu.vector_store %arg7[%c0_12, %c8, %c0_13], %30 {strides = array<i32>} : memref<2x16x1024xbf16, #tpu.memory_space<vmem>>, vector<2x4x1024xbf16>,
    %32 = vector.extract_strided_slice %0 {offsets = [0, 3, 0, 0], sizes = [2, 1, 5, 256], strides = [1, 1, 1, 1]} : vector<2x4x5x256xbf16> to vector<2x1x5x256xbf16>
    %33 = vector.shape_cast %32 : vector<2x1x5x256xbf16> to vector<2x5x256xbf16>
    %34 = vector.shape_cast %1 : vector<2x1x5x256xbf16> to vector<2x5x256xbf16>
    %35 = vector.extract_strided_slice %33 {offsets = [0, 0, 0], sizes = [2, 4, 256], strides = [1, 1, 1]} : vector<2x5x256xbf16> to vector<2x4x256xbf16>
    %36 = vector.extract_strided_slice %33 {offsets = [0, 1, 0], sizes = [2, 4, 256], strides = [1, 1, 1]} : vector<2x5x256xbf16> to vector<2x4x256xbf16>
    %37 = vector.extract_strided_slice %34 {offsets = [0, 0, 0], sizes = [2, 4, 256], strides = [1, 1, 1]} : vector<2x5x256xbf16> to vector<2x4x256xbf16>
    %38 = vector.extract_strided_slice %34 {offsets = [0, 1, 0], sizes = [2, 4, 256], strides = [1, 1, 1]} : vector<2x5x256xbf16> to vector<2x4x256xbf16>
    %39 = tpu.concatenate %35, %36, %37, %38 in 2 : vector<2x4x256xbf16>, vector<2x4x256xbf16>, vector<2x4x256xbf16>, vector<2x4x256xbf16> -> vector<2x4x1024xbf16>
    %c0_14 = arith.constant 0 : index
    %c12 = arith.constant 12 : index
    %c0_15 = arith.constant 0 : index
    %40 = vector.load %arg7[%c0_14, %c12, %c0_15] : memref<2x16x1024xbf16, #tpu.memory_space<vmem>>, vector<2x4x1024xbf16>
    tpu.vector_store %arg7[%c0_14, %c12, %c0_15], %39 {strides = array<i32>} : memref<2x16x1024xbf16, #tpu.memory_space<vmem>>, vector<2x4x1024xbf16>,
    %c0_16 = arith.constant 0 : index
    %c0_17 = arith.constant 0 : index
    %41 = vector.load %arg4[%c0_16, %c0_17] : memref<1024x128xbf16, #tpu.memory_space<vmem>>, vector<1024x128xbf16>
    %c0_18 = arith.constant 0 : index
    %c0_19 = arith.constant 0 : index
    %c0_20 = arith.constant 0 : index
    %42 = vector.load %arg7[%c0_18, %c0_19, %c0_20] : memref<2x16x1024xbf16, #tpu.memory_space<vmem>>, vector<1x16x1024xbf16>
    %43 = vector.shape_cast %42 : vector<1x16x1024xbf16> to vector<16x1024xbf16>
    %cst = arith.constant dense<0.000000e+00> : vector<16x128xf32>
    %44 = tpu.matmul %43, %41, %cst {dimension_numbers = #tpu.dot_dimension_numbers<[1], [0], [0], [1], [0, 0, 1, 1], [], []>} : vector<16x1024xbf16>, vector<1024x128xbf16>, vector<16x128xf32> -> vector<16x128xf32>
    %cst_21 = arith.constant dense<0.000000e+00> : vector<128xf32>
    %45 = vector.multi_reduction <add>, %44, %cst_21 [0] : vector<16x128xf32> to vector<128xf32>
    %46 = vector.shape_cast %45 : vector<128xf32> to vector<1x128xf32>
    %47 = arith.mulf %44, %44 : vector<16x128xf32>
    %cst_22 = arith.constant dense<0.000000e+00> : vector<128xf32>
    %48 = vector.multi_reduction <add>, %47, %cst_22 [0] : vector<16x128xf32> to vector<128xf32>
    %49 = vector.shape_cast %48 : vector<128xf32> to vector<1x128xf32>
    %50 = tpu.concatenate %46, %49 in 0 : vector<1x128xf32>, vector<1x128xf32> -> vector<2x128xf32>
    %51 = arith.truncf %44 : vector<16x128xf32> to vector<16x128xbf16>
    %c0_23 = arith.constant 0 : index
    %c0_24 = arith.constant 0 : index
    %c0_25 = arith.constant 0 : index
    %52 = vector.load %arg5[%c0_23, %c0_24, %c0_25] : memref<2x16x128xbf16, #tpu.memory_space<vmem>>, vector<1x16x128xbf16>
    %53 = vector.shape_cast %52 : vector<1x16x128xbf16> to vector<16x128xbf16>
    %54 = vector.shape_cast %51 : vector<16x128xbf16> to vector<1x16x128xbf16>
    tpu.vector_store %arg5[%c0_23, %c0_24, %c0_25], %54 {strides = array<i32>} : memref<2x16x128xbf16, #tpu.memory_space<vmem>>, vector<1x16x128xbf16>,
    %c1 = arith.constant 1 : index
    %c0_26 = arith.constant 0 : index
    %c0_27 = arith.constant 0 : index
    %55 = vector.load %arg7[%c1, %c0_26, %c0_27] : memref<2x16x1024xbf16, #tpu.memory_space<vmem>>, vector<1x16x1024xbf16>
    %56 = vector.shape_cast %55 : vector<1x16x1024xbf16> to vector<16x1024xbf16>
    %cst_28 = arith.constant dense<0.000000e+00> : vector<16x128xf32>
    %57 = tpu.matmul %56, %41, %cst_28 {dimension_numbers = #tpu.dot_dimension_numbers<[1], [0], [0], [1], [0, 0, 1, 1], [], []>} : vector<16x1024xbf16>, vector<1024x128xbf16>, vector<16x128xf32> -> vector<16x128xf32>
    %cst_29 = arith.constant dense<0.000000e+00> : vector<128xf32>
    %58 = vector.multi_reduction <add>, %57, %cst_29 [0] : vector<16x128xf32> to vector<128xf32>
    %59 = vector.shape_cast %58 : vector<128xf32> to vector<1x128xf32>
    %60 = arith.mulf %57, %57 : vector<16x128xf32>
    %cst_30 = arith.constant dense<0.000000e+00> : vector<128xf32>
    %61 = vector.multi_reduction <add>, %60, %cst_30 [0] : vector<16x128xf32> to vector<128xf32>
    %62 = vector.shape_cast %61 : vector<128xf32> to vector<1x128xf32>
    %63 = tpu.concatenate %59, %62 in 0 : vector<1x128xf32>, vector<1x128xf32> -> vector<2x128xf32>
    %64 = arith.addf %50, %63 : vector<2x128xf32>
    %65 = arith.truncf %57 : vector<16x128xf32> to vector<16x128xbf16>
    %c1_31 = arith.constant 1 : index
    %c0_32 = arith.constant 0 : index
    %c0_33 = arith.constant 0 : index
    %66 = vector.load %arg5[%c1_31, %c0_32, %c0_33] : memref<2x16x128xbf16, #tpu.memory_space<vmem>>, vector<1x16x128xbf16>
    %67 = vector.shape_cast %66 : vector<1x16x128xbf16> to vector<16x128xbf16>
    %68 = vector.shape_cast %65 : vector<16x128xbf16> to vector<1x16x128xbf16>
    tpu.vector_store %arg5[%c1_31, %c0_32, %c0_33], %68 {strides = array<i32>} : memref<2x16x128xbf16, #tpu.memory_space<vmem>>, vector<1x16x128xbf16>,
    %c0_34 = arith.constant 0 : index
    %c0_35 = arith.constant 0 : index
    %c0_36 = arith.constant 0 : index
    %c0_37 = arith.constant 0 : index
    %69 = vector.load %arg6[%c0_34, %c0_35, %c0_36, %c0_37] : memref<1x1x2x128xf32, #tpu.memory_space<vmem>>, vector<1x1x2x128xf32>
    %70 = vector.shape_cast %69 : vector<1x1x2x128xf32> to vector<2x128xf32>
    %71 = vector.shape_cast %64 : vector<2x128xf32> to vector<1x1x2x128xf32>
    tpu.vector_store %arg6[%c0_34, %c0_35, %c0_36, %c0_37], %71 {strides = array<i32>} : memref<1x1x2x128xf32, #tpu.memory_space<vmem>>, vector<1x1x2x128xf32>,
    return
  }
  func.func @transform_0(%arg0: i32, %arg1: i32) -> (i32, i32, i32, i32) {
    %c0_i32 = arith.constant 0 : i32
    %c0_i32_0 = arith.constant 0 : i32
    %c0_i32_1 = arith.constant 0 : i32
    return %arg0, %arg1, %c0_i32, %c0_i32_0 : i32, i32, i32, i32
  }
  func.func @transform_1(%arg0: i32, %arg1: i32) -> (i32, i32, i32, i32) {
    %c1_i32 = arith.constant 1 : i32
    %0 = arith.addi %arg1, %c1_i32 : i32
    %c4_i32 = arith.constant 4 : i32
    %1 = arith.muli %0, %c4_i32 : i32
    %c0_i32 = arith.constant 0 : i32
    %c0_i32_0 = arith.constant 0 : i32
    %c0_i32_1 = arith.constant 0 : i32
    return %arg0, %1, %c0_i32, %c0_i32_0 : i32, i32, i32, i32
  }
  func.func @transform_2(%arg0: i32, %arg1: i32) -> (i32, i32) {
    %c0_i32 = arith.constant 0 : i32
    %c0_i32_0 = arith.constant 0 : i32
    %c0_i32_1 = arith.constant 0 : i32
    return %c0_i32, %c0_i32_0 : i32, i32
  }
  func.func @transform_3(%arg0: i32, %arg1: i32) -> (i32, i32, i32) {
    %c0_i32 = arith.constant 0 : i32
    %c0_i32_0 = arith.constant 0 : i32
    return %arg0, %arg1, %c0_i32 : i32, i32, i32
  }
  func.func @transform_4(%arg0: i32, %arg1: i32) -> (i32, i32, i32, i32) {
    %c0_i32 = arith.constant 0 : i32
    %c0_i32_0 = arith.constant 0 : i32
    %c0_i32_1 = arith.constant 0 : i32
    return %arg0, %arg1, %c0_i32, %c0_i32_0 : i32, i32, i32, i32
  }
}

module attributes {stable_mosaic.version = 11 : i64} {
  func.func @kernel(%arg0: i32, %arg1: i32, %arg2: memref<2x2x3x512xbf16, #tpu.memory_space<vmem>>, %arg3: memref<2x1x3x512xbf16, #tpu.memory_space<vmem>>, %arg4: memref<2048x256xbf16, #tpu.memory_space<vmem>>, %arg5: memref<2x4x256xbf16, #tpu.memory_space<vmem>>, %arg6: memref<1x1x2x256xf32, #tpu.memory_space<vmem>>, %arg7: memref<2x4x2048xbf16, #tpu.memory_space<vmem>>) attributes {dimension_semantics = [#tpu.dimension_semantics<parallel>, #tpu.dimension_semantics<parallel>], iteration_bounds = array<i64: 1, 1>, scalar_prefetch = 0 : i64, scratch_operands = 1 : i64, tpu.core_type = #tpu.core_type<tc>, window_params = [{transform_indices = @transform_0, window_bounds = array<i64: 2, 2, 3, 512>}, {transform_indices = @transform_1, window_bounds = array<i64: 2, 1, 3, 512>}, {pipeline_mode = #tpu.pipeline_mode<synchronous>, transform_indices = @transform_2, window_bounds = array<i64: 2048, 256>}, {transform_indices = @transform_3, window_bounds = array<i64: 2, 4, 256>}, {transform_indices = @transform_4, window_bounds = array<i64: 1, 1, 2, 256>}]} {
    %c0 = arith.constant 0 : index
    %c0_0 = arith.constant 0 : index
    %c0_1 = arith.constant 0 : index
    %c0_2 = arith.constant 0 : index
    %0 = vector.load %arg2[%c0, %c0_0, %c0_1, %c0_2] : memref<2x2x3x512xbf16, #tpu.memory_space<vmem>>, vector<2x2x3x512xbf16>
    %c0_3 = arith.constant 0 : index
    %c0_4 = arith.constant 0 : index
    %c0_5 = arith.constant 0 : index
    %c0_6 = arith.constant 0 : index
    %1 = vector.load %arg3[%c0_3, %c0_4, %c0_5, %c0_6] : memref<2x1x3x512xbf16, #tpu.memory_space<vmem>>, vector<2x1x3x512xbf16>
    %2 = vector.extract_strided_slice %0 {offsets = [0, 0, 0, 0], sizes = [2, 1, 3, 512], strides = [1, 1, 1, 1]} : vector<2x2x3x512xbf16> to vector<2x1x3x512xbf16>
    %3 = vector.shape_cast %2 : vector<2x1x3x512xbf16> to vector<2x3x512xbf16>
    %4 = vector.extract_strided_slice %0 {offsets = [0, 1, 0, 0], sizes = [2, 1, 3, 512], strides = [1, 1, 1, 1]} : vector<2x2x3x512xbf16> to vector<2x1x3x512xbf16>
    %5 = vector.shape_cast %4 : vector<2x1x3x512xbf16> to vector<2x3x512xbf16>
    %6 = vector.extract_strided_slice %3 {offsets = [0, 0, 0], sizes = [2, 2, 512], strides = [1, 1, 1]} : vector<2x3x512xbf16> to vector<2x2x512xbf16>
    %7 = vector.extract_strided_slice %3 {offsets = [0, 1, 0], sizes = [2, 2, 512], strides = [1, 1, 1]} : vector<2x3x512xbf16> to vector<2x2x512xbf16>
    %8 = vector.extract_strided_slice %5 {offsets = [0, 0, 0], sizes = [2, 2, 512], strides = [1, 1, 1]} : vector<2x3x512xbf16> to vector<2x2x512xbf16>
    %9 = vector.extract_strided_slice %5 {offsets = [0, 1, 0], sizes = [2, 2, 512], strides = [1, 1, 1]} : vector<2x3x512xbf16> to vector<2x2x512xbf16>
    %10 = tpu.concatenate %6, %7, %8, %9 in 2 : vector<2x2x512xbf16>, vector<2x2x512xbf16>, vector<2x2x512xbf16>, vector<2x2x512xbf16> -> vector<2x2x2048xbf16>
    %c0_7 = arith.constant 0 : index
    %c0_8 = arith.constant 0 : index
    %c0_9 = arith.constant 0 : index
    %11 = vector.load %arg7[%c0_7, %c0_8, %c0_9] : memref<2x4x2048xbf16, #tpu.memory_space<vmem>>, vector<2x2x2048xbf16>
    tpu.vector_store %arg7[%c0_7, %c0_8, %c0_9], %10 {strides = array<i32>} : memref<2x4x2048xbf16, #tpu.memory_space<vmem>>, vector<2x2x2048xbf16>,
    %12 = vector.extract_strided_slice %0 {offsets = [0, 1, 0, 0], sizes = [2, 1, 3, 512], strides = [1, 1, 1, 1]} : vector<2x2x3x512xbf16> to vector<2x1x3x512xbf16>
    %13 = vector.shape_cast %12 : vector<2x1x3x512xbf16> to vector<2x3x512xbf16>
    %14 = vector.shape_cast %1 : vector<2x1x3x512xbf16> to vector<2x3x512xbf16>
    %15 = vector.extract_strided_slice %13 {offsets = [0, 0, 0], sizes = [2, 2, 512], strides = [1, 1, 1]} : vector<2x3x512xbf16> to vector<2x2x512xbf16>
    %16 = vector.extract_strided_slice %13 {offsets = [0, 1, 0], sizes = [2, 2, 512], strides = [1, 1, 1]} : vector<2x3x512xbf16> to vector<2x2x512xbf16>
    %17 = vector.extract_strided_slice %14 {offsets = [0, 0, 0], sizes = [2, 2, 512], strides = [1, 1, 1]} : vector<2x3x512xbf16> to vector<2x2x512xbf16>
    %18 = vector.extract_strided_slice %14 {offsets = [0, 1, 0], sizes = [2, 2, 512], strides = [1, 1, 1]} : vector<2x3x512xbf16> to vector<2x2x512xbf16>
    %19 = tpu.concatenate %15, %16, %17, %18 in 2 : vector<2x2x512xbf16>, vector<2x2x512xbf16>, vector<2x2x512xbf16>, vector<2x2x512xbf16> -> vector<2x2x2048xbf16>
    %c0_10 = arith.constant 0 : index
    %c2 = arith.constant 2 : index
    %c0_11 = arith.constant 0 : index
    %20 = vector.load %arg7[%c0_10, %c2, %c0_11] : memref<2x4x2048xbf16, #tpu.memory_space<vmem>>, vector<2x2x2048xbf16>
    tpu.vector_store %arg7[%c0_10, %c2, %c0_11], %19 {strides = array<i32>} : memref<2x4x2048xbf16, #tpu.memory_space<vmem>>, vector<2x2x2048xbf16>,
    %c0_12 = arith.constant 0 : index
    %c0_13 = arith.constant 0 : index
    %21 = vector.load %arg4[%c0_12, %c0_13] : memref<2048x256xbf16, #tpu.memory_space<vmem>>, vector<2048x256xbf16>
    %c0_14 = arith.constant 0 : index
    %c0_15 = arith.constant 0 : index
    %c0_16 = arith.constant 0 : index
    %22 = vector.load %arg7[%c0_14, %c0_15, %c0_16] : memref<2x4x2048xbf16, #tpu.memory_space<vmem>>, vector<1x4x2048xbf16>
    %23 = vector.shape_cast %22 : vector<1x4x2048xbf16> to vector<4x2048xbf16>
    %cst = arith.constant dense<0.000000e+00> : vector<4x256xf32>
    %24 = tpu.matmul %23, %21, %cst {dimension_numbers = #tpu.dot_dimension_numbers<[1], [0], [0], [1], [0, 0, 1, 1], [], []>} : vector<4x2048xbf16>, vector<2048x256xbf16>, vector<4x256xf32> -> vector<4x256xf32>
    %cst_17 = arith.constant dense<0.000000e+00> : vector<256xf32>
    %25 = vector.multi_reduction <add>, %24, %cst_17 [0] : vector<4x256xf32> to vector<256xf32>
    %26 = vector.shape_cast %25 : vector<256xf32> to vector<1x256xf32>
    %27 = arith.mulf %24, %24 : vector<4x256xf32>
    %cst_18 = arith.constant dense<0.000000e+00> : vector<256xf32>
    %28 = vector.multi_reduction <add>, %27, %cst_18 [0] : vector<4x256xf32> to vector<256xf32>
    %29 = vector.shape_cast %28 : vector<256xf32> to vector<1x256xf32>
    %30 = tpu.concatenate %26, %29 in 0 : vector<1x256xf32>, vector<1x256xf32> -> vector<2x256xf32>
    %31 = arith.truncf %24 : vector<4x256xf32> to vector<4x256xbf16>
    %c0_19 = arith.constant 0 : index
    %c0_20 = arith.constant 0 : index
    %c0_21 = arith.constant 0 : index
    %32 = vector.load %arg5[%c0_19, %c0_20, %c0_21] : memref<2x4x256xbf16, #tpu.memory_space<vmem>>, vector<1x4x256xbf16>
    %33 = vector.shape_cast %32 : vector<1x4x256xbf16> to vector<4x256xbf16>
    %34 = vector.shape_cast %31 : vector<4x256xbf16> to vector<1x4x256xbf16>
    tpu.vector_store %arg5[%c0_19, %c0_20, %c0_21], %34 {strides = array<i32>} : memref<2x4x256xbf16, #tpu.memory_space<vmem>>, vector<1x4x256xbf16>,
    %c1 = arith.constant 1 : index
    %c0_22 = arith.constant 0 : index
    %c0_23 = arith.constant 0 : index
    %35 = vector.load %arg7[%c1, %c0_22, %c0_23] : memref<2x4x2048xbf16, #tpu.memory_space<vmem>>, vector<1x4x2048xbf16>
    %36 = vector.shape_cast %35 : vector<1x4x2048xbf16> to vector<4x2048xbf16>
    %cst_24 = arith.constant dense<0.000000e+00> : vector<4x256xf32>
    %37 = tpu.matmul %36, %21, %cst_24 {dimension_numbers = #tpu.dot_dimension_numbers<[1], [0], [0], [1], [0, 0, 1, 1], [], []>} : vector<4x2048xbf16>, vector<2048x256xbf16>, vector<4x256xf32> -> vector<4x256xf32>
    %cst_25 = arith.constant dense<0.000000e+00> : vector<256xf32>
    %38 = vector.multi_reduction <add>, %37, %cst_25 [0] : vector<4x256xf32> to vector<256xf32>
    %39 = vector.shape_cast %38 : vector<256xf32> to vector<1x256xf32>
    %40 = arith.mulf %37, %37 : vector<4x256xf32>
    %cst_26 = arith.constant dense<0.000000e+00> : vector<256xf32>
    %41 = vector.multi_reduction <add>, %40, %cst_26 [0] : vector<4x256xf32> to vector<256xf32>
    %42 = vector.shape_cast %41 : vector<256xf32> to vector<1x256xf32>
    %43 = tpu.concatenate %39, %42 in 0 : vector<1x256xf32>, vector<1x256xf32> -> vector<2x256xf32>
    %44 = arith.addf %30, %43 : vector<2x256xf32>
    %45 = arith.truncf %37 : vector<4x256xf32> to vector<4x256xbf16>
    %c1_27 = arith.constant 1 : index
    %c0_28 = arith.constant 0 : index
    %c0_29 = arith.constant 0 : index
    %46 = vector.load %arg5[%c1_27, %c0_28, %c0_29] : memref<2x4x256xbf16, #tpu.memory_space<vmem>>, vector<1x4x256xbf16>
    %47 = vector.shape_cast %46 : vector<1x4x256xbf16> to vector<4x256xbf16>
    %48 = vector.shape_cast %45 : vector<4x256xbf16> to vector<1x4x256xbf16>
    tpu.vector_store %arg5[%c1_27, %c0_28, %c0_29], %48 {strides = array<i32>} : memref<2x4x256xbf16, #tpu.memory_space<vmem>>, vector<1x4x256xbf16>,
    %c0_30 = arith.constant 0 : index
    %c0_31 = arith.constant 0 : index
    %c0_32 = arith.constant 0 : index
    %c0_33 = arith.constant 0 : index
    %49 = vector.load %arg6[%c0_30, %c0_31, %c0_32, %c0_33] : memref<1x1x2x256xf32, #tpu.memory_space<vmem>>, vector<1x1x2x256xf32>
    %50 = vector.shape_cast %49 : vector<1x1x2x256xf32> to vector<2x256xf32>
    %51 = vector.shape_cast %44 : vector<2x256xf32> to vector<1x1x2x256xf32>
    tpu.vector_store %arg6[%c0_30, %c0_31, %c0_32, %c0_33], %51 {strides = array<i32>} : memref<1x1x2x256xf32, #tpu.memory_space<vmem>>, vector<1x1x2x256xf32>,
    return
  }
  func.func @transform_0(%arg0: i32, %arg1: i32) -> (i32, i32, i32, i32) {
    %c0_i32 = arith.constant 0 : i32
    %c0_i32_0 = arith.constant 0 : i32
    %c0_i32_1 = arith.constant 0 : i32
    return %arg0, %arg1, %c0_i32, %c0_i32_0 : i32, i32, i32, i32
  }
  func.func @transform_1(%arg0: i32, %arg1: i32) -> (i32, i32, i32, i32) {
    %c1_i32 = arith.constant 1 : i32
    %0 = arith.addi %arg1, %c1_i32 : i32
    %c2_i32 = arith.constant 2 : i32
    %1 = arith.muli %0, %c2_i32 : i32
    %c0_i32 = arith.constant 0 : i32
    %c0_i32_0 = arith.constant 0 : i32
    %c0_i32_1 = arith.constant 0 : i32
    return %arg0, %1, %c0_i32, %c0_i32_0 : i32, i32, i32, i32
  }
  func.func @transform_2(%arg0: i32, %arg1: i32) -> (i32, i32) {
    %c0_i32 = arith.constant 0 : i32
    %c0_i32_0 = arith.constant 0 : i32
    %c0_i32_1 = arith.constant 0 : i32
    return %c0_i32, %c0_i32_0 : i32, i32
  }
  func.func @transform_3(%arg0: i32, %arg1: i32) -> (i32, i32, i32) {
    %c0_i32 = arith.constant 0 : i32
    %c0_i32_0 = arith.constant 0 : i32
    return %arg0, %arg1, %c0_i32 : i32, i32, i32
  }
  func.func @transform_4(%arg0: i32, %arg1: i32) -> (i32, i32, i32, i32) {
    %c0_i32 = arith.constant 0 : i32
    %c0_i32_0 = arith.constant 0 : i32
    %c0_i32_1 = arith.constant 0 : i32
    return %arg0, %arg1, %c0_i32, %c0_i32_0 : i32, i32, i32, i32
  }
}

module attributes {stable_mosaic.version = 11 : i64} {
  func.func @kernel(%arg0: i32, %arg1: i32, %arg2: memref<2x1x2x1024xbf16, #tpu.memory_space<vmem>>, %arg3: memref<2x1x2x1024xbf16, #tpu.memory_space<vmem>>, %arg4: memref<4096x128xbf16, #tpu.memory_space<vmem>>, %arg5: memref<2x1x128xf32, #tpu.memory_space<vmem>>, %arg6: memref<2x1x4096xbf16, #tpu.memory_space<vmem>>) attributes {dimension_semantics = [#tpu.dimension_semantics<parallel>, #tpu.dimension_semantics<parallel>], iteration_bounds = array<i64: 1, 1>, scalar_prefetch = 0 : i64, scratch_operands = 1 : i64, tpu.core_type = #tpu.core_type<tc>, window_params = [{transform_indices = @transform_0, window_bounds = array<i64: 2, 1, 2, 1024>}, {transform_indices = @transform_1, window_bounds = array<i64: 2, 1, 2, 1024>}, {pipeline_mode = #tpu.pipeline_mode<synchronous>, transform_indices = @transform_2, window_bounds = array<i64: 4096, 128>}, {transform_indices = @transform_3, window_bounds = array<i64: 2, 1, 128>}]} {
    %c0 = arith.constant 0 : index
    %c0_0 = arith.constant 0 : index
    %c0_1 = arith.constant 0 : index
    %c0_2 = arith.constant 0 : index
    %0 = vector.load %arg2[%c0, %c0_0, %c0_1, %c0_2] : memref<2x1x2x1024xbf16, #tpu.memory_space<vmem>>, vector<2x1x2x1024xbf16>
    %c0_3 = arith.constant 0 : index
    %c0_4 = arith.constant 0 : index
    %c0_5 = arith.constant 0 : index
    %c0_6 = arith.constant 0 : index
    %1 = vector.load %arg3[%c0_3, %c0_4, %c0_5, %c0_6] : memref<2x1x2x1024xbf16, #tpu.memory_space<vmem>>, vector<2x1x2x1024xbf16>
    %2 = vector.shape_cast %0 : vector<2x1x2x1024xbf16> to vector<2x2x1024xbf16>
    %3 = vector.shape_cast %1 : vector<2x1x2x1024xbf16> to vector<2x2x1024xbf16>
    %4 = vector.extract_strided_slice %2 {offsets = [0, 0, 0], sizes = [2, 1, 1024], strides = [1, 1, 1]} : vector<2x2x1024xbf16> to vector<2x1x1024xbf16>
    %5 = vector.extract_strided_slice %2 {offsets = [0, 1, 0], sizes = [2, 1, 1024], strides = [1, 1, 1]} : vector<2x2x1024xbf16> to vector<2x1x1024xbf16>
    %6 = vector.extract_strided_slice %3 {offsets = [0, 0, 0], sizes = [2, 1, 1024], strides = [1, 1, 1]} : vector<2x2x1024xbf16> to vector<2x1x1024xbf16>
    %7 = vector.extract_strided_slice %3 {offsets = [0, 1, 0], sizes = [2, 1, 1024], strides = [1, 1, 1]} : vector<2x2x1024xbf16> to vector<2x1x1024xbf16>
    %8 = tpu.concatenate %4, %5, %6, %7 in 2 : vector<2x1x1024xbf16>, vector<2x1x1024xbf16>, vector<2x1x1024xbf16>, vector<2x1x1024xbf16> -> vector<2x1x4096xbf16>
    %c0_7 = arith.constant 0 : index
    %c0_8 = arith.constant 0 : index
    %c0_9 = arith.constant 0 : index
    %9 = vector.load %arg6[%c0_7, %c0_8, %c0_9] : memref<2x1x4096xbf16, #tpu.memory_space<vmem>>, vector<2x1x4096xbf16>
    tpu.vector_store %arg6[%c0_7, %c0_8, %c0_9], %8 {strides = array<i32>} : memref<2x1x4096xbf16, #tpu.memory_space<vmem>>, vector<2x1x4096xbf16>,
    %c0_10 = arith.constant 0 : index
    %c0_11 = arith.constant 0 : index
    %10 = vector.load %arg4[%c0_10, %c0_11] : memref<4096x128xbf16, #tpu.memory_space<vmem>>, vector<4096x128xbf16>
    %c0_12 = arith.constant 0 : index
    %c0_13 = arith.constant 0 : index
    %c0_14 = arith.constant 0 : index
    %11 = vector.load %arg6[%c0_12, %c0_13, %c0_14] : memref<2x1x4096xbf16, #tpu.memory_space<vmem>>, vector<1x1x4096xbf16>
    %12 = vector.shape_cast %11 : vector<1x1x4096xbf16> to vector<1x4096xbf16>
    %cst = arith.constant dense<0.000000e+00> : vector<1x128xf32>
    %13 = tpu.matmul %12, %10, %cst {dimension_numbers = #tpu.dot_dimension_numbers<[1], [0], [0], [1], [0, 0, 1, 1], [], []>} : vector<1x4096xbf16>, vector<4096x128xbf16>, vector<1x128xf32> -> vector<1x128xf32>
    %cst_15 = arith.constant 0.000000e+00 : f32
    %14 = vector.broadcast %cst_15 : f32 to vector<1x128xf32>
    %15 = arith.subf %14, %13 : vector<1x128xf32>
    %16 = math.exp %15 : vector<1x128xf32>
    %cst_16 = arith.constant 1.000000e+00 : f32
    %17 = vector.broadcast %cst_16 : f32 to vector<1x128xf32>
    %18 = arith.addf %17, %16 : vector<1x128xf32>
    %cst_17 = arith.constant 1.000000e+00 : f32
    %19 = vector.broadcast %cst_17 : f32 to vector<1x128xf32>
    %20 = arith.divf %19, %18 : vector<1x128xf32>
    %c0_18 = arith.constant 0 : index
    %c0_19 = arith.constant 0 : index
    %c0_20 = arith.constant 0 : index
    %21 = vector.load %arg5[%c0_18, %c0_19, %c0_20] : memref<2x1x128xf32, #tpu.memory_space<vmem>>, vector<1x1x128xf32>
    %22 = vector.shape_cast %21 : vector<1x1x128xf32> to vector<1x128xf32>
    %23 = vector.shape_cast %20 : vector<1x128xf32> to vector<1x1x128xf32>
    tpu.vector_store %arg5[%c0_18, %c0_19, %c0_20], %23 {strides = array<i32>} : memref<2x1x128xf32, #tpu.memory_space<vmem>>, vector<1x1x128xf32>,
    %c1 = arith.constant 1 : index
    %c0_21 = arith.constant 0 : index
    %c0_22 = arith.constant 0 : index
    %24 = vector.load %arg6[%c1, %c0_21, %c0_22] : memref<2x1x4096xbf16, #tpu.memory_space<vmem>>, vector<1x1x4096xbf16>
    %25 = vector.shape_cast %24 : vector<1x1x4096xbf16> to vector<1x4096xbf16>
    %cst_23 = arith.constant dense<0.000000e+00> : vector<1x128xf32>
    %26 = tpu.matmul %25, %10, %cst_23 {dimension_numbers = #tpu.dot_dimension_numbers<[1], [0], [0], [1], [0, 0, 1, 1], [], []>} : vector<1x4096xbf16>, vector<4096x128xbf16>, vector<1x128xf32> -> vector<1x128xf32>
    %cst_24 = arith.constant 0.000000e+00 : f32
    %27 = vector.broadcast %cst_24 : f32 to vector<1x128xf32>
    %28 = arith.subf %27, %26 : vector<1x128xf32>
    %29 = math.exp %28 : vector<1x128xf32>
    %cst_25 = arith.constant 1.000000e+00 : f32
    %30 = vector.broadcast %cst_25 : f32 to vector<1x128xf32>
    %31 = arith.addf %30, %29 : vector<1x128xf32>
    %cst_26 = arith.constant 1.000000e+00 : f32
    %32 = vector.broadcast %cst_26 : f32 to vector<1x128xf32>
    %33 = arith.divf %32, %31 : vector<1x128xf32>
    %c1_27 = arith.constant 1 : index
    %c0_28 = arith.constant 0 : index
    %c0_29 = arith.constant 0 : index
    %34 = vector.load %arg5[%c1_27, %c0_28, %c0_29] : memref<2x1x128xf32, #tpu.memory_space<vmem>>, vector<1x1x128xf32>
    %35 = vector.shape_cast %34 : vector<1x1x128xf32> to vector<1x128xf32>
    %36 = vector.shape_cast %33 : vector<1x128xf32> to vector<1x1x128xf32>
    tpu.vector_store %arg5[%c1_27, %c0_28, %c0_29], %36 {strides = array<i32>} : memref<2x1x128xf32, #tpu.memory_space<vmem>>, vector<1x1x128xf32>,
    return
  }
  func.func @transform_0(%arg0: i32, %arg1: i32) -> (i32, i32, i32, i32) {
    %c0_i32 = arith.constant 0 : i32
    %c0_i32_0 = arith.constant 0 : i32
    %c0_i32_1 = arith.constant 0 : i32
    return %arg0, %arg1, %c0_i32, %c0_i32_0 : i32, i32, i32, i32
  }
  func.func @transform_1(%arg0: i32, %arg1: i32) -> (i32, i32, i32, i32) {
    %c1_i32 = arith.constant 1 : i32
    %0 = arith.addi %arg1, %c1_i32 : i32
    %c1_i32_0 = arith.constant 1 : i32
    %1 = arith.muli %0, %c1_i32_0 : i32
    %c0_i32 = arith.constant 0 : i32
    %c0_i32_1 = arith.constant 0 : i32
    %c0_i32_2 = arith.constant 0 : i32
    return %arg0, %1, %c0_i32, %c0_i32_1 : i32, i32, i32, i32
  }
  func.func @transform_2(%arg0: i32, %arg1: i32) -> (i32, i32) {
    %c0_i32 = arith.constant 0 : i32
    %c0_i32_0 = arith.constant 0 : i32
    %c0_i32_1 = arith.constant 0 : i32
    return %c0_i32, %c0_i32_0 : i32, i32
  }
  func.func @transform_3(%arg0: i32, %arg1: i32) -> (i32, i32, i32) {
    %c0_i32 = arith.constant 0 : i32
    %c0_i32_0 = arith.constant 0 : i32
    return %arg0, %arg1, %c0_i32 : i32, i32, i32
  }
}

</mosaic_0001>

<bundles_post_ra>
// kernel: discriminator_forward.4
= control target key start
LH: loop header
LB: loop body
LE: loop exit
PB: predicated region body
PF: predicated region fallthrough
CT: control target
= control target key end

     0   :  { %vm76_vm0 = vcmask 130048   ;;  %vm310_vm3 = vcmask 519168   ;;  %s533_s1 = inlined_call_operand.vmem [shape: bf16[16,64], index: 1, kind: input, shape index: {}]   ;;  %s534_s0 = inlined_call_operand.vmem [shape: bf16[128,16], index: 0, kind: input, shape index: {}]   ;;  %s535_s2 = inlined_call_operand.vmem [shape: bf16[128,64], index: 2, kind: output, shape index: {}]  }
   0x1   :  { %v409_v0 = vld [vmem:[%s533_s1] sm:$0xff]   ;;  %v412_v3 = vld [vmem:[%s534_s0 + $0x8] sm:$0xff]   ;;  %v414_v5 = vld [vmem:[%s534_s0 + $0x10] sm:$0xff]  }
   0x2   :  { %v410_v1 = vld [vmem:[%s534_s0] sm:$0xff]   ;;  %389 = vmatprep.subr.bf16.mxu0 %v409_v0  ;;  %407 = vmatprep.subr.bf16.mxu1 %v409_v0  ;;  %v413_v4 = vld [vmem:[%s534_s0 + $0x28] sm:$0xff]   ;;  %v415_v6 = vld [vmem:[%s534_s0 + $0x30] sm:$0xff]  }
   0x3   :  { %v411_v2 = vld [vmem:[%s534_s0 + $0x20] sm:$0xff]   ;;  %390 = vmatpush3.bf16.msra.mxu0 %v409_v0  ;;  %408 = vmatpush3.bf16.msra.mxu1 %v409_v0  ;;  %v416_v7 = vld [vmem:[%s534_s0 + $0x18] sm:$0xff]  }
   0x4   :  { %391 = vmatprep.mubr.msk.bf16.mxu0 %vm76_vm0, %v410_v1  ;;  %399 = vmatprep.mubr.msk.bf16.mxu1 %vm76_vm0, %v411_v2  ;;  %v417_v8 = vld [vmem:[%s534_s0 + $0x38] sm:$0xff]  }
   0x6   :  { %392 = vmatmul.mubr.msk.bf16.vlgmr.msra.gmra.mrb[0].mxu0 %vm76_vm0, %v412_v3  ;;  %400 = vmatmul.mubr.msk.bf16.vlgmr.msra.gmra.mrb[0].mxu1 %vm76_vm0, %v413_v4 }
   0x7   :  { %395 = vmatprep.mubr.msk.bf16.mxu0 %vm76_vm0, %v414_v5  ;;  %403 = vmatprep.mubr.msk.bf16.mxu1 %vm76_vm0, %v415_v6 }
   0xe   :  { %396 = vmatmul.mubr.msk.bf16.gmra.mrb[4].mxu0 %vm76_vm0, %v416_v7  ;;  %404 = vmatmul.mubr.msk.bf16.gmra.mrb[4].mxu1 %vm76_vm0, %v417_v8 }
  0xd9   :  { %v393_v9 = vpop.f32.mrb[0].mxu0  ;;  %v401_v10 = vpop.f32.mrb[0].mxu1 }
  0xda   :  { %vm200_vm1 = vcmp.ge.f32.partialorder %v393_v9, 0.0  ;;  %v216_v11 = vmul.f32 0.2, %v393_v9  ;;  %vm208_vm2 = vcmp.ge.f32.partialorder %v401_v10, 0.0  ;;  %v224_v12 = vmul.f32 0.2, %v401_v10 }
  0xdb   :  { %v135_v13 = vpop.f32.mrb[1].mxu0  ;;  %v167_v14 = vpop.f32.mrb[1].mxu1 }
  0xdc   :  { %v232_v15 = vsel %vm200_vm1, %v393_v9, %v216_v11  ;;  %v240_v16 = vsel %vm208_vm2, %v401_v10, %v224_v12  ;;  %vm198_vm4 = vcmp.ge.f32.partialorder %v135_v13, 0.0  ;;  %v214_v17 = vmul.f32 0.2, %v135_v13  ;;  %v394_v18 = vpop.f32.mrb[2].mxu0  ;;  %v402_v19 = vpop.f32.mrb[2].mxu1 }
  0xdd   :  { %v366_v20 = vpack.c.bf16 %v232_v15, %v232_v15  ;;  %v374_v21 = vpack.c.bf16 %v240_v16, %v240_v16  ;;  %vm206_vm5 = vcmp.ge.f32.partialorder %v167_v14, 0.0  ;;  %v222_v22 = vmul.f32 0.2, %v167_v14  ;;  %v138_v23 = vpop.f32.mrb[3].mxu0  ;;  %v170_v24 = vpop.f32.mrb[3].mxu1 }
  0xde   :  { %v230_v25 = vsel %vm198_vm4, %v135_v13, %v214_v17  ;;  %vm201_vm6 = vcmp.ge.f32.partialorder %v394_v18, 0.0  ;;  %v217_v26 = vmul.f32 0.2, %v394_v18  ;;  %vm209_vm7 = vcmp.ge.f32.partialorder %v402_v19, 0.0 }
  0xdf   :  { %313 = vst.msk [vmem:[%s535_s2 + $0x8] sm:$0xf] %vm310_vm3, %v366_v20  ;;  %321 = vst.msk [vmem:[%s535_s2 + $0x28] sm:$0xf] %vm310_vm3, %v374_v21  ;;  %v364_v27 = vpack.c.bf16 %v230_v25, %v230_v25  ;;  %v238_v28 = vsel %vm206_vm5, %v167_v14, %v222_v22  ;;  %v225_v29 = vmul.f32 0.2, %v402_v19 }
  0xe0   :  { %vm199_vm8 = vcmp.ge.f32.partialorder %v138_v23, 0.0  ;;  %v372_v30 = vpack.c.bf16 %v238_v28, %v238_v28  ;;  %v233_v31 = vsel %vm201_vm6, %v394_v18, %v217_v26  ;;  %v215_v32 = vmul.f32 0.2, %v138_v23 }
  0xe1   :  { %vm207_vm9 = vcmp.ge.f32.partialorder %v170_v24, 0.0  ;;  %311 = vst.msk [vmem:[%s535_s2] sm:$0xf] %vm310_vm3, %v364_v27  ;;  %v367_v33 = vpack.c.bf16 %v233_v31, %v233_v31  ;;  %v241_v34 = vsel %vm209_vm7, %v402_v19, %v225_v29  ;;  %v223_v35 = vmul.f32 0.2, %v170_v24  ;;  %v397_v36 = vpop.f32.mrb[4].mxu0 }
  0xe2   :  { %v405_v37 = vpop.f32.mrb[4].mxu1  ;;  %319 = vst.msk [vmem:[%s535_s2 + $0x20] sm:$0xf] %vm310_vm3, %v372_v30  ;;  %v375_v38 = vpack.c.bf16 %v241_v34, %v241_v34  ;;  %v231_v39 = vsel %vm199_vm8, %v138_v23, %v215_v32  ;;  %vm204_vm10 = vcmp.ge.f32.partialorder %v397_v36, 0.0  ;;  %v220_v40 = vmul.f32 0.2, %v397_v36 }
  0xe3   :  { %v151_v41 = vpop.f32.mrb[5].mxu0  ;;  %v183_v42 = vpop.f32.mrb[5].mxu1  ;;  %314 = vst.msk [vmem:[%s535_s2 + $0xc] sm:$0xf] %vm310_vm3, %v367_v33  ;;  %v365_v43 = vpack.c.bf16 %v231_v39, %v231_v39  ;;  %v239_v44 = vsel %vm207_vm9, %v170_v24, %v223_v35  ;;  %vm212_vm11 = vcmp.ge.f32.partialorder %v405_v37, 0.0 }
  0xe4   :  { %v228_v45 = vmul.f32 0.2, %v405_v37  ;;  %v398_v46 = vpop.f32.mrb[6].mxu0  ;;  %v406_v47 = vpop.f32.mrb[6].mxu1  ;;  %322 = vst.msk [vmem:[%s535_s2 + $0x2c] sm:$0xf] %vm310_vm3, %v375_v38  ;;  %v373_v48 = vpack.c.bf16 %v239_v44, %v239_v44  ;;  %v236_v49 = vsel %vm204_vm10, %v397_v36, %v220_v40 }
  0xe5   :  { %vm202_vm12 = vcmp.ge.f32.partialorder %v151_v41, 0.0  ;;  %v218_v50 = vmul.f32 0.2, %v151_v41  ;;  %v154_v51 = vpop.f32.mrb[7].mxu0  ;;  %v186_v52 = vpop.f32.mrb[7].mxu1  ;;  %v370_v53 = vpack.c.bf16 %v236_v49, %v236_v49  ;;  %vm210_vm13 = vcmp.ge.f32.partialorder %v183_v42, 0.0 }
  0xe6   :  { %312 = vst.msk [vmem:[%s535_s2 + $0x4] sm:$0xf] %vm310_vm3, %v365_v43  ;;  %v244_v54 = vsel %vm212_vm11, %v405_v37, %v228_v45  ;;  %v226_v55 = vmul.f32 0.2, %v183_v42  ;;  %320 = vst.msk [vmem:[%s535_s2 + $0x24] sm:$0xf] %vm310_vm3, %v373_v48 }
  0xe7   :  { %v378_v56 = vpack.c.bf16 %v244_v54, %v244_v54  ;;  %v234_v57 = vsel %vm202_vm12, %v151_v41, %v218_v50  ;;  %vm205_vm14 = vcmp.ge.f32.partialorder %v398_v46, 0.0  ;;  %v221_v58 = vmul.f32 0.2, %v398_v46  ;;  %317 = vst.msk [vmem:[%s535_s2 + $0x18] sm:$0xf] %vm310_vm3, %v370_v53 }
  0xe8   :  { %v368_v59 = vpack.c.bf16 %v234_v57, %v234_v57  ;;  %v242_v60 = vsel %vm210_vm13, %v183_v42, %v226_v55  ;;  %vm213_vm15 = vcmp.ge.f32.partialorder %v406_v47, 0.0  ;;  %v229_v61 = vmul.f32 0.2, %v406_v47 }
  0xe9   :  { %325 = vst.msk [vmem:[%s535_s2 + $0x38] sm:$0xf] %vm310_vm3, %v378_v56  ;;  %v376_v62 = vpack.c.bf16 %v242_v60, %v242_v60  ;;  %v237_v63 = vsel %vm205_vm14, %v398_v46, %v221_v58  ;;  %vm203_vm0 = vcmp.ge.f32.partialorder %v154_v51, 0.0  ;;  %v219_v0 = vmul.f32 0.2, %v154_v51 }
  0xea   :  { %315 = vst.msk [vmem:[%s535_s2 + $0x10] sm:$0xf] %vm310_vm3, %v368_v59  ;;  %v371_v1 = vpack.c.bf16 %v237_v63, %v237_v63  ;;  %v245_v2 = vsel %vm213_vm15, %v406_v47, %v229_v61  ;;  %vm211_vm1 = vcmp.ge.f32.partialorder %v186_v52, 0.0  ;;  %v227_v3 = vmul.f32 0.2, %v186_v52 }
  0xeb   :  { %323 = vst.msk [vmem:[%s535_s2 + $0x30] sm:$0xf] %vm310_vm3, %v376_v62  ;;  %v379_v4 = vpack.c.bf16 %v245_v2, %v245_v2  ;;  %v235_v5 = vsel %vm203_vm0, %v154_v51, %v219_v0 }
  0xec   :  { %318 = vst.msk [vmem:[%s535_s2 + $0x1c] sm:$0xf] %vm310_vm3, %v371_v1  ;;  %v369_v6 = vpack.c.bf16 %v235_v5, %v235_v5  ;;  %v243_v7 = vsel %vm211_vm1, %v186_v52, %v227_v3 }
  0xed   :  { %326 = vst.msk [vmem:[%s535_s2 + $0x3c] sm:$0xf] %vm310_vm3, %v379_v4  ;;  %v377_v8 = vpack.c.bf16 %v243_v7, %v243_v7 }
  0xee   :  { %316 = vst.msk [vmem:[%s535_s2 + $0x14] sm:$0xf] %vm310_vm3, %v369_v6 }
  0xef   :  { %324 = vst.msk [vmem:[%s535_s2 + $0x34] sm:$0xf] %vm310_vm3, %v377_v8 }

// kernel: discriminator_forward.5
= control target key start
LH: loop header
LB: loop body
LE: loop exit
PB: predicated region body
PF: predicated region fallthrough
CT: control target
= control target key end

     0   :  { %vm1200_vm0 = vcmask 1040384   ;;  %s2354_s0 = inlined_call_operand.vmem [shape: bf16[2,5,5,256], index: 0, kind: input, shape index: {}, may-alias: {0,1}]   ;;  %s2355_s1 = inlined_call_operand.vmem [shape: bf16[2,5,5,256], index: 1, kind: input, shape index: {}, may-alias: {0,1}]   ;;  %s2356_s2 = inlined_call_operand.vmem [shape: bf16[1024,128], index: 2, kind: input, shape index: {}]   ;;  %s2357_s3 = inlined_call_operand.vmem [shape: bf16[2,16,128], index: 3, kind: output, shape index: {0}]   ;;  %s2358_s4 = inlined_call_operand.vmem [shape: f32[1,1,2,128], index: 4, kind: output, shape index: {1}]  }
   0x1   :  { %v1827_v0 = vld [vmem:[%s2356_s2 + $0x40] sm:$0xff]   ;;  %v1850_v4 = vld [vmem:[%s2356_s2 + $0x48] sm:$0xff]   ;;  %v1874_v8 = vld [vmem:[%s2356_s2 + $0x50] sm:$0xff]  }
   0x2   :  { %v1832_v1 = vld [vmem:[%s2356_s2 + $0xc0] sm:$0xff]   ;;  %1539 = vmatprep.subr.bf16.mxu0 %v1827_v0  ;;  %v1856_v5 = vld [vmem:[%s2356_s2 + $0xc8] sm:$0xff]   ;;  %v1880_v9 = vld [vmem:[%s2356_s2 + $0xd0] sm:$0xff]  }
   0x3   :  { %v1838_v2 = vld [vmem:[%s2356_s2] sm:$0xff]   ;;  %1561 = vmatprep.subr.bf16.mxu1 %v1832_v1  ;;  %v1862_v6 = vld [vmem:[%s2356_s2 + $0x8] sm:$0xff]   ;;  %v1886_v10 = vld [vmem:[%s2356_s2 + $0x10] sm:$0xff]  }
   0x4   :  { %v1844_v3 = vld [vmem:[%s2356_s2 + $0x80] sm:$0xff]   ;;  %1540 = vmatpush3.bf16.msra.mxu0 %v1838_v2  ;;  %v1868_v7 = vld [vmem:[%s2356_s2 + $0x88] sm:$0xff]   ;;  %v1892_v11 = vld [vmem:[%s2356_s2 + $0x90] sm:$0xff]  }
   0x5   :  { %1562 = vmatpush3.bf16.msra.mxu1 %v1844_v3  ;;  %1541 = vmatprep.subr.bf16.mxu0 %v1850_v4  ;;  %v1898_v12 = vld [vmem:[%s2356_s2 + $0x58] sm:$0xff]   ;;  %v1922_v16 = vld [vmem:[%s2356_s2 + $0x60] sm:$0xff]   ;;  %v1946_v20 = vld [vmem:[%s2356_s2 + $0x68] sm:$0xff]  }
   0x6   :  { %1563 = vmatprep.subr.bf16.mxu1 %v1856_v5  ;;  %v1904_v13 = vld [vmem:[%s2356_s2 + $0xd8] sm:$0xff]   ;;  %v1928_v17 = vld [vmem:[%s2356_s2 + $0xe0] sm:$0xff]   ;;  %v1952_v21 = vld [vmem:[%s2356_s2 + $0xe8] sm:$0xff]  }
   0x7   :  { %v1910_v14 = vld [vmem:[%s2356_s2 + $0x18] sm:$0xff]   ;;  %v1934_v18 = vld [vmem:[%s2356_s2 + $0x20] sm:$0xff]   ;;  %v1958_v22 = vld [vmem:[%s2356_s2 + $0x28] sm:$0xff]  }
   0x8   :  { %1542 = vmatpush3.bf16.msra.mxu0 %v1862_v6  ;;  %v1916_v15 = vld [vmem:[%s2356_s2 + $0x98] sm:$0xff]   ;;  %v1940_v19 = vld [vmem:[%s2356_s2 + $0xa0] sm:$0xff]   ;;  %v1964_v23 = vld [vmem:[%s2356_s2 + $0xa8] sm:$0xff]  }
   0x9   :  { %1564 = vmatpush3.bf16.msra.mxu1 %v1868_v7  ;;  %1543 = vmatprep.subr.bf16.mxu0 %v1874_v8  ;;  %v1970_v24 = vld [vmem:[%s2356_s2 + $0x70] sm:$0xff]   ;;  %v1994_v28 = vld [vmem:[%s2356_s2 + $0x78] sm:$0xff]   ;;  %v53_v32 = vld [vmem:[%s2354_s0] sm:$0xff] }
   0xa   :  { %1565 = vmatprep.subr.bf16.mxu1 %v1880_v9  ;;  %v1976_v25 = vld [vmem:[%s2356_s2 + $0xf0] sm:$0xff]   ;;  %v2000_v29 = vld [vmem:[%s2356_s2 + $0xf8] sm:$0xff]   ;;  %v55_v33 = vld [vmem:[%s2354_s0 + $0x8] sm:$0xff]  ;;  %54 = vst [vmem:[#allocation3] sm:$0xff] %v53_v32 }
   0xb   :  { %v1982_v26 = vld [vmem:[%s2356_s2 + $0x30] sm:$0xff]   ;;  %v2006_v30 = vld [vmem:[%s2356_s2 + $0x38] sm:$0xff]   ;;  %56 = vst [vmem:[#allocation3 + $0x8] sm:$0xff] %v55_v33  ;;  %v2031_v36 = vld [vmem:[%s2356_s2 + $0x140] sm:$0xff]  }
   0xc   :  { %1544 = vmatpush3.bf16.msra.mxu0 %v1886_v10  ;;  %v1988_v27 = vld [vmem:[%s2356_s2 + $0xb0] sm:$0xff]   ;;  %v2012_v31 = vld [vmem:[%s2356_s2 + $0xb8] sm:$0xff]   ;;  %v2036_v37 = vld [vmem:[%s2356_s2 + $0x1c0] sm:$0xff]  }
   0xd   :  { %1566 = vmatpush3.bf16.msra.mxu1 %v1892_v11  ;;  %1545 = vmatprep.subr.bf16.mxu0 %v1898_v12  ;;  %2385 = vst [vmem:[#allocation5_spill] sm:$0xff] %v2012_v31  ;;  %v57_v34 = vld [vmem:[%s2354_s0 + $0x10] sm:$0xff]  ;;  %v59_v35 = vld [vmem:[%s2354_s0 + $0x18] sm:$0xff]  ;;  %2386 = vst [vmem:[#allocation6_spill] sm:$0xff] %v2036_v37 }
   0xe   :  { %1567 = vmatprep.subr.bf16.mxu1 %v1904_v13  ;;  %58 = vst [vmem:[#allocation3 + $0x10] sm:$0xff] %v57_v34  ;;  %60 = vst [vmem:[#allocation3 + $0x18] sm:$0xff] %v59_v35 }
  0x10   :  { %1546 = vmatpush3.bf16.msra.mxu0 %v1910_v14 }
  0x11   :  { %1568 = vmatpush3.bf16.msra.mxu1 %v1916_v15  ;;  %1547 = vmatprep.subr.bf16.mxu0 %v1922_v16  ;;  %v124_v38 = vld [vmem:[#allocation3] sm:$0x77] }
  0x12   :  { %1569 = vmatprep.subr.bf16.mxu1 %v1928_v17  ;;  %v125_v39 = vld [vmem:[#allocation3 + $0x8] sm:$0x77]  ;;  %v1435_v42 = vcombine.high %v124_v38, %v124_v38  ;;  %v1434_v45 = vcombine.low %v124_v38, %v124_v38 }
  0x13   :  { %v1439_v43 = vcombine.high %v125_v39, %v125_v39  ;;  %v1438_v47 = vcombine.low %v125_v39, %v125_v39 }
  0x14   :  { %1548 = vmatpush3.bf16.msra.mxu0 %v1934_v18  ;;  %227 = vst [vmem:[#allocation2 + $0x8] sm:$0x3] %v1435_v42  ;;  %v156_v51 = vshrl.u32 %v1435_v42, 16  ;;  %v158_v52 = vshll.u32 %v1435_v42, 16  ;;  %226 = vst [vmem:[#allocation2] sm:$0x3] %v1434_v45 }
  0x15   :  { %1570 = vmatpush3.bf16.msra.mxu1 %v1940_v19  ;;  %1549 = vmatprep.subr.bf16.mxu0 %v1946_v20  ;;  %v126_v40 = vld [vmem:[#allocation3 + $0x10] sm:$0x77]  ;;  %v127_v41 = vld [vmem:[#allocation3 + $0x18] sm:$0x77]  ;;  %v281_v50 = vrot.slane %v1439_v43, 6  ;;  %v202_v53 = vshrl.u32 %v1439_v43, 16 }
  0x16   :  { %1571 = vmatprep.subr.bf16.mxu1 %v1952_v21  ;;  %v2040_v44 = vcombine.high %v126_v40, %v126_v40  ;;  %v1447_v46 = vcombine.high %v127_v41, %v127_v41  ;;  %v2042_v48 = vcombine.low %v126_v40, %v126_v40  ;;  %v2044_v49 = vcombine.low %v127_v41, %v127_v41 }
  0x17   :  { %231 = vst [vmem:[#allocation2 + $0x28] sm:$0x3] %v1439_v43  ;;  %v204_v55 = vshll.u32 %v1439_v43, 16  ;;  %230 = vst [vmem:[#allocation2 + $0x20] sm:$0x3] %v1438_v47  ;;  %v160_v58 = vrot.slane %v158_v52, 1 }
  0x18   :  { %1550 = vmatpush3.bf16.msra.mxu0 %v1958_v22  ;;  %399 = vst [vmem:[#allocation2 + $0x8] sm:$0x30] %v2040_v44  ;;  %v453_v54 = vrot.slane %v1447_v46, 2  ;;  %403 = vst [vmem:[#allocation2 + $0x28] sm:$0x30] %v1447_v46  ;;  %v260_v56 = vshrl.u32 %v2040_v44, 16 }
  0x19   :  { %1572 = vmatpush3.bf16.msra.mxu1 %v1964_v23  ;;  %1551 = vmatprep.subr.bf16.mxu0 %v1970_v24  ;;  %v262_v57 = vshll.u32 %v2040_v44, 16  ;;  %398 = vst [vmem:[#allocation2] sm:$0x30] %v2042_v48  ;;  %402 = vst [vmem:[#allocation2 + $0x20] sm:$0x30] %v2044_v49  ;;  %v346_v59 = vshrl.u32 %v1447_v46, 16  ;;  %v161_v34 = vor.u32 %v160_v58, %v156_v51 }
  0x1a   :  { %1573 = vmatprep.subr.bf16.mxu1 %v1976_v25  ;;  %313 = vst [vmem:[#allocation2 + $0x8] sm:$0xc] %v281_v50  ;;  %v348_v60 = vshll.u32 %v1447_v46, 16  ;;  %v280_v61 = vrot.slane %v1438_v47, 6  ;;  %485 = vst [vmem:[#allocation2 + $0x8] sm:$0xc0] %v453_v54 }
  0x1b   :  { %v206_v62 = vrot.slane %v204_v55, 1  ;;  %v264_v63 = vrot.slane %v262_v57, 1  ;;  %v452_v32 = vrot.slane %v2044_v49, 2  ;;  %v149_v33 = vshrl.u32 %v1434_v45, 16  ;;  %229 = vst [vmem:[#allocation2 + $0x18] sm:$0x3] %v161_v34 }
  0x1c   :  { %1552 = vmatpush3.bf16.msra.mxu0 %v1982_v26  ;;  %v350_v35 = vrot.slane %v348_v60, 1  ;;  %312 = vst [vmem:[#allocation2] sm:$0xc] %v280_v61  ;;  %v151_v38 = vshll.u32 %v1434_v45, 16  ;;  %v195_v39 = vshrl.u32 %v1438_v47, 16  ;;  %v197_v42 = vshll.u32 %v1438_v47, 16 }
  0x1d   :  { %1574 = vmatpush3.bf16.msra.mxu1 %v1988_v27  ;;  %1553 = vmatprep.subr.bf16.mxu0 %v1994_v28  ;;  %v207_v40 = vor.u32 %v206_v62, %v202_v53  ;;  %v265_v41 = vor.u32 %v264_v63, %v260_v56  ;;  %484 = vst [vmem:[#allocation2] sm:$0xc0] %v452_v32  ;;  %v253_v43 = vshrl.u32 %v2042_v48, 16  ;;  %v255_v52 = vshll.u32 %v2042_v48, 16 }
  0x1e   :  { %1575 = vmatprep.subr.bf16.mxu1 %v2000_v29  ;;  %v351_v46 = vor.u32 %v350_v35, %v346_v59  ;;  %v153_v50 = vrot.slane %v151_v38, 1  ;;  %v339_v54 = vshrl.u32 %v2044_v49, 16  ;;  %v199_v51 = vrot.slane %v197_v42, 1  ;;  %v2059_v59 = vld [vmem:[%s2356_s2 + $0x100] sm:$0xff]  }
  0x1f   :  { %v283_v55 = vrot.slane %v207_v40, 6  ;;  %v369_v57 = vrot.slane %v265_v41, 4  ;;  %233 = vst [vmem:[#allocation2 + $0x38] sm:$0x3] %v207_v40  ;;  %v341_v45 = vshll.u32 %v2044_v49, 16  ;;  %v257_v56 = vrot.slane %v255_v52, 1 }
  0x20   :  { %1554 = vmatpush3.bf16.msra.mxu0 %v2006_v30  ;;  %v455_v58 = vrot.slane %v351_v46, 2  ;;  %v154_v53 = vor.u32 %v153_v50, %v149_v33  ;;  %v200_v47 = vor.u32 %v199_v51, %v195_v39  ;;  %v285_v63 = vrot.slane %v2040_v44, 6  ;;  %v2065_v33 = vld [vmem:[%s2356_s2 + $0x148] sm:$0xff]   ;;  %v2077_v40 = vld [vmem:[%s2356_s2 + $0x150] sm:$0xff]   ;;  %v2106_v51 = vld [vmem:[%s2356_s2 + $0x118] sm:$0xff]  }
  0x21   :  { %1576 = vmatpush3.bf16.msra.mxu1 %v2012_v31  ;;  %1583 = vmatprep.subr.bf16.mxu0 %v2031_v36  ;;  %315 = vst [vmem:[#allocation2 + $0x18] sm:$0xc] %v283_v55  ;;  %401 = vst [vmem:[#allocation2 + $0x18] sm:$0x30] %v369_v57  ;;  %v343_v60 = vrot.slane %v341_v45, 1  ;;  %v629_v61 = vld [vmem:[#allocation2 + $0x8] sm:$0xff]  ;;  %v258_v62 = vor.u32 %v257_v56, %v253_v43 }
  0x22   :  { %1605 = vmatprep.subr.bf16.mxu1 %v2036_v37  ;;  %487 = vst [vmem:[#allocation2 + $0x18] sm:$0xc0] %v455_v58  ;;  %228 = vst [vmem:[#allocation2 + $0x10] sm:$0x3] %v154_v53  ;;  %1052 = vmatprep.mubr.bf16.mxu0 %v629_v61  ;;  %v282_v49 = vrot.slane %v200_v47, 6  ;;  %v2071_v44 = vld [vmem:[%s2356_s2 + $0x108] sm:$0xff]  }
  0x23   :  { %v344_v32 = vor.u32 %v343_v60, %v339_v54  ;;  %232 = vst [vmem:[#allocation2 + $0x30] sm:$0x3] %v200_v47  ;;  %v368_v35 = vrot.slane %v258_v62, 4  ;;  %317 = vst [vmem:[#allocation2 + $0x28] sm:$0xc] %v285_v63  ;;  %v287_v39 = vrot.slane %v265_v41, 6 }
  0x24   :  { %v628_v34 = vld [vmem:[#allocation2] sm:$0xff]  ;;  %314 = vst [vmem:[#allocation2 + $0x10] sm:$0xc] %v282_v49  ;;  %2387 = vst [vmem:[#allocation7_spill] sm:$0xff] %v2071_v44  ;;  %v373_v42 = vrot.slane %v351_v46, 4  ;;  %v284_v43 = vrot.slane %v2042_v48, 6 }
  0x25   :  { %1053 = vmatmul.mubr.bf16.vlgmr.msra.gmra.mrb[0].mxu0 %v628_v34  ;;  %v454_v38 = vrot.slane %v344_v32, 2  ;;  %400 = vst [vmem:[#allocation2 + $0x10] sm:$0x30] %v368_v35  ;;  %2388 = vst [vmem:[#allocation8_spill] sm:$0xff] %v2077_v40  ;;  %v286_v52 = vrot.slane %v258_v62, 6  ;;  %v372_v54 = vrot.slane %v344_v32, 4 }
  0x26   :  { %1584 = vmatpush3.bf16.msra.mxu0 %v2059_v59  ;;  %319 = vst [vmem:[#allocation2 + $0x38] sm:$0xc] %v287_v39  ;;  %405 = vst [vmem:[#allocation2 + $0x38] sm:$0x30] %v373_v42  ;;  %v2084_v41 = vld [vmem:[%s2356_s2 + $0x110] sm:$0xff]   ;;  %v2090_v46 = vld [vmem:[%s2356_s2 + $0x158] sm:$0xff]  }
  0x27   :  { %486 = vst [vmem:[#allocation2 + $0x10] sm:$0xc0] %v454_v38  ;;  %1585 = vmatprep.subr.bf16.mxu0 %v2065_v33  ;;  %2389 = vst [vmem:[#allocation9_spill] sm:$0xff] %v2084_v41  ;;  %v2095_v48 = vld [vmem:[%s2356_s2 + $0x180] sm:$0xff]   ;;  %v2100_v55 = vld [vmem:[%s2356_s2 + $0x1c8] sm:$0xff]  }
  0x28   :  { %316 = vst [vmem:[#allocation2 + $0x20] sm:$0xc] %v284_v43  ;;  %2390 = vst [vmem:[#allocation10_spill] sm:$0xff] %v2090_v46  ;;  %v2112_v45 = vld [vmem:[%s2356_s2 + $0x160] sm:$0xff]   ;;  %v2118_v58 = vld [vmem:[%s2356_s2 + $0x188] sm:$0xff]  }
  0x29   :  { %v631_v50 = vld [vmem:[#allocation2 + $0x18] sm:$0xff]  ;;  %318 = vst [vmem:[#allocation2 + $0x30] sm:$0xc] %v286_v52  ;;  %404 = vst [vmem:[#allocation2 + $0x30] sm:$0x30] %v372_v54  ;;  %v2124_v53 = vld [vmem:[%s2356_s2 + $0x1d0] sm:$0xff]  }
  0x2a   :  { %1093 = vmatprep.mubr.bf16.mxu1 %v631_v50  ;;  %1586 = vmatpush3.bf16.msra.mxu0 %v2071_v44  ;;  %2391 = vst [vmem:[#allocation11_spill] sm:$0xff] %v2095_v48  ;;  %2392 = vst [vmem:[#allocation12_spill] sm:$0xff] %v2100_v55  ;;  %v2129_v56 = vld [vmem:[%s2356_s2 + $0x190] sm:$0xff]   ;;  %v2135_v47 = vld [vmem:[%s2356_s2 + $0x120] sm:$0xff]  }
  0x2b   :  { %1587 = vmatprep.subr.bf16.mxu0 %v2077_v40  ;;  %2393 = vst [vmem:[#allocation13_spill] sm:$0xff] %v2106_v51  ;;  %2394 = vst [vmem:[#allocation14_spill] sm:$0xff] %v2112_v45  ;;  %v2140_v60 = vld [vmem:[%s2356_s2 + $0x1d8] sm:$0xff]   ;;  %v2146_v61 = vld [vmem:[%s2356_s2 + $0x168] sm:$0xff]  }
  0x2c   :  { %2395 = vst [vmem:[#allocation15_spill] sm:$0xff] %v2118_v58  ;;  %2396 = vst [vmem:[#allocation16_spill] sm:$0xff] %v2124_v53  ;;  %v2152_v62 = vld [vmem:[%s2356_s2 + $0x128] sm:$0xff]   ;;  %v1432_v63 = vld [vmem:[%s2355_s1 + $0x20] sm:$0xff] }
  0x2d   :  { %2397 = vst [vmem:[#allocation17_spill] sm:$0xff] %v2129_v56  ;;  %2398 = vst [vmem:[#allocation18_spill] sm:$0xff] %v2135_v47  ;;  %v61_v49 = vld [vmem:[%s2354_s0 + $0x28] sm:$0xff]  ;;  %v63_v32 = vld [vmem:[%s2354_s0 + $0x30] sm:$0xff] }
  0x2e   :  { %v630_v57 = vld [vmem:[#allocation2 + $0x10] sm:$0xff]  ;;  %1588 = vmatpush3.bf16.msra.mxu0 %v2084_v41  ;;  %2399 = vst [vmem:[#allocation19_spill] sm:$0xff] %v2140_v60  ;;  %2400 = vst [vmem:[#allocation20_spill] sm:$0xff] %v2146_v61  ;;  %v65_v34 = vld [vmem:[%s2354_s0 + $0x38] sm:$0xff] }
  0x2f   :  { %1094 = vmatmul.mubr.bf16.vlgmr.msra.gmra.mrb[0].mxu1 %v630_v57  ;;  %1589 = vmatprep.subr.bf16.mxu0 %v2090_v46  ;;  %2401 = vst [vmem:[#allocation21_spill] sm:$0xff] %v2152_v62  ;;  %109 = vst [vmem:[#allocation4] sm:$0xff] %v1432_v63  ;;  %v67_v35 = vld [vmem:[%s2354_s0 + $0x40] sm:$0xff]  ;;  %v1433_v38 = vld [vmem:[%s2355_s1 + $0x48] sm:$0xff] }
  0x30   :  { %1606 = vmatpush3.bf16.msra.mxu1 %v2095_v48  ;;  %62 = vst [vmem:[#allocation3 + $0x20] sm:$0xff] %v61_v49  ;;  %64 = vst [vmem:[#allocation3 + $0x28] sm:$0xff] %v63_v32  ;;  %v2178_v39 = vld [vmem:[%s2356_s2 + $0x170] sm:$0xff]   ;;  %v2184_v42 = vld [vmem:[%s2356_s2 + $0x198] sm:$0xff]  }
  0x31   :  { %1607 = vmatprep.subr.bf16.mxu1 %v2100_v55  ;;  %2402 = vst [vmem:[#allocation22_spill] sm:$0xff] %v2178_v39  ;;  %66 = vst [vmem:[#allocation3 + $0x30] sm:$0xff] %v65_v34  ;;  %v2190_v43 = vld [vmem:[%s2356_s2 + $0x1e0] sm:$0xff]   ;;  %v2196_v50 = vld [vmem:[%s2356_s2 + $0x130] sm:$0xff]  }
  0x32   :  { %1590 = vmatpush3.bf16.msra.mxu0 %v2106_v51  ;;  %68 = vst [vmem:[#allocation3 + $0x38] sm:$0xff] %v67_v35  ;;  %111 = vst [vmem:[#allocation4 + $0x8] sm:$0xff] %v1433_v38  ;;  %v2202_v52 = vld [vmem:[%s2356_s2 + $0x178] sm:$0xff]   ;;  %v2208_v54 = vld [vmem:[%s2356_s2 + $0x1a0] sm:$0xff]  }
  0x33   :  { %1591 = vmatprep.subr.bf16.mxu0 %v2112_v45  ;;  %2403 = vst [vmem:[#allocation23_spill] sm:$0xff] %v2184_v42  ;;  %2404 = vst [vmem:[#allocation24_spill] sm:$0xff] %v2190_v43  ;;  %v2213_v57 = vld [vmem:[%s2356_s2 + $0x1e8] sm:$0xff]   ;;  %v2220_v34 = vld [vmem:[%s2356_s2 + $0x138] sm:$0xff]  }
  0x34   :  { %1608 = vmatpush3.bf16.msra.mxu1 %v2118_v58  ;;  %2405 = vst [vmem:[#allocation25_spill] sm:$0xff] %v2196_v50  ;;  %2406 = vst [vmem:[#allocation26_spill] sm:$0xff] %v2202_v52 }
  0x35   :  { %1609 = vmatprep.subr.bf16.mxu1 %v2124_v53  ;;  %2407 = vst [vmem:[#allocation27_spill] sm:$0xff] %v2208_v54  ;;  %2408 = vst [vmem:[#allocation28_spill] sm:$0xff] %v2213_v57 }
  0x36   :  { %1592 = vmatpush3.bf16.msra.mxu0 %v2135_v47  ;;  %v132_v63 = vld [vmem:[#allocation4] sm:$0x77]  ;;  %2409 = vst [vmem:[#allocation29_spill] sm:$0xff] %v2220_v34 }
  0x37   :  { %1593 = vmatprep.subr.bf16.mxu0 %v2146_v61  ;;  %v128_v49 = vld [vmem:[#allocation3 + $0x20] sm:$0x77]  ;;  %v129_v32 = vld [vmem:[#allocation3 + $0x28] sm:$0x77]  ;;  %v1451_v35 = vcombine.high %v132_v63, %v132_v63  ;;  %v1450_v38 = vcombine.low %v132_v63, %v132_v63 }
  0x38   :  { %1610 = vmatpush3.bf16.msra.mxu1 %v2129_v56  ;;  %v1441_v61 = vcombine.high %v129_v32, %v129_v32  ;;  %v2227_v56 = vcombine.low %v129_v32, %v129_v32 }
  0x39   :  { %1611 = vmatprep.subr.bf16.mxu1 %v2140_v60  ;;  %v2225_v60 = vcombine.low %v128_v49, %v128_v49  ;;  %v457_v63 = vrot.slane %v1451_v35, 2  ;;  %v432_v45 = vshrl.u32 %v1451_v35, 16  ;;  %v434_v51 = vshll.u32 %v1451_v35, 16 }
  0x3a   :  { %1594 = vmatpush3.bf16.msra.mxu0 %v2152_v62  ;;  %v131_v62 = vld [vmem:[#allocation3 + $0x38] sm:$0x77]  ;;  %v456_v53 = vrot.slane %v1450_v38, 2  ;;  %239 = vst [vmem:[#allocation2 + $0x68] sm:$0x3] %v1441_v61  ;;  %v425_v32 = vshrl.u32 %v1450_v38, 16 }
  0x3b   :  { %1595 = vmatprep.subr.bf16.mxu0 %v2178_v39  ;;  %v130_v39 = vld [vmem:[#allocation3 + $0x30] sm:$0x77]  ;;  %234 = vst [vmem:[#allocation2 + $0x40] sm:$0x3] %v2225_v60  ;;  %238 = vst [vmem:[#allocation2 + $0x60] sm:$0x3] %v2227_v56  ;;  %v1448_v31 = vcombine.low %v131_v62, %v131_v62 }
  0x3c   :  { %1612 = vmatpush3.bf16.msra.mxu1 %v2184_v42  ;;  %v1437_v42 = vcombine.high %v128_v49, %v128_v49  ;;  %v2223_v47 = vcombine.high %v130_v39, %v130_v39  ;;  %v2239_v49 = vld [vmem:[%s2356_s2 + $0x1f0] sm:$0xff]   ;;  %489 = vst [vmem:[#allocation2 + $0x28] sm:$0xc0] %v457_v63  ;;  %v436_v35 = vrot.slane %v434_v51, 1  ;;  %488 = vst [vmem:[#allocation2 + $0x20] sm:$0xc0] %v456_v53 }
  0x3d   :  { %1613 = vmatprep.subr.bf16.mxu1 %v2190_v43  ;;  %v1449_v43 = vcombine.high %v131_v62, %v131_v62  ;;  %v216_v41 = vshrl.u32 %v1441_v61, 16  ;;  %v2252_v51 = vld [vmem:[%s2356_s2 + $0x1b0] sm:$0xff]   ;;  %410 = vst [vmem:[#allocation2 + $0x60] sm:$0x30] %v1448_v31 }
  0x3e   :  { %1596 = vmatpush3.bf16.msra.mxu0 %v2196_v50  ;;  %v2233_v50 = vld [vmem:[%s2356_s2 + $0x1a8] sm:$0xff]   ;;  %235 = vst [vmem:[#allocation2 + $0x48] sm:$0x3] %v1437_v42  ;;  %407 = vst [vmem:[#allocation2 + $0x48] sm:$0x30] %v2223_v47  ;;  %v172_v46 = vshll.u32 %v1437_v42, 16  ;;  %v437_v53 = vor.u32 %v436_v35, %v432_v45 }
  0x3f   :  { %1597 = vmatprep.subr.bf16.mxu0 %v2202_v52  ;;  %2410 = vst [vmem:[#allocation30_spill] sm:$0xff] %v2233_v50  ;;  %v427_v52 = vshll.u32 %v1450_v38, 16  ;;  %v461_v58 = vrot.slane %v1449_v43, 2  ;;  %411 = vst [vmem:[#allocation2 + $0x68] sm:$0x30] %v1449_v43  ;;  %v218_v38 = vshll.u32 %v1441_v61, 16 }
  0x40   :  { %1614 = vmatpush3.bf16.msra.mxu1 %v2208_v54  ;;  %v289_v54 = vrot.slane %v1441_v61, 6  ;;  %v274_v48 = vshrl.u32 %v2223_v47, 16  ;;  %v276_v40 = vshll.u32 %v2223_v47, 16  ;;  %v360_v63 = vshrl.u32 %v1449_v43, 16 }
  0x41   :  { %1615 = vmatprep.subr.bf16.mxu1 %v2213_v57  ;;  %v170_v57 = vshrl.u32 %v1437_v42, 16  ;;  %v429_v55 = vrot.slane %v427_v52, 1  ;;  %493 = vst [vmem:[#allocation2 + $0x48] sm:$0xc0] %v461_v58  ;;  %v174_v42 = vrot.slane %v172_v46, 1  ;;  %v362_v52 = vshll.u32 %v1449_v43, 16 }
  0x42   :  { %1598 = vmatpush3.bf16.msra.mxu0 %v2220_v34  ;;  %321 = vst [vmem:[#allocation2 + $0x48] sm:$0xc] %v289_v54  ;;  %v220_v61 = vrot.slane %v218_v38, 1  ;;  %v278_v54 = vrot.slane %v276_v40, 1  ;;  %v2260_v34 = vcombine.low %v130_v39, %v130_v39  ;;  %v288_v45 = vrot.slane %v2227_v56, 6 }
  0x43   :  { %1627 = vmatprep.subr.bf16.mxu0 %v1827_v0  ;;  %v2258_v0 = vld [vmem:[%s2356_s2 + $0x1f8] sm:$0xff]   ;;  %v430_v58 = vor.u32 %v429_v55, %v425_v32  ;;  %v175_v44 = vor.u32 %v174_v42, %v170_v57  ;;  %v364_v37 = vrot.slane %v362_v52, 1  ;;  %v163_v39 = vshrl.u32 %v2225_v60, 16  ;;  %v633_v62 = vld [vmem:[#allocation2 + $0x28] sm:$0xff]  ;;  %v632_v32 = vld [vmem:[#allocation2 + $0x20] sm:$0xff] }
  0x44   :  { %1616 = vmatpush3.bf16.msra.mxu1 %v2233_v50  ;;  %v459_v50 = vrot.slane %v437_v53, 2  ;;  %v221_v35 = vor.u32 %v220_v61, %v216_v41  ;;  %v279_v43 = vor.u32 %v278_v54, %v274_v48  ;;  %406 = vst [vmem:[#allocation2 + $0x40] sm:$0x30] %v2260_v34  ;;  %v2268_v55 = vld [vmem:[%s2356_s2 + $0x1b8] sm:$0xff]   ;;  %320 = vst [vmem:[#allocation2 + $0x40] sm:$0xc] %v288_v45  ;;  %1134 = vmatprep.mubr.bf16.mxu0 %v633_v62 }
  0x45   :  { %1617 = vmatprep.subr.bf16.mxu1 %v2239_v49  ;;  %v458_v46 = vrot.slane %v430_v58, 2  ;;  %237 = vst [vmem:[#allocation2 + $0x58] sm:$0x3] %v175_v44  ;;  %v365_v40 = vor.u32 %v364_v37, %v360_v63  ;;  %v165_v57 = vshll.u32 %v2225_v60, 16  ;;  %v209_v41 = vshrl.u32 %v2227_v56, 16  ;;  %1135 = vmatmul.mubr.bf16.vlgmr.msra.gmra.mrb[4].mxu0 %v632_v32 }
  0x46   :  { %491 = vst [vmem:[#allocation2 + $0x38] sm:$0xc0] %v459_v50  ;;  %v133_v48 = vld [vmem:[#allocation4 + $0x8] sm:$0x77]  ;;  %v291_v38 = vrot.slane %v221_v35, 6  ;;  %v377_v53 = vrot.slane %v279_v43, 4  ;;  %1628 = vmatpush3.bf16.msra.mxu0 %v1838_v2 }
  0x47   :  { %490 = vst [vmem:[#allocation2 + $0x30] sm:$0xc0] %v458_v46  ;;  %241 = vst [vmem:[#allocation2 + $0x78] sm:$0x3] %v221_v35  ;;  %v460_v42 = vrot.slane %v1448_v31, 2  ;;  %v211_v37 = vshll.u32 %v2227_v56, 16  ;;  %v1453_v35 = vcombine.high %v133_v48, %v133_v48  ;;  %1629 = vmatprep.subr.bf16.mxu0 %v1850_v4 }
  0x48   :  { %1618 = vmatpush3.bf16.msra.mxu1 %v2252_v51  ;;  %v463_v44 = vrot.slane %v365_v40, 2  ;;  %v167_v50 = vrot.slane %v165_v57, 1  ;;  %v267_v60 = vshrl.u32 %v2260_v34, 16  ;;  %v269_v63 = vshll.u32 %v2260_v34, 16  ;;  %323 = vst [vmem:[#allocation2 + $0x58] sm:$0xc] %v291_v38 }
  0x49   :  { %1619 = vmatprep.subr.bf16.mxu1 %v2258_v0  ;;  %v1214_v52 = vld [vmem:[#allocation2 + $0x48] sm:$0xff]  ;;  %409 = vst [vmem:[#allocation2 + $0x58] sm:$0x30] %v377_v53  ;;  %492 = vst [vmem:[#allocation2 + $0x40] sm:$0xc0] %v460_v42  ;;  %v213_v58 = vrot.slane %v211_v37, 1 }
  0x4a   :  { %v353_v61 = vshrl.u32 %v1448_v31, 16  ;;  %v355_v54 = vshll.u32 %v1448_v31, 16  ;;  %v293_v45 = vrot.slane %v2223_v47, 6  ;;  %495 = vst [vmem:[#allocation2 + $0x58] sm:$0xc0] %v463_v44  ;;  %v168_v56 = vor.u32 %v167_v50, %v163_v39  ;;  %1253 = vmatprep.mubr.bf16.mxu0 %v1214_v52  ;;  %1630 = vmatpush3.bf16.msra.mxu0 %v1862_v6 }
  0x4b   :  { %v271_v46 = vrot.slane %v269_v63, 1  ;;  %v295_v57 = vrot.slane %v279_v43, 6  ;;  %v214_v62 = vor.u32 %v213_v58, %v209_v41  ;;  %v381_v38 = vrot.slane %v365_v40, 4  ;;  %1631 = vmatprep.subr.bf16.mxu0 %v1874_v8 }
  0x4c   :  { %1620 = vmatpush3.bf16.msra.mxu1 %v2268_v55  ;;  %v357_v32 = vrot.slane %v355_v54, 1  ;;  %325 = vst [vmem:[#allocation2 + $0x68] sm:$0xc] %v293_v45  ;;  %v292_v31 = vrot.slane %v2260_v34, 6  ;;  %236 = vst [vmem:[#allocation2 + $0x50] sm:$0x3] %v168_v56 }
  0x4d   :  { %1649 = vmatprep.subr.bf16.mxu1 %v1832_v1  ;;  %v272_v47 = vor.u32 %v271_v46, %v267_v60  ;;  %v465_v53 = vrot.slane %v1453_v35, 2  ;;  %327 = vst [vmem:[#allocation2 + $0x78] sm:$0xc] %v295_v57  ;;  %v446_v2 = vshrl.u32 %v1453_v35, 16  ;;  %v448_v39 = vshll.u32 %v1453_v35, 16  ;;  %v635_v42 = vld [vmem:[#allocation2 + $0x38] sm:$0xff] }
  0x4e   :  { %v290_v37 = vrot.slane %v214_v62, 6  ;;  %v358_v43 = vor.u32 %v357_v32, %v353_v61  ;;  %240 = vst [vmem:[#allocation2 + $0x70] sm:$0x3] %v214_v62  ;;  %413 = vst [vmem:[#allocation2 + $0x78] sm:$0x30] %v381_v38  ;;  %v1452_v1 = vcombine.low %v133_v48, %v133_v48  ;;  %1175 = vmatprep.mubr.bf16.mxu1 %v635_v42  ;;  %v634_v4 = vld [vmem:[#allocation2 + $0x30] sm:$0xff]  ;;  %1632 = vmatpush3.bf16.msra.mxu0 %v1886_v10 }
  0x4f   :  { %324 = vst [vmem:[#allocation2 + $0x60] sm:$0xc] %v292_v31  ;;  %v376_v40 = vrot.slane %v272_v47, 4  ;;  %497 = vst [vmem:[#allocation2 + $0x68] sm:$0xc0] %v465_v53  ;;  %v450_v34 = vrot.slane %v448_v39, 1  ;;  %1176 = vmatmul.mubr.bf16.vlgmr.msra.gmra.mrb[4].mxu1 %v634_v4  ;;  %1633 = vmatprep.subr.bf16.mxu0 %v1898_v12 }
  0x50   :  { %v294_v41 = vrot.slane %v272_v47, 6  ;;  %322 = vst [vmem:[#allocation2 + $0x50] sm:$0xc] %v290_v37  ;;  %v462_v44 = vrot.slane %v358_v43, 2  ;;  %v464_v50 = vrot.slane %v1452_v1, 2  ;;  %v380_v60 = vrot.slane %v358_v43, 4  ;;  %1650 = vmatpush3.bf16.msra.mxu1 %v1844_v3 }
  0x51   :  { %408 = vst [vmem:[#allocation2 + $0x50] sm:$0x30] %v376_v40  ;;  %v451_v63 = vor.u32 %v450_v34, %v446_v2  ;;  %v439_v48 = vshrl.u32 %v1452_v1, 16  ;;  %v441_v52 = vshll.u32 %v1452_v1, 16  ;;  %1651 = vmatprep.subr.bf16.mxu1 %v1856_v5  ;;  %v1216_v6 = vld [vmem:[#allocation2 + $0x58] sm:$0xff]  ;;  %v2411_v10 = vld [vmem:[#allocation5_spill] sm:$0xff] }
  0x52   :  { %326 = vst [vmem:[#allocation2 + $0x70] sm:$0xc] %v294_v41  ;;  %494 = vst [vmem:[#allocation2 + $0x50] sm:$0xc0] %v462_v44  ;;  %1294 = vmatprep.mubr.bf16.mxu1 %v1216_v6  ;;  %1634 = vmatpush3.bf16.msra.mxu0 %v1910_v14  ;;  %v2412_v12 = vld [vmem:[#allocation6_spill] sm:$0xff]  ;;  %v2413_v14 = vld [vmem:[#allocation7_spill] sm:$0xff] }
  0x53   :  { %496 = vst [vmem:[#allocation2 + $0x60] sm:$0xc0] %v464_v50  ;;  %412 = vst [vmem:[#allocation2 + $0x70] sm:$0x30] %v380_v60  ;;  %v467_v8 = vrot.slane %v451_v63, 2  ;;  %v443_v58 = vrot.slane %v441_v52, 1  ;;  %1635 = vmatprep.subr.bf16.mxu0 %v1922_v16 }
  0x54   :  { %1652 = vmatpush3.bf16.msra.mxu1 %v1868_v7  ;;  %v1213_v7 = vld [vmem:[#allocation2 + $0x40] sm:$0xff]  ;;  %v2433_v61 = vld [vmem:[#allocation25_spill] sm:$0xff]  ;;  %v2434_v54 = vld [vmem:[#allocation26_spill] sm:$0xff] }
  0x55   :  { %499 = vst [vmem:[#allocation2 + $0x78] sm:$0xc0] %v467_v8  ;;  %v444_v3 = vor.u32 %v443_v58, %v439_v48  ;;  %1653 = vmatprep.subr.bf16.mxu1 %v1880_v9  ;;  %v2415_v16 = vld [vmem:[#allocation11_spill] sm:$0xff]  ;;  %v2435_v45 = vld [vmem:[#allocation30_spill] sm:$0xff]  ;;  %v2436_v56 = vld [vmem:[#allocation29_spill] sm:$0xff] }
  0x56   :  { %1636 = vmatpush3.bf16.msra.mxu0 %v1934_v18  ;;  %v1218_v9 = vld [vmem:[#allocation2 + $0x68] sm:$0xff]  ;;  %v2417_v18 = vld [vmem:[#allocation9_spill] sm:$0xff] }
  0x57   :  { %v466_v5 = vrot.slane %v444_v3, 2  ;;  %1637 = vmatprep.subr.bf16.mxu0 %v1946_v20  ;;  %v2419_v20 = vld [vmem:[#allocation15_spill] sm:$0xff] }
  0x58   :  { %1654 = vmatpush3.bf16.msra.mxu1 %v1892_v11 }
  0x59   :  { %498 = vst [vmem:[#allocation2 + $0x70] sm:$0xc0] %v466_v5  ;;  %1655 = vmatprep.subr.bf16.mxu1 %v1904_v13  ;;  %v1215_v11 = vld [vmem:[#allocation2 + $0x50] sm:$0xff] }
  0x5a   :  { %1638 = vmatpush3.bf16.msra.mxu0 %v1958_v22  ;;  %v2421_v22 = vld [vmem:[#allocation13_spill] sm:$0xff]  ;;  %v1217_v46 = vld [vmem:[#allocation2 + $0x60] sm:$0xff] }
  0x5b   :  { %1639 = vmatprep.subr.bf16.mxu0 %v1970_v24  ;;  %v2423_v24 = vld [vmem:[#allocation17_spill] sm:$0xff] }
  0x5c   :  { %1656 = vmatpush3.bf16.msra.mxu1 %v1916_v15  ;;  %v1220_v13 = vld [vmem:[#allocation2 + $0x78] sm:$0xff]  ;;  %v2414_v15 = vld [vmem:[#allocation8_spill] sm:$0xff] }
  0x5d   :  { %1657 = vmatprep.subr.bf16.mxu1 %v1928_v17  ;;  %v2416_v17 = vld [vmem:[#allocation12_spill] sm:$0xff] }
  0x5e   :  { %1640 = vmatpush3.bf16.msra.mxu0 %v1982_v26  ;;  %v2425_v26 = vld [vmem:[#allocation18_spill] sm:$0xff] }
  0x5f   :  { %1641 = vmatprep.subr.bf16.mxu0 %v1994_v28  ;;  %v2427_v28 = vld [vmem:[#allocation23_spill] sm:$0xff] }
  0x60   :  { %1658 = vmatpush3.bf16.msra.mxu1 %v1940_v19  ;;  %v2418_v19 = vld [vmem:[#allocation10_spill] sm:$0xff]  ;;  %v1219_v35 = vld [vmem:[#allocation2 + $0x70] sm:$0xff] }
  0x61   :  { %1659 = vmatprep.subr.bf16.mxu1 %v1952_v21  ;;  %v2420_v21 = vld [vmem:[#allocation16_spill] sm:$0xff] }
  0x62   :  { %1642 = vmatpush3.bf16.msra.mxu0 %v2006_v30  ;;  %v2429_v30 = vld [vmem:[#allocation21_spill] sm:$0xff] }
  0x63   :  { %1671 = vmatprep.subr.bf16.mxu0 %v2031_v36  ;;  %v2430_v36 = vld [vmem:[#allocation22_spill] sm:$0xff] }
  0x64   :  { %1660 = vmatpush3.bf16.msra.mxu1 %v1964_v23  ;;  %v2422_v23 = vld [vmem:[#allocation14_spill] sm:$0xff] }
  0x65   :  { %1661 = vmatprep.subr.bf16.mxu1 %v1976_v25  ;;  %1254 = vmatmul.mubr.bf16.vlgmr.msra.gmra.mrb[8].mxu0 %v1213_v7  ;;  %v2424_v25 = vld [vmem:[#allocation19_spill] sm:$0xff] }
  0x66   :  { %1672 = vmatpush3.bf16.msra.mxu0 %v2059_v59  ;;  %1335 = vmatprep.mubr.bf16.mxu0 %v1218_v9  ;;  %v2431_v59 = vld [vmem:[#allocation27_spill] sm:$0xff] }
  0x67   :  { %1673 = vmatprep.subr.bf16.mxu0 %v2065_v33  ;;  %v2432_v33 = vld [vmem:[#allocation28_spill] sm:$0xff] }
  0x68   :  { %1662 = vmatpush3.bf16.msra.mxu1 %v1988_v27  ;;  %v2426_v27 = vld [vmem:[#allocation20_spill] sm:$0xff] }
  0x69   :  { %1663 = vmatprep.subr.bf16.mxu1 %v2000_v29  ;;  %v2428_v29 = vld [vmem:[#allocation24_spill] sm:$0xff] }
  0x6a   :  { %1674 = vmatpush3.bf16.msra.mxu0 %v2413_v14 }
  0x6b   :  { %1675 = vmatprep.subr.bf16.mxu0 %v2414_v15 }
  0x6c   :  { %1664 = vmatpush3.bf16.msra.mxu1 %v2411_v10 }
  0x6d   :  { %1693 = vmatprep.subr.bf16.mxu1 %v2412_v12 }
  0x6e   :  { %1676 = vmatpush3.bf16.msra.mxu0 %v2417_v18 }
  0x6f   :  { %1295 = vmatmul.mubr.bf16.vlgmr.msra.gmra.mrb[8].mxu1 %v1215_v11  ;;  %1677 = vmatprep.subr.bf16.mxu0 %v2418_v19 }
  0x70   :  { %1694 = vmatpush3.bf16.msra.mxu1 %v2415_v16  ;;  %1376 = vmatprep.mubr.bf16.mxu1 %v1220_v13 }
  0x71   :  { %1695 = vmatprep.subr.bf16.mxu1 %v2416_v17 }
  0x72   :  { %1678 = vmatpush3.bf16.msra.mxu0 %v2421_v22 }
  0x73   :  { %1679 = vmatprep.subr.bf16.mxu0 %v2422_v23 }
  0x74   :  { %1696 = vmatpush3.bf16.msra.mxu1 %v2419_v20 }
  0x75   :  { %1697 = vmatprep.subr.bf16.mxu1 %v2420_v21 }
  0x76   :  { %1680 = vmatpush3.bf16.msra.mxu0 %v2425_v26 }
  0x77   :  { %1681 = vmatprep.subr.bf16.mxu0 %v2426_v27 }
  0x78   :  { %1698 = vmatpush3.bf16.msra.mxu1 %v2423_v24 }
  0x79   :  { %1699 = vmatprep.subr.bf16.mxu1 %v2424_v25 }
  0x7a   :  { %1682 = vmatpush3.bf16.msra.mxu0 %v2429_v30 }
  0x7b   :  { %1683 = vmatprep.subr.bf16.mxu0 %v2430_v36 }
  0x7c   :  { %1700 = vmatpush3.bf16.msra.mxu1 %v2427_v28 }
  0x7d   :  { %1701 = vmatprep.subr.bf16.mxu1 %v2428_v29 }
  0x7e   :  { %1684 = vmatpush3.bf16.msra.mxu0 %v2433_v61 }
  0x7f   :  { %1685 = vmatprep.subr.bf16.mxu0 %v2434_v54 }
  0x80   :  { %1702 = vmatpush3.bf16.msra.mxu1 %v2431_v59 }
  0x81   :  { %1703 = vmatprep.subr.bf16.mxu1 %v2432_v33 }
  0x82   :  { %1686 = vmatpush3.bf16.msra.mxu0 %v2436_v56 }
  0x84   :  { %1704 = vmatpush3.bf16.msra.mxu1 %v2435_v45 }
  0x85   :  { %1705 = vmatprep.subr.bf16.mxu1 %v2239_v49  ;;  %1336 = vmatmul.mubr.bf16.vlgmr.msra.gmra.mrb[12].mxu0 %v1217_v46 }
  0x88   :  { %1706 = vmatpush3.bf16.msra.mxu1 %v2252_v51 }
  0x89   :  { %1707 = vmatprep.subr.bf16.mxu1 %v2258_v0 }
  0x8c   :  { %1708 = vmatpush3.bf16.msra.mxu1 %v2268_v55 }
  0x8f   :  { %1377 = vmatmul.mubr.bf16.vlgmr.msra.gmra.mrb[12].mxu1 %v1219_v35 }
  0xf8   :  { %v1555_v57 = vpop.f32.mrb[0].mxu0 }
  0xf9   :  { %v1556_v62 = vpop.f32.mrb[1].mxu0 }
  0xfa   :  { %v1557_v32 = vadd.f32 %v1556_v62, %v1555_v57  ;;  %v1558_v38 = vpop.f32.mrb[2].mxu0 }
  0xfb   :  { %v1559_v31 = vpop.f32.mrb[3].mxu0 }
  0xfc   :  { %v1560_v47 = vadd.f32 %v1559_v31, %v1558_v38 }
 0x102   :  { %v1577_v53 = vpop.f32.mrb[0].mxu1 }
 0x103   :  { %v1578_v49 = vpop.f32.mrb[1].mxu1 }
 0x104   :  { %v1579_v2 = vadd.f32 %v1578_v49, %v1577_v53  ;;  %v1580_v39 = vpop.f32.mrb[2].mxu1 }
 0x105   :  { %v1581_v42 = vpop.f32.mrb[3].mxu1 }
 0x106   :  { %v1096_v37 = vadd.f32 %v1579_v2, %v1557_v32  ;;  %v1582_v51 = vadd.f32 %v1581_v42, %v1580_v39 }
 0x108   :  { %v1099_v43 = vadd.f32 %v1582_v51, %v1560_v47 }
 0x118   :  { %v1599_v0 = vpop.f32.mrb[4].mxu0 }
 0x119   :  { %v1600_v1 = vpop.f32.mrb[5].mxu0 }
 0x11a   :  { %v1601_v4 = vadd.f32 %v1600_v1, %v1599_v0  ;;  %v1602_v55 = vpop.f32.mrb[6].mxu0 }
 0x11b   :  { %v1603_v40 = vpop.f32.mrb[7].mxu0 }
 0x11c   :  { %v1137_v34 = vadd.f32 %v1601_v4, %v1096_v37  ;;  %v1604_v41 = vadd.f32 %v1603_v40, %v1602_v55 }
 0x11e   :  { %v1140_v50 = vadd.f32 %v1604_v41, %v1099_v43 }
 0x122   :  { %v1621_v44 = vpop.f32.mrb[4].mxu1 }
 0x123   :  { %v1622_v60 = vpop.f32.mrb[5].mxu1 }
 0x124   :  { %v1623_v63 = vadd.f32 %v1622_v60, %v1621_v44  ;;  %v1624_v48 = vpop.f32.mrb[6].mxu1 }
 0x125   :  { %v1625_v52 = vpop.f32.mrb[7].mxu1 }
 0x126   :  { %v1178_v6 = vadd.f32 %v1623_v63, %v1137_v34  ;;  %v1626_v8 = vadd.f32 %v1625_v52, %v1624_v48 }
 0x128   :  { %v1181_v58 = vadd.f32 %v1626_v8, %v1140_v50  ;;  %v1191_v3 = vmul.f32 %v1178_v6, %v1178_v6 }
 0x12a   :  { %v1184_v5 = vadd.f32 %v1181_v58, %v1178_v6  ;;  %v1192_v7 = vmul.f32 %v1181_v58, %v1181_v58  ;;  %v1531_v9 = vpack.c.bf16 %v1181_v58, %v1178_v6 }
 0x12c   :  { %v1185_v10 = vrot.slane %v1184_v5, 4  ;;  %v1193_v11 = vadd.f32 %v1192_v7, %v1191_v3  ;;  %1532 = vst [vmem:[%s2357_s3] sm:$0xff] %v1531_v9  }
 0x12e   :  { %v1186_v12 = vadd.f32 %v1185_v10, %v1184_v5  ;;  %v1194_v13 = vrot.slane %v1193_v11, 4 }
 0x130   :  { %v1187_v14 = vrot.slane %v1186_v12, 2  ;;  %v1195_v15 = vadd.f32 %v1194_v13, %v1193_v11 }
 0x132   :  { %v1188_v16 = vadd.f32 %v1187_v14, %v1186_v12  ;;  %v1196_v17 = vrot.slane %v1195_v15, 2 }
 0x134   :  { %v1189_v18 = vrot.slane %v1188_v16, 1  ;;  %v1197_v19 = vadd.f32 %v1196_v17, %v1195_v15 }
 0x136   :  { %v1198_v20 = vrot.slane %v1197_v19, 1  ;;  %v1190_v21 = vadd.f32 %v1189_v18, %v1188_v16 }
 0x138   :  { %v1199_v22 = vadd.f32 %v1198_v20, %v1197_v19  ;;  %v1643_v24 = vpop.f32.mrb[8].mxu0 }
 0x139   :  { %v1644_v25 = vpop.f32.mrb[9].mxu0 }
 0x13a   :  { %v1201_v23 = vsel %vm1200_vm0, %v1190_v21, %v1199_v22  ;;  %v1645_v26 = vadd.f32 %v1644_v25, %v1643_v24  ;;  %v1646_v27 = vpop.f32.mrb[10].mxu0 }
 0x13b   :  { %v1647_v28 = vpop.f32.mrb[11].mxu0 }
 0x13c   :  { %v1648_v29 = vadd.f32 %v1647_v28, %v1646_v27 }
 0x142   :  { %v1665_v30 = vpop.f32.mrb[8].mxu1 }
 0x143   :  { %v1666_v36 = vpop.f32.mrb[9].mxu1 }
 0x144   :  { %v1667_v59 = vadd.f32 %v1666_v36, %v1665_v30  ;;  %v1668_v33 = vpop.f32.mrb[10].mxu1 }
 0x145   :  { %v1669_v61 = vpop.f32.mrb[11].mxu1 }
 0x146   :  { %v1297_v54 = vadd.f32 %v1667_v59, %v1645_v26  ;;  %v1670_v45 = vadd.f32 %v1669_v61, %v1668_v33 }
 0x148   :  { %v1300_v56 = vadd.f32 %v1670_v45, %v1648_v29 }
 0x158   :  { %v1687_v46 = vpop.f32.mrb[12].mxu0 }
 0x159   :  { %v1688_v35 = vpop.f32.mrb[13].mxu0 }
 0x15a   :  { %v1689_v57 = vadd.f32 %v1688_v35, %v1687_v46  ;;  %v1690_v62 = vpop.f32.mrb[14].mxu0 }
 0x15b   :  { %v1691_v32 = vpop.f32.mrb[15].mxu0 }
 0x15c   :  { %v1338_v38 = vadd.f32 %v1689_v57, %v1297_v54  ;;  %v1692_v31 = vadd.f32 %v1691_v32, %v1690_v62 }
 0x15e   :  { %v1341_v53 = vadd.f32 %v1692_v31, %v1300_v56 }
 0x162   :  { %v1709_v47 = vpop.f32.mrb[12].mxu1 }
 0x163   :  { %v1710_v49 = vpop.f32.mrb[13].mxu1 }
 0x164   :  { %v1711_v2 = vadd.f32 %v1710_v49, %v1709_v47  ;;  %v1712_v39 = vpop.f32.mrb[14].mxu1 }
 0x165   :  { %v1713_v42 = vpop.f32.mrb[15].mxu1 }
 0x166   :  { %v1379_v37 = vadd.f32 %v1711_v2, %v1338_v38  ;;  %v1714_v51 = vadd.f32 %v1713_v42, %v1712_v39 }
 0x168   :  { %v1382_v43 = vadd.f32 %v1714_v51, %v1341_v53  ;;  %v1392_v0 = vmul.f32 %v1379_v37, %v1379_v37 }
 0x16a   :  { %v1385_v1 = vadd.f32 %v1382_v43, %v1379_v37  ;;  %v1393_v4 = vmul.f32 %v1382_v43, %v1382_v43  ;;  %v1536_v55 = vpack.c.bf16 %v1382_v43, %v1379_v37 }
 0x16c   :  { %v1386_v40 = vrot.slane %v1385_v1, 4  ;;  %v1394_v34 = vadd.f32 %v1393_v4, %v1392_v0  ;;  %1538 = vst [vmem:[%s2357_s3 + $0x8] sm:$0xff] %v1536_v55  }
 0x16e   :  { %v1387_v41 = vadd.f32 %v1386_v40, %v1385_v1  ;;  %v1395_v44 = vrot.slane %v1394_v34, 4 }
 0x170   :  { %v1388_v50 = vrot.slane %v1387_v41, 2  ;;  %v1396_v60 = vadd.f32 %v1395_v44, %v1394_v34 }
 0x172   :  { %v1389_v63 = vadd.f32 %v1388_v50, %v1387_v41  ;;  %v1397_v48 = vrot.slane %v1396_v60, 2 }
 0x174   :  { %v1390_v52 = vrot.slane %v1389_v63, 1  ;;  %v1398_v6 = vadd.f32 %v1397_v48, %v1396_v60 }
 0x176   :  { %v1399_v8 = vrot.slane %v1398_v6, 1  ;;  %v1391_v58 = vadd.f32 %v1390_v52, %v1389_v63 }
 0x178   :  { %v1400_v3 = vadd.f32 %v1399_v8, %v1398_v6 }
 0x17a   :  { %v1401_v5 = vsel %vm1200_vm0, %v1391_v58, %v1400_v3 }
 0x17b   :  { %v1402_v7 = vadd.f32 %v1401_v5, %v1201_v23 }
 0x17d   :  { %1414 = vst [vmem:[%s2358_s4] sm:$0x3] %v1402_v7 }

// kernel: discriminator_forward.6
= control target key start
LH: loop header
LB: loop body
LE: loop exit
PB: predicated region body
PF: predicated region fallthrough
CT: control target
= control target key end

     0   :  { %v3855_v7 = vmov 1983009808   ;;  %v119_v9 = vlaneseq  ;;  %vm2589_vm0 = vcmask 1043456   ;;  %vm2620_vm1 = vcmask 1040384   ;;  %s5018_s0 = inlined_call_operand.vmem [shape: bf16[2,3,3,512], index: 0, kind: input, shape index: {}, may-alias: {0,1}]   ;;  %s5019_s1 = inlined_call_operand.vmem [shape: bf16[2,3,3,512], index: 1, kind: input, shape index: {}, may-alias: {0,1}]   ;;  %s5020_s2 = inlined_call_operand.vmem [shape: bf16[2048,256], index: 2, kind: input, shape index: {}]   ;;  %s5021_s3 = inlined_call_operand.vmem [shape: bf16[2,4,256], index: 3, kind: output, shape index: {0}]   ;;  %s5022_s4 = inlined_call_operand.vmem [shape: f32[1,1,2,256], index: 4, kind: output, shape index: {1}]  }
   0x1   :  { %v3457_v0 = vld [vmem:[%s5020_s2 + $0x4] ss:$8 sps:$4 sm:$0xff]   ;;  %v3459_v1 = vld [vmem:[%s5020_s2] ss:$8 sps:$4 sm:$0xff]   ;;  %v3460_v2 = vld [vmem:[%s5020_s2 + $0x14] ss:$8 sps:$4 sm:$0xff]   ;;  %v117_v8 = vunpack.c.l.s4 %v3855_v7 }
   0x2   :  { %2261 = vmatprep.subr.bf16.mxu0 %v3457_v0  ;;  %2730 = vmatprep.subr.bf16.mxu1 %v3457_v0  ;;  %v3462_v3 = vld [vmem:[%s5020_s2 + $0x10] ss:$8 sps:$4 sm:$0xff]   ;;  %v3463_v4 = vld [vmem:[%s5020_s2 + $0x24] ss:$8 sps:$4 sm:$0xff]   ;;  %v3465_v5 = vld [vmem:[%s5020_s2 + $0x20] ss:$8 sps:$4 sm:$0xff]  }
   0x3   :  { %2262 = vmatpush1.bf16.msra.mxu0 %v3459_v1  ;;  %2731 = vmatpush1.bf16.msra.mxu1 %v3459_v1  ;;  %v3466_v6 = vld [vmem:[%s5020_s2 + $0x34] ss:$8 sps:$4 sm:$0xff]   ;;  %v3468_v10 = vld [vmem:[%s5020_s2 + $0x30] ss:$8 sps:$4 sm:$0xff]   ;;  %v3469_v11 = vld [vmem:[%s5020_s2 + $0x44] ss:$8 sps:$4 sm:$0xff]   ;;  %v118_v12 = vunpack.c.0.s8 %v117_v8 }
   0x4   :  { %2263 = vmatprep.subr.bf16.mxu0 %v3460_v2  ;;  %2732 = vmatprep.subr.bf16.mxu1 %v3460_v2  ;;  %v120_v13 = vshrl.u32 %v119_v9, 7  ;;  %v3471_v14 = vld [vmem:[%s5020_s2 + $0x40] ss:$8 sps:$4 sm:$0xff]   ;;  %v3472_v15 = vld [vmem:[%s5020_s2 + $0x54] ss:$8 sps:$4 sm:$0xff]  }
   0x5   :  { %v3474_v17 = vld [vmem:[%s5020_s2 + $0x50] ss:$8 sps:$4 sm:$0xff]   ;;  %v3475_v18 = vld [vmem:[%s5020_s2 + $0x64] ss:$8 sps:$4 sm:$0xff]   ;;  %v3477_v25 = vld [vmem:[%s5020_s2 + $0x60] ss:$8 sps:$4 sm:$0xff]  }
   0x6   :  { %v3914_v16 = vsub.s32 %v118_v12, %v120_v13  ;;  %v45_v19 = vld [vmem:[%s5018_s0] sm:$0xff]  ;;  %v47_v20 = vld [vmem:[%s5018_s0 + $0x8] sm:$0xff]  ;;  %v49_v26 = vld [vmem:[%s5018_s0 + $0x18] sm:$0xff] }
   0x7   :  { %2264 = vmatpush1.bf16.msra.mxu0 %v3462_v3  ;;  %2733 = vmatpush1.bf16.msra.mxu1 %v3462_v3  ;;  %v115_v21 = vcombine.high %v45_v19, %v45_v19  ;;  %v207_v23 = vcombine.high %v47_v20, %v47_v20  ;;  %v51_v27 = vld [vmem:[%s5018_s0 + $0x20] sm:$0xff]  ;;  %v3478_v28 = vld [vmem:[%s5020_s2 + $0x74] ss:$8 sps:$4 sm:$0xff]   ;;  %v132_v33 = vcombine.high %v49_v26, %v49_v26  ;;  %v3480_v40 = vld [vmem:[%s5020_s2 + $0x70] ss:$8 sps:$4 sm:$0xff]  }
   0x8   :  { %2265 = vmatprep.subr.bf16.mxu0 %v3463_v4  ;;  %2734 = vmatprep.subr.bf16.mxu1 %v3463_v4  ;;  %v3929_v22 = vrot.slane %v45_v19, %v3914_v16  ;;  %v3932_v24 = vrot.slane %v47_v20, %v3914_v16  ;;  %v3961_v34 = vrot.slane %v49_v26, %v3914_v16  ;;  %v3481_v44 = vld [vmem:[%s5020_s2 + $0x84] ss:$8 sps:$4 sm:$0xff]   ;;  %v3483_v55 = vld [vmem:[%s5020_s2 + $0x80] ss:$8 sps:$4 sm:$0xff]   ;;  %v3484_v59 = vld [vmem:[%s5020_s2 + $0x94] ss:$8 sps:$4 sm:$0xff]  }
   0x9   :  { %v3947_v29 = vrot.slane %v115_v21, %v3914_v16  ;;  %v3954_v31 = vrot.slane %v207_v23, %v3914_v16  ;;  %v224_v35 = vcombine.high %v51_v27, %v51_v27  ;;  %v3974_v39 = vrot.slane %v51_v27, %v3914_v16  ;;  %v3486_v3 = vld [vmem:[%s5020_s2 + $0x90] ss:$8 sps:$4 sm:$0xff]   ;;  %v3489_v8 = vld [vmem:[%s5020_s2 + $0xa0] ss:$8 sps:$4 sm:$0xff]  }
   0xa   :  { %v3951_v30 = vcombine.high %v3929_v22, %v3929_v22  ;;  %v3958_v32 = vcombine.high %v3932_v24, %v3932_v24  ;;  %v3982_v42 = vrot.slane %v132_v33, %v3914_v16  ;;  %v3986_v43 = vcombine.high %v3961_v34, %v3961_v34  ;;  %v3492_v12 = vld [vmem:[%s5020_s2 + $0xb0] ss:$8 sps:$4 sm:$0xff]   ;;  %v3495_v23 = vld [vmem:[%s5020_s2 + $0xc0] ss:$8 sps:$4 sm:$0xff]  }
   0xb   :  { %2266 = vmatpush1.bf16.msra.mxu0 %v3465_v5  ;;  %2735 = vmatpush1.bf16.msra.mxu1 %v3465_v5  ;;  %v3965_v36 = vcombine.high %v3947_v29, %v3947_v29  ;;  %v3969_v37 = vcombine.high %v3954_v31, %v3954_v31  ;;  %v4002_v50 = vrot.slane %v224_v35, %v3914_v16  ;;  %v150_v19 = vshrl.u32 %v3929_v22, 16 }
   0xc   :  { %2267 = vmatprep.subr.bf16.mxu0 %v3466_v6  ;;  %2736 = vmatprep.subr.bf16.mxu1 %v3466_v6  ;;  %v297_v38 = vcombine.low %v3929_v22, %v3951_v30  ;;  %v331_v41 = vcombine.low %v3932_v24, %v3958_v32  ;;  %v3999_v49 = vcombine.high %v3982_v42, %v3982_v42  ;;  %v3487_v6 = vld [vmem:[%s5020_s2 + $0xa4] ss:$8 sps:$4 sm:$0xff]   ;;  %v157_v21 = vshrl.u32 %v3951_v30, 16 }
   0xd   :  { %v298_v45 = vcombine.low %v3947_v29, %v3965_v36  ;;  %v332_v47 = vcombine.low %v3954_v31, %v3969_v37  ;;  %v4006_v51 = vcombine.high %v3974_v39, %v3974_v39  ;;  %v365_v54 = vcombine.low %v3961_v34, %v3986_v43 }
   0xe   :  { %v305_v46 = vrot.slane %v297_v38, %v3914_v16  ;;  %v339_v48 = vrot.slane %v331_v41, %v3914_v16  ;;  %v4017_v56 = vcombine.high %v4002_v50, %v4002_v50  ;;  %v366_v57 = vcombine.low %v3982_v42, %v3999_v49 }
   0xf   :  { %2268 = vmatpush1.bf16.msra.mxu0 %v3468_v10  ;;  %2737 = vmatpush1.bf16.msra.mxu1 %v3468_v10  ;;  %v312_v52 = vrot.slane %v298_v45, %v3914_v16  ;;  %v346_v53 = vrot.slane %v332_v47, %v3914_v16  ;;  %v399_v58 = vcombine.low %v3974_v39, %v4006_v51  ;;  %v3490_v10 = vld [vmem:[%s5020_s2 + $0xb4] ss:$8 sps:$4 sm:$0xff]   ;;  %v164_v33 = vshrl.u32 %v3947_v29, 16 }
  0x10   :  { %2269 = vmatprep.subr.bf16.mxu0 %v3469_v11  ;;  %2738 = vmatprep.subr.bf16.mxu1 %v3469_v11  ;;  %v373_v62 = vrot.slane %v365_v54, %v3914_v16  ;;  %v380_v63 = vrot.slane %v366_v57, %v3914_v16  ;;  %v400_v0 = vcombine.low %v4002_v50, %v4017_v56  ;;  %v152_v11 = vshll.u32 %v3929_v22, 16 }
  0x11   :  { %v313_v60 = vcombine.low %v305_v46, %v312_v52  ;;  %v347_v61 = vcombine.low %v339_v48, %v346_v53  ;;  %v407_v1 = vrot.slane %v399_v58, %v3914_v16  ;;  %v251_v22 = vshll.u32 %v3958_v32, 16  ;;  %v3499_v58 = vld [vmem:[%s5020_s2 + $0xe4] ss:$8 sps:$4 sm:$0xff]  }
  0x12   :  { %v381_v4 = vcombine.low %v373_v62, %v380_v63  ;;  %v414_v5 = vrot.slane %v400_v0, %v3914_v16  ;;  %v154_v20 = vrot.slane %v152_v11, 1  ;;  %v171_v41 = vshrl.u32 %v3965_v36, 16 }
  0x13   :  { %2270 = vmatpush1.bf16.msra.mxu0 %v3471_v14  ;;  %2739 = vmatpush1.bf16.msra.mxu1 %v3471_v14  ;;  %441 = vst [vmem:[#allocation2] sm:$0x55] %v313_v60  ;;  %v609_v2 = vrot.slane %v347_v61, 7  ;;  %443 = vst [vmem:[#allocation2 + $0x10] sm:$0x55] %v347_v61  ;;  %v159_v14 = vshll.u32 %v3951_v30, 16 }
  0x14   :  { %2271 = vmatprep.subr.bf16.mxu0 %v3472_v15  ;;  %2740 = vmatprep.subr.bf16.mxu1 %v3472_v15  ;;  %v415_v7 = vcombine.low %v407_v1, %v414_v5  ;;  %445 = vst [vmem:[#allocation2 + $0x20] sm:$0x55] %v381_v4  ;;  %v166_v15 = vshll.u32 %v3947_v29, 16  ;;  %v155_v26 = vor.u32 %v154_v20, %v150_v19  ;;  %v3496_v30 = vld [vmem:[%s5020_s2 + $0xd4] ss:$8 sps:$4 sm:$0xff]   ;;  %v242_v45 = vshrl.u32 %v3932_v24, 16 }
  0x15   :  { %625 = vst [vmem:[#allocation2] sm:$0xaa] %v609_v2  ;;  %v161_v27 = vrot.slane %v159_v14, 1  ;;  %v258_v46 = vshll.u32 %v3954_v31, 16  ;;  %v265_v47 = vshll.u32 %v3969_v37, 16  ;;  %v249_v57 = vshrl.u32 %v3958_v32, 16 }
  0x16   :  { %v613_v9 = vrot.slane %v415_v7, 7  ;;  %447 = vst [vmem:[#allocation2 + $0x30] sm:$0x55] %v415_v7  ;;  %v168_v35 = vrot.slane %v166_v15, 1  ;;  %v256_v61 = vshrl.u32 %v3954_v31, 16  ;;  %v263_v0 = vshrl.u32 %v3969_v37, 16 }
  0x17   :  { %2272 = vmatpush1.bf16.msra.mxu0 %v3474_v17  ;;  %2741 = vmatpush1.bf16.msra.mxu1 %v3474_v17  ;;  %v3493_v17 = vld [vmem:[%s5020_s2 + $0xc4] ss:$8 sps:$4 sm:$0xff]   ;;  %v260_v63 = vrot.slane %v258_v46, 1  ;;  %v267_v1 = vrot.slane %v265_v47, 1  ;;  %v3502_v31 = vld [vmem:[%s5020_s2 + $0xf4] ss:$8 sps:$4 sm:$0xff]  }
  0x18   :  { %2273 = vmatprep.subr.bf16.mxu0 %v3475_v18  ;;  %2742 = vmatprep.subr.bf16.mxu1 %v3475_v18  ;;  %629 = vst [vmem:[#allocation2 + $0x20] sm:$0xaa] %v613_v9  ;;  %v169_v48 = vor.u32 %v168_v35, %v164_v33  ;;  %v187_v19 = vshll.u32 %v3986_v43, 16  ;;  %v194_v20 = vshll.u32 %v3982_v42, 16  ;;  %v3514_v46 = vld [vmem:[%s5020_s2 + $0x110] ss:$8 sps:$4 sm:$0xff]  }
  0x19   :  { %v261_v4 = vor.u32 %v260_v63, %v256_v61  ;;  %v268_v7 = vor.u32 %v267_v1, %v263_v0  ;;  %v3522_v0 = vld [vmem:[%s5020_s2 + $0x134] ss:$8 sps:$4 sm:$0xff]  }
  0x1b   :  { %2274 = vmatpush1.bf16.msra.mxu0 %v3477_v25  ;;  %2743 = vmatpush1.bf16.msra.mxu1 %v3477_v25  ;;  %v349_v15 = vcombine.low %v261_v4, %v268_v7 }
  0x1c   :  { %2275 = vmatprep.subr.bf16.mxu0 %v3478_v28  ;;  %2744 = vmatprep.subr.bf16.mxu1 %v3478_v28  ;;  %v4048_v13 = vld [vmem:[#allocation2] sm:$0xff]  ;;  %v244_v28 = vshll.u32 %v3932_v24, 16  ;;  %v253_v24 = vrot.slane %v251_v22, 1  ;;  %v201_v22 = vshll.u32 %v3999_v49, 16 }
  0x1d   :  { %v4057_v18 = vrot.slane %v4048_v13, %v3914_v16  ;;  %v897_v37 = vcombine.high %v4048_v13, %v4048_v13  ;;  %v3504_v13 = vld [vmem:[%s5020_s2 + $0xf0] ss:$8 sps:$4 sm:$0xff]  }
  0x1e   :  { %v246_v53 = vrot.slane %v244_v28, 1  ;;  %v254_v62 = vor.u32 %v253_v24, %v249_v57  ;;  %v196_v28 = vrot.slane %v194_v20, 1  ;;  %v284_v57 = vshrl.u32 %v4002_v50, 16  ;;  %v3540_v20 = vld [vmem:[%s5020_s2 + $0x194] ss:$8 sps:$4 sm:$0xff]  }
  0x1f   :  { %2276 = vmatpush1.bf16.msra.mxu0 %v3480_v40  ;;  %2745 = vmatpush1.bf16.msra.mxu1 %v3480_v40  ;;  %v912_v25 = vcombine.high %v4057_v18, %v4057_v18  ;;  %v4072_v38 = vld [vmem:[#allocation2 + $0x20] sm:$0xff]  ;;  %v162_v40 = vor.u32 %v161_v27, %v157_v21  ;;  %v4119_v21 = vrot.slane %v897_v37, %v3914_v16  ;;  %v192_v27 = vshrl.u32 %v3982_v42, 16  ;;  %v3516_v42 = vld [vmem:[%s5020_s2 + $0x114] ss:$8 sps:$4 sm:$0xff]  }
  0x20   :  { %2277 = vmatprep.subr.bf16.mxu0 %v3481_v44  ;;  %2746 = vmatprep.subr.bf16.mxu1 %v3481_v44  ;;  %v173_v44 = vshll.u32 %v3965_v36, 16  ;;  %v4078_v29 = vrot.slane %v4072_v38, %v3914_v16  ;;  %v3498_v36 = vld [vmem:[%s5020_s2 + $0xd0] ss:$8 sps:$4 sm:$0xff]   ;;  %v247_v60 = vor.u32 %v246_v53, %v242_v45  ;;  %v2646_v9 = vcombine.high %v4072_v38, %v4072_v38 }
  0x21   :  { %2293 = vmatprep.mubr.bf16.mxu0 %v912_v25  ;;  %v314_v54 = vcombine.low %v155_v26, %v162_v40  ;;  %v199_v38 = vshrl.u32 %v3999_v49, 16  ;;  %v272_v40 = vshll.u32 %v3974_v39, 16  ;;  %v270_v45 = vshrl.u32 %v3974_v39, 16 }
  0x22   :  { %v175_v52 = vrot.slane %v173_v44, 1  ;;  %v348_v5 = vcombine.low %v247_v60, %v254_v62  ;;  %v4123_v25 = vrot.slane %v2646_v9, %v3914_v16  ;;  %v197_v47 = vor.u32 %v196_v28, %v192_v27  ;;  %v3528_v9 = vld [vmem:[%s5020_s2 + $0x154] ss:$8 sps:$4 sm:$0xff]   ;;  %v3544_v27 = vld [vmem:[%s5020_s2 + $0x1b0] ss:$8 sps:$4 sm:$0xff]  }
  0x23   :  { %2278 = vmatpush1.bf16.msra.mxu0 %v3483_v55  ;;  %2747 = vmatpush1.bf16.msra.mxu1 %v3483_v55  ;;  %v2661_v55 = vcombine.high %v4078_v29, %v4078_v29  ;;  %v322_v32 = vrot.slane %v314_v54, %v3914_v16  ;;  %v274_v53 = vrot.slane %v272_v40, 1  ;;  %v277_v54 = vshrl.u32 %v4006_v51, 16  ;;  %v3549_v28 = vld [vmem:[%s5020_s2 + $0x1c4] ss:$8 sps:$4 sm:$0xff]   ;;  %v3558_v40 = vld [vmem:[%s5020_s2 + $0x1f4] ss:$8 sps:$4 sm:$0xff]  }
  0x24   :  { %2279 = vmatprep.subr.bf16.mxu0 %v3484_v59  ;;  %2748 = vmatprep.subr.bf16.mxu1 %v3484_v59  ;;  %v176_v59 = vor.u32 %v175_v52, %v171_v41  ;;  %v913_v41 = vcombine.high %v4119_v21, %v4119_v21  ;;  %v2662_v49 = vcombine.high %v4123_v25, %v4123_v25  ;;  %v279_v39 = vshll.u32 %v4006_v51, 16 }
  0x25   :  { %2762 = vmatprep.mubr.bf16.mxu1 %v2661_v55  ;;  %v286_v24 = vshll.u32 %v4002_v50, 16  ;;  %v3517_v50 = vld [vmem:[%s5020_s2 + $0x120] ss:$8 sps:$4 sm:$0xff]  }
  0x26   :  { %v315_v2 = vcombine.low %v169_v48, %v176_v59  ;;  %v203_v48 = vrot.slane %v201_v22, 1  ;;  %v293_v59 = vshll.u32 %v4017_v56, 16  ;;  %v3550_v22 = vld [vmem:[%s5020_s2 + $0x1d0] ss:$8 sps:$4 sm:$0xff]  }
  0x27   :  { %2280 = vmatpush1.bf16.msra.mxu0 %v3486_v3  ;;  %2749 = vmatpush1.bf16.msra.mxu1 %v3486_v3  ;;  %v3501_v3 = vld [vmem:[%s5020_s2 + $0xe0] ss:$8 sps:$4 sm:$0xff]   ;;  %v288_v51 = vrot.slane %v286_v24, 1  ;;  %v3576_v24 = vld [vmem:[%s5020_s2 + $0x254] ss:$8 sps:$4 sm:$0xff]  }
  0x28   :  { %2281 = vmatprep.subr.bf16.mxu0 %v3487_v6  ;;  %2750 = vmatprep.subr.bf16.mxu1 %v3487_v6  ;;  %v180_v6 = vshll.u32 %v3961_v34, 16  ;;  %v204_v55 = vor.u32 %v203_v48, %v199_v38  ;;  %v295_v63 = vrot.slane %v293_v59, 1  ;;  %v3553_v38 = vld [vmem:[%s5020_s2 + $0x1e0] ss:$8 sps:$4 sm:$0xff]   ;;  %v3564_v48 = vld [vmem:[%s5020_s2 + $0x214] ss:$8 sps:$4 sm:$0xff]  }
  0x29   :  { %v289_v1 = vor.u32 %v288_v51, %v284_v57  ;;  %v3571_v57 = vld [vmem:[%s5020_s2 + $0x240] ss:$8 sps:$4 sm:$0xff]   ;;  %v3582_v59 = vld [vmem:[%s5020_s2 + $0x274] ss:$8 sps:$4 sm:$0xff]   ;;  %v3580_v51 = vld [vmem:[%s5020_s2 + $0x270] ss:$8 sps:$4 sm:$0xff]  }
  0x2a   :  { %v182_v11 = vrot.slane %v180_v6, 1  ;;  %v383_v60 = vcombine.low %v197_v47, %v204_v55  ;;  %v3520_v6 = vld [vmem:[%s5020_s2 + $0x130] ss:$8 sps:$4 sm:$0xff]   ;;  %v3559_v47 = vld [vmem:[%s5020_s2 + $0x200] ss:$8 sps:$4 sm:$0xff]  }
  0x2b   :  { %2282 = vmatpush1.bf16.msra.mxu0 %v3489_v8  ;;  %2751 = vmatpush1.bf16.msra.mxu1 %v3489_v8  ;;  %v329_v8 = vrot.slane %v315_v2, %v3914_v16  ;;  %v3573_v55 = vld [vmem:[%s5020_s2 + $0x244] ss:$8 sps:$4 sm:$0xff]  }
  0x2c   :  { %2283 = vmatprep.subr.bf16.mxu0 %v3490_v10  ;;  %2752 = vmatprep.subr.bf16.mxu1 %v3490_v10  ;;  %v178_v10 = vshrl.u32 %v3961_v34, 16  ;;  %v3510_v34 = vld [vmem:[%s5020_s2 + $0x104] ss:$8 sps:$4 sm:$0xff]  }
  0x2d   :  { %v330_v14 = vcombine.low %v322_v32, %v329_v8  ;;  %v3523_v8 = vld [vmem:[%s5020_s2 + $0x140] ss:$8 sps:$4 sm:$0xff]  }
  0x2e   :  { %v183_v26 = vor.u32 %v182_v11, %v178_v10  ;;  %v3526_v11 = vld [vmem:[%s5020_s2 + $0x150] ss:$8 sps:$4 sm:$0xff]  }
  0x2f   :  { %2284 = vmatpush1.bf16.msra.mxu0 %v3492_v12  ;;  %2753 = vmatpush1.bf16.msra.mxu1 %v3492_v12  ;;  %v185_v12 = vshrl.u32 %v3986_v43, 16  ;;  %442 = vst [vmem:[#allocation2 + $0x8] sm:$0x55] %v330_v14  ;;  %v189_v43 = vrot.slane %v187_v19, 1  ;;  %v3529_v14 = vld [vmem:[%s5020_s2 + $0x160] ss:$8 sps:$4 sm:$0xff]  }
  0x30   :  { %2285 = vmatprep.subr.bf16.mxu0 %v3493_v17  ;;  %2754 = vmatprep.subr.bf16.mxu1 %v3493_v17  ;;  %v356_v17 = vrot.slane %v348_v5, %v3914_v16  ;;  %v3537_v19 = vld [vmem:[%s5020_s2 + $0x184] ss:$8 sps:$4 sm:$0xff]  }
  0x31   :  { %v190_v35 = vor.u32 %v189_v43, %v185_v12  ;;  %v3531_v12 = vld [vmem:[%s5020_s2 + $0x164] ss:$8 sps:$4 sm:$0xff]   ;;  %v3541_v43 = vld [vmem:[%s5020_s2 + $0x1a0] ss:$8 sps:$4 sm:$0xff]  }
  0x33   :  { %2286 = vmatpush1.bf16.msra.mxu0 %v3495_v23  ;;  %2755 = vmatpush1.bf16.msra.mxu1 %v3495_v23  ;;  %v363_v23 = vrot.slane %v349_v15, %v3914_v16  ;;  %v382_v52 = vcombine.low %v183_v26, %v190_v35  ;;  %v3534_v15 = vld [vmem:[%s5020_s2 + $0x174] ss:$8 sps:$4 sm:$0xff]  }
  0x34   :  { %2287 = vmatprep.subr.bf16.mxu0 %v3496_v30  ;;  %2756 = vmatprep.subr.bf16.mxu1 %v3496_v30  ;;  %v3508_v30 = vld [vmem:[%s5020_s2 + $0x100] ss:$8 sps:$4 sm:$0xff]   ;;  %v3546_v26 = vld [vmem:[%s5020_s2 + $0x1b4] ss:$8 sps:$4 sm:$0xff]  }
  0x35   :  { %v364_v33 = vcombine.low %v356_v17, %v363_v23  ;;  %v390_v61 = vrot.slane %v382_v52, %v3914_v16  ;;  %v3532_v17 = vld [vmem:[%s5020_s2 + $0x170] ss:$8 sps:$4 sm:$0xff]   ;;  %v3543_v23 = vld [vmem:[%s5020_s2 + $0x1a4] ss:$8 sps:$4 sm:$0xff]   ;;  %v3552_v35 = vld [vmem:[%s5020_s2 + $0x1d4] ss:$8 sps:$4 sm:$0xff]  }
  0x37   :  { %2288 = vmatpush1.bf16.msra.mxu0 %v3498_v36  ;;  %2757 = vmatpush1.bf16.msra.mxu1 %v3498_v36  ;;  %v610_v44 = vrot.slane %v364_v33, 7  ;;  %444 = vst [vmem:[#allocation2 + $0x18] sm:$0x55] %v364_v33  ;;  %v3519_v36 = vld [vmem:[%s5020_s2 + $0x124] ss:$8 sps:$4 sm:$0xff]  }
  0x38   :  { %2289 = vmatprep.subr.bf16.mxu0 %v3499_v58  ;;  %2758 = vmatprep.subr.bf16.mxu1 %v3499_v58  ;;  %v291_v58 = vshrl.u32 %v4017_v56, 16  ;;  %v397_v56 = vrot.slane %v383_v60, %v3914_v16  ;;  %v3547_v33 = vld [vmem:[%s5020_s2 + $0x1c0] ss:$8 sps:$4 sm:$0xff]   ;;  %v3585_v60 = vld [vmem:[%s5020_s2 + $0x284] ss:$8 sps:$4 sm:$0xff]  }
  0x39   :  { %626 = vst [vmem:[#allocation2 + $0x8] sm:$0xaa] %v610_v44  ;;  %v3556_v44 = vld [vmem:[%s5020_s2 + $0x1f0] ss:$8 sps:$4 sm:$0xff]  }
  0x3a   :  { %v296_v2 = vor.u32 %v295_v63, %v291_v58  ;;  %v3577_v58 = vld [vmem:[%s5020_s2 + $0x260] ss:$8 sps:$4 sm:$0xff]   ;;  %v3586_v63 = vld [vmem:[%s5020_s2 + $0x290] ss:$8 sps:$4 sm:$0xff]  }
  0x3b   :  { %2290 = vmatpush1.bf16.msra.mxu0 %v3501_v3  ;;  %2759 = vmatpush1.bf16.msra.mxu1 %v3501_v3  ;;  %v398_v3 = vcombine.low %v390_v61, %v397_v56  ;;  %v3583_v61 = vld [vmem:[%s5020_s2 + $0x280] ss:$8 sps:$4 sm:$0xff]   ;;  %v3594_v56 = vld [vmem:[%s5020_s2 + $0x2b4] ss:$8 sps:$4 sm:$0xff]  }
  0x3c   :  { %2291 = vmatprep.subr.bf16.mxu0 %v3502_v31  ;;  %2760 = vmatprep.subr.bf16.mxu1 %v3502_v31  ;;  %v417_v4 = vcombine.low %v289_v1, %v296_v2  ;;  %v3525_v31 = vld [vmem:[%s5020_s2 + $0x144] ss:$8 sps:$4 sm:$0xff]   ;;  %v3136_v1 = vld [vmem:[%s5019_s1 + $0x10] sm:$0xff] }
  0x3d   :  { %446 = vst [vmem:[#allocation2 + $0x28] sm:$0x55] %v398_v3  ;;  %v451_v2 = vcombine.high %v3136_v1, %v3136_v1 }
  0x3e   :  { %v431_v37 = vrot.slane %v417_v4, %v3914_v16  ;;  %v4333_v4 = vrot.slane %v3136_v1, %v3914_v16  ;;  %v3640_v1 = vld [vmem:[%s5020_s2 + $0x3b0] ss:$8 sps:$4 sm:$0xff]  }
  0x3f   :  { %2292 = vmatpush1.bf16.msra.mxu0 %v3504_v13  ;;  %2761 = vmatpush1.bf16.msra.mxu1 %v3504_v13  ;;  %v3535_v13 = vld [vmem:[%s5020_s2 + $0x180] ss:$8 sps:$4 sm:$0xff]  }
  0x40   :  { %2302 = vmatprep.subr.bf16.mxu0 %v3510_v34  ;;  %2771 = vmatprep.subr.bf16.mxu1 %v3510_v34  ;;  %v3538_v34 = vld [vmem:[%s5020_s2 + $0x190] ss:$8 sps:$4 sm:$0xff]  }
  0x42   :  { %2294 = vmatmul.mubr.bf16.vlgmr.msra.gmra.mrb[0].mxu0 %v4057_v18  ;;  %2763 = vmatmul.mubr.bf16.vlgmr.msra.gmra.mrb[0].mxu1 %v4078_v29  ;;  %v275_v18 = vor.u32 %v274_v53, %v270_v45  ;;  %v281_v29 = vrot.slane %v279_v39, 1  ;;  %v3561_v45 = vld [vmem:[%s5020_s2 + $0x204] ss:$8 sps:$4 sm:$0xff]  }
  0x43   :  { %2303 = vmatpush1.bf16.msra.mxu0 %v3508_v30  ;;  %2772 = vmatpush1.bf16.msra.mxu1 %v3508_v30  ;;  %v3555_v30 = vld [vmem:[%s5020_s2 + $0x1e4] ss:$8 sps:$4 sm:$0xff]  }
  0x44   :  { %2304 = vmatprep.subr.bf16.mxu0 %v3516_v42  ;;  %2773 = vmatprep.subr.bf16.mxu1 %v3516_v42  ;;  %v282_v62 = vor.u32 %v281_v29, %v277_v54  ;;  %v4236_v42 = vld [vmem:[#allocation2 + $0x8] sm:$0xff]  ;;  %v3562_v54 = vld [vmem:[%s5020_s2 + $0x210] ss:$8 sps:$4 sm:$0xff]  }
  0x45   :  { %2334 = vmatprep.mubr.bf16.mxu0 %v913_v41  ;;  %2803 = vmatprep.mubr.bf16.mxu1 %v2662_v49  ;;  %v3567_v39 = vld [vmem:[%s5020_s2 + $0x224] ss:$8 sps:$4 sm:$0xff]  }
  0x46   :  { %v416_v32 = vcombine.low %v275_v18, %v282_v62  ;;  %v3574_v18 = vld [vmem:[%s5020_s2 + $0x250] ss:$8 sps:$4 sm:$0xff]   ;;  %v3579_v29 = vld [vmem:[%s5020_s2 + $0x264] ss:$8 sps:$4 sm:$0xff]   ;;  %v3588_v62 = vld [vmem:[%s5020_s2 + $0x294] ss:$8 sps:$4 sm:$0xff]  }
  0x47   :  { %2305 = vmatpush1.bf16.msra.mxu0 %v3514_v46  ;;  %2774 = vmatpush1.bf16.msra.mxu1 %v3514_v46  ;;  %v4248_v46 = vrot.slane %v4236_v42, %v3914_v16 }
  0x48   :  { %2306 = vmatprep.subr.bf16.mxu0 %v3519_v36  ;;  %2775 = vmatprep.subr.bf16.mxu1 %v3519_v36  ;;  %v424_v5 = vrot.slane %v416_v32, %v3914_v16  ;;  %v3568_v36 = vld [vmem:[%s5020_s2 + $0x230] ss:$8 sps:$4 sm:$0xff]   ;;  %v3137_v32 = vld [vmem:[%s5019_s1 + $0x28] sm:$0xff] }
  0x49   :  { %v929_v52 = vcombine.high %v4248_v46, %v4248_v46  ;;  %v468_v3 = vcombine.high %v3137_v32, %v3137_v32 }
  0x4a   :  { %v432_v7 = vcombine.low %v424_v5, %v431_v37  ;;  %v4336_v5 = vrot.slane %v451_v2, %v3914_v16  ;;  %v3643_v2 = vld [vmem:[%s5020_s2 + $0x3c0] ss:$8 sps:$4 sm:$0xff]  }
  0x4b   :  { %2307 = vmatpush1.bf16.msra.mxu0 %v3517_v50  ;;  %2776 = vmatpush1.bf16.msra.mxu1 %v3517_v50  ;;  %v3591_v50 = vld [vmem:[%s5020_s2 + $0x2a4] ss:$8 sps:$4 sm:$0xff]   ;;  %v4345_v37 = vrot.slane %v468_v3, %v3914_v16  ;;  %v3646_v3 = vld [vmem:[%s5020_s2 + $0x3d0] ss:$8 sps:$4 sm:$0xff]  }
  0x4c   :  { %2308 = vmatprep.subr.bf16.mxu0 %v3522_v0  ;;  %2777 = vmatprep.subr.bf16.mxu1 %v3522_v0  ;;  %v614_v10 = vrot.slane %v432_v7, 7  ;;  %448 = vst [vmem:[#allocation2 + $0x38] sm:$0x55] %v432_v7  ;;  %v3589_v0 = vld [vmem:[%s5020_s2 + $0x2a0] ss:$8 sps:$4 sm:$0xff]  }
  0x4d   :  { %v3597_v7 = vld [vmem:[%s5020_s2 + $0x2c4] ss:$8 sps:$4 sm:$0xff]  }
  0x4e   :  { %630 = vst [vmem:[#allocation2 + $0x28] sm:$0xaa] %v614_v10 }
  0x4f   :  { %2309 = vmatpush1.bf16.msra.mxu0 %v3520_v6  ;;  %2778 = vmatpush1.bf16.msra.mxu1 %v3520_v6  ;;  %v4339_v6 = vrot.slane %v3137_v32, %v3914_v16  ;;  %v3648_v32 = vld [vmem:[%s5020_s2 + $0x3d4] ss:$8 sps:$4 sm:$0xff]  }
  0x50   :  { %2310 = vmatprep.subr.bf16.mxu0 %v3525_v31  ;;  %2779 = vmatprep.subr.bf16.mxu1 %v3525_v31  ;;  %v3592_v31 = vld [vmem:[%s5020_s2 + $0x2b0] ss:$8 sps:$4 sm:$0xff]  }
  0x51   :  { %v4360_v10 = vcombine.high %v4339_v6, %v4339_v6 }
  0x53   :  { %2311 = vmatpush1.bf16.msra.mxu0 %v3523_v8  ;;  %2780 = vmatpush1.bf16.msra.mxu1 %v3523_v8  ;;  %v4352_v8 = vcombine.high %v4333_v4, %v4333_v4 }
  0x54   :  { %2312 = vmatprep.subr.bf16.mxu0 %v3528_v9  ;;  %2781 = vmatprep.subr.bf16.mxu1 %v3528_v9  ;;  %v4356_v9 = vcombine.high %v4336_v5, %v4336_v5 }
  0x55   :  { %v4238_v41 = vld [vmem:[#allocation2 + $0x28] sm:$0xff] }
  0x56   :  { %v4252_v49 = vrot.slane %v4238_v41, %v3914_v16 }
  0x57   :  { %2313 = vmatpush1.bf16.msra.mxu0 %v3526_v11  ;;  %2782 = vmatpush1.bf16.msra.mxu1 %v3526_v11  ;;  %v4364_v11 = vcombine.high %v4345_v37, %v4345_v37 }
  0x58   :  { %2314 = vmatprep.subr.bf16.mxu0 %v3531_v12  ;;  %2783 = vmatprep.subr.bf16.mxu1 %v3531_v12  ;;  %v2678_v53 = vcombine.high %v4252_v49, %v4252_v49  ;;  %v541_v12 = vcombine.low %v4333_v4, %v4352_v8 }
  0x5b   :  { %2315 = vmatpush1.bf16.msra.mxu0 %v3529_v14  ;;  %2784 = vmatpush1.bf16.msra.mxu1 %v3529_v14  ;;  %v542_v14 = vcombine.low %v4336_v5, %v4356_v9 }
  0x5c   :  { %2316 = vmatprep.subr.bf16.mxu0 %v3534_v15  ;;  %2785 = vmatprep.subr.bf16.mxu1 %v3534_v15  ;;  %v575_v15 = vcombine.low %v4339_v6, %v4360_v10 }
  0x5f   :  { %2317 = vmatpush1.bf16.msra.mxu0 %v3532_v17  ;;  %2786 = vmatpush1.bf16.msra.mxu1 %v3532_v17  ;;  %v3595_v17 = vld [vmem:[%s5020_s2 + $0x2c0] ss:$8 sps:$4 sm:$0xff]  }
  0x60   :  { %2318 = vmatprep.subr.bf16.mxu0 %v3537_v19  ;;  %2787 = vmatprep.subr.bf16.mxu1 %v3537_v19  ;;  %v576_v19 = vcombine.low %v4345_v37, %v4364_v11 }
  0x63   :  { %2319 = vmatpush1.bf16.msra.mxu0 %v3535_v13  ;;  %2788 = vmatpush1.bf16.msra.mxu1 %v3535_v13  ;;  %v3600_v13 = vld [vmem:[%s5020_s2 + $0x2d4] ss:$8 sps:$4 sm:$0xff]  }
  0x64   :  { %2320 = vmatprep.subr.bf16.mxu0 %v3540_v20  ;;  %2789 = vmatprep.subr.bf16.mxu1 %v3540_v20  ;;  %v549_v20 = vrot.slane %v541_v12, %v3914_v16  ;;  %v3654_v12 = vld [vmem:[%s5020_s2 + $0x3f4] ss:$8 sps:$4 sm:$0xff]  }
  0x67   :  { %2321 = vmatpush1.bf16.msra.mxu0 %v3538_v34  ;;  %2790 = vmatpush1.bf16.msra.mxu1 %v3538_v34  ;;  %v556_v34 = vrot.slane %v542_v14, %v3914_v16 }
  0x68   :  { %2322 = vmatprep.subr.bf16.mxu0 %v3543_v23  ;;  %2791 = vmatprep.subr.bf16.mxu1 %v3543_v23  ;;  %v583_v23 = vrot.slane %v575_v15, %v3914_v16 }
  0x6b   :  { %2323 = vmatpush1.bf16.msra.mxu0 %v3541_v43  ;;  %2792 = vmatpush1.bf16.msra.mxu1 %v3541_v43  ;;  %v590_v43 = vrot.slane %v576_v19, %v3914_v16  ;;  %v3658_v19 = vld [vmem:[%s5020_s2 + $0x404] ss:$8 sps:$4 sm:$0xff]  }
  0x6c   :  { %2324 = vmatprep.subr.bf16.mxu0 %v3546_v26  ;;  %2793 = vmatprep.subr.bf16.mxu1 %v3546_v26  ;;  %v557_v26 = vcombine.low %v549_v20, %v556_v34  ;;  %v3656_v34 = vld [vmem:[%s5020_s2 + $0x400] ss:$8 sps:$4 sm:$0xff]  }
  0x6f   :  { %2325 = vmatpush1.bf16.msra.mxu0 %v3544_v27  ;;  %2794 = vmatpush1.bf16.msra.mxu1 %v3544_v27  ;;  %v3598_v27 = vld [vmem:[%s5020_s2 + $0x2d0] ss:$8 sps:$4 sm:$0xff]  }
  0x70   :  { %2326 = vmatprep.subr.bf16.mxu0 %v3549_v28  ;;  %2795 = vmatprep.subr.bf16.mxu1 %v3549_v28  ;;  %v591_v28 = vcombine.low %v583_v23, %v590_v43  ;;  %v3662_v23 = vld [vmem:[%s5020_s2 + $0x414] ss:$8 sps:$4 sm:$0xff]  }
  0x73   :  { %2327 = vmatpush1.bf16.msra.mxu0 %v3547_v33  ;;  %2796 = vmatpush1.bf16.msra.mxu1 %v3547_v33  ;;  %v3603_v33 = vld [vmem:[%s5020_s2 + $0x2e4] ss:$8 sps:$4 sm:$0xff]  }
  0x74   :  { %2328 = vmatprep.subr.bf16.mxu0 %v3552_v35  ;;  %2797 = vmatprep.subr.bf16.mxu1 %v3552_v35  ;;  %v611_v35 = vrot.slane %v557_v26, 7 }
  0x76   :  { %627 = vst [vmem:[#allocation2 + $0x10] sm:$0xaa] %v611_v35  ;;  %v3668_v35 = vld [vmem:[%s5020_s2 + $0x434] ss:$8 sps:$4 sm:$0xff]  }
  0x77   :  { %2329 = vmatpush1.bf16.msra.mxu0 %v3550_v22  ;;  %2798 = vmatpush1.bf16.msra.mxu1 %v3550_v22  ;;  %v615_v22 = vrot.slane %v591_v28, 7  ;;  %v3665_v28 = vld [vmem:[%s5020_s2 + $0x424] ss:$8 sps:$4 sm:$0xff]  }
  0x78   :  { %2330 = vmatprep.subr.bf16.mxu0 %v3555_v30  ;;  %2799 = vmatprep.subr.bf16.mxu1 %v3555_v30  ;;  %v3601_v30 = vld [vmem:[%s5020_s2 + $0x2e0] ss:$8 sps:$4 sm:$0xff]  }
  0x79   :  { %631 = vst [vmem:[#allocation2 + $0x30] sm:$0xaa] %v615_v22  ;;  %v3666_v22 = vld [vmem:[%s5020_s2 + $0x430] ss:$8 sps:$4 sm:$0xff]  }
  0x7b   :  { %2331 = vmatpush1.bf16.msra.mxu0 %v3553_v38  ;;  %2800 = vmatpush1.bf16.msra.mxu1 %v3553_v38  ;;  %v3606_v38 = vld [vmem:[%s5020_s2 + $0x2f4] ss:$8 sps:$4 sm:$0xff]  }
  0x7c   :  { %2332 = vmatprep.subr.bf16.mxu0 %v3558_v40  ;;  %2801 = vmatprep.subr.bf16.mxu1 %v3558_v40  ;;  %v914_v40 = vcombine.high %v4236_v42, %v4236_v42 }
  0x7d   :  { %v4508_v14 = vld [vmem:[#allocation2 + $0x10] sm:$0xff] }
  0x7f   :  { %2333 = vmatpush1.bf16.msra.mxu0 %v3556_v44  ;;  %2802 = vmatpush1.bf16.msra.mxu1 %v3556_v44  ;;  %v2663_v44 = vcombine.high %v4238_v41, %v4238_v41  ;;  %v3607_v41 = vld [vmem:[%s5020_s2 + $0x300] ss:$8 sps:$4 sm:$0xff]  }
  0x80   :  { %2343 = vmatprep.subr.bf16.mxu0 %v3561_v45  ;;  %2812 = vmatprep.subr.bf16.mxu1 %v3561_v45  ;;  %v3604_v45 = vld [vmem:[%s5020_s2 + $0x2f0] ss:$8 sps:$4 sm:$0xff]  }
  0x81   :  { %v4410_v42 = vrot.slane %v2663_v44, %v3914_v16  ;;  %v4510_v15 = vld [vmem:[#allocation2 + $0x30] sm:$0xff] }
  0x82   :  { %2335 = vmatmul.mubr.bf16.vlgmr.msra.gmra.mrb[0].mxu0 %v4119_v21  ;;  %2804 = vmatmul.mubr.bf16.vlgmr.msra.gmra.mrb[0].mxu1 %v4123_v25  ;;  %v3565_v21 = vld [vmem:[%s5020_s2 + $0x220] ss:$8 sps:$4 sm:$0xff]   ;;  %v3570_v25 = vld [vmem:[%s5020_s2 + $0x234] ss:$8 sps:$4 sm:$0xff]   ;;  %v4524_v20 = vrot.slane %v4510_v15, %v3914_v16  ;;  %v3672_v44 = vld [vmem:[%s5020_s2 + $0x450] ss:$8 sps:$4 sm:$0xff]  }
  0x83   :  { %2344 = vmatpush1.bf16.msra.mxu0 %v3559_v47  ;;  %2813 = vmatpush1.bf16.msra.mxu1 %v3559_v47  ;;  %v3609_v47 = vld [vmem:[%s5020_s2 + $0x304] ss:$8 sps:$4 sm:$0xff]  }
  0x84   :  { %2345 = vmatprep.subr.bf16.mxu0 %v3564_v48  ;;  %2814 = vmatprep.subr.bf16.mxu1 %v3564_v48  ;;  %v4407_v48 = vrot.slane %v914_v40, %v3914_v16  ;;  %v2695_v26 = vcombine.high %v4524_v20, %v4524_v20  ;;  %v3674_v40 = vld [vmem:[%s5020_s2 + $0x454] ss:$8 sps:$4 sm:$0xff]  }
  0x85   :  { %2375 = vmatprep.mubr.bf16.mxu0 %v929_v52  ;;  %2844 = vmatprep.mubr.bf16.mxu1 %v2678_v53  ;;  %v3612_v52 = vld [vmem:[%s5020_s2 + $0x314] ss:$8 sps:$4 sm:$0xff]  }
  0x86   :  { %v930_v53 = vcombine.high %v4407_v48, %v4407_v48 }
  0x87   :  { %2346 = vmatpush1.bf16.msra.mxu0 %v3562_v54  ;;  %2815 = vmatpush1.bf16.msra.mxu1 %v3562_v54  ;;  %v2679_v54 = vcombine.high %v4410_v42, %v4410_v42 }
  0x88   :  { %2347 = vmatprep.subr.bf16.mxu0 %v3567_v39  ;;  %2816 = vmatprep.subr.bf16.mxu1 %v3567_v39  ;;  %v3610_v39 = vld [vmem:[%s5020_s2 + $0x310] ss:$8 sps:$4 sm:$0xff]  }
  0x8b   :  { %2348 = vmatpush1.bf16.msra.mxu0 %v3565_v21  ;;  %2817 = vmatpush1.bf16.msra.mxu1 %v3565_v21  ;;  %v3615_v21 = vld [vmem:[%s5020_s2 + $0x324] ss:$8 sps:$4 sm:$0xff]  }
  0x8c   :  { %2349 = vmatprep.subr.bf16.mxu0 %v3570_v25  ;;  %2818 = vmatprep.subr.bf16.mxu1 %v3570_v25  ;;  %v3616_v25 = vld [vmem:[%s5020_s2 + $0x330] ss:$8 sps:$4 sm:$0xff]  }
  0x8f   :  { %2350 = vmatpush1.bf16.msra.mxu0 %v3568_v36  ;;  %2819 = vmatpush1.bf16.msra.mxu1 %v3568_v36  ;;  %v3621_v36 = vld [vmem:[%s5020_s2 + $0x344] ss:$8 sps:$4 sm:$0xff]  }
  0x90   :  { %2351 = vmatprep.subr.bf16.mxu0 %v3573_v55  ;;  %2820 = vmatprep.subr.bf16.mxu1 %v3573_v55  ;;  %v3619_v55 = vld [vmem:[%s5020_s2 + $0x340] ss:$8 sps:$4 sm:$0xff]  }
  0x93   :  { %2352 = vmatpush1.bf16.msra.mxu0 %v3571_v57  ;;  %2821 = vmatpush1.bf16.msra.mxu1 %v3571_v57  ;;  %v3624_v57 = vld [vmem:[%s5020_s2 + $0x354] ss:$8 sps:$4 sm:$0xff]  }
  0x94   :  { %2353 = vmatprep.subr.bf16.mxu0 %v3576_v24  ;;  %2822 = vmatprep.subr.bf16.mxu1 %v3576_v24  ;;  %v3622_v24 = vld [vmem:[%s5020_s2 + $0x350] ss:$8 sps:$4 sm:$0xff]  }
  0x97   :  { %2354 = vmatpush1.bf16.msra.mxu0 %v3574_v18  ;;  %2823 = vmatpush1.bf16.msra.mxu1 %v3574_v18  ;;  %v3627_v18 = vld [vmem:[%s5020_s2 + $0x364] ss:$8 sps:$4 sm:$0xff]  }
  0x98   :  { %2355 = vmatprep.subr.bf16.mxu0 %v3579_v29  ;;  %2824 = vmatprep.subr.bf16.mxu1 %v3579_v29  ;;  %v3625_v29 = vld [vmem:[%s5020_s2 + $0x360] ss:$8 sps:$4 sm:$0xff]  }
  0x9b   :  { %2356 = vmatpush1.bf16.msra.mxu0 %v3577_v58  ;;  %2825 = vmatpush1.bf16.msra.mxu1 %v3577_v58  ;;  %v3630_v58 = vld [vmem:[%s5020_s2 + $0x374] ss:$8 sps:$4 sm:$0xff]  }
  0x9c   :  { %2357 = vmatprep.subr.bf16.mxu0 %v3582_v59  ;;  %2826 = vmatprep.subr.bf16.mxu1 %v3582_v59  ;;  %v3628_v59 = vld [vmem:[%s5020_s2 + $0x370] ss:$8 sps:$4 sm:$0xff]  }
  0x9f   :  { %2358 = vmatpush1.bf16.msra.mxu0 %v3580_v51  ;;  %2827 = vmatpush1.bf16.msra.mxu1 %v3580_v51  ;;  %v3633_v51 = vld [vmem:[%s5020_s2 + $0x384] ss:$8 sps:$4 sm:$0xff]  }
  0xa0   :  { %2359 = vmatprep.subr.bf16.mxu0 %v3585_v60  ;;  %2828 = vmatprep.subr.bf16.mxu1 %v3585_v60  ;;  %v3631_v60 = vld [vmem:[%s5020_s2 + $0x380] ss:$8 sps:$4 sm:$0xff]  }
  0xa3   :  { %2360 = vmatpush1.bf16.msra.mxu0 %v3583_v61  ;;  %2829 = vmatpush1.bf16.msra.mxu1 %v3583_v61  ;;  %v3636_v61 = vld [vmem:[%s5020_s2 + $0x394] ss:$8 sps:$4 sm:$0xff]  }
  0xa4   :  { %2361 = vmatprep.subr.bf16.mxu0 %v3588_v62  ;;  %2830 = vmatprep.subr.bf16.mxu1 %v3588_v62  ;;  %v3634_v62 = vld [vmem:[%s5020_s2 + $0x390] ss:$8 sps:$4 sm:$0xff]  }
  0xa7   :  { %2362 = vmatpush1.bf16.msra.mxu0 %v3586_v63  ;;  %2831 = vmatpush1.bf16.msra.mxu1 %v3586_v63  ;;  %v3639_v63 = vld [vmem:[%s5020_s2 + $0x3a4] ss:$8 sps:$4 sm:$0xff]  }
  0xa8   :  { %2363 = vmatprep.subr.bf16.mxu0 %v3591_v50  ;;  %2832 = vmatprep.subr.bf16.mxu1 %v3591_v50  ;;  %v3637_v50 = vld [vmem:[%s5020_s2 + $0x3a0] ss:$8 sps:$4 sm:$0xff]  }
  0xab   :  { %2364 = vmatpush1.bf16.msra.mxu0 %v3589_v0  ;;  %2833 = vmatpush1.bf16.msra.mxu1 %v3589_v0  ;;  %v3642_v0 = vld [vmem:[%s5020_s2 + $0x3b4] ss:$8 sps:$4 sm:$0xff]  }
  0xac   :  { %2365 = vmatprep.subr.bf16.mxu0 %v3594_v56  ;;  %2834 = vmatprep.subr.bf16.mxu1 %v3594_v56  ;;  %v3645_v56 = vld [vmem:[%s5020_s2 + $0x3c4] ss:$8 sps:$4 sm:$0xff]  }
  0xaf   :  { %2366 = vmatpush1.bf16.msra.mxu0 %v3592_v31  ;;  %2835 = vmatpush1.bf16.msra.mxu1 %v3592_v31  ;;  %v3651_v31 = vld [vmem:[%s5020_s2 + $0x3e4] ss:$8 sps:$4 sm:$0xff]  }
  0xb0   :  { %2367 = vmatprep.subr.bf16.mxu0 %v3597_v7  ;;  %2836 = vmatprep.subr.bf16.mxu1 %v3597_v7  ;;  %v3649_v7 = vld [vmem:[%s5020_s2 + $0x3e0] ss:$8 sps:$4 sm:$0xff]  }
  0xb3   :  { %2368 = vmatpush1.bf16.msra.mxu0 %v3595_v17  ;;  %2837 = vmatpush1.bf16.msra.mxu1 %v3595_v17  ;;  %v3652_v17 = vld [vmem:[%s5020_s2 + $0x3f0] ss:$8 sps:$4 sm:$0xff]  }
  0xb4   :  { %2369 = vmatprep.subr.bf16.mxu0 %v3600_v13  ;;  %2838 = vmatprep.subr.bf16.mxu1 %v3600_v13  ;;  %v4520_v13 = vrot.slane %v4508_v14, %v3914_v16 }
  0xb6   :  { %v946_v43 = vcombine.high %v4520_v13, %v4520_v13 }
  0xb7   :  { %2370 = vmatpush1.bf16.msra.mxu0 %v3598_v27  ;;  %2839 = vmatpush1.bf16.msra.mxu1 %v3598_v27  ;;  %v3660_v27 = vld [vmem:[%s5020_s2 + $0x410] ss:$8 sps:$4 sm:$0xff]  }
  0xb8   :  { %2371 = vmatprep.subr.bf16.mxu0 %v3603_v33  ;;  %2840 = vmatprep.subr.bf16.mxu1 %v3603_v33  ;;  %v3663_v33 = vld [vmem:[%s5020_s2 + $0x420] ss:$8 sps:$4 sm:$0xff]  }
  0xbb   :  { %2372 = vmatpush1.bf16.msra.mxu0 %v3601_v30  ;;  %2841 = vmatpush1.bf16.msra.mxu1 %v3601_v30  ;;  %v3671_v30 = vld [vmem:[%s5020_s2 + $0x444] ss:$8 sps:$4 sm:$0xff]  }
  0xbc   :  { %2373 = vmatprep.subr.bf16.mxu0 %v3606_v38  ;;  %2842 = vmatprep.subr.bf16.mxu1 %v3606_v38  ;;  %v3669_v38 = vld [vmem:[%s5020_s2 + $0x440] ss:$8 sps:$4 sm:$0xff]  }
  0xbf   :  { %2374 = vmatpush1.bf16.msra.mxu0 %v3604_v45  ;;  %2843 = vmatpush1.bf16.msra.mxu1 %v3604_v45  ;;  %v3677_v45 = vld [vmem:[%s5020_s2 + $0x464] ss:$8 sps:$4 sm:$0xff]  }
  0xc0   :  { %2384 = vmatprep.subr.bf16.mxu0 %v3609_v47  ;;  %2853 = vmatprep.subr.bf16.mxu1 %v3609_v47  ;;  %v3675_v47 = vld [vmem:[%s5020_s2 + $0x460] ss:$8 sps:$4 sm:$0xff]  }
  0xc2   :  { %2376 = vmatmul.mubr.bf16.vlgmr.msra.gmra.mrb[0].mxu0 %v4248_v46  ;;  %2845 = vmatmul.mubr.bf16.vlgmr.msra.gmra.mrb[0].mxu1 %v4252_v49  ;;  %v3613_v46 = vld [vmem:[%s5020_s2 + $0x320] ss:$8 sps:$4 sm:$0xff]   ;;  %v3618_v49 = vld [vmem:[%s5020_s2 + $0x334] ss:$8 sps:$4 sm:$0xff]  }
  0xc3   :  { %2385 = vmatpush1.bf16.msra.mxu0 %v3607_v41  ;;  %2854 = vmatpush1.bf16.msra.mxu1 %v3607_v41  ;;  %v3683_v41 = vld [vmem:[%s5020_s2 + $0x484] ss:$8 sps:$4 sm:$0xff]  }
  0xc4   :  { %2386 = vmatprep.subr.bf16.mxu0 %v3612_v52  ;;  %2855 = vmatprep.subr.bf16.mxu1 %v3612_v52  ;;  %v3681_v52 = vld [vmem:[%s5020_s2 + $0x480] ss:$8 sps:$4 sm:$0xff]  }
  0xc5   :  { %2416 = vmatprep.mubr.bf16.mxu0 %v930_v53  ;;  %2885 = vmatprep.mubr.bf16.mxu1 %v2679_v54  ;;  %v3686_v53 = vld [vmem:[%s5020_s2 + $0x494] ss:$8 sps:$4 sm:$0xff]   ;;  %v3684_v54 = vld [vmem:[%s5020_s2 + $0x490] ss:$8 sps:$4 sm:$0xff]  }
  0xc7   :  { %2387 = vmatpush1.bf16.msra.mxu0 %v3610_v39  ;;  %2856 = vmatpush1.bf16.msra.mxu1 %v3610_v39  ;;  %v3689_v39 = vld [vmem:[%s5020_s2 + $0x4a4] ss:$8 sps:$4 sm:$0xff]  }
  0xc8   :  { %2388 = vmatprep.subr.bf16.mxu0 %v3615_v21  ;;  %2857 = vmatprep.subr.bf16.mxu1 %v3615_v21  ;;  %v3687_v21 = vld [vmem:[%s5020_s2 + $0x4a0] ss:$8 sps:$4 sm:$0xff]  }
  0xcb   :  { %2389 = vmatpush1.bf16.msra.mxu0 %v3613_v46  ;;  %2858 = vmatpush1.bf16.msra.mxu1 %v3613_v46  ;;  %v3692_v46 = vld [vmem:[%s5020_s2 + $0x4b4] ss:$8 sps:$4 sm:$0xff]  }
  0xcc   :  { %2390 = vmatprep.subr.bf16.mxu0 %v3618_v49  ;;  %2859 = vmatprep.subr.bf16.mxu1 %v3618_v49  ;;  %v488_v49 = vshll.u32 %v4333_v4, 16 }
  0xcf   :  { %2391 = vmatpush1.bf16.msra.mxu0 %v3616_v25  ;;  %2860 = vmatpush1.bf16.msra.mxu1 %v3616_v25  ;;  %v495_v25 = vshll.u32 %v4352_v8, 16 }
  0xd0   :  { %2392 = vmatprep.subr.bf16.mxu0 %v3621_v36  ;;  %2861 = vmatprep.subr.bf16.mxu1 %v3621_v36  ;;  %v502_v36 = vshll.u32 %v4336_v5, 16 }
  0xd3   :  { %2393 = vmatpush1.bf16.msra.mxu0 %v3619_v55  ;;  %2862 = vmatpush1.bf16.msra.mxu1 %v3619_v55  ;;  %v509_v55 = vshll.u32 %v4356_v9, 16 }
  0xd4   :  { %2394 = vmatprep.subr.bf16.mxu0 %v3624_v57  ;;  %2863 = vmatprep.subr.bf16.mxu1 %v3624_v57  ;;  %v516_v57 = vshll.u32 %v4339_v6, 16 }
  0xd7   :  { %2395 = vmatpush1.bf16.msra.mxu0 %v3622_v24  ;;  %2864 = vmatpush1.bf16.msra.mxu1 %v3622_v24  ;;  %v523_v24 = vshll.u32 %v4360_v10, 16 }
  0xd8   :  { %2396 = vmatprep.subr.bf16.mxu0 %v3627_v18  ;;  %2865 = vmatprep.subr.bf16.mxu1 %v3627_v18  ;;  %v486_v18 = vshrl.u32 %v4333_v4, 16  ;;  %v3695_v4 = vld [vmem:[%s5020_s2 + $0x4c4] ss:$8 sps:$4 sm:$0xff]  }
  0xdb   :  { %2397 = vmatpush1.bf16.msra.mxu0 %v3625_v29  ;;  %2866 = vmatpush1.bf16.msra.mxu1 %v3625_v29  ;;  %v490_v29 = vrot.slane %v488_v49, 1 }
  0xdc   :  { %2398 = vmatprep.subr.bf16.mxu0 %v3630_v58  ;;  %2867 = vmatprep.subr.bf16.mxu1 %v3630_v58  ;;  %v493_v58 = vshrl.u32 %v4352_v8, 16 }
  0xdd   :  { %v491_v8 = vor.u32 %v490_v29, %v486_v18  ;;  %v3724_v18 = vld [vmem:[%s5020_s2 + $0x554] ss:$8 sps:$4 sm:$0xff]   ;;  %v3722_v29 = vld [vmem:[%s5020_s2 + $0x550] ss:$8 sps:$4 sm:$0xff]  }
  0xdf   :  { %2399 = vmatpush1.bf16.msra.mxu0 %v3628_v59  ;;  %2868 = vmatpush1.bf16.msra.mxu1 %v3628_v59  ;;  %v497_v59 = vrot.slane %v495_v25, 1  ;;  %v3710_v25 = vld [vmem:[%s5020_s2 + $0x510] ss:$8 sps:$4 sm:$0xff]  }
  0xe0   :  { %2400 = vmatprep.subr.bf16.mxu0 %v3633_v51  ;;  %2869 = vmatprep.subr.bf16.mxu1 %v3633_v51  ;;  %v3690_v51 = vld [vmem:[%s5020_s2 + $0x4b0] ss:$8 sps:$4 sm:$0xff]  }
  0xe3   :  { %2401 = vmatpush1.bf16.msra.mxu0 %v3631_v60  ;;  %2870 = vmatpush1.bf16.msra.mxu1 %v3631_v60  ;;  %v500_v60 = vshrl.u32 %v4336_v5, 16  ;;  %v518_v5 = vrot.slane %v516_v57, 1  ;;  %v3721_v57 = vld [vmem:[%s5020_s2 + $0x544] ss:$8 sps:$4 sm:$0xff]  }
  0xe4   :  { %2402 = vmatprep.subr.bf16.mxu0 %v3636_v61  ;;  %2871 = vmatprep.subr.bf16.mxu1 %v3636_v61  ;;  %v504_v61 = vrot.slane %v502_v36, 1  ;;  %v3715_v36 = vld [vmem:[%s5020_s2 + $0x524] ss:$8 sps:$4 sm:$0xff]  }
  0xe7   :  { %2403 = vmatpush1.bf16.msra.mxu0 %v3634_v62  ;;  %2872 = vmatpush1.bf16.msra.mxu1 %v3634_v62  ;;  %v530_v62 = vshll.u32 %v4345_v37, 16 }
  0xe8   :  { %2404 = vmatprep.subr.bf16.mxu0 %v3639_v63  ;;  %2873 = vmatprep.subr.bf16.mxu1 %v3639_v63  ;;  %v537_v63 = vshll.u32 %v4364_v11, 16 }
  0xeb   :  { %2405 = vmatpush1.bf16.msra.mxu0 %v3637_v50  ;;  %2874 = vmatpush1.bf16.msra.mxu1 %v3637_v50  ;;  %v498_v50 = vor.u32 %v497_v59, %v493_v58  ;;  %v3727_v58 = vld [vmem:[%s5020_s2 + $0x564] ss:$8 sps:$4 sm:$0xff]   ;;  %v3725_v59 = vld [vmem:[%s5020_s2 + $0x560] ss:$8 sps:$4 sm:$0xff]  }
  0xec   :  { %2406 = vmatprep.subr.bf16.mxu0 %v3642_v0  ;;  %2875 = vmatprep.subr.bf16.mxu1 %v3642_v0  ;;  %v507_v0 = vshrl.u32 %v4356_v9, 16  ;;  %v532_v9 = vrot.slane %v530_v62, 1  ;;  %v3731_v62 = vld [vmem:[%s5020_s2 + $0x580] ss:$8 sps:$4 sm:$0xff]  }
  0xef   :  { %2407 = vmatpush1.bf16.msra.mxu0 %v3640_v1  ;;  %2876 = vmatpush1.bf16.msra.mxu1 %v3640_v1  ;;  %v511_v1 = vrot.slane %v509_v55, 1  ;;  %v3716_v55 = vld [vmem:[%s5020_s2 + $0x530] ss:$8 sps:$4 sm:$0xff]  }
  0xf0   :  { %2408 = vmatprep.subr.bf16.mxu0 %v3645_v56  ;;  %2877 = vmatprep.subr.bf16.mxu1 %v3645_v56  ;;  %v505_v56 = vor.u32 %v504_v61, %v500_v60  ;;  %v3728_v60 = vld [vmem:[%s5020_s2 + $0x570] ss:$8 sps:$4 sm:$0xff]   ;;  %v3733_v61 = vld [vmem:[%s5020_s2 + $0x584] ss:$8 sps:$4 sm:$0xff]  }
  0xf3   :  { %2409 = vmatpush1.bf16.msra.mxu0 %v3643_v2  ;;  %2878 = vmatpush1.bf16.msra.mxu1 %v3643_v2  ;;  %v514_v2 = vshrl.u32 %v4339_v6, 16  ;;  %v3698_v6 = vld [vmem:[%s5020_s2 + $0x4d4] ss:$8 sps:$4 sm:$0xff]  }
  0xf4   :  { %2410 = vmatprep.subr.bf16.mxu0 %v3648_v32  ;;  %2879 = vmatprep.subr.bf16.mxu1 %v3648_v32  ;;  %v521_v32 = vshrl.u32 %v4360_v10, 16 }
  0xf7   :  { %2411 = vmatpush1.bf16.msra.mxu0 %v3646_v3  ;;  %2880 = vmatpush1.bf16.msra.mxu1 %v3646_v3  ;;  %v512_v3 = vor.u32 %v511_v1, %v507_v0  ;;  %v3742_v0 = vld [vmem:[%s5020_s2 + $0x5b4] ss:$8 sps:$4 sm:$0xff]   ;;  %v3740_v1 = vld [vmem:[%s5020_s2 + $0x5b0] ss:$8 sps:$4 sm:$0xff]  }
  0xf8   :  { %2412 = vmatprep.subr.bf16.mxu0 %v3651_v31  ;;  %2881 = vmatprep.subr.bf16.mxu1 %v3651_v31  ;;  %v558_v31 = vcombine.low %v491_v8, %v498_v50  ;;  %v3739_v8 = vld [vmem:[%s5020_s2 + $0x5a4] ss:$8 sps:$4 sm:$0xff]   ;;  %v3737_v50 = vld [vmem:[%s5020_s2 + $0x5a0] ss:$8 sps:$4 sm:$0xff]  }
  0xf9   :  { %v559_v10 = vcombine.low %v505_v56, %v512_v3  ;;  %v3745_v56 = vld [vmem:[%s5020_s2 + $0x5c4] ss:$8 sps:$4 sm:$0xff]  }
  0xfa   :  { %v3751_v3 = vld [vmem:[%s5020_s2 + $0x5e4] ss:$8 sps:$4 sm:$0xff]  }
  0xfb   :  { %2413 = vmatpush1.bf16.msra.mxu0 %v3649_v7  ;;  %2882 = vmatpush1.bf16.msra.mxu1 %v3649_v7  ;;  %v525_v7 = vrot.slane %v523_v24, 1  ;;  %v3719_v24 = vld [vmem:[%s5020_s2 + $0x540] ss:$8 sps:$4 sm:$0xff]  }
  0xfc   :  { %2414 = vmatprep.subr.bf16.mxu0 %v3654_v12  ;;  %2883 = vmatprep.subr.bf16.mxu1 %v3654_v12  ;;  %v528_v12 = vshrl.u32 %v4345_v37, 16 }
  0xfd   :  { %v526_v37 = vor.u32 %v525_v7, %v521_v32  ;;  %v3746_v32 = vld [vmem:[%s5020_s2 + $0x5d0] ss:$8 sps:$4 sm:$0xff]   ;;  %v3754_v7 = vld [vmem:[%s5020_s2 + $0x5f4] ss:$8 sps:$4 sm:$0xff]  }
  0xff   :  { %2415 = vmatpush1.bf16.msra.mxu0 %v3652_v17  ;;  %2884 = vmatpush1.bf16.msra.mxu1 %v3652_v17  ;;  %v3693_v17 = vld [vmem:[%s5020_s2 + $0x4c0] ss:$8 sps:$4 sm:$0xff]  }
 0x100   :  { %2425 = vmatprep.subr.bf16.mxu0 %v3658_v19  ;;  %2894 = vmatprep.subr.bf16.mxu1 %v3658_v19  ;;  %v519_v19 = vor.u32 %v518_v5, %v514_v2  ;;  %v3743_v2 = vld [vmem:[%s5020_s2 + $0x5c0] ss:$8 sps:$4 sm:$0xff]   ;;  %v3748_v5 = vld [vmem:[%s5020_s2 + $0x5d4] ss:$8 sps:$4 sm:$0xff]  }
 0x102   :  { %2417 = vmatmul.mubr.bf16.vlgmr.msra.gmra.mrb[0].mxu0 %v4407_v48  ;;  %2886 = vmatmul.mubr.bf16.vlgmr.msra.gmra.mrb[0].mxu1 %v4410_v42  ;;  %v3680_v48 = vld [vmem:[%s5020_s2 + $0x474] ss:$8 sps:$4 sm:$0xff]   ;;  %v3678_v42 = vld [vmem:[%s5020_s2 + $0x470] ss:$8 sps:$4 sm:$0xff]  }
 0x103   :  { %2426 = vmatpush1.bf16.msra.mxu0 %v3656_v34  ;;  %2895 = vmatpush1.bf16.msra.mxu1 %v3656_v34  ;;  %v535_v34 = vshrl.u32 %v4364_v11, 16  ;;  %v3696_v11 = vld [vmem:[%s5020_s2 + $0x4d0] ss:$8 sps:$4 sm:$0xff]  }
 0x104   :  { %2427 = vmatprep.subr.bf16.mxu0 %v3662_v23  ;;  %2896 = vmatprep.subr.bf16.mxu1 %v3662_v23  ;;  %v566_v23 = vrot.slane %v558_v31, %v3914_v16  ;;  %v3749_v31 = vld [vmem:[%s5020_s2 + $0x5e0] ss:$8 sps:$4 sm:$0xff]  }
 0x105   :  { %2457 = vmatprep.mubr.bf16.mxu0 %v946_v43  ;;  %2926 = vmatprep.mubr.bf16.mxu1 %v2695_v26  ;;  %v539_v43 = vrot.slane %v537_v63, 1  ;;  %v533_v26 = vor.u32 %v532_v9, %v528_v12  ;;  %v3736_v63 = vld [vmem:[%s5020_s2 + $0x594] ss:$8 sps:$4 sm:$0xff]   ;;  %v3758_v9 = vld [vmem:[%s5020_s2 + $0x604] ss:$8 sps:$4 sm:$0xff]  }
 0x107   :  { %2428 = vmatpush1.bf16.msra.mxu0 %v3660_v27  ;;  %2897 = vmatpush1.bf16.msra.mxu1 %v3660_v27  ;;  %v573_v27 = vrot.slane %v559_v10, %v3914_v16  ;;  %v3756_v10 = vld [vmem:[%s5020_s2 + $0x600] ss:$8 sps:$4 sm:$0xff]  }
 0x108   :  { %2429 = vmatprep.subr.bf16.mxu0 %v3665_v28  ;;  %2898 = vmatprep.subr.bf16.mxu1 %v3665_v28  ;;  %v540_v28 = vor.u32 %v539_v43, %v535_v34 }
 0x10b   :  { %2430 = vmatpush1.bf16.msra.mxu0 %v3663_v33  ;;  %2899 = vmatpush1.bf16.msra.mxu1 %v3663_v33  ;;  %v592_v33 = vcombine.low %v519_v19, %v526_v37  ;;  %v3752_v19 = vld [vmem:[%s5020_s2 + $0x5f0] ss:$8 sps:$4 sm:$0xff]  }
 0x10c   :  { %2431 = vmatprep.subr.bf16.mxu0 %v3668_v35  ;;  %2900 = vmatprep.subr.bf16.mxu1 %v3668_v35  ;;  %v3701_v35 = vld [vmem:[%s5020_s2 + $0x4e4] ss:$8 sps:$4 sm:$0xff]  }
 0x10f   :  { %2432 = vmatpush1.bf16.msra.mxu0 %v3666_v22  ;;  %2901 = vmatpush1.bf16.msra.mxu1 %v3666_v22  ;;  %v574_v22 = vcombine.low %v566_v23, %v573_v27  ;;  %v3762_v23 = vld [vmem:[%s5020_s2 + $0x614] ss:$8 sps:$4 sm:$0xff]   ;;  %v3765_v27 = vld [vmem:[%s5020_s2 + $0x624] ss:$8 sps:$4 sm:$0xff]  }
 0x110   :  { %2433 = vmatprep.subr.bf16.mxu0 %v3671_v30  ;;  %2902 = vmatprep.subr.bf16.mxu1 %v3671_v30  ;;  %v593_v30 = vcombine.low %v533_v26, %v540_v28  ;;  %v3760_v26 = vld [vmem:[%s5020_s2 + $0x610] ss:$8 sps:$4 sm:$0xff]   ;;  %v3763_v28 = vld [vmem:[%s5020_s2 + $0x620] ss:$8 sps:$4 sm:$0xff]  }
 0x113   :  { %2434 = vmatpush1.bf16.msra.mxu0 %v3669_v38  ;;  %2903 = vmatpush1.bf16.msra.mxu1 %v3669_v38  ;;  %v600_v38 = vrot.slane %v592_v33, %v3914_v16  ;;  %v3768_v33 = vld [vmem:[%s5020_s2 + $0x634] ss:$8 sps:$4 sm:$0xff]  }
 0x114   :  { %2435 = vmatprep.subr.bf16.mxu0 %v3674_v40  ;;  %2904 = vmatprep.subr.bf16.mxu1 %v3674_v40  ;;  %v612_v40 = vrot.slane %v574_v22, 7  ;;  %v3769_v22 = vld [vmem:[%s5020_s2 + $0x640] ss:$8 sps:$4 sm:$0xff]  }
 0x116   :  { %628 = vst [vmem:[#allocation2 + $0x18] sm:$0xaa] %v612_v40  ;;  %v3777_v40 = vld [vmem:[%s5020_s2 + $0x664] ss:$8 sps:$4 sm:$0xff]  }
 0x117   :  { %2436 = vmatpush1.bf16.msra.mxu0 %v3672_v44  ;;  %2905 = vmatpush1.bf16.msra.mxu1 %v3672_v44  ;;  %v607_v44 = vrot.slane %v593_v30, %v3914_v16  ;;  %v3774_v30 = vld [vmem:[%s5020_s2 + $0x654] ss:$8 sps:$4 sm:$0xff]  }
 0x118   :  { %2437 = vmatprep.subr.bf16.mxu0 %v3677_v45  ;;  %2906 = vmatprep.subr.bf16.mxu1 %v3677_v45  ;;  %v3699_v45 = vld [vmem:[%s5020_s2 + $0x4e0] ss:$8 sps:$4 sm:$0xff]  }
 0x11b   :  { %2438 = vmatpush1.bf16.msra.mxu0 %v3675_v47  ;;  %2907 = vmatpush1.bf16.msra.mxu1 %v3675_v47  ;;  %v3704_v47 = vld [vmem:[%s5020_s2 + $0x4f4] ss:$8 sps:$4 sm:$0xff]  }
 0x11c   :  { %2439 = vmatprep.subr.bf16.mxu0 %v3680_v48  ;;  %2908 = vmatprep.subr.bf16.mxu1 %v3680_v48  ;;  %v608_v48 = vcombine.low %v600_v38, %v607_v44  ;;  %v3772_v38 = vld [vmem:[%s5020_s2 + $0x650] ss:$8 sps:$4 sm:$0xff]   ;;  %v3775_v44 = vld [vmem:[%s5020_s2 + $0x660] ss:$8 sps:$4 sm:$0xff]  }
 0x11d   :  { %v4754_v12 = vld [vmem:[#allocation2 + $0x18] sm:$0xff] }
 0x11e   :  { %v4766_v34 = vrot.slane %v4754_v12, %v3914_v16 }
 0x11f   :  { %2440 = vmatpush1.bf16.msra.mxu0 %v3678_v42  ;;  %2909 = vmatpush1.bf16.msra.mxu1 %v3678_v42  ;;  %v931_v42 = vcombine.high %v4508_v14, %v4508_v14 }
 0x120   :  { %2441 = vmatprep.subr.bf16.mxu0 %v3683_v41  ;;  %2910 = vmatprep.subr.bf16.mxu1 %v3683_v41  ;;  %v2680_v41 = vcombine.high %v4510_v15, %v4510_v15  ;;  %v3706_v15 = vld [vmem:[%s5020_s2 + $0x500] ss:$8 sps:$4 sm:$0xff]   ;;  %v963_v37 = vcombine.high %v4766_v34, %v4766_v34 }
 0x122   :  { %v4656_v14 = vrot.slane %v2680_v41, %v3914_v16  ;;  %v3786_v41 = vld [vmem:[%s5020_s2 + $0x694] ss:$8 sps:$4 sm:$0xff]  }
 0x123   :  { %2442 = vmatpush1.bf16.msra.mxu0 %v3681_v52  ;;  %2911 = vmatpush1.bf16.msra.mxu1 %v3681_v52  ;;  %v616_v52 = vrot.slane %v608_v48, 7  ;;  %v3783_v48 = vld [vmem:[%s5020_s2 + $0x684] ss:$8 sps:$4 sm:$0xff]  }
 0x124   :  { %2443 = vmatprep.subr.bf16.mxu0 %v3686_v53  ;;  %2912 = vmatprep.subr.bf16.mxu1 %v3686_v53  ;;  %v3702_v53 = vld [vmem:[%s5020_s2 + $0x4f0] ss:$8 sps:$4 sm:$0xff]   ;;  %v2696_v49 = vcombine.high %v4656_v14, %v4656_v14 }
 0x125   :  { %632 = vst [vmem:[#allocation2 + $0x38] sm:$0xaa] %v616_v52  ;;  %v3784_v52 = vld [vmem:[%s5020_s2 + $0x690] ss:$8 sps:$4 sm:$0xff]  }
 0x127   :  { %2444 = vmatpush1.bf16.msra.mxu0 %v3684_v54  ;;  %2913 = vmatpush1.bf16.msra.mxu1 %v3684_v54  ;;  %v3708_v54 = vld [vmem:[%s5020_s2 + $0x504] ss:$8 sps:$4 sm:$0xff]  }
 0x128   :  { %2445 = vmatprep.subr.bf16.mxu0 %v3689_v39  ;;  %2914 = vmatprep.subr.bf16.mxu1 %v3689_v39  ;;  %v4653_v39 = vrot.slane %v931_v42, %v3914_v16  ;;  %v3781_v42 = vld [vmem:[%s5020_s2 + $0x680] ss:$8 sps:$4 sm:$0xff]  }
 0x12b   :  { %2446 = vmatpush1.bf16.msra.mxu0 %v3687_v21  ;;  %2915 = vmatpush1.bf16.msra.mxu1 %v3687_v21  ;;  %v3712_v21 = vld [vmem:[%s5020_s2 + $0x514] ss:$8 sps:$4 sm:$0xff]  }
 0x12c   :  { %2447 = vmatprep.subr.bf16.mxu0 %v3692_v46  ;;  %2916 = vmatprep.subr.bf16.mxu1 %v3692_v46  ;;  %v947_v46 = vcombine.high %v4653_v39, %v4653_v39 }
 0x12f   :  { %2448 = vmatpush1.bf16.msra.mxu0 %v3690_v51  ;;  %2917 = vmatpush1.bf16.msra.mxu1 %v3690_v51  ;;  %v3730_v51 = vld [vmem:[%s5020_s2 + $0x574] ss:$8 sps:$4 sm:$0xff]  }
 0x130   :  { %2449 = vmatprep.subr.bf16.mxu0 %v3695_v4  ;;  %2918 = vmatprep.subr.bf16.mxu1 %v3695_v4  ;;  %v3734_v4 = vld [vmem:[%s5020_s2 + $0x590] ss:$8 sps:$4 sm:$0xff]  }
 0x133   :  { %2450 = vmatpush1.bf16.msra.mxu0 %v3693_v17  ;;  %2919 = vmatpush1.bf16.msra.mxu1 %v3693_v17  ;;  %v4756_v17 = vld [vmem:[#allocation2 + $0x38] sm:$0xff] }
 0x134   :  { %2451 = vmatprep.subr.bf16.mxu0 %v3698_v6  ;;  %2920 = vmatprep.subr.bf16.mxu1 %v3698_v6  ;;  %v4770_v6 = vrot.slane %v4756_v17, %v3914_v16 }
 0x136   :  { %v2712_v43 = vcombine.high %v4770_v6, %v4770_v6 }
 0x137   :  { %2452 = vmatpush1.bf16.msra.mxu0 %v3696_v11  ;;  %2921 = vmatpush1.bf16.msra.mxu1 %v3696_v11  ;;  %v3766_v11 = vld [vmem:[%s5020_s2 + $0x630] ss:$8 sps:$4 sm:$0xff]  }
 0x138   :  { %2453 = vmatprep.subr.bf16.mxu0 %v3701_v35  ;;  %2922 = vmatprep.subr.bf16.mxu1 %v3701_v35  ;;  %v3771_v35 = vld [vmem:[%s5020_s2 + $0x644] ss:$8 sps:$4 sm:$0xff]  }
 0x13b   :  { %2454 = vmatpush1.bf16.msra.mxu0 %v3699_v45  ;;  %2923 = vmatpush1.bf16.msra.mxu1 %v3699_v45  ;;  %v3780_v45 = vld [vmem:[%s5020_s2 + $0x674] ss:$8 sps:$4 sm:$0xff]  }
 0x13c   :  { %2455 = vmatprep.subr.bf16.mxu0 %v3704_v47  ;;  %2924 = vmatprep.subr.bf16.mxu1 %v3704_v47  ;;  %v3778_v47 = vld [vmem:[%s5020_s2 + $0x670] ss:$8 sps:$4 sm:$0xff]  }
 0x13f   :  { %2456 = vmatpush1.bf16.msra.mxu0 %v3702_v53  ;;  %2925 = vmatpush1.bf16.msra.mxu1 %v3702_v53  ;;  %v3789_v53 = vld [vmem:[%s5020_s2 + $0x6a4] ss:$8 sps:$4 sm:$0xff]  }
 0x140   :  { %2466 = vmatprep.subr.bf16.mxu0 %v3708_v54  ;;  %2935 = vmatprep.subr.bf16.mxu1 %v3708_v54  ;;  %v3787_v54 = vld [vmem:[%s5020_s2 + $0x6a0] ss:$8 sps:$4 sm:$0xff]  }
 0x142   :  { %2458 = vmatmul.mubr.bf16.vlgmr.msra.gmra.mrb[0].mxu0 %v4520_v13  ;;  %2927 = vmatmul.mubr.bf16.vlgmr.msra.gmra.mrb[0].mxu1 %v4524_v20  ;;  %v3713_v13 = vld [vmem:[%s5020_s2 + $0x520] ss:$8 sps:$4 sm:$0xff]   ;;  %v3718_v20 = vld [vmem:[%s5020_s2 + $0x534] ss:$8 sps:$4 sm:$0xff]  }
 0x143   :  { %2467 = vmatpush1.bf16.msra.mxu0 %v3706_v15  ;;  %2936 = vmatpush1.bf16.msra.mxu1 %v3706_v15  ;;  %v3795_v15 = vld [vmem:[%s5020_s2 + $0x6c4] ss:$8 sps:$4 sm:$0xff]  }
 0x144   :  { %2468 = vmatprep.subr.bf16.mxu0 %v3712_v21  ;;  %2937 = vmatprep.subr.bf16.mxu1 %v3712_v21  ;;  %v3793_v21 = vld [vmem:[%s5020_s2 + $0x6c0] ss:$8 sps:$4 sm:$0xff]  }
 0x145   :  { %2498 = vmatprep.mubr.bf16.mxu0 %v947_v46  ;;  %2967 = vmatprep.mubr.bf16.mxu1 %v2696_v49  ;;  %v3798_v46 = vld [vmem:[%s5020_s2 + $0x6d4] ss:$8 sps:$4 sm:$0xff]   ;;  %v3796_v49 = vld [vmem:[%s5020_s2 + $0x6d0] ss:$8 sps:$4 sm:$0xff]  }
 0x147   :  { %2469 = vmatpush1.bf16.msra.mxu0 %v3710_v25  ;;  %2938 = vmatpush1.bf16.msra.mxu1 %v3710_v25  ;;  %v3801_v25 = vld [vmem:[%s5020_s2 + $0x6e4] ss:$8 sps:$4 sm:$0xff]  }
 0x148   :  { %2470 = vmatprep.subr.bf16.mxu0 %v3715_v36  ;;  %2939 = vmatprep.subr.bf16.mxu1 %v3715_v36  ;;  %v3799_v36 = vld [vmem:[%s5020_s2 + $0x6e0] ss:$8 sps:$4 sm:$0xff]  }
 0x14b   :  { %2471 = vmatpush1.bf16.msra.mxu0 %v3713_v13  ;;  %2940 = vmatpush1.bf16.msra.mxu1 %v3713_v13  ;;  %v3804_v13 = vld [vmem:[%s5020_s2 + $0x6f4] ss:$8 sps:$4 sm:$0xff]  }
 0x14c   :  { %2472 = vmatprep.subr.bf16.mxu0 %v3718_v20  ;;  %2941 = vmatprep.subr.bf16.mxu1 %v3718_v20  ;;  %v948_v20 = vcombine.high %v4754_v12, %v4754_v12  ;;  %v3832_v12 = vld [vmem:[%s5020_s2 + $0x790] ss:$8 sps:$4 sm:$0xff]  }
 0x14f   :  { %2473 = vmatpush1.bf16.msra.mxu0 %v3716_v55  ;;  %2942 = vmatpush1.bf16.msra.mxu1 %v3716_v55  ;;  %v2697_v55 = vcombine.high %v4756_v17, %v4756_v17  ;;  %v3837_v17 = vld [vmem:[%s5020_s2 + $0x7a4] ss:$8 sps:$4 sm:$0xff]  }
 0x150   :  { %2474 = vmatprep.subr.bf16.mxu0 %v3721_v57  ;;  %2943 = vmatprep.subr.bf16.mxu1 %v3721_v57  ;;  %v3802_v57 = vld [vmem:[%s5020_s2 + $0x6f0] ss:$8 sps:$4 sm:$0xff]  }
 0x153   :  { %2475 = vmatpush1.bf16.msra.mxu0 %v3719_v24  ;;  %2944 = vmatpush1.bf16.msra.mxu1 %v3719_v24  ;;  %v3807_v24 = vld [vmem:[%s5020_s2 + $0x704] ss:$8 sps:$4 sm:$0xff]  }
 0x154   :  { %2476 = vmatprep.subr.bf16.mxu0 %v3724_v18  ;;  %2945 = vmatprep.subr.bf16.mxu1 %v3724_v18  ;;  %v4879_v18 = vrot.slane %v948_v20, %v3914_v16 }
 0x157   :  { %2477 = vmatpush1.bf16.msra.mxu0 %v3722_v29  ;;  %2946 = vmatpush1.bf16.msra.mxu1 %v3722_v29  ;;  %v4882_v29 = vrot.slane %v2697_v55, %v3914_v16  ;;  %v3808_v16 = vld [vmem:[%s5020_s2 + $0x710] ss:$8 sps:$4 sm:$0xff]  }
 0x158   :  { %2478 = vmatprep.subr.bf16.mxu0 %v3727_v58  ;;  %2947 = vmatprep.subr.bf16.mxu1 %v3727_v58  ;;  %v3805_v58 = vld [vmem:[%s5020_s2 + $0x700] ss:$8 sps:$4 sm:$0xff]  }
 0x15b   :  { %2479 = vmatpush1.bf16.msra.mxu0 %v3725_v59  ;;  %2948 = vmatpush1.bf16.msra.mxu1 %v3725_v59  ;;  %v3810_v59 = vld [vmem:[%s5020_s2 + $0x714] ss:$8 sps:$4 sm:$0xff]  }
 0x15c   :  { %2480 = vmatprep.subr.bf16.mxu0 %v3730_v51  ;;  %2949 = vmatprep.subr.bf16.mxu1 %v3730_v51  ;;  %v964_v51 = vcombine.high %v4879_v18, %v4879_v18 }
 0x15f   :  { %2481 = vmatpush1.bf16.msra.mxu0 %v3728_v60  ;;  %2950 = vmatpush1.bf16.msra.mxu1 %v3728_v60  ;;  %v2713_v60 = vcombine.high %v4882_v29, %v4882_v29 }
 0x160   :  { %2482 = vmatprep.subr.bf16.mxu0 %v3733_v61  ;;  %2951 = vmatprep.subr.bf16.mxu1 %v3733_v61  ;;  %v3813_v61 = vld [vmem:[%s5020_s2 + $0x724] ss:$8 sps:$4 sm:$0xff]  }
 0x163   :  { %2483 = vmatpush1.bf16.msra.mxu0 %v3731_v62  ;;  %2952 = vmatpush1.bf16.msra.mxu1 %v3731_v62  ;;  %v3811_v62 = vld [vmem:[%s5020_s2 + $0x720] ss:$8 sps:$4 sm:$0xff]  }
 0x164   :  { %2484 = vmatprep.subr.bf16.mxu0 %v3736_v63  ;;  %2953 = vmatprep.subr.bf16.mxu1 %v3736_v63  ;;  %v3816_v63 = vld [vmem:[%s5020_s2 + $0x734] ss:$8 sps:$4 sm:$0xff]  }
 0x167   :  { %2485 = vmatpush1.bf16.msra.mxu0 %v3734_v4  ;;  %2954 = vmatpush1.bf16.msra.mxu1 %v3734_v4  ;;  %v3814_v4 = vld [vmem:[%s5020_s2 + $0x730] ss:$8 sps:$4 sm:$0xff]  }
 0x168   :  { %2486 = vmatprep.subr.bf16.mxu0 %v3739_v8  ;;  %2955 = vmatprep.subr.bf16.mxu1 %v3739_v8  ;;  %v3819_v8 = vld [vmem:[%s5020_s2 + $0x744] ss:$8 sps:$4 sm:$0xff]  }
 0x16b   :  { %2487 = vmatpush1.bf16.msra.mxu0 %v3737_v50  ;;  %2956 = vmatpush1.bf16.msra.mxu1 %v3737_v50  ;;  %v3817_v50 = vld [vmem:[%s5020_s2 + $0x740] ss:$8 sps:$4 sm:$0xff]  }
 0x16c   :  { %2488 = vmatprep.subr.bf16.mxu0 %v3742_v0  ;;  %2957 = vmatprep.subr.bf16.mxu1 %v3742_v0  ;;  %v3822_v0 = vld [vmem:[%s5020_s2 + $0x754] ss:$8 sps:$4 sm:$0xff]  }
 0x16f   :  { %2489 = vmatpush1.bf16.msra.mxu0 %v3740_v1  ;;  %2958 = vmatpush1.bf16.msra.mxu1 %v3740_v1  ;;  %v3820_v1 = vld [vmem:[%s5020_s2 + $0x750] ss:$8 sps:$4 sm:$0xff]  }
 0x170   :  { %2490 = vmatprep.subr.bf16.mxu0 %v3745_v56  ;;  %2959 = vmatprep.subr.bf16.mxu1 %v3745_v56  ;;  %v3825_v56 = vld [vmem:[%s5020_s2 + $0x764] ss:$8 sps:$4 sm:$0xff]  }
 0x173   :  { %2491 = vmatpush1.bf16.msra.mxu0 %v3743_v2  ;;  %2960 = vmatpush1.bf16.msra.mxu1 %v3743_v2  ;;  %v3823_v2 = vld [vmem:[%s5020_s2 + $0x760] ss:$8 sps:$4 sm:$0xff]  }
 0x174   :  { %2492 = vmatprep.subr.bf16.mxu0 %v3748_v5  ;;  %2961 = vmatprep.subr.bf16.mxu1 %v3748_v5  ;;  %v3828_v5 = vld [vmem:[%s5020_s2 + $0x774] ss:$8 sps:$4 sm:$0xff]  }
 0x177   :  { %2493 = vmatpush1.bf16.msra.mxu0 %v3746_v32  ;;  %2962 = vmatpush1.bf16.msra.mxu1 %v3746_v32  ;;  %v3826_v32 = vld [vmem:[%s5020_s2 + $0x770] ss:$8 sps:$4 sm:$0xff]  }
 0x178   :  { %2494 = vmatprep.subr.bf16.mxu0 %v3751_v3  ;;  %2963 = vmatprep.subr.bf16.mxu1 %v3751_v3  ;;  %v3831_v3 = vld [vmem:[%s5020_s2 + $0x784] ss:$8 sps:$4 sm:$0xff]  }
 0x17b   :  { %2495 = vmatpush1.bf16.msra.mxu0 %v3749_v31  ;;  %2964 = vmatpush1.bf16.msra.mxu1 %v3749_v31  ;;  %v3829_v31 = vld [vmem:[%s5020_s2 + $0x780] ss:$8 sps:$4 sm:$0xff]  }
 0x17c   :  { %2496 = vmatprep.subr.bf16.mxu0 %v3754_v7  ;;  %2965 = vmatprep.subr.bf16.mxu1 %v3754_v7  ;;  %v3834_v7 = vld [vmem:[%s5020_s2 + $0x794] ss:$8 sps:$4 sm:$0xff]  }
 0x17f   :  { %2497 = vmatpush1.bf16.msra.mxu0 %v3752_v19  ;;  %2966 = vmatpush1.bf16.msra.mxu1 %v3752_v19  ;;  %v3835_v19 = vld [vmem:[%s5020_s2 + $0x7a0] ss:$8 sps:$4 sm:$0xff]  }
 0x180   :  { %2507 = vmatprep.subr.bf16.mxu0 %v3758_v9  ;;  %2976 = vmatprep.subr.bf16.mxu1 %v3758_v9  ;;  %v3840_v9 = vld [vmem:[%s5020_s2 + $0x7b4] ss:$8 sps:$4 sm:$0xff]  }
 0x182   :  { %2499 = vmatmul.mubr.bf16.vlgmr.msra.gmra.mrb[0].mxu0 %v4653_v39  ;;  %2968 = vmatmul.mubr.bf16.vlgmr.msra.gmra.mrb[0].mxu1 %v4656_v14  ;;  %v3792_v39 = vld [vmem:[%s5020_s2 + $0x6b4] ss:$8 sps:$4 sm:$0xff]   ;;  %v3790_v14 = vld [vmem:[%s5020_s2 + $0x6b0] ss:$8 sps:$4 sm:$0xff]  }
 0x183   :  { %2508 = vmatpush1.bf16.msra.mxu0 %v3756_v10  ;;  %2977 = vmatpush1.bf16.msra.mxu1 %v3756_v10  ;;  %v3841_v10 = vld [vmem:[%s5020_s2 + $0x7c0] ss:$8 sps:$4 sm:$0xff]  }
 0x184   :  { %2509 = vmatprep.subr.bf16.mxu0 %v3762_v23  ;;  %2978 = vmatprep.subr.bf16.mxu1 %v3762_v23  ;;  %v3846_v23 = vld [vmem:[%s5020_s2 + $0x7d4] ss:$8 sps:$4 sm:$0xff]  }
 0x185   :  { %2539 = vmatprep.mubr.bf16.mxu0 %v963_v37  ;;  %3008 = vmatprep.mubr.bf16.mxu1 %v2712_v43  ;;  %v3844_v37 = vld [vmem:[%s5020_s2 + $0x7d0] ss:$8 sps:$4 sm:$0xff]   ;;  %v3849_v43 = vld [vmem:[%s5020_s2 + $0x7e4] ss:$8 sps:$4 sm:$0xff]  }
 0x187   :  { %2510 = vmatpush1.bf16.msra.mxu0 %v3760_v26  ;;  %2979 = vmatpush1.bf16.msra.mxu1 %v3760_v26  ;;  %v3847_v26 = vld [vmem:[%s5020_s2 + $0x7e0] ss:$8 sps:$4 sm:$0xff]  }
 0x188   :  { %2511 = vmatprep.subr.bf16.mxu0 %v3765_v27  ;;  %2980 = vmatprep.subr.bf16.mxu1 %v3765_v27  ;;  %v3852_v27 = vld [vmem:[%s5020_s2 + $0x7f4] ss:$8 sps:$4 sm:$0xff]  }
 0x18b   :  { %2512 = vmatpush1.bf16.msra.mxu0 %v3763_v28  ;;  %2981 = vmatpush1.bf16.msra.mxu1 %v3763_v28  ;;  %v3850_v28 = vld [vmem:[%s5020_s2 + $0x7f0] ss:$8 sps:$4 sm:$0xff]  }
 0x18c   :  { %2513 = vmatprep.subr.bf16.mxu0 %v3768_v33  ;;  %2982 = vmatprep.subr.bf16.mxu1 %v3768_v33 }
 0x18f   :  { %2514 = vmatpush1.bf16.msra.mxu0 %v3766_v11  ;;  %2983 = vmatpush1.bf16.msra.mxu1 %v3766_v11 }
 0x190   :  { %2515 = vmatprep.subr.bf16.mxu0 %v3771_v35  ;;  %2984 = vmatprep.subr.bf16.mxu1 %v3771_v35 }
 0x193   :  { %2516 = vmatpush1.bf16.msra.mxu0 %v3769_v22  ;;  %2985 = vmatpush1.bf16.msra.mxu1 %v3769_v22 }
 0x194   :  { %2517 = vmatprep.subr.bf16.mxu0 %v3774_v30  ;;  %2986 = vmatprep.subr.bf16.mxu1 %v3774_v30 }
 0x197   :  { %2518 = vmatpush1.bf16.msra.mxu0 %v3772_v38  ;;  %2987 = vmatpush1.bf16.msra.mxu1 %v3772_v38 }
 0x198   :  { %2519 = vmatprep.subr.bf16.mxu0 %v3777_v40  ;;  %2988 = vmatprep.subr.bf16.mxu1 %v3777_v40 }
 0x19b   :  { %2520 = vmatpush1.bf16.msra.mxu0 %v3775_v44  ;;  %2989 = vmatpush1.bf16.msra.mxu1 %v3775_v44 }
 0x19c   :  { %2521 = vmatprep.subr.bf16.mxu0 %v3780_v45  ;;  %2990 = vmatprep.subr.bf16.mxu1 %v3780_v45 }
 0x19f   :  { %2522 = vmatpush1.bf16.msra.mxu0 %v3778_v47  ;;  %2991 = vmatpush1.bf16.msra.mxu1 %v3778_v47 }
 0x1a0   :  { %2523 = vmatprep.subr.bf16.mxu0 %v3783_v48  ;;  %2992 = vmatprep.subr.bf16.mxu1 %v3783_v48 }
 0x1a3   :  { %2524 = vmatpush1.bf16.msra.mxu0 %v3781_v42  ;;  %2993 = vmatpush1.bf16.msra.mxu1 %v3781_v42 }
 0x1a4   :  { %2525 = vmatprep.subr.bf16.mxu0 %v3786_v41  ;;  %2994 = vmatprep.subr.bf16.mxu1 %v3786_v41 }
 0x1a7   :  { %2526 = vmatpush1.bf16.msra.mxu0 %v3784_v52  ;;  %2995 = vmatpush1.bf16.msra.mxu1 %v3784_v52 }
 0x1a8   :  { %2527 = vmatprep.subr.bf16.mxu0 %v3789_v53  ;;  %2996 = vmatprep.subr.bf16.mxu1 %v3789_v53 }
 0x1ab   :  { %2528 = vmatpush1.bf16.msra.mxu0 %v3787_v54  ;;  %2997 = vmatpush1.bf16.msra.mxu1 %v3787_v54 }
 0x1ac   :  { %2529 = vmatprep.subr.bf16.mxu0 %v3792_v39  ;;  %2998 = vmatprep.subr.bf16.mxu1 %v3792_v39 }
 0x1af   :  { %2530 = vmatpush1.bf16.msra.mxu0 %v3790_v14  ;;  %2999 = vmatpush1.bf16.msra.mxu1 %v3790_v14 }
 0x1b0   :  { %2531 = vmatprep.subr.bf16.mxu0 %v3795_v15  ;;  %3000 = vmatprep.subr.bf16.mxu1 %v3795_v15 }
 0x1b3   :  { %2532 = vmatpush1.bf16.msra.mxu0 %v3793_v21  ;;  %3001 = vmatpush1.bf16.msra.mxu1 %v3793_v21 }
 0x1b4   :  { %2533 = vmatprep.subr.bf16.mxu0 %v3798_v46  ;;  %3002 = vmatprep.subr.bf16.mxu1 %v3798_v46 }
 0x1b7   :  { %2534 = vmatpush1.bf16.msra.mxu0 %v3796_v49  ;;  %3003 = vmatpush1.bf16.msra.mxu1 %v3796_v49 }
 0x1b8   :  { %2535 = vmatprep.subr.bf16.mxu0 %v3801_v25  ;;  %3004 = vmatprep.subr.bf16.mxu1 %v3801_v25 }
 0x1bb   :  { %2536 = vmatpush1.bf16.msra.mxu0 %v3799_v36  ;;  %3005 = vmatpush1.bf16.msra.mxu1 %v3799_v36 }
 0x1bc   :  { %2537 = vmatprep.subr.bf16.mxu0 %v3804_v13  ;;  %3006 = vmatprep.subr.bf16.mxu1 %v3804_v13 }
 0x1bf   :  { %2538 = vmatpush1.bf16.msra.mxu0 %v3802_v57  ;;  %3007 = vmatpush1.bf16.msra.mxu1 %v3802_v57 }
 0x1c0   :  { %2548 = vmatprep.subr.bf16.mxu0 %v3807_v24  ;;  %3017 = vmatprep.subr.bf16.mxu1 %v3807_v24 }
 0x1c2   :  { %2540 = vmatmul.mubr.bf16.vlgmr.msra.gmra.mrb[0].mxu0 %v4766_v34  ;;  %3009 = vmatmul.mubr.bf16.vlgmr.msra.gmra.mrb[0].mxu1 %v4770_v6  ;;  %v3838_v34 = vld [vmem:[%s5020_s2 + $0x7b0] ss:$8 sps:$4 sm:$0xff]   ;;  %v3843_v6 = vld [vmem:[%s5020_s2 + $0x7c4] ss:$8 sps:$4 sm:$0xff]  }
 0x1c3   :  { %2549 = vmatpush1.bf16.msra.mxu0 %v3805_v58  ;;  %3018 = vmatpush1.bf16.msra.mxu1 %v3805_v58 }
 0x1c4   :  { %2550 = vmatprep.subr.bf16.mxu0 %v3810_v59  ;;  %3019 = vmatprep.subr.bf16.mxu1 %v3810_v59 }
 0x1c5   :  { %2580 = vmatprep.mubr.bf16.mxu0 %v964_v51  ;;  %3049 = vmatprep.mubr.bf16.mxu1 %v2713_v60 }
 0x1c7   :  { %2551 = vmatpush1.bf16.msra.mxu0 %v3808_v16  ;;  %3020 = vmatpush1.bf16.msra.mxu1 %v3808_v16 }
 0x1c8   :  { %2552 = vmatprep.subr.bf16.mxu0 %v3813_v61  ;;  %3021 = vmatprep.subr.bf16.mxu1 %v3813_v61 }
 0x1cb   :  { %2553 = vmatpush1.bf16.msra.mxu0 %v3811_v62  ;;  %3022 = vmatpush1.bf16.msra.mxu1 %v3811_v62 }
 0x1cc   :  { %2554 = vmatprep.subr.bf16.mxu0 %v3816_v63  ;;  %3023 = vmatprep.subr.bf16.mxu1 %v3816_v63 }
 0x1cf   :  { %2555 = vmatpush1.bf16.msra.mxu0 %v3814_v4  ;;  %3024 = vmatpush1.bf16.msra.mxu1 %v3814_v4 }
 0x1d0   :  { %2556 = vmatprep.subr.bf16.mxu0 %v3819_v8  ;;  %3025 = vmatprep.subr.bf16.mxu1 %v3819_v8 }
 0x1d3   :  { %2557 = vmatpush1.bf16.msra.mxu0 %v3817_v50  ;;  %3026 = vmatpush1.bf16.msra.mxu1 %v3817_v50 }
 0x1d4   :  { %2558 = vmatprep.subr.bf16.mxu0 %v3822_v0  ;;  %3027 = vmatprep.subr.bf16.mxu1 %v3822_v0 }
 0x1d7   :  { %2559 = vmatpush1.bf16.msra.mxu0 %v3820_v1  ;;  %3028 = vmatpush1.bf16.msra.mxu1 %v3820_v1 }
 0x1d8   :  { %2560 = vmatprep.subr.bf16.mxu0 %v3825_v56  ;;  %3029 = vmatprep.subr.bf16.mxu1 %v3825_v56 }
 0x1db   :  { %2561 = vmatpush1.bf16.msra.mxu0 %v3823_v2  ;;  %3030 = vmatpush1.bf16.msra.mxu1 %v3823_v2 }
 0x1dc   :  { %2562 = vmatprep.subr.bf16.mxu0 %v3828_v5  ;;  %3031 = vmatprep.subr.bf16.mxu1 %v3828_v5 }
 0x1df   :  { %2563 = vmatpush1.bf16.msra.mxu0 %v3826_v32  ;;  %3032 = vmatpush1.bf16.msra.mxu1 %v3826_v32 }
 0x1e0   :  { %2564 = vmatprep.subr.bf16.mxu0 %v3831_v3  ;;  %3033 = vmatprep.subr.bf16.mxu1 %v3831_v3 }
 0x1e3   :  { %2565 = vmatpush1.bf16.msra.mxu0 %v3829_v31  ;;  %3034 = vmatpush1.bf16.msra.mxu1 %v3829_v31 }
 0x1e4   :  { %2566 = vmatprep.subr.bf16.mxu0 %v3834_v7  ;;  %3035 = vmatprep.subr.bf16.mxu1 %v3834_v7 }
 0x1e7   :  { %2567 = vmatpush1.bf16.msra.mxu0 %v3832_v12  ;;  %3036 = vmatpush1.bf16.msra.mxu1 %v3832_v12 }
 0x1e8   :  { %2568 = vmatprep.subr.bf16.mxu0 %v3837_v17  ;;  %3037 = vmatprep.subr.bf16.mxu1 %v3837_v17 }
 0x1eb   :  { %2569 = vmatpush1.bf16.msra.mxu0 %v3835_v19  ;;  %3038 = vmatpush1.bf16.msra.mxu1 %v3835_v19 }
 0x1ec   :  { %2570 = vmatprep.subr.bf16.mxu0 %v3840_v9  ;;  %3039 = vmatprep.subr.bf16.mxu1 %v3840_v9 }
 0x1ef   :  { %2571 = vmatpush1.bf16.msra.mxu0 %v3838_v34  ;;  %3040 = vmatpush1.bf16.msra.mxu1 %v3838_v34 }
 0x1f0   :  { %2572 = vmatprep.subr.bf16.mxu0 %v3843_v6  ;;  %3041 = vmatprep.subr.bf16.mxu1 %v3843_v6 }
 0x1f3   :  { %2573 = vmatpush1.bf16.msra.mxu0 %v3841_v10  ;;  %3042 = vmatpush1.bf16.msra.mxu1 %v3841_v10 }
 0x1f4   :  { %2574 = vmatprep.subr.bf16.mxu0 %v3846_v23  ;;  %3043 = vmatprep.subr.bf16.mxu1 %v3846_v23 }
 0x1f7   :  { %2575 = vmatpush1.bf16.msra.mxu0 %v3844_v37  ;;  %3044 = vmatpush1.bf16.msra.mxu1 %v3844_v37 }
 0x1f8   :  { %2576 = vmatprep.subr.bf16.mxu0 %v3849_v43  ;;  %3045 = vmatprep.subr.bf16.mxu1 %v3849_v43 }
 0x1fb   :  { %2577 = vmatpush1.bf16.msra.mxu0 %v3847_v26  ;;  %3046 = vmatpush1.bf16.msra.mxu1 %v3847_v26 }
 0x1fc   :  { %2578 = vmatprep.subr.bf16.mxu0 %v3852_v27  ;;  %3047 = vmatprep.subr.bf16.mxu1 %v3852_v27 }
 0x1ff   :  { %2579 = vmatpush1.bf16.msra.mxu0 %v3850_v28  ;;  %3048 = vmatpush1.bf16.msra.mxu1 %v3850_v28 }
 0x202   :  { %2581 = vmatmul.mubr.bf16.vlgmr.msra.gmra.mrb[0].mxu0 %v4879_v18  ;;  %3050 = vmatmul.mubr.bf16.vlgmr.msra.gmra.mrb[0].mxu1 %v4882_v29 }
 0x2d5   :  { %v2582_v33 = vpop.f32.mrb[0].mxu0  ;;  %v4985_v11 = vpop.f32.mrb[0].mxu1 }
 0x2d6   :  { %v2590_v35 = vsel %vm2589_vm0, %v2582_v33, 0.0  ;;  %v2604_v22 = vmul.f32 %v2582_v33, %v2582_v33  ;;  %v3058_v30 = vsel %vm2589_vm0, %v4985_v11, 0.0  ;;  %v3072_v38 = vmul.f32 %v4985_v11, %v4985_v11  ;;  %v2584_v40 = vpop.f32.mrb[1].mxu0  ;;  %v4992_v44 = vpop.f32.mrb[1].mxu1 }
 0x2d7   :  { %v2591_v45 = vrot.slane %v2590_v35, 4  ;;  %v3059_v47 = vrot.slane %v3058_v30, 4  ;;  %v2597_v48 = vsel %vm2589_vm0, %v2584_v40, 0.0  ;;  %v2605_v42 = vmul.f32 %v2584_v40, %v2584_v40  ;;  %v2586_v41 = vpop.f32.mrb[2].mxu0  ;;  %v3055_v52 = vpop.f32.mrb[2].mxu1 }
 0x2d8   :  { %v2606_v53 = vsel %vm2589_vm0, %v2604_v22, 0.0  ;;  %v3074_v54 = vsel %vm2589_vm0, %v3072_v38, 0.0  ;;  %v2598_v39 = vrot.slane %v2597_v48, 4  ;;  %v3394_v14 = vpack.c.bf16 %v2584_v40, %v2582_v33  ;;  %v2587_v15 = vpop.f32.mrb[3].mxu0  ;;  %v3056_v21 = vpop.f32.mrb[3].mxu1 }
 0x2d9   :  { %v2592_v46 = vadd.f32 %v2591_v45, %v2590_v35  ;;  %v2607_v49 = vrot.slane %v2606_v53, 4  ;;  %v3060_v25 = vadd.f32 %v3059_v47, %v3058_v30  ;;  %v3075_v36 = vrot.slane %v3074_v54, 4 }
 0x2da   :  { %v2599_v13 = vadd.f32 %v2598_v39, %v2597_v48  ;;  %v2613_v20 = vsel %vm2589_vm0, %v2605_v42, 0.0  ;;  %3395 = vst.sshfl [vmem:[%s5021_s3] sm:$0x33 pattern:$0x76325410] %v3394_v14  ;;  %v3065_v55 = vsel %vm2589_vm0, %v4992_v44, 0.0  ;;  %v3073_v57 = vmul.f32 %v4992_v44, %v4992_v44 }
 0x2db   :  { %v2593_v24 = vrot.slane %v2592_v46, 2  ;;  %v2608_v18 = vadd.f32 %v2607_v49, %v2606_v53  ;;  %v3061_v29 = vrot.slane %v3060_v25, 2  ;;  %v3076_v58 = vadd.f32 %v3075_v36, %v3074_v54 }
 0x2dc   :  { %v2600_v59 = vrot.slane %v2599_v13, 2  ;;  %v2614_v51 = vrot.slane %v2613_v20, 4  ;;  %v3066_v60 = vrot.slane %v3065_v55, 4  ;;  %v3081_v16 = vsel %vm2589_vm0, %v3073_v57, 0.0 }
 0x2dd   :  { %v2594_v61 = vadd.f32 %v2593_v24, %v2592_v46  ;;  %v2609_v62 = vrot.slane %v2608_v18, 2  ;;  %v3062_v63 = vadd.f32 %v3061_v29, %v3060_v25  ;;  %v3077_v4 = vrot.slane %v3076_v58, 2 }
 0x2de   :  { %v2601_v8 = vadd.f32 %v2600_v59, %v2599_v13  ;;  %v2615_v50 = vadd.f32 %v2614_v51, %v2613_v20  ;;  %v3067_v0 = vadd.f32 %v3066_v60, %v3065_v55  ;;  %v3082_v1 = vrot.slane %v3081_v16, 4 }
 0x2df   :  { %v2595_v56 = vrot.slane %v2594_v61, 1  ;;  %v2610_v2 = vadd.f32 %v2609_v62, %v2608_v18  ;;  %v3063_v5 = vrot.slane %v3062_v63, 1  ;;  %v3078_v32 = vadd.f32 %v3077_v4, %v3076_v58 }
 0x2e0   :  { %v2616_v3 = vrot.slane %v2615_v50, 2  ;;  %v3068_v31 = vrot.slane %v3067_v0, 2  ;;  %v3083_v7 = vadd.f32 %v3082_v1, %v3081_v16  ;;  %v2602_v19 = vrot.slane %v2601_v8, 1 }
 0x2e1   :  { %v2611_v12 = vrot.slane %v2610_v2, 1  ;;  %v3079_v17 = vrot.slane %v3078_v32, 1  ;;  %v2596_v9 = vadd.f32 %v2595_v56, %v2594_v61  ;;  %v3064_v37 = vadd.f32 %v3063_v5, %v3062_v63 }
 0x2e2   :  { %v2617_v34 = vadd.f32 %v2616_v3, %v2615_v50  ;;  %v3069_v6 = vadd.f32 %v3068_v31, %v3067_v0  ;;  %v3084_v10 = vrot.slane %v3083_v7, 2  ;;  %v3396_v26 = vpack.c.bf16 %v4992_v44, %v4985_v11 }
 0x2e3   :  { %v2612_v23 = vadd.f32 %v2611_v12, %v2610_v2  ;;  %v3080_v43 = vadd.f32 %v3079_v17, %v3078_v32  ;;  %v2603_v38 = vadd.f32 %v2602_v19, %v2601_v8 }
 0x2e4   :  { %v2618_v27 = vrot.slane %v2617_v34, 1  ;;  %v3070_v28 = vrot.slane %v3069_v6, 1  ;;  %v3085_v33 = vadd.f32 %v3084_v10, %v3083_v7  ;;  %3399 = vst.sshfl [vmem:[%s5021_s3 + $0x4] sm:$0x33 pattern:$0x76325410] %v3396_v26 }
 0x2e5   :  { %v2621_v35 = vsel %vm2620_vm1, %v2596_v9, %v2612_v23  ;;  %v3088_v22 = vsel %vm2620_vm1, %v3064_v37, %v3080_v43 }
 0x2e6   :  { %v3090_v30 = vadd.f32 %v3088_v22, %v2621_v35  ;;  %v2619_v40 = vadd.f32 %v2618_v27, %v2617_v34  ;;  %v3086_v45 = vrot.slane %v3085_v33, 1  ;;  %v3071_v48 = vadd.f32 %v3070_v28, %v3069_v6 }
 0x2e8   :  { %v2622_v47 = vsel %vm2620_vm1, %v2603_v38, %v2619_v40  ;;  %v3087_v42 = vadd.f32 %v3086_v45, %v3085_v33 }
 0x2ea   :  { %v3089_v11 = vsel %vm2620_vm1, %v3071_v48, %v3087_v42 }
 0x2eb   :  { %v3091_v44 = vadd.f32 %v3089_v11, %v2622_v47 }
 0x2ed   :  { %v3109_v41 = vcombine.low %v3090_v30, %v3091_v44 }
 0x2ef   :  { %3398 = vst.sshfl [vmem:[%s5022_s4] sm:$0x33 pattern:$0x76325410] %v3109_v41 }

// kernel: discriminator_forward.7
= control target key start
LH: loop header
LB: loop body
LE: loop exit
PB: predicated region body
PF: predicated region fallthrough
CT: control target
= control target key end

     0   :  { %v105_v28 = vlaneseq  ;;  %vm795_vm0 = vcmask 1040384   ;;  %vm798_vm1 = vcmask 1041409   ;;  %vm796_vm2 = vsmask.f32 256  ;;  %s8099_s0 = inlined_call_operand.vmem [shape: bf16[2,2,2,1024], index: 0, kind: input, shape index: {}, may-alias: {0,1}]   ;;  %s8100_s1 = inlined_call_operand.vmem [shape: bf16[2,2,2,1024], index: 1, kind: input, shape index: {}, may-alias: {0,1}]   ;;  %s8101_s2 = inlined_call_operand.vmem [shape: bf16[4096,128], index: 2, kind: input, shape index: {}]   ;;  %s8102_s3 = inlined_call_operand.vmem [shape: f32[2,1,128], index: 3, kind: output, shape index: {}]  }
   0x1   :  { %v5651_v0 = vld [vmem:[%s8101_s2 + $0x40] sm:$0xff]   ;;  %v5655_v4 = vld [vmem:[%s8101_s2 + $0x48] sm:$0xff]   ;;  %v5659_v8 = vld [vmem:[%s8101_s2 + $0x50] sm:$0xff]   ;;  %vm802_vm3 = vcmask 1042434   ;;  %v6174_v35 = vmov 1966171168  }
   0x2   :  { %v5652_v1 = vld [vmem:[%s8101_s2] sm:$0xff]   ;;  %4946 = vmatprep.subr.bf16.mxu0 %v5651_v0  ;;  %v5656_v5 = vld [vmem:[%s8101_s2 + $0x8] sm:$0xff]   ;;  %v5660_v9 = vld [vmem:[%s8101_s2 + $0x10] sm:$0xff]   ;;  %v106_v33 = vshrl.u32 %v105_v28, 7  ;;  %v103_v36 = vunpack.c.l.s4 %v6174_v35  ;;  %vm799_vm5 = vsmask.f32 1280 }
   0x3   :  { %v5653_v2 = vld [vmem:[%s8101_s2 + $0xc0] sm:$0xff]   ;;  %4947 = vmatpush3.bf16.msra.mxu0 %v5652_v1  ;;  %v5657_v6 = vld [vmem:[%s8101_s2 + $0xc8] sm:$0xff]   ;;  %v5661_v10 = vld [vmem:[%s8101_s2 + $0xd0] sm:$0xff]   ;;  %vm803_vm6 = vsmask.f32 2304  ;;  %vm806_vm9 = vcmask 1043459  }
   0x4   :  { %v5654_v3 = vld [vmem:[%s8101_s2 + $0x80] sm:$0xff]   ;;  %4968 = vmatprep.subr.bf16.mxu1 %v5653_v2  ;;  %4948 = vmatprep.subr.bf16.mxu0 %v5655_v4  ;;  %v5658_v7 = vld [vmem:[%s8101_s2 + $0x88] sm:$0xff]   ;;  %v5662_v11 = vld [vmem:[%s8101_s2 + $0x90] sm:$0xff]   ;;  %v104_v38 = vunpack.c.0.s8 %v103_v36  ;;  %vm807_vm10 = vsmask.f32 3328  ;;  %vm810_vm13 = vcmask 1044484  }
   0x5   :  { %4969 = vmatpush3.bf16.msra.mxu1 %v5654_v3  ;;  %v5663_v12 = vld [vmem:[%s8101_s2 + $0x58] sm:$0xff]   ;;  %v5667_v16 = vld [vmem:[%s8101_s2 + $0x60] sm:$0xff]   ;;  %v5671_v20 = vld [vmem:[%s8101_s2 + $0x68] sm:$0xff]   ;;  %vm811_vm14 = vsmask.f32 4352 }
   0x6   :  { %4970 = vmatprep.subr.bf16.mxu1 %v5657_v6  ;;  %v5664_v13 = vld [vmem:[%s8101_s2 + $0x18] sm:$0xff]   ;;  %v5668_v17 = vld [vmem:[%s8101_s2 + $0x20] sm:$0xff]   ;;  %v5672_v21 = vld [vmem:[%s8101_s2 + $0x28] sm:$0xff]   ;;  %v6297_v40 = vsub.s32 %v104_v38, %v106_v33 }
   0x7   :  { %4949 = vmatpush3.bf16.msra.mxu0 %v5656_v5  ;;  %v5665_v14 = vld [vmem:[%s8101_s2 + $0xd8] sm:$0xff]   ;;  %v5669_v18 = vld [vmem:[%s8101_s2 + $0xe0] sm:$0xff]   ;;  %v5673_v22 = vld [vmem:[%s8101_s2 + $0xe8] sm:$0xff]  }
   0x8   :  { %4950 = vmatprep.subr.bf16.mxu0 %v5659_v8  ;;  %v5666_v15 = vld [vmem:[%s8101_s2 + $0x98] sm:$0xff]   ;;  %v5670_v19 = vld [vmem:[%s8101_s2 + $0xa0] sm:$0xff]   ;;  %v5674_v23 = vld [vmem:[%s8101_s2 + $0xa8] sm:$0xff]  }
   0x9   :  { %4971 = vmatpush3.bf16.msra.mxu1 %v5658_v7  ;;  %v5675_v24 = vld [vmem:[%s8101_s2 + $0x70] sm:$0xff]   ;;  %v5679_v29 = vld [vmem:[%s8101_s2 + $0x78] sm:$0xff]   ;;  %v39_v34 = vld [vmem:[%s8099_s0] sm:$0xff] }
   0xa   :  { %4972 = vmatprep.subr.bf16.mxu1 %v5661_v10  ;;  %v5676_v25 = vld [vmem:[%s8101_s2 + $0x30] sm:$0xff]   ;;  %v5680_v30 = vld [vmem:[%s8101_s2 + $0x38] sm:$0xff]   ;;  %vm797_vm4 = vmand %vm795_vm0, %vm796_vm2  ;;  %v101_v37 = vcombine.high %v39_v34, %v39_v34  ;;  %v108_v42 = vrot.slane %v39_v34, %v6297_v40  ;;  %vm815_vm2 = vsmask.f32 5376 }
   0xb   :  { %4951 = vmatpush3.bf16.msra.mxu0 %v5660_v9  ;;  %v5677_v26 = vld [vmem:[%s8101_s2 + $0xf0] sm:$0xff]   ;;  %v5681_v31 = vld [vmem:[%s8101_s2 + $0xf8] sm:$0xff]   ;;  %vm800_vm7 = vmand %vm798_vm1, %vm799_vm5  ;;  %vm814_vm1 = vcmask 1045509  }
   0xc   :  { %4952 = vmatprep.subr.bf16.mxu0 %v5663_v12  ;;  %v5678_v27 = vld [vmem:[%s8101_s2 + $0xb0] sm:$0xff]   ;;  %v5682_v32 = vld [vmem:[%s8101_s2 + $0xb8] sm:$0xff]   ;;  %vm801_vm8 = vmor %vm800_vm7, %vm797_vm4  ;;  %v115_v43 = vrot.slane %v101_v37, %v6297_v40  ;;  %v116_v45 = vcombine.high %v108_v42, %v108_v42  ;;  %v6311_v47 = vrot.slane %v108_v42, %v6297_v40  ;;  %vm819_vm7 = vsmask.f32 6400 }
   0xd   :  { %4973 = vmatpush3.bf16.msra.mxu1 %v5662_v11  ;;  %vm804_vm11 = vmand %vm802_vm3, %vm803_vm6  ;;  %v5684_v39 = vld [vmem:[%s8101_s2 + $0x140] sm:$0xff]   ;;  %vm818_vm6 = vcmask 1046534   ;;  %v5698_v28 = vld [vmem:[%s8101_s2 + $0x1d8] sm:$0xff]  }
   0xe   :  { %4974 = vmatprep.subr.bf16.mxu1 %v5665_v14  ;;  %vm6299_vm12 = vmor %vm804_vm11, %vm801_vm8  ;;  %v5686_v44 = vld [vmem:[%s8101_s2 + $0x1c0] sm:$0xff]   ;;  %v117_v46 = vcombine.high %v115_v43, %v115_v43  ;;  %v6314_v48 = vrot.slane %v115_v43, %v6297_v40  ;;  %v6325_v51 = vrot.slane %v116_v45, %v6297_v40  ;;  %vm823_vm11 = vsmask.f32 7424  ;;  %v5707_v50 = vld [vmem:[%s8101_s2 + $0x1a8] sm:$0xff]  }
   0xf   :  { %4953 = vmatpush3.bf16.msra.mxu0 %v5664_v13  ;;  %vm808_vm15 = vmand %vm806_vm9, %vm807_vm10  ;;  %vm822_vm10 = vcmask 1047559   ;;  %v826_v1 = vld [vmem:[#allocation2] sm:$0xff]  ;;  %v6012_v2 = vld [vmem:[%s8101_s2 + $0x2f8] sm:$0xff]  }
  0x10   :  { %4954 = vmatprep.subr.bf16.mxu0 %v5667_v16  ;;  %vm809_vm0 = vmor %vm808_vm15, %vm6299_vm12  ;;  %v6328_v52 = vrot.slane %v117_v46, %v6297_v40  ;;  %v395_v53 = vcombine.low %v6311_v47, %v6325_v51  ;;  %v4681_v54 = vcombine.high %v6311_v47, %v6325_v51  ;;  %v5685_v10 = vld [vmem:[%s8101_s2 + $0x100] sm:$0xff]   ;;  %v212_v34 = vshrl.u32 %v6314_v48, 16  ;;  %v5705_v46 = vld [vmem:[%s8101_s2 + $0x128] sm:$0xff]  }
  0x11   :  { %4975 = vmatpush3.bf16.msra.mxu1 %v5666_v15  ;;  %vm812_vm3 = vmand %vm810_vm13, %vm811_vm14  ;;  %v5687_v12 = vld [vmem:[%s8101_s2 + $0x180] sm:$0xff]   ;;  %v5688_v15 = vld [vmem:[%s8101_s2 + $0x148] sm:$0xff]   ;;  %v147_v36 = vcombine.high %v6314_v48, %v6314_v48  ;;  %v203_v37 = vshrl.u32 %v6325_v51, 16 }
  0x12   :  { %4976 = vmatprep.subr.bf16.mxu1 %v5669_v18  ;;  %vm6316_vm4 = vmor %vm812_vm3, %vm809_vm0  ;;  %v397_v55 = vcombine.low %v6314_v48, %v6328_v52  ;;  %v4682_v56 = vcombine.high %v6314_v48, %v6328_v52  ;;  %v405_v57 = vrot.slane %v395_v53, %v6297_v40  ;;  %v412_v58 = vrot.slane %v4681_v54, %v6297_v40  ;;  %v5700_v33 = vld [vmem:[%s8101_s2 + $0x160] sm:$0xff]   ;;  %v5706_v48 = vld [vmem:[%s8101_s2 + $0x1e8] sm:$0xff]  }
  0x13   :  { %4955 = vmatpush3.bf16.msra.mxu0 %v5668_v17  ;;  %vm6320_vm5 = vmand %vm814_vm1, %vm815_vm2  ;;  %v5689_v17 = vld [vmem:[%s8101_s2 + $0x108] sm:$0xff]   ;;  %v5701_v35 = vld [vmem:[%s8101_s2 + $0x120] sm:$0xff]   ;;  %v215_v45 = vshrl.u32 %v6328_v52, 16 }
  0x14   :  { %4956 = vmatprep.subr.bf16.mxu0 %v5671_v20  ;;  %vm817_vm8 = vmor %vm6320_vm5, %vm6316_vm4  ;;  %v419_v59 = vrot.slane %v397_v55, %v6297_v40  ;;  %v426_v60 = vrot.slane %v4682_v56, %v6297_v40  ;;  %v427_v61 = vcombine.low %v405_v57, %v412_v58  ;;  %v5691_v20 = vld [vmem:[%s8101_s2 + $0x188] sm:$0xff]   ;;  %v5702_v38 = vld [vmem:[%s8101_s2 + $0x1e0] sm:$0xff]  }
  0x15   :  { %4977 = vmatpush3.bf16.msra.mxu1 %v5670_v19  ;;  %vm820_vm9 = vmand %vm818_vm6, %vm819_vm7  ;;  %v5690_v19 = vld [vmem:[%s8101_s2 + $0x1c8] sm:$0xff]   ;;  %v5703_v42 = vld [vmem:[%s8101_s2 + $0x1a0] sm:$0xff]   ;;  %v446_v56 = vcombine.low %v212_v34, %v215_v45 }
  0x16   :  { %4978 = vmatprep.subr.bf16.mxu1 %v5673_v22  ;;  %vm821_vm12 = vmor %vm820_vm9, %vm817_vm8  ;;  %v428_v62 = vcombine.low %v419_v59, %v426_v60  ;;  %v435_v63 = vrot.slane %v427_v61, %v6297_v40  ;;  %v5692_v22 = vld [vmem:[%s8101_s2 + $0x150] sm:$0xff]   ;;  %v5712_v59 = vld [vmem:[%s8101_s2 + $0x178] sm:$0xff]  }
  0x17   :  { %4957 = vmatpush3.bf16.msra.mxu0 %v5672_v21  ;;  %vm824_vm13 = vmand %vm822_vm10, %vm823_vm11  ;;  %v5710_v53 = vld [vmem:[%s8101_s2 + $0x1f0] sm:$0xff]   ;;  %v5713_v60 = vld [vmem:[%s8101_s2 + $0x138] sm:$0xff]  }
  0x18   :  { %4958 = vmatprep.subr.bf16.mxu0 %v5675_v24  ;;  %v442_v0 = vrot.slane %v428_v62, %v6297_v40  ;;  %vm6348_vm14 = vmor %vm824_vm13, %vm821_vm12  ;;  %v5694_v24 = vld [vmem:[%s8101_s2 + $0x1d0] sm:$0xff]   ;;  %v5714_v61 = vld [vmem:[%s8101_s2 + $0x1f8] sm:$0xff]  }
  0x19   :  { %4979 = vmatpush3.bf16.msra.mxu1 %v5674_v23  ;;  %v5693_v23 = vld [vmem:[%s8101_s2 + $0x110] sm:$0xff]   ;;  %v5735_v34 = vld [vmem:[%s8101_s2 + $0x2a0] sm:$0xff]  }
  0x1a   :  { %4980 = vmatprep.subr.bf16.mxu1 %v5677_v26  ;;  %v443_v3 = vcombine.low %v435_v63, %v442_v0  ;;  %v5696_v26 = vld [vmem:[%s8101_s2 + $0x158] sm:$0xff]   ;;  %v5711_v58 = vld [vmem:[%s8101_s2 + $0x1b0] sm:$0xff]   ;;  %v468_v0 = vrot.slane %v446_v56, %v6297_v40 }
  0x1b   :  { %4959 = vmatpush3.bf16.msra.mxu0 %v5676_v25  ;;  %v5695_v25 = vld [vmem:[%s8101_s2 + $0x190] sm:$0xff]  }
  0x1c   :  { %4960 = vmatprep.subr.bf16.mxu0 %v5679_v29  ;;  %v827_v4 = vsel %vm6348_vm14, %v443_v3, %v826_v1  ;;  %v146_v29 = vcombine.high %v6311_v47, %v6311_v47  ;;  %v5715_v3 = vld [vmem:[%s8101_s2 + $0x1b8] sm:$0xff]  }
  0x1d   :  { %4981 = vmatpush3.bf16.msra.mxu1 %v5678_v27  ;;  %828 = vst [vmem:[#allocation2] sm:$0xff] %v827_v4  ;;  %v1370_v5 = vcombine.high %v827_v4, %v827_v4  ;;  %v1377_v6 = vrot.slane %v827_v4, %v6297_v40  ;;  %v5697_v27 = vld [vmem:[%s8101_s2 + $0x118] sm:$0xff]  }
  0x1e   :  { %4982 = vmatprep.subr.bf16.mxu1 %v5681_v31  ;;  %v148_v31 = vcombine.high %v6325_v51, %v6325_v51  ;;  %v206_v41 = vshrl.u32 %v146_v29, 16  ;;  %v5708_v51 = vld [vmem:[%s8101_s2 + $0x170] sm:$0xff]  }
  0x1f   :  { %4961 = vmatpush3.bf16.msra.mxu0 %v5680_v30  ;;  %v1385_v7 = vcombine.high %v1377_v6, %v1377_v6  ;;  %v1393_v8 = vrot.slane %v1377_v6, %v6297_v40  ;;  %v6357_v9 = vrot.slane %v1370_v5, %v6297_v40  ;;  %v5699_v30 = vld [vmem:[%s8101_s2 + $0x198] sm:$0xff]   ;;  %v5716_v5 = vld [vmem:[%s8101_s2 + $0x240] sm:$0xff]  }
  0x20   :  { %4990 = vmatprep.subr.bf16.mxu0 %v5684_v39  ;;  %v149_v39 = vcombine.high %v6328_v52, %v6328_v52  ;;  %v209_v43 = vshrl.u32 %v148_v31, 16  ;;  %v5709_v52 = vld [vmem:[%s8101_s2 + $0x130] sm:$0xff]   ;;  %v5717_v6 = vld [vmem:[%s8101_s2 + $0x200] sm:$0xff]  }
  0x21   :  { %4983 = vmatpush3.bf16.msra.mxu1 %v5682_v32  ;;  %v1407_v11 = vrot.slane %v1385_v7, %v6297_v40  ;;  %v1386_v13 = vcombine.high %v6357_v9, %v6357_v9  ;;  %v1415_v14 = vcombine.high %v1393_v8, %v1393_v8  ;;  %v200_v32 = vshrl.u32 %v6311_v47, 16  ;;  %v5718_v7 = vld [vmem:[%s8101_s2 + $0x2c0] sm:$0xff]  }
  0x22   :  { %5012 = vmatprep.subr.bf16.mxu1 %v5686_v44  ;;  %v5704_v44 = vld [vmem:[%s8101_s2 + $0x168] sm:$0xff]   ;;  %v218_v47 = vshrl.u32 %v147_v36, 16  ;;  %v221_v49 = vshrl.u32 %v149_v39, 16  ;;  %v445_v55 = vcombine.low %v206_v41, %v209_v43  ;;  %v1400_v4 = vrot.slane %v6357_v9, %v6297_v40  ;;  %v5719_v9 = vld [vmem:[%s8101_s2 + $0x280] sm:$0xff]   ;;  %v5740_v43 = vld [vmem:[%s8101_s2 + $0x270] sm:$0xff]  }
  0x23   :  { %3166 = vmatprep.mubr.bf16.mxu0 %v1407_v11  ;;  %v1417_v16 = vcombine.high %v1407_v11, %v1407_v11  ;;  %v1414_v18 = vrot.slane %v1386_v13, %v6297_v40  ;;  %v444_v54 = vcombine.low %v200_v32, %v203_v37  ;;  %v5721_v13 = vld [vmem:[%s8101_s2 + $0x208] sm:$0xff]   ;;  %v5733_v31 = vld [vmem:[%s8101_s2 + $0x220] sm:$0xff]  }
  0x24   :  { %3167 = vmatmul.mubr.bf16.vlgmr.msra.gmra.mrb[0].mxu0 %v1393_v8  ;;  %v447_v57 = vcombine.low %v218_v47, %v221_v49  ;;  %v461_v63 = vrot.slane %v445_v55, %v6297_v40  ;;  %v1416_v11 = vcombine.high %v1400_v4, %v1400_v4  ;;  %v5736_v36 = vld [vmem:[%s8101_s2 + $0x268] sm:$0xff]   ;;  %v5743_v47 = vld [vmem:[%s8101_s2 + $0x2b0] sm:$0xff]   ;;  %v5745_v49 = vld [vmem:[%s8101_s2 + $0x238] sm:$0xff]  }
  0x25   :  { %4991 = vmatpush3.bf16.msra.mxu0 %v5685_v10  ;;  %3206 = vmatprep.mubr.bf16.mxu1 %v1417_v16  ;;  %v1418_v21 = vcombine.high %v1414_v18, %v1414_v18  ;;  %v454_v62 = vrot.slane %v444_v54, %v6297_v40  ;;  %v5737_v37 = vld [vmem:[%s8101_s2 + $0x228] sm:$0xff]   ;;  %v5748_v54 = vld [vmem:[%s8101_s2 + $0x340] sm:$0xff]  }
  0x26   :  { %3207 = vmatmul.mubr.bf16.vlgmr.msra.gmra.mrb[0].mxu1 %v1415_v14  ;;  %4992 = vmatprep.subr.bf16.mxu0 %v5688_v15  ;;  %v475_v1 = vrot.slane %v447_v57, %v6297_v40  ;;  %v5722_v14 = vld [vmem:[%s8101_s2 + $0x2c8] sm:$0xff]   ;;  %v5749_v55 = vld [vmem:[%s8101_s2 + $0x300] sm:$0xff]  }
  0x27   :  { %5013 = vmatpush3.bf16.msra.mxu1 %v5687_v12  ;;  %3246 = vmatprep.mubr.bf16.mxu0 %v1414_v18  ;;  %v476_v8 = vcombine.low %v454_v62, %v461_v63  ;;  %v5720_v12 = vld [vmem:[%s8101_s2 + $0x248] sm:$0xff]   ;;  %v5724_v18 = vld [vmem:[%s8101_s2 + $0x250] sm:$0xff]   ;;  %v5750_v57 = vld [vmem:[%s8101_s2 + $0x3c0] sm:$0xff]  }
  0x28   :  { %5014 = vmatprep.subr.bf16.mxu1 %v5690_v19  ;;  %3286 = vmatprep.mubr.bf16.mxu1 %v1418_v21  ;;  %v477_v10 = vcombine.low %v468_v0, %v475_v1  ;;  %v5725_v19 = vld [vmem:[%s8101_s2 + $0x210] sm:$0xff]   ;;  %v5738_v41 = vld [vmem:[%s8101_s2 + $0x2e8] sm:$0xff]  }
  0x29   :  { %4993 = vmatpush3.bf16.msra.mxu0 %v5689_v17  ;;  %v484_v15 = vrot.slane %v476_v8, %v6297_v40  ;;  %v5723_v17 = vld [vmem:[%s8101_s2 + $0x288] sm:$0xff]   ;;  %v5756_v1 = vld [vmem:[%s8101_s2 + $0x350] sm:$0xff]   ;;  %v5762_v8 = vld [vmem:[%s8101_s2 + $0x3d8] sm:$0xff]  }
  0x2a   :  { %4994 = vmatprep.subr.bf16.mxu0 %v5692_v22  ;;  %v491_v16 = vrot.slane %v477_v10, %v6297_v40  ;;  %v5727_v22 = vld [vmem:[%s8101_s2 + $0x290] sm:$0xff]   ;;  %v5754_v63 = vld [vmem:[%s8101_s2 + $0x3c8] sm:$0xff]   ;;  %v5763_v10 = vld [vmem:[%s8101_s2 + $0x398] sm:$0xff]  }
  0x2b   :  { %5015 = vmatpush3.bf16.msra.mxu1 %v5691_v20  ;;  %v5726_v20 = vld [vmem:[%s8101_s2 + $0x2d0] sm:$0xff]   ;;  %v5755_v0 = vld [vmem:[%s8101_s2 + $0x388] sm:$0xff]  }
  0x2c   :  { %5016 = vmatprep.subr.bf16.mxu1 %v5694_v24  ;;  %v492_v21 = vcombine.low %v484_v15, %v491_v16  ;;  %v5729_v24 = vld [vmem:[%s8101_s2 + $0x218] sm:$0xff]   ;;  %v5769_v15 = vld [vmem:[%s8101_s2 + $0x328] sm:$0xff]  }
  0x2d   :  { %4995 = vmatpush3.bf16.msra.mxu0 %v5693_v23  ;;  %v5728_v23 = vld [vmem:[%s8101_s2 + $0x258] sm:$0xff]   ;;  %v5770_v16 = vld [vmem:[%s8101_s2 + $0x3e8] sm:$0xff]  }
  0x2e   :  { %4996 = vmatprep.subr.bf16.mxu0 %v5696_v26  ;;  %v5730_v26 = vld [vmem:[%s8101_s2 + $0x2d8] sm:$0xff]  }
  0x2f   :  { %5017 = vmatpush3.bf16.msra.mxu1 %v5695_v25  ;;  %v829_v25 = vld [vmem:[#allocation2 + $0x8] sm:$0xff] }
  0x30   :  { %5018 = vmatprep.subr.bf16.mxu1 %v5698_v28  ;;  %v5731_v28 = vld [vmem:[%s8101_s2 + $0x298] sm:$0xff]  }
  0x31   :  { %4997 = vmatpush3.bf16.msra.mxu0 %v5697_v27  ;;  %v830_v27 = vsel %vm6348_vm14, %v492_v21, %v829_v25  ;;  %v5775_v21 = vld [vmem:[%s8101_s2 + $0x3b0] sm:$0xff]   ;;  %v5779_v25 = vld [vmem:[%s8101_s2 + $0x3b8] sm:$0xff]  }
  0x32   :  { %4998 = vmatprep.subr.bf16.mxu0 %v5700_v33  ;;  %831 = vst [vmem:[#allocation2 + $0x8] sm:$0xff] %v830_v27  ;;  %v1426_v29 = vrot.slane %v830_v27, %v6297_v40  ;;  %v5734_v33 = vld [vmem:[%s8101_s2 + $0x2e0] sm:$0xff]   ;;  %v1419_v39 = vcombine.high %v830_v27, %v830_v27 }
  0x33   :  { %5019 = vmatpush3.bf16.msra.mxu1 %v5699_v30  ;;  %v5732_v30 = vld [vmem:[%s8101_s2 + $0x260] sm:$0xff]  }
  0x34   :  { %5020 = vmatprep.subr.bf16.mxu1 %v5702_v38  ;;  %v1434_v32 = vcombine.high %v1426_v29, %v1426_v29  ;;  %v6556_v45 = vrot.slane %v1419_v39, %v6297_v40  ;;  %v5780_v27 = vld [vmem:[%s8101_s2 + $0x440] sm:$0xff]   ;;  %v5791_v39 = vld [vmem:[%s8101_s2 + $0x490] sm:$0xff]  }
  0x35   :  { %4999 = vmatpush3.bf16.msra.mxu0 %v5701_v35 }
  0x36   :  { %5000 = vmatprep.subr.bf16.mxu0 %v5704_v44  ;;  %v1456_v35 = vrot.slane %v1434_v32, %v6297_v40  ;;  %v5741_v44 = vld [vmem:[%s8101_s2 + $0x230] sm:$0xff]   ;;  %v5784_v32 = vld [vmem:[%s8101_s2 + $0x448] sm:$0xff]  }
  0x37   :  { %5021 = vmatpush3.bf16.msra.mxu1 %v5703_v42  ;;  %v5739_v42 = vld [vmem:[%s8101_s2 + $0x2a8] sm:$0xff]  }
  0x38   :  { %5022 = vmatprep.subr.bf16.mxu1 %v5706_v48  ;;  %v1466_v38 = vcombine.high %v1456_v35, %v1456_v35  ;;  %v5744_v48 = vld [vmem:[%s8101_s2 + $0x278] sm:$0xff]  }
  0x39   :  { %5001 = vmatpush3.bf16.msra.mxu0 %v5705_v46  ;;  %v5742_v46 = vld [vmem:[%s8101_s2 + $0x2f0] sm:$0xff]  }
  0x3a   :  { %5002 = vmatprep.subr.bf16.mxu0 %v5708_v51  ;;  %v5746_v51 = vld [vmem:[%s8101_s2 + $0x2f8] sm:$0xff]  }
  0x3b   :  { %5023 = vmatpush3.bf16.msra.mxu1 %v5707_v50  ;;  %v1435_v50 = vcombine.high %v6556_v45, %v6556_v45 }
  0x3c   :  { %5024 = vmatprep.subr.bf16.mxu1 %v5710_v53  ;;  %v1442_v53 = vrot.slane %v1426_v29, %v6297_v40  ;;  %v5782_v29 = vld [vmem:[%s8101_s2 + $0x4c0] sm:$0xff]  }
  0x3d   :  { %5003 = vmatpush3.bf16.msra.mxu0 %v5709_v52  ;;  %v5747_v52 = vld [vmem:[%s8101_s2 + $0x2b8] sm:$0xff]   ;;  %v1463_v56 = vrot.slane %v1435_v50, %v6297_v40 }
  0x3e   :  { %5004 = vmatprep.subr.bf16.mxu0 %v5712_v59  ;;  %v1464_v59 = vcombine.high %v1442_v53, %v1442_v53 }
  0x3f   :  { %5025 = vmatpush3.bf16.msra.mxu1 %v5711_v58  ;;  %v5751_v58 = vld [vmem:[%s8101_s2 + $0x380] sm:$0xff]   ;;  %v1467_v62 = vcombine.high %v1463_v56, %v1463_v56 }
  0x40   :  { %5026 = vmatprep.subr.bf16.mxu1 %v5714_v61  ;;  %v5753_v61 = vld [vmem:[%s8101_s2 + $0x308] sm:$0xff]  }
  0x41   :  { %5005 = vmatpush3.bf16.msra.mxu0 %v5713_v60  ;;  %v5752_v60 = vld [vmem:[%s8101_s2 + $0x348] sm:$0xff]  }
  0x42   :  { %5034 = vmatprep.subr.bf16.mxu0 %v5716_v5  ;;  %v5759_v5 = vld [vmem:[%s8101_s2 + $0x390] sm:$0xff]  }
  0x43   :  { %5027 = vmatpush3.bf16.msra.mxu1 %v5715_v3  ;;  %v5757_v3 = vld [vmem:[%s8101_s2 + $0x310] sm:$0xff]  }
  0x44   :  { %3247 = vmatmul.mubr.bf16.vlgmr.msra.gmra.mrb[4].mxu0 %v1400_v4  ;;  %5056 = vmatprep.subr.bf16.mxu1 %v5718_v7  ;;  %v5758_v4 = vld [vmem:[%s8101_s2 + $0x3d0] sm:$0xff]   ;;  %v5761_v7 = vld [vmem:[%s8101_s2 + $0x318] sm:$0xff]  }
  0x45   :  { %5035 = vmatpush3.bf16.msra.mxu0 %v5717_v6  ;;  %3326 = vmatprep.mubr.bf16.mxu0 %v1456_v35  ;;  %v5760_v6 = vld [vmem:[%s8101_s2 + $0x358] sm:$0xff]   ;;  %v5787_v35 = vld [vmem:[%s8101_s2 + $0x488] sm:$0xff]  }
  0x46   :  { %3287 = vmatmul.mubr.bf16.vlgmr.msra.gmra.mrb[4].mxu1 %v1416_v11  ;;  %5036 = vmatprep.subr.bf16.mxu0 %v5720_v12  ;;  %v5765_v11 = vld [vmem:[%s8101_s2 + $0x320] sm:$0xff]  }
  0x47   :  { %5057 = vmatpush3.bf16.msra.mxu1 %v5719_v9  ;;  %3366 = vmatprep.mubr.bf16.mxu1 %v1466_v38  ;;  %v5764_v9 = vld [vmem:[%s8101_s2 + $0x360] sm:$0xff]   ;;  %v5790_v38 = vld [vmem:[%s8101_s2 + $0x4d0] sm:$0xff]  }
  0x48   :  { %5058 = vmatprep.subr.bf16.mxu1 %v5722_v14  ;;  %v5766_v12 = vld [vmem:[%s8101_s2 + $0x3e0] sm:$0xff]   ;;  %v5768_v14 = vld [vmem:[%s8101_s2 + $0x368] sm:$0xff]  }
  0x49   :  { %5037 = vmatpush3.bf16.msra.mxu0 %v5721_v13  ;;  %v5767_v13 = vld [vmem:[%s8101_s2 + $0x3a0] sm:$0xff]  }
  0x4a   :  { %5038 = vmatprep.subr.bf16.mxu0 %v5724_v18  ;;  %v5772_v18 = vld [vmem:[%s8101_s2 + $0x370] sm:$0xff]  }
  0x4b   :  { %5059 = vmatpush3.bf16.msra.mxu1 %v5723_v17  ;;  %v5771_v17 = vld [vmem:[%s8101_s2 + $0x3a8] sm:$0xff]  }
  0x4c   :  { %5060 = vmatprep.subr.bf16.mxu1 %v5726_v20  ;;  %v5774_v20 = vld [vmem:[%s8101_s2 + $0x3f0] sm:$0xff]  }
  0x4d   :  { %5039 = vmatpush3.bf16.msra.mxu0 %v5725_v19  ;;  %v5773_v19 = vld [vmem:[%s8101_s2 + $0x330] sm:$0xff]  }
  0x4e   :  { %5040 = vmatprep.subr.bf16.mxu0 %v5728_v23  ;;  %v5777_v23 = vld [vmem:[%s8101_s2 + $0x338] sm:$0xff]  }
  0x4f   :  { %5061 = vmatpush3.bf16.msra.mxu1 %v5727_v22  ;;  %v5776_v22 = vld [vmem:[%s8101_s2 + $0x378] sm:$0xff]  }
  0x50   :  { %5062 = vmatprep.subr.bf16.mxu1 %v5730_v26  ;;  %v1449_v26 = vrot.slane %v6556_v45, %v6297_v40 }
  0x51   :  { %5041 = vmatpush3.bf16.msra.mxu0 %v5729_v24  ;;  %v5778_v24 = vld [vmem:[%s8101_s2 + $0x3f8] sm:$0xff]  }
  0x52   :  { %5042 = vmatprep.subr.bf16.mxu0 %v5732_v30  ;;  %v5783_v30 = vld [vmem:[%s8101_s2 + $0x480] sm:$0xff]  }
  0x53   :  { %5063 = vmatpush3.bf16.msra.mxu1 %v5731_v28  ;;  %v5781_v28 = vld [vmem:[%s8101_s2 + $0x400] sm:$0xff]  }
  0x54   :  { %5064 = vmatprep.subr.bf16.mxu1 %v5734_v33  ;;  %v5785_v33 = vld [vmem:[%s8101_s2 + $0x408] sm:$0xff]  }
  0x55   :  { %5043 = vmatpush3.bf16.msra.mxu0 %v5733_v31  ;;  %v1465_v31 = vcombine.high %v1449_v26, %v1449_v26 }
  0x56   :  { %5044 = vmatprep.subr.bf16.mxu0 %v5736_v36  ;;  %v5788_v36 = vld [vmem:[%s8101_s2 + $0x450] sm:$0xff]  }
  0x57   :  { %5065 = vmatpush3.bf16.msra.mxu1 %v5735_v34  ;;  %v5786_v34 = vld [vmem:[%s8101_s2 + $0x4c8] sm:$0xff]  }
  0x58   :  { %5066 = vmatprep.subr.bf16.mxu1 %v5738_v41  ;;  %v5792_v41 = vld [vmem:[%s8101_s2 + $0x458] sm:$0xff]  }
  0x59   :  { %5045 = vmatpush3.bf16.msra.mxu0 %v5737_v37  ;;  %v5789_v37 = vld [vmem:[%s8101_s2 + $0x410] sm:$0xff]  }
  0x5a   :  { %5046 = vmatprep.subr.bf16.mxu0 %v5740_v43  ;;  %v4679_v43 = vld [vmem:[%s8100_s1 + $0x8] sm:$0xff] }
  0x5b   :  { %5067 = vmatpush3.bf16.msra.mxu1 %v5739_v42  ;;  %v5793_v42 = vld [vmem:[%s8101_s2 + $0x418] sm:$0xff]   ;;  %v249_v45 = vcombine.high %v4679_v43, %v4679_v43 }
  0x5c   :  { %5068 = vmatprep.subr.bf16.mxu1 %v5742_v46  ;;  %v256_v46 = vrot.slane %v4679_v43, %v6297_v40  ;;  %v5820_v43 = vld [vmem:[%s8101_s2 + $0x588] sm:$0xff]  }
  0x5d   :  { %5047 = vmatpush3.bf16.msra.mxu0 %v5741_v44  ;;  %v5794_v44 = vld [vmem:[%s8101_s2 + $0x4d8] sm:$0xff]  }
  0x5e   :  { %5048 = vmatprep.subr.bf16.mxu0 %v5744_v48  ;;  %v5796_v48 = vld [vmem:[%s8101_s2 + $0x460] sm:$0xff]   ;;  %v264_v50 = vcombine.high %v256_v46, %v256_v46 }
  0x5f   :  { %5069 = vmatpush3.bf16.msra.mxu1 %v5743_v47  ;;  %v5795_v47 = vld [vmem:[%s8101_s2 + $0x498] sm:$0xff]  }
  0x60   :  { %5070 = vmatprep.subr.bf16.mxu1 %v5746_v51  ;;  %v6735_v51 = vrot.slane %v256_v46, %v6297_v40  ;;  %v5825_v46 = vld [vmem:[%s8101_s2 + $0x558] sm:$0xff]  }
  0x61   :  { %5049 = vmatpush3.bf16.msra.mxu0 %v5745_v49  ;;  %v263_v49 = vrot.slane %v249_v45, %v6297_v40  ;;  %v5822_v45 = vld [vmem:[%s8101_s2 + $0x510] sm:$0xff]  }
  0x62   :  { %5078 = vmatprep.subr.bf16.mxu0 %v5748_v54 }
  0x63   :  { %5071 = vmatpush3.bf16.msra.mxu1 %v5747_v52  ;;  %v5797_v52 = vld [vmem:[%s8101_s2 + $0x420] sm:$0xff]   ;;  %v265_v54 = vcombine.high %v263_v49, %v263_v49 }
  0x64   :  { %3327 = vmatmul.mubr.bf16.vlgmr.msra.gmra.mrb[8].mxu0 %v1442_v53  ;;  %5100 = vmatprep.subr.bf16.mxu1 %v5750_v57  ;;  %v5798_v53 = vld [vmem:[%s8101_s2 + $0x4e0] sm:$0xff]  }
  0x65   :  { %5079 = vmatpush3.bf16.msra.mxu0 %v5749_v55  ;;  %3406 = vmatprep.mubr.bf16.mxu0 %v1463_v56  ;;  %v6744_v55 = vrot.slane %v263_v49, %v6297_v40  ;;  %v6747_v56 = vrot.slane %v264_v50, %v6297_v40  ;;  %v5799_v57 = vld [vmem:[%s8101_s2 + $0x4a0] sm:$0xff]   ;;  %v5827_v50 = vld [vmem:[%s8101_s2 + $0x5d8] sm:$0xff]  }
  0x66   :  { %3367 = vmatmul.mubr.bf16.vlgmr.msra.gmra.mrb[8].mxu1 %v1464_v59  ;;  %5080 = vmatprep.subr.bf16.mxu0 %v5752_v60  ;;  %v6756_v59 = vrot.slane %v265_v54, %v6297_v40 }
  0x67   :  { %5101 = vmatpush3.bf16.msra.mxu1 %v5751_v58  ;;  %3446 = vmatprep.mubr.bf16.mxu1 %v1467_v62  ;;  %v5800_v58 = vld [vmem:[%s8101_s2 + $0x468] sm:$0xff]   ;;  %v493_v60 = vcombine.low %v6735_v51, %v6747_v56  ;;  %v296_v49 = vcombine.high %v6747_v56, %v6747_v56  ;;  %v351_v54 = vshrl.u32 %v6747_v56, 16 }
  0x68   :  { %5102 = vmatprep.subr.bf16.mxu1 %v5754_v63  ;;  %v5801_v62 = vld [vmem:[%s8101_s2 + $0x428] sm:$0xff]  }
  0x69   :  { %5081 = vmatpush3.bf16.msra.mxu0 %v5753_v61  ;;  %v4683_v61 = vcombine.high %v6735_v51, %v6747_v56  ;;  %v5802_v63 = vld [vmem:[%s8101_s2 + $0x4e8] sm:$0xff]   ;;  %v5831_v56 = vld [vmem:[%s8101_s2 + $0x5e0] sm:$0xff]  }
  0x6a   :  { %5082 = vmatprep.subr.bf16.mxu0 %v5756_v1  ;;  %v4684_v1 = vcombine.high %v6744_v55, %v6756_v59 }
  0x6b   :  { %5103 = vmatpush3.bf16.msra.mxu1 %v5755_v0  ;;  %v495_v0 = vcombine.low %v6744_v55, %v6756_v59 }
  0x6c   :  { %5104 = vmatprep.subr.bf16.mxu1 %v5758_v4  ;;  %v510_v4 = vrot.slane %v4683_v61, %v6297_v40  ;;  %v297_v61 = vcombine.high %v6756_v59, %v6756_v59 }
  0x6d   :  { %5083 = vmatpush3.bf16.msra.mxu0 %v5757_v3  ;;  %v503_v3 = vrot.slane %v493_v60, %v6297_v40 }
  0x6e   :  { %5084 = vmatprep.subr.bf16.mxu0 %v5760_v6  ;;  %v5804_v6 = vld [vmem:[%s8101_s2 + $0x470] sm:$0xff]  }
  0x6f   :  { %5105 = vmatpush3.bf16.msra.mxu1 %v5759_v5  ;;  %v5803_v5 = vld [vmem:[%s8101_s2 + $0x4a8] sm:$0xff]  }
  0x70   :  { %5106 = vmatprep.subr.bf16.mxu1 %v5762_v8  ;;  %v524_v8 = vrot.slane %v4684_v1, %v6297_v40  ;;  %v363_v1 = vshrl.u32 %v6756_v59, 16  ;;  %v5834_v59 = vld [vmem:[%s8101_s2 + $0x528] sm:$0xff]  }
  0x71   :  { %5085 = vmatpush3.bf16.msra.mxu0 %v5761_v7  ;;  %v517_v7 = vrot.slane %v495_v0, %v6297_v40  ;;  %v5830_v0 = vld [vmem:[%s8101_s2 + $0x520] sm:$0xff]  }
  0x72   :  { %5086 = vmatprep.subr.bf16.mxu0 %v5764_v9  ;;  %v5805_v9 = vld [vmem:[%s8101_s2 + $0x430] sm:$0xff]  }
  0x73   :  { %5107 = vmatpush3.bf16.msra.mxu1 %v5763_v10  ;;  %v525_v10 = vcombine.low %v503_v3, %v510_v4  ;;  %v5833_v3 = vld [vmem:[%s8101_s2 + $0x568] sm:$0xff]  }
  0x74   :  { %5108 = vmatprep.subr.bf16.mxu1 %v5766_v12  ;;  %v526_v12 = vcombine.low %v517_v7, %v524_v8  ;;  %v5837_v7 = vld [vmem:[%s8101_s2 + $0x570] sm:$0xff]   ;;  %v5836_v8 = vld [vmem:[%s8101_s2 + $0x5a8] sm:$0xff]  }
  0x75   :  { %5087 = vmatpush3.bf16.msra.mxu0 %v5765_v11  ;;  %v5806_v11 = vld [vmem:[%s8101_s2 + $0x4f0] sm:$0xff]  }
  0x76   :  { %5088 = vmatprep.subr.bf16.mxu0 %v5768_v14  ;;  %v5807_v14 = vld [vmem:[%s8101_s2 + $0x4b0] sm:$0xff]  }
  0x77   :  { %5109 = vmatpush3.bf16.msra.mxu1 %v5767_v13  ;;  %v533_v13 = vrot.slane %v525_v10, %v6297_v40 }
  0x78   :  { %5110 = vmatprep.subr.bf16.mxu1 %v5770_v16  ;;  %v540_v16 = vrot.slane %v526_v12, %v6297_v40 }
  0x79   :  { %5089 = vmatpush3.bf16.msra.mxu0 %v5769_v15  ;;  %v5808_v15 = vld [vmem:[%s8101_s2 + $0x478] sm:$0xff]  }
  0x7a   :  { %5090 = vmatprep.subr.bf16.mxu0 %v5772_v18  ;;  %v5810_v18 = vld [vmem:[%s8101_s2 + $0x4f8] sm:$0xff]  }
  0x7b   :  { %5111 = vmatpush3.bf16.msra.mxu1 %v5771_v17  ;;  %v832_v17 = vld [vmem:[#allocation2 + $0x10] sm:$0xff] }
  0x7c   :  { %5112 = vmatprep.subr.bf16.mxu1 %v5774_v20  ;;  %v5809_v20 = vld [vmem:[%s8101_s2 + $0x438] sm:$0xff]  }
  0x7d   :  { %5091 = vmatpush3.bf16.msra.mxu0 %v5773_v19  ;;  %v541_v19 = vcombine.low %v533_v13, %v540_v16  ;;  %v5839_v13 = vld [vmem:[%s8101_s2 + $0x5f0] sm:$0xff]  }
  0x7e   :  { %5092 = vmatprep.subr.bf16.mxu0 %v5776_v22  ;;  %v5813_v22 = vld [vmem:[%s8101_s2 + $0x540] sm:$0xff]   ;;  %v5840_v16 = vld [vmem:[%s8101_s2 + $0x5b0] sm:$0xff]  }
  0x7f   :  { %5113 = vmatpush3.bf16.msra.mxu1 %v5775_v21  ;;  %v833_v21 = vsel %vm6348_vm14, %v541_v19, %v832_v17 }
  0x80   :  { %5114 = vmatprep.subr.bf16.mxu1 %v5778_v24  ;;  %834 = vst [vmem:[#allocation2 + $0x10] sm:$0xff] %v833_v21  ;;  %v5812_v24 = vld [vmem:[%s8101_s2 + $0x4b8] sm:$0xff]  }
  0x81   :  { %5093 = vmatpush3.bf16.msra.mxu0 %v5777_v23  ;;  %v1475_v23 = vrot.slane %v833_v21, %v6297_v40 }
  0x82   :  { %5122 = vmatprep.subr.bf16.mxu0 %v5780_v27 }
  0x83   :  { %5115 = vmatpush3.bf16.msra.mxu1 %v5779_v25  ;;  %v1468_v25 = vcombine.high %v833_v21, %v833_v21  ;;  %v1483_v27 = vcombine.high %v1475_v23, %v1475_v23  ;;  %v5843_v21 = vld [vmem:[%s8101_s2 + $0x5f8] sm:$0xff]  }
  0x84   :  { %3407 = vmatmul.mubr.bf16.vlgmr.msra.gmra.mrb[12].mxu0 %v1449_v26  ;;  %5144 = vmatprep.subr.bf16.mxu1 %v5782_v29  ;;  %v5815_v26 = vld [vmem:[%s8101_s2 + $0x5c0] sm:$0xff]  }
  0x85   :  { %5123 = vmatpush3.bf16.msra.mxu0 %v5781_v28  ;;  %v1491_v28 = vrot.slane %v1475_v23, %v6297_v40  ;;  %v6816_v29 = vrot.slane %v1468_v25, %v6297_v40  ;;  %v5844_v25 = vld [vmem:[%s8101_s2 + $0x5b8] sm:$0xff]  }
  0x86   :  { %3447 = vmatmul.mubr.bf16.vlgmr.msra.gmra.mrb[12].mxu1 %v1465_v31  ;;  %5124 = vmatprep.subr.bf16.mxu0 %v5784_v32  ;;  %v5814_v31 = vld [vmem:[%s8101_s2 + $0x500] sm:$0xff]  }
  0x87   :  { %5145 = vmatpush3.bf16.msra.mxu1 %v5783_v30  ;;  %v1505_v30 = vrot.slane %v1483_v27, %v6297_v40  ;;  %v1484_v32 = vcombine.high %v6816_v29, %v6816_v29  ;;  %v1498_v23 = vrot.slane %v6816_v29, %v6297_v40  ;;  %v5846_v29 = vld [vmem:[%s8101_s2 + $0x600] sm:$0xff]  }
  0x88   :  { %5146 = vmatprep.subr.bf16.mxu1 %v5786_v34  ;;  %v5817_v34 = vld [vmem:[%s8101_s2 + $0x548] sm:$0xff]  }
  0x89   :  { %5125 = vmatpush3.bf16.msra.mxu0 %v5785_v33  ;;  %v1513_v33 = vcombine.high %v1491_v28, %v1491_v28  ;;  %3486 = vmatprep.mubr.bf16.mxu0 %v1505_v30 }
  0x8a   :  { %5126 = vmatprep.subr.bf16.mxu0 %v5788_v36  ;;  %v5816_v36 = vld [vmem:[%s8101_s2 + $0x580] sm:$0xff]  }
  0x8b   :  { %5147 = vmatpush3.bf16.msra.mxu1 %v5787_v35  ;;  %v1515_v35 = vcombine.high %v1505_v30, %v1505_v30  ;;  %v1514_v30 = vcombine.high %v1498_v23, %v1498_v23 }
  0x8c   :  { %5148 = vmatprep.subr.bf16.mxu1 %v5790_v38  ;;  %v5819_v38 = vld [vmem:[%s8101_s2 + $0x5c8] sm:$0xff]  }
  0x8d   :  { %5127 = vmatpush3.bf16.msra.mxu0 %v5789_v37  ;;  %v1512_v37 = vrot.slane %v1484_v32, %v6297_v40  ;;  %3526 = vmatprep.mubr.bf16.mxu1 %v1515_v35  ;;  %v5848_v32 = vld [vmem:[%s8101_s2 + $0x680] sm:$0xff]   ;;  %v5851_v35 = vld [vmem:[%s8101_s2 + $0x6c8] sm:$0xff]  }
  0x8e   :  { %5128 = vmatprep.subr.bf16.mxu0 %v5792_v41 }
  0x8f   :  { %5149 = vmatpush3.bf16.msra.mxu1 %v5791_v39  ;;  %v5818_v39 = vld [vmem:[%s8101_s2 + $0x508] sm:$0xff]   ;;  %v1516_v41 = vcombine.high %v1512_v37, %v1512_v37 }
  0x90   :  { %5150 = vmatprep.subr.bf16.mxu1 %v5794_v44  ;;  %v5823_v44 = vld [vmem:[%s8101_s2 + $0x5d0] sm:$0xff]  }
  0x91   :  { %5129 = vmatpush3.bf16.msra.mxu0 %v5793_v42  ;;  %v5821_v42 = vld [vmem:[%s8101_s2 + $0x550] sm:$0xff]  }
  0x92   :  { %5130 = vmatprep.subr.bf16.mxu0 %v5796_v48  ;;  %v5824_v48 = vld [vmem:[%s8101_s2 + $0x590] sm:$0xff]  }
  0x93   :  { %5151 = vmatpush3.bf16.msra.mxu1 %v5795_v47  ;;  %v294_v47 = vcombine.high %v6735_v51, %v6735_v51 }
  0x94   :  { %5152 = vmatprep.subr.bf16.mxu1 %v5798_v53  ;;  %v5826_v53 = vld [vmem:[%s8101_s2 + $0x518] sm:$0xff]  }
  0x95   :  { %5131 = vmatpush3.bf16.msra.mxu0 %v5797_v52  ;;  %v348_v52 = vshrl.u32 %v6735_v51, 16  ;;  %v354_v60 = vshrl.u32 %v294_v47, 16  ;;  %v5828_v51 = vld [vmem:[%s8101_s2 + $0x598] sm:$0xff]  }
  0x96   :  { %5132 = vmatprep.subr.bf16.mxu0 %v5800_v58  ;;  %v295_v58 = vcombine.high %v6744_v55, %v6744_v55  ;;  %v5859_v47 = vld [vmem:[%s8101_s2 + $0x6d8] sm:$0xff]  }
  0x97   :  { %5153 = vmatpush3.bf16.msra.mxu1 %v5799_v57  ;;  %v5829_v57 = vld [vmem:[%s8101_s2 + $0x560] sm:$0xff]   ;;  %v542_v10 = vcombine.low %v348_v52, %v351_v54 }
  0x98   :  { %5154 = vmatprep.subr.bf16.mxu1 %v5802_v63  ;;  %v360_v63 = vshrl.u32 %v6744_v55, 16  ;;  %v366_v4 = vshrl.u32 %v295_v58, 16  ;;  %v5835_v55 = vld [vmem:[%s8101_s2 + $0x5e8] sm:$0xff]   ;;  %v5863_v54 = vld [vmem:[%s8101_s2 + $0x6e0] sm:$0xff]  }
  0x99   :  { %5133 = vmatpush3.bf16.msra.mxu0 %v5801_v62  ;;  %v357_v62 = vshrl.u32 %v296_v49, 16  ;;  %v552_v17 = vrot.slane %v542_v10, %v6297_v40  ;;  %v5858_v49 = vld [vmem:[%s8101_s2 + $0x618] sm:$0xff]   ;;  %v5862_v58 = vld [vmem:[%s8101_s2 + $0x620] sm:$0xff]  }
  0x9a   :  { %5134 = vmatprep.subr.bf16.mxu0 %v5804_v6  ;;  %v369_v6 = vshrl.u32 %v297_v61, 16  ;;  %v5864_v61 = vld [vmem:[%s8101_s2 + $0x6a0] sm:$0xff]  }
  0x9b   :  { %5155 = vmatpush3.bf16.msra.mxu1 %v5803_v5  ;;  %v5832_v5 = vld [vmem:[%s8101_s2 + $0x5a0] sm:$0xff]  }
  0x9c   :  { %5156 = vmatprep.subr.bf16.mxu1 %v5806_v11  ;;  %v544_v11 = vcombine.low %v360_v63, %v363_v1  ;;  %v545_v12 = vcombine.low %v366_v4, %v369_v6  ;;  %v5866_v63 = vld [vmem:[%s8101_s2 + $0x628] sm:$0xff]   ;;  %v5871_v4 = vld [vmem:[%s8101_s2 + $0x6f0] sm:$0xff]   ;;  %v5873_v6 = vld [vmem:[%s8101_s2 + $0x678] sm:$0xff]  }
  0x9d   :  { %5135 = vmatpush3.bf16.msra.mxu0 %v5805_v9  ;;  %v543_v9 = vcombine.low %v354_v60, %v357_v62  ;;  %v5865_v60 = vld [vmem:[%s8101_s2 + $0x668] sm:$0xff]  }
  0x9e   :  { %5136 = vmatprep.subr.bf16.mxu0 %v5808_v15  ;;  %v5841_v15 = vld [vmem:[%s8101_s2 + $0x578] sm:$0xff]   ;;  %v566_v19 = vrot.slane %v544_v11, %v6297_v40  ;;  %v5868_v1 = vld [vmem:[%s8101_s2 + $0x6a8] sm:$0xff]  }
  0x9f   :  { %5157 = vmatpush3.bf16.msra.mxu1 %v5807_v14  ;;  %v5838_v14 = vld [vmem:[%s8101_s2 + $0x530] sm:$0xff]   ;;  %v5876_v11 = vld [vmem:[%s8101_s2 + $0x6b8] sm:$0xff]  }
  0xa0   :  { %5158 = vmatprep.subr.bf16.mxu1 %v5810_v18  ;;  %v559_v18 = vrot.slane %v543_v9, %v6297_v40  ;;  %v5877_v9 = vld [vmem:[%s8101_s2 + $0x740] sm:$0xff]  }
  0xa1   :  { %5137 = vmatpush3.bf16.msra.mxu0 %v5809_v20  ;;  %v573_v20 = vrot.slane %v545_v12, %v6297_v40 }
  0xa2   :  { %5166 = vmatprep.subr.bf16.mxu0 %v5813_v22  ;;  %v5842_v22 = vld [vmem:[%s8101_s2 + $0x538] sm:$0xff]  }
  0xa3   :  { %5159 = vmatpush3.bf16.msra.mxu1 %v5812_v24  ;;  %v5845_v24 = vld [vmem:[%s8101_s2 + $0x640] sm:$0xff]   ;;  %v575_v27 = vcombine.low %v566_v19, %v573_v20  ;;  %v5883_v19 = vld [vmem:[%s8101_s2 + $0x7c8] sm:$0xff]  }
  0xa4   :  { %5188 = vmatprep.subr.bf16.mxu1 %v5815_v26  ;;  %3487 = vmatmul.mubr.bf16.vlgmr.msra.gmra.mrb[16].mxu0 %v1491_v28  ;;  %v574_v26 = vcombine.low %v552_v17, %v559_v18  ;;  %v5847_v28 = vld [vmem:[%s8101_s2 + $0x6c0] sm:$0xff]   ;;  %v5882_v20 = vld [vmem:[%s8101_s2 + $0x708] sm:$0xff]  }
  0xa5   :  { %5167 = vmatpush3.bf16.msra.mxu0 %v5814_v31  ;;  %3566 = vmatprep.mubr.bf16.mxu0 %v1512_v37  ;;  %v5849_v31 = vld [vmem:[%s8101_s2 + $0x648] sm:$0xff]   ;;  %v5853_v37 = vld [vmem:[%s8101_s2 + $0x650] sm:$0xff]   ;;  %v5880_v17 = vld [vmem:[%s8101_s2 + $0x780] sm:$0xff]  }
  0xa6   :  { %3527 = vmatmul.mubr.bf16.vlgmr.msra.gmra.mrb[16].mxu1 %v1513_v33  ;;  %5168 = vmatprep.subr.bf16.mxu0 %v5817_v34  ;;  %v582_v33 = vrot.slane %v574_v26, %v6297_v40  ;;  %v589_v34 = vrot.slane %v575_v27, %v6297_v40  ;;  %v5888_v26 = vld [vmem:[%s8101_s2 + $0x790] sm:$0xff]  }
  0xa7   :  { %5189 = vmatpush3.bf16.msra.mxu1 %v5816_v36  ;;  %3606 = vmatprep.mubr.bf16.mxu1 %v1516_v41  ;;  %v5850_v36 = vld [vmem:[%s8101_s2 + $0x608] sm:$0xff]   ;;  %v5855_v41 = vld [vmem:[%s8101_s2 + $0x6d0] sm:$0xff]  }
  0xa8   :  { %5190 = vmatprep.subr.bf16.mxu1 %v5819_v38  ;;  %v5852_v38 = vld [vmem:[%s8101_s2 + $0x688] sm:$0xff]   ;;  %v41_v27 = vld [vmem:[%s8099_s0 + $0x10] sm:$0xff] }
  0xa9   :  { %5169 = vmatpush3.bf16.msra.mxu0 %v5818_v39  ;;  %v590_v39 = vcombine.low %v582_v33, %v589_v34 }
  0xaa   :  { %5170 = vmatprep.subr.bf16.mxu0 %v5821_v42  ;;  %v5854_v42 = vld [vmem:[%s8101_s2 + $0x610] sm:$0xff]  }
  0xab   :  { %5191 = vmatpush3.bf16.msra.mxu1 %v5820_v43  ;;  %v5857_v43 = vld [vmem:[%s8101_s2 + $0x658] sm:$0xff]  }
  0xac   :  { %5192 = vmatprep.subr.bf16.mxu1 %v5823_v44  ;;  %v835_v44 = vld [vmem:[#allocation2 + $0x18] sm:$0xff] }
  0xad   :  { %5171 = vmatpush3.bf16.msra.mxu0 %v5822_v45  ;;  %v5856_v45 = vld [vmem:[%s8101_s2 + $0x690] sm:$0xff]  }
  0xae   :  { %5172 = vmatprep.subr.bf16.mxu0 %v5825_v46  ;;  %v836_v46 = vsel %vm6348_vm14, %v590_v39, %v835_v44 }
  0xaf   :  { %5193 = vmatpush3.bf16.msra.mxu1 %v5824_v48  ;;  %837 = vst [vmem:[#allocation2 + $0x18] sm:$0xff] %v836_v46  ;;  %v1524_v48 = vrot.slane %v836_v46, %v6297_v40  ;;  %v1517_v62 = vcombine.high %v836_v46, %v836_v46 }
  0xb0   :  { %5194 = vmatprep.subr.bf16.mxu1 %v5827_v50  ;;  %v5861_v50 = vld [vmem:[%s8101_s2 + $0x660] sm:$0xff]  }
  0xb1   :  { %5173 = vmatpush3.bf16.msra.mxu0 %v5826_v53  ;;  %v1532_v52 = vcombine.high %v1524_v48, %v1524_v48  ;;  %v5860_v53 = vld [vmem:[%s8101_s2 + $0x698] sm:$0xff]   ;;  %v1540_v10 = vrot.slane %v1524_v48, %v6297_v40 }
  0xb2   :  { %5174 = vmatprep.subr.bf16.mxu0 %v5829_v57 }
  0xb3   :  { %5195 = vmatpush3.bf16.msra.mxu1 %v5828_v51  ;;  %v1554_v57 = vrot.slane %v1532_v52, %v6297_v40 }
  0xb4   :  { %5196 = vmatprep.subr.bf16.mxu1 %v5831_v56  ;;  %v5867_v56 = vld [vmem:[%s8101_s2 + $0x6e8] sm:$0xff]  }
  0xb5   :  { %5175 = vmatpush3.bf16.msra.mxu0 %v5830_v0  ;;  %v1564_v51 = vcombine.high %v1554_v57, %v1554_v57  ;;  %v5869_v0 = vld [vmem:[%s8101_s2 + $0x670] sm:$0xff]  }
  0xb6   :  { %5176 = vmatprep.subr.bf16.mxu0 %v5833_v3  ;;  %v7012_v3 = vrot.slane %v1517_v62, %v6297_v40 }
  0xb7   :  { %5197 = vmatpush3.bf16.msra.mxu1 %v5832_v5  ;;  %v5870_v5 = vld [vmem:[%s8101_s2 + $0x630] sm:$0xff]  }
  0xb8   :  { %5198 = vmatprep.subr.bf16.mxu1 %v5835_v55  ;;  %v5872_v55 = vld [vmem:[%s8101_s2 + $0x6b0] sm:$0xff]  }
  0xb9   :  { %5177 = vmatpush3.bf16.msra.mxu0 %v5834_v59  ;;  %v1533_v59 = vcombine.high %v7012_v3, %v7012_v3 }
  0xba   :  { %5178 = vmatprep.subr.bf16.mxu0 %v5837_v7  ;;  %v5875_v7 = vld [vmem:[%s8101_s2 + $0x6f8] sm:$0xff]  }
  0xbb   :  { %5199 = vmatpush3.bf16.msra.mxu1 %v5836_v8  ;;  %v5874_v8 = vld [vmem:[%s8101_s2 + $0x638] sm:$0xff]   ;;  %v1561_v12 = vrot.slane %v1533_v59, %v6297_v40 }
  0xbc   :  { %5200 = vmatprep.subr.bf16.mxu1 %v5839_v13  ;;  %v5879_v13 = vld [vmem:[%s8101_s2 + $0x7c0] sm:$0xff]  }
  0xbd   :  { %5179 = vmatpush3.bf16.msra.mxu0 %v5838_v14  ;;  %v5878_v14 = vld [vmem:[%s8101_s2 + $0x700] sm:$0xff]   ;;  %v1565_v18 = vcombine.high %v1561_v12, %v1561_v12 }
  0xbe   :  { %5180 = vmatprep.subr.bf16.mxu0 %v5841_v15  ;;  %v1562_v15 = vcombine.high %v1540_v10, %v1540_v10 }
  0xbf   :  { %5201 = vmatpush3.bf16.msra.mxu1 %v5840_v16  ;;  %v5881_v16 = vld [vmem:[%s8101_s2 + $0x748] sm:$0xff]  }
  0xc0   :  { %5202 = vmatprep.subr.bf16.mxu1 %v5843_v21  ;;  %v5885_v21 = vld [vmem:[%s8101_s2 + $0x750] sm:$0xff]  }
  0xc1   :  { %5181 = vmatpush3.bf16.msra.mxu0 %v5842_v22  ;;  %v5884_v22 = vld [vmem:[%s8101_s2 + $0x788] sm:$0xff]  }
  0xc2   :  { %5210 = vmatprep.subr.bf16.mxu0 %v5845_v24  ;;  %v5886_v24 = vld [vmem:[%s8101_s2 + $0x710] sm:$0xff]  }
  0xc3   :  { %5203 = vmatpush3.bf16.msra.mxu1 %v5844_v25  ;;  %v5889_v25 = vld [vmem:[%s8101_s2 + $0x758] sm:$0xff]  }
  0xc4   :  { %3567 = vmatmul.mubr.bf16.vlgmr.msra.gmra.mrb[20].mxu0 %v1498_v23  ;;  %5232 = vmatprep.subr.bf16.mxu1 %v5847_v28  ;;  %v5887_v23 = vld [vmem:[%s8101_s2 + $0x7d0] sm:$0xff]   ;;  %v5891_v28 = vld [vmem:[%s8101_s2 + $0x7d8] sm:$0xff]  }
  0xc5   :  { %5211 = vmatpush3.bf16.msra.mxu0 %v5846_v29  ;;  %3646 = vmatprep.mubr.bf16.mxu0 %v1554_v57  ;;  %v150_v29 = vcombine.high %v41_v27, %v41_v27 }
  0xc6   :  { %3607 = vmatmul.mubr.bf16.vlgmr.msra.gmra.mrb[20].mxu1 %v1514_v30  ;;  %5212 = vmatprep.subr.bf16.mxu0 %v5849_v31  ;;  %v157_v30 = vrot.slane %v41_v27, %v6297_v40  ;;  %v5890_v31 = vld [vmem:[%s8101_s2 + $0x718] sm:$0xff]  }
  0xc7   :  { %5233 = vmatpush3.bf16.msra.mxu1 %v5848_v32  ;;  %3686 = vmatprep.mubr.bf16.mxu1 %v1564_v51  ;;  %v5893_v32 = vld [vmem:[%s8101_s2 + $0x760] sm:$0xff]   ;;  %v164_v33 = vrot.slane %v150_v29, %v6297_v40 }
  0xc8   :  { %5234 = vmatprep.subr.bf16.mxu1 %v5851_v35  ;;  %v165_v34 = vcombine.high %v157_v30, %v157_v30  ;;  %v173_v35 = vrot.slane %v157_v30, %v6297_v40  ;;  %v5905_v30 = vld [vmem:[%s8101_s2 + $0x778] sm:$0xff]  }
  0xc9   :  { %5213 = vmatpush3.bf16.msra.mxu0 %v5850_v36  ;;  %v5892_v36 = vld [vmem:[%s8101_s2 + $0x798] sm:$0xff]   ;;  %v180_v39 = vrot.slane %v164_v33, %v6297_v40 }
  0xca   :  { %5214 = vmatprep.subr.bf16.mxu0 %v5853_v37  ;;  %v5895_v37 = vld [vmem:[%s8101_s2 + $0x7e0] sm:$0xff]   ;;  %v224_v44 = vshrl.u32 %v173_v35, 16 }
  0xcb   :  { %5235 = vmatpush3.bf16.msra.mxu1 %v5852_v38  ;;  %v166_v38 = vcombine.high %v164_v33, %v164_v33  ;;  %v236_v57 = vshrl.u32 %v180_v39, 16  ;;  %v5904_v33 = vld [vmem:[%s8101_s2 + $0x7b0] sm:$0xff]  }
  0xcc   :  { %5236 = vmatprep.subr.bf16.mxu1 %v5855_v41  ;;  %v187_v41 = vrot.slane %v165_v34, %v6297_v40  ;;  %v838_v34 = vld [vmem:[#allocation2 + $0x20] sm:$0xff] }
  0xcd   :  { %5215 = vmatpush3.bf16.msra.mxu0 %v5854_v42  ;;  %v195_v42 = vcombine.high %v173_v35, %v173_v35  ;;  %v194_v46 = vrot.slane %v166_v38, %v6297_v40 }
  0xce   :  { %5216 = vmatprep.subr.bf16.mxu0 %v5857_v43  ;;  %v5894_v43 = vld [vmem:[%s8101_s2 + $0x720] sm:$0xff]   ;;  %v4685_v48 = vcombine.high %v173_v35, %v187_v41  ;;  %v197_v52 = vcombine.high %v187_v41, %v187_v41 }
  0xcf   :  { %5237 = vmatpush3.bf16.msra.mxu1 %v5856_v45  ;;  %v5897_v45 = vld [vmem:[%s8101_s2 + $0x768] sm:$0xff]   ;;  %v4686_v51 = vcombine.high %v180_v39, %v194_v46 }
  0xd0   :  { %5238 = vmatprep.subr.bf16.mxu1 %v5859_v47  ;;  %v591_v47 = vcombine.low %v173_v35, %v187_v41  ;;  %v608_v62 = vrot.slane %v4685_v48, %v6297_v40 }
  0xd1   :  { %5217 = vmatpush3.bf16.msra.mxu0 %v5858_v49  ;;  %v196_v49 = vcombine.high %v180_v39, %v180_v39 }
  0xd2   :  { %5218 = vmatprep.subr.bf16.mxu0 %v5861_v50  ;;  %v5896_v50 = vld [vmem:[%s8101_s2 + $0x7a0] sm:$0xff]  }
  0xd3   :  { %5239 = vmatpush3.bf16.msra.mxu1 %v5860_v53  ;;  %v227_v53 = vshrl.u32 %v187_v41, 16 }
  0xd4   :  { %5240 = vmatprep.subr.bf16.mxu1 %v5863_v54  ;;  %v230_v54 = vshrl.u32 %v195_v42, 16 }
  0xd5   :  { %5219 = vmatpush3.bf16.msra.mxu0 %v5862_v58  ;;  %v5899_v58 = vld [vmem:[%s8101_s2 + $0x7e8] sm:$0xff]  }
  0xd6   :  { %5220 = vmatprep.subr.bf16.mxu0 %v5865_v60  ;;  %v593_v60 = vcombine.low %v180_v39, %v194_v46  ;;  %v5906_v39 = vld [vmem:[%s8101_s2 + $0x738] sm:$0xff]  }
  0xd7   :  { %5241 = vmatpush3.bf16.msra.mxu1 %v5864_v61  ;;  %v601_v61 = vrot.slane %v591_v47, %v6297_v40 }
  0xd8   :  { %5242 = vmatprep.subr.bf16.mxu1 %v5867_v56  ;;  %v615_v59 = vrot.slane %v593_v60, %v6297_v40 }
  0xd9   :  { %5221 = vmatpush3.bf16.msra.mxu0 %v5866_v63  ;;  %v5898_v63 = vld [vmem:[%s8101_s2 + $0x728] sm:$0xff]  }
  0xda   :  { %5222 = vmatprep.subr.bf16.mxu0 %v5869_v0  ;;  %v198_v0 = vcombine.high %v194_v46, %v194_v46 }
  0xdb   :  { %5243 = vmatpush3.bf16.msra.mxu1 %v5868_v1  ;;  %v233_v1 = vshrl.u32 %v197_v52, 16 }
  0xdc   :  { %5244 = vmatprep.subr.bf16.mxu1 %v5871_v4  ;;  %v239_v4 = vshrl.u32 %v194_v46, 16 }
  0xdd   :  { %5223 = vmatpush3.bf16.msra.mxu0 %v5870_v5  ;;  %v242_v5 = vshrl.u32 %v196_v49, 16  ;;  %v841_v49 = vld [vmem:[#allocation2 + $0x28] sm:$0xff] }
  0xde   :  { %5224 = vmatprep.subr.bf16.mxu0 %v5873_v6 }
  0xdf   :  { %5245 = vmatpush3.bf16.msra.mxu1 %v5872_v55  ;;  %v5901_v55 = vld [vmem:[%s8101_s2 + $0x770] sm:$0xff]  }
  0xe0   :  { %5246 = vmatprep.subr.bf16.mxu1 %v5875_v7  ;;  %v622_v7 = vrot.slane %v4686_v51, %v6297_v40  ;;  %v5922_v51 = vld [vmem:[%s8101_s2 + $0x48] sm:$0xff]  }
  0xe1   :  { %5225 = vmatpush3.bf16.msra.mxu0 %v5874_v8  ;;  %v623_v8 = vcombine.low %v601_v61, %v608_v62  ;;  %v5923_v61 = vld [vmem:[%s8101_s2 + $0x80] sm:$0xff]   ;;  %v5924_v62 = vld [vmem:[%s8101_s2 + $0xc8] sm:$0xff]  }
  0xe2   :  { %5254 = vmatprep.subr.bf16.mxu0 %v5877_v9 }
  0xe3   :  { %5247 = vmatpush3.bf16.msra.mxu1 %v5876_v11 }
  0xe4   :  { %3647 = vmatmul.mubr.bf16.vlgmr.msra.gmra.mrb[24].mxu0 %v1540_v10  ;;  %5276 = vmatprep.subr.bf16.mxu1 %v5879_v13  ;;  %v640_v10 = vcombine.low %v224_v44, %v227_v53  ;;  %v5900_v13 = vld [vmem:[%s8101_s2 + $0x7a8] sm:$0xff]  }
  0xe5   :  { %5255 = vmatpush3.bf16.msra.mxu0 %v5878_v14  ;;  %3726 = vmatprep.mubr.bf16.mxu0 %v1561_v12  ;;  %v245_v14 = vshrl.u32 %v198_v0, 16  ;;  %v5926_v0 = vld [vmem:[%s8101_s2 + $0x50] sm:$0xff]  }
  0xe6   :  { %3687 = vmatmul.mubr.bf16.vlgmr.msra.gmra.mrb[24].mxu1 %v1562_v15  ;;  %5256 = vmatprep.subr.bf16.mxu0 %v5881_v16  ;;  %v641_v15 = vcombine.low %v230_v54, %v233_v1  ;;  %v642_v16 = vcombine.low %v236_v57, %v239_v4  ;;  %v5920_v54 = vld [vmem:[%s8101_s2 + $0xc0] sm:$0xff]   ;;  %v5927_v1 = vld [vmem:[%s8101_s2 + $0x88] sm:$0xff]  }
  0xe7   :  { %5277 = vmatpush3.bf16.msra.mxu1 %v5880_v17  ;;  %3766 = vmatprep.mubr.bf16.mxu1 %v1565_v18 }
  0xe8   :  { %5278 = vmatprep.subr.bf16.mxu1 %v5883_v19  ;;  %v5903_v19 = vld [vmem:[%s8101_s2 + $0x7f0] sm:$0xff]   ;;  %v657_v27 = vrot.slane %v641_v15, %v6297_v40  ;;  %v5933_v15 = vld [vmem:[%s8101_s2 + $0x18] sm:$0xff]  }
  0xe9   :  { %5257 = vmatpush3.bf16.msra.mxu0 %v5882_v20  ;;  %v624_v20 = vcombine.low %v615_v59, %v622_v7  ;;  %v5930_v7 = vld [vmem:[%s8101_s2 + $0x58] sm:$0xff]  }
  0xea   :  { %5258 = vmatprep.subr.bf16.mxu0 %v5885_v21  ;;  %v631_v21 = vrot.slane %v623_v8, %v6297_v40 }
  0xeb   :  { %5279 = vmatpush3.bf16.msra.mxu1 %v5884_v22  ;;  %v650_v22 = vrot.slane %v640_v10, %v6297_v40  ;;  %v5931_v10 = vld [vmem:[%s8101_s2 + $0x90] sm:$0xff]  }
  0xec   :  { %5280 = vmatprep.subr.bf16.mxu1 %v5887_v23 }
  0xed   :  { %5259 = vmatpush3.bf16.msra.mxu0 %v5886_v24 }
  0xee   :  { %5260 = vmatprep.subr.bf16.mxu0 %v5889_v25  ;;  %v5902_v25 = vld [vmem:[%s8101_s2 + $0x730] sm:$0xff]  }
  0xef   :  { %5281 = vmatpush3.bf16.msra.mxu1 %v5888_v26  ;;  %v643_v26 = vcombine.low %v242_v5, %v245_v14  ;;  %v5928_v5 = vld [vmem:[%s8101_s2 + $0xd0] sm:$0xff]  }
  0xf0   :  { %5282 = vmatprep.subr.bf16.mxu1 %v5891_v28  ;;  %v664_v28 = vrot.slane %v642_v16, %v6297_v40 }
  0xf1   :  { %5261 = vmatpush3.bf16.msra.mxu0 %v5890_v31  ;;  %v638_v31 = vrot.slane %v624_v20, %v6297_v40  ;;  %v671_v35 = vrot.slane %v643_v26, %v6297_v40  ;;  %v5935_v20 = vld [vmem:[%s8101_s2 + $0x98] sm:$0xff]  }
  0xf2   :  { %5262 = vmatprep.subr.bf16.mxu0 %v5893_v32 }
  0xf3   :  { %5283 = vmatpush3.bf16.msra.mxu1 %v5892_v36  ;;  %v672_v36 = vcombine.low %v650_v22, %v657_v27  ;;  %v639_v38 = vcombine.low %v631_v21, %v638_v31  ;;  %v673_v41 = vcombine.low %v664_v28, %v671_v35  ;;  %v5937_v27 = vld [vmem:[%s8101_s2 + $0x20] sm:$0xff]  }
  0xf4   :  { %5284 = vmatprep.subr.bf16.mxu1 %v5895_v37  ;;  %v5907_v37 = vld [vmem:[%s8101_s2 + $0x7f8] sm:$0xff]   ;;  %v5939_v35 = vld [vmem:[%s8101_s2 + $0xa0] sm:$0xff]  }
  0xf5   :  { %5263 = vmatpush3.bf16.msra.mxu0 %v5894_v43  ;;  %v680_v42 = vrot.slane %v672_v36, %v6297_v40  ;;  %v1547_v43 = vrot.slane %v7012_v3, %v6297_v40  ;;  %v7158_v44 = vsel %vm6348_vm14, %v639_v38, %v838_v34  ;;  %v687_v47 = vrot.slane %v673_v41, %v6297_v40 }
  0xf6   :  { %5264 = vmatprep.subr.bf16.mxu0 %v5897_v45  ;;  %v7163_v45 = vld [vmem:[%s8101_s2 + $0x7b8] sm:$0xff]   ;;  %840 = vst [vmem:[#allocation2 + $0x20] sm:$0xff] %v7158_v44  ;;  %v7168_v46 = vrot.slane %v7158_v44, %v6297_v40  ;;  %v3790_v21 = vcombine.high %v7158_v44, %v7158_v44  ;;  %v5940_v44 = vld [vmem:[%s8101_s2 + $0xe8] sm:$0xff]  }
  0xf7   :  { %v4962_v56 = vpop.f32.mrb[0].mxu0  ;;  %5285 = vmatpush3.bf16.msra.mxu1 %v5896_v50  ;;  %v688_v48 = vcombine.low %v680_v42, %v687_v47  ;;  %v5919_v50 = vld [vmem:[%s8101_s2 + $0x40] sm:$0xff]   ;;  %v1563_v52 = vcombine.high %v1547_v43, %v1547_v43 }
  0xf8   :  { %v4963_v6 = vpop.f32.mrb[1].mxu0  ;;  %5286 = vmatprep.subr.bf16.mxu1 %v5899_v58  ;;  %v3805_v3 = vcombine.high %v7168_v46, %v7168_v46  ;;  %v5921_v58 = vld [vmem:[%s8101_s2] sm:$0xff]  }
  0xf9   :  { %v4964_v9 = vadd.f32 %v4963_v6, %v4962_v56  ;;  %v4965_v11 = vpop.f32.mrb[2].mxu0  ;;  %v4984_v12 = vpop.f32.mrb[0].mxu1  ;;  %5265 = vmatpush3.bf16.msra.mxu0 %v5898_v63  ;;  %v7183_v57 = vsel %vm6348_vm14, %v688_v48, %v841_v49  ;;  %v5925_v56 = vld [vmem:[%s8101_s2 + $0x8] sm:$0xff]   ;;  %v4680_v63 = vld [vmem:[%s8100_s1 + $0x18] sm:$0xff] }
  0xfa   :  { %v4966_v17 = vpop.f32.mrb[3].mxu0  ;;  %v4985_v18 = vpop.f32.mrb[1].mxu1  ;;  %5266 = vmatprep.subr.bf16.mxu0 %v5901_v55  ;;  %v3827_v53 = vrot.slane %v3805_v3, %v6297_v40  ;;  %843 = vst [vmem:[#allocation2 + $0x28] sm:$0xff] %v7183_v57  ;;  %v298_v4 = vcombine.high %v4680_v63, %v4680_v63  ;;  %v305_v6 = vrot.slane %v4680_v63, %v6297_v40  ;;  %v5929_v55 = vld [vmem:[%s8101_s2 + $0x10] sm:$0xff]   ;;  %v5932_v11 = vld [vmem:[%s8101_s2 + $0xd8] sm:$0xff]   ;;  %v5941_v48 = vld [vmem:[%s8101_s2 + $0x28] sm:$0xff]  }
  0xfb   :  { %v4986_v23 = vadd.f32 %v4985_v18, %v4984_v12  ;;  %v4987_v24 = vpop.f32.mrb[2].mxu1  ;;  %5287 = vmatpush3.bf16.msra.mxu1 %v5900_v13  ;;  %v5934_v17 = vld [vmem:[%s8101_s2 + $0x60] sm:$0xff]  }
  0xfc   :  { %v4988_v29 = vpop.f32.mrb[3].mxu1  ;;  %5288 = vmatprep.subr.bf16.mxu1 %v5903_v19  ;;  %v3837_v60 = vcombine.high %v3827_v53, %v3827_v53  ;;  %v312_v59 = vrot.slane %v298_v4, %v6297_v40  ;;  %v313_v8 = vcombine.high %v305_v6, %v305_v6  ;;  %v7228_v12 = vrot.slane %v305_v6, %v6297_v40  ;;  %v5936_v24 = vld [vmem:[%s8101_s2 + $0xe0] sm:$0xff]   ;;  %v5947_v4 = vld [vmem:[%s8101_s2 + $0xb0] sm:$0xff]   ;;  %v5948_v6 = vld [vmem:[%s8101_s2 + $0xf8] sm:$0xff]  }
  0xfd   :  { %v7141_v32 = vadd.f32 %v4986_v23, %v4964_v9  ;;  %5267 = vmatpush3.bf16.msra.mxu0 %v5902_v25 }
  0xfe   :  { %5268 = vmatprep.subr.bf16.mxu0 %v5905_v30  ;;  %v314_v9 = vcombine.high %v312_v59, %v312_v59  ;;  %v7231_v13 = vrot.slane %v312_v59, %v6297_v40  ;;  %v7234_v14 = vrot.slane %v313_v8, %v6297_v40 }
  0xff   :  { %5289 = vmatpush3.bf16.msra.mxu1 %v5904_v33  ;;  %v5938_v33 = vld [vmem:[%s8101_s2 + $0x68] sm:$0xff]  }
 0x100   :  { %5290 = vmatprep.subr.bf16.mxu1 %v5907_v37  ;;  %v7240_v16 = vrot.slane %v314_v9, %v6297_v40  ;;  %v689_v18 = vcombine.low %v7228_v12, %v7234_v14  ;;  %v4687_v19 = vcombine.high %v7228_v12, %v7234_v14  ;;  %v5953_v9 = vld [vmem:[%s8101_s2 + $0x100] sm:$0xff]  }
 0x101   :  { %5269 = vmatpush3.bf16.msra.mxu0 %v5906_v39  ;;  %v7275_v39 = vrot.slane %v3790_v21, %v6297_v40  ;;  %v5960_v21 = vld [vmem:[%s8101_s2 + $0x1d0] sm:$0xff]  }
 0x102   :  { %5298 = vmatprep.subr.bf16.mxu0 %v5919_v50  ;;  %v691_v22 = vcombine.low %v7231_v13, %v7240_v16  ;;  %v4688_v23 = vcombine.high %v7231_v13, %v7240_v16  ;;  %v699_v25 = vrot.slane %v689_v18, %v6297_v40  ;;  %v706_v26 = vrot.slane %v4687_v19, %v6297_v40  ;;  %v5957_v18 = vld [vmem:[%s8101_s2 + $0x108] sm:$0xff]   ;;  %v5958_v19 = vld [vmem:[%s8101_s2 + $0x150] sm:$0xff]  }
 0x103   :  { %5291 = vmatpush3.bf16.msra.mxu1 %v7163_v45 }
 0x104   :  { %3727 = vmatmul.mubr.bf16.vlgmr.msra.gmra.mrb[28].mxu0 %v1547_v43  ;;  %5320 = vmatprep.subr.bf16.mxu1 %v5920_v54  ;;  %v713_v29 = vrot.slane %v691_v22, %v6297_v40  ;;  %v720_v30 = vrot.slane %v4688_v23, %v6297_v40  ;;  %v721_v34 = vcombine.low %v699_v25, %v706_v26  ;;  %v5942_v54 = vld [vmem:[%s8101_s2 + $0x70] sm:$0xff]   ;;  %v5962_v23 = vld [vmem:[%s8101_s2 + $0x158] sm:$0xff]  }
 0x105   :  { %5299 = vmatpush3.bf16.msra.mxu0 %v5921_v58  ;;  %4050 = vmatprep.mubr.bf16.mxu0 %v3827_v53  ;;  %v5961_v22 = vld [vmem:[%s8101_s2 + $0x110] sm:$0xff]   ;;  %v5964_v25 = vld [vmem:[%s8101_s2 + $0x1d8] sm:$0xff]  }
 0x106   :  { %3767 = vmatmul.mubr.bf16.vlgmr.msra.gmra.mrb[28].mxu1 %v1563_v52  ;;  %5300 = vmatprep.subr.bf16.mxu0 %v5922_v51  ;;  %v722_v41 = vcombine.low %v713_v29, %v720_v30  ;;  %v729_v47 = vrot.slane %v721_v34, %v6297_v40  ;;  %v5965_v26 = vld [vmem:[%s8101_s2 + $0x118] sm:$0xff]   ;;  %v5968_v29 = vld [vmem:[%s8101_s2 + $0x1e0] sm:$0xff]   ;;  %v5970_v34 = vld [vmem:[%s8101_s2 + $0x168] sm:$0xff]  }
 0x107   :  { %5321 = vmatpush3.bf16.msra.mxu1 %v5923_v61  ;;  %4090 = vmatprep.mubr.bf16.mxu1 %v3837_v60  ;;  %v3806_v60 = vcombine.high %v7275_v39, %v7275_v39  ;;  %v844_v61 = vld [vmem:[#allocation2 + $0x30] sm:$0xff]  ;;  %v5969_v30 = vld [vmem:[%s8101_s2 + $0x120] sm:$0xff]  }
 0x108   :  { %5322 = vmatprep.subr.bf16.mxu1 %v5924_v62  ;;  %v736_v52 = vrot.slane %v722_v41, %v6297_v40  ;;  %v5944_v62 = vld [vmem:[%s8101_s2 + $0xf0] sm:$0xff]   ;;  %v7390_v41 = vrot.slane %v7183_v57, %v6297_v40 }
 0x109   :  { %5301 = vmatpush3.bf16.msra.mxu0 %v5925_v56  ;;  %v5945_v56 = vld [vmem:[%s8101_s2 + $0x30] sm:$0xff]  }
 0x10a   :  { %5302 = vmatprep.subr.bf16.mxu0 %v5926_v0  ;;  %v737_v51 = vcombine.low %v729_v47, %v736_v52  ;;  %v5946_v0 = vld [vmem:[%s8101_s2 + $0x78] sm:$0xff]   ;;  %v5974_v52 = vld [vmem:[%s8101_s2 + $0x170] sm:$0xff]  }
 0x10b   :  { %5323 = vmatpush3.bf16.msra.mxu1 %v5927_v1  ;;  %v3813_v1 = vrot.slane %v7168_v46, %v6297_v40  ;;  %v5950_v46 = vld [vmem:[%s8101_s2 + $0x140] sm:$0xff]  }
 0x10c   :  { %5324 = vmatprep.subr.bf16.mxu1 %v5928_v5  ;;  %v7304_v63 = vsel %vm6348_vm14, %v737_v51, %v844_v61  ;;  %v3834_v5 = vrot.slane %v3806_v60, %v6297_v40  ;;  %v5977_v60 = vld [vmem:[%s8101_s2 + $0x130] sm:$0xff]   ;;  %v5978_v51 = vld [vmem:[%s8101_s2 + $0x178] sm:$0xff]   ;;  %v3820_v61 = vrot.slane %v7275_v39, %v6297_v40  ;;  %v5982_v39 = vld [vmem:[%s8101_s2 + $0x240] sm:$0xff]  }
 0x10d   :  { %5303 = vmatpush3.bf16.msra.mxu0 %v5929_v55  ;;  %846 = vst [vmem:[#allocation2 + $0x30] sm:$0xff] %v7304_v63  ;;  %v5949_v55 = vld [vmem:[%s8101_s2 + $0x38] sm:$0xff]   ;;  %v3835_v59 = vcombine.high %v3813_v1, %v3813_v1 }
 0x10e   :  { %5304 = vmatprep.subr.bf16.mxu0 %v5930_v7  ;;  %v5951_v7 = vld [vmem:[%s8101_s2 + $0xb8] sm:$0xff]   ;;  %v3838_v8 = vcombine.high %v3834_v5, %v3834_v5 }
 0x10f   :  { %5325 = vmatpush3.bf16.msra.mxu1 %v5931_v10  ;;  %v5952_v10 = vld [vmem:[%s8101_s2 + $0x1c0] sm:$0xff]  }
 0x110   :  { %5326 = vmatprep.subr.bf16.mxu1 %v5932_v11  ;;  %v5954_v11 = vld [vmem:[%s8101_s2 + $0x148] sm:$0xff]  }
 0x111   :  { %5305 = vmatpush3.bf16.msra.mxu0 %v5933_v15  ;;  %v5955_v15 = vld [vmem:[%s8101_s2 + $0x180] sm:$0xff]  }
 0x112   :  { %5306 = vmatprep.subr.bf16.mxu0 %v5934_v17  ;;  %v5956_v17 = vld [vmem:[%s8101_s2 + $0x1c8] sm:$0xff]  }
 0x113   :  { %5327 = vmatpush3.bf16.msra.mxu1 %v5935_v20  ;;  %v5959_v20 = vld [vmem:[%s8101_s2 + $0x188] sm:$0xff]  }
 0x114   :  { %5328 = vmatprep.subr.bf16.mxu1 %v5936_v24  ;;  %v5963_v24 = vld [vmem:[%s8101_s2 + $0x190] sm:$0xff]  }
 0x115   :  { %5307 = vmatpush3.bf16.msra.mxu0 %v5937_v27  ;;  %v5966_v27 = vld [vmem:[%s8101_s2 + $0x160] sm:$0xff]  }
 0x116   :  { %5308 = vmatprep.subr.bf16.mxu0 %v5938_v33 }
 0x117   :  { %v5006_v28 = vpop.f32.mrb[4].mxu0  ;;  %5329 = vmatpush3.bf16.msra.mxu1 %v5939_v35  ;;  %v5971_v35 = vld [vmem:[%s8101_s2 + $0x1a0] sm:$0xff]  }
 0x118   :  { %v5007_v31 = vpop.f32.mrb[5].mxu0  ;;  %5330 = vmatprep.subr.bf16.mxu1 %v5940_v44  ;;  %v5972_v44 = vld [vmem:[%s8101_s2 + $0x1e8] sm:$0xff]  }
 0x119   :  { %v5008_v36 = vadd.f32 %v5007_v31, %v5006_v28  ;;  %v5009_v37 = vpop.f32.mrb[6].mxu0  ;;  %v5028_v38 = vpop.f32.mrb[4].mxu1  ;;  %5309 = vmatpush3.bf16.msra.mxu0 %v5941_v48  ;;  %v5967_v28 = vld [vmem:[%s8101_s2 + $0x198] sm:$0xff]  }
 0x11a   :  { %v5010_v42 = vpop.f32.mrb[7].mxu0  ;;  %v5029_v43 = vpop.f32.mrb[5].mxu1  ;;  %5310 = vmatprep.subr.bf16.mxu0 %v5942_v54  ;;  %v5975_v54 = vld [vmem:[%s8101_s2 + $0x1a8] sm:$0xff]  }
 0x11b   :  { %v3249_v3 = vadd.f32 %v5008_v36, %v7141_v32  ;;  %v5030_v49 = vadd.f32 %v5029_v43, %v5028_v38  ;;  %v5031_v50 = vpop.f32.mrb[6].mxu1  ;;  %v5943_v32 = vld [vmem:[%s8101_s2 + $0xa8] sm:$0xff]  }
 0x11c   :  { %v5032_v53 = vpop.f32.mrb[7].mxu1  ;;  %5331 = vmatpush3.bf16.msra.mxu1 %v5943_v32  ;;  %v5976_v32 = vld [vmem:[%s8101_s2 + $0x1f0] sm:$0xff]  }
 0x11d   :  { %v7289_v58 = vadd.f32 %v5030_v49, %v3249_v3  ;;  %5332 = vmatprep.subr.bf16.mxu1 %v5944_v62  ;;  %5311 = vmatpush3.bf16.msra.mxu0 %v5945_v56  ;;  %v5973_v3 = vld [vmem:[%s8101_s2 + $0x128] sm:$0xff]   ;;  %v5979_v62 = vld [vmem:[%s8101_s2 + $0x1b0] sm:$0xff]  }
 0x11e   :  { %5312 = vmatprep.subr.bf16.mxu0 %v5946_v0  ;;  %v5980_v0 = vld [vmem:[%s8101_s2 + $0x1f8] sm:$0xff]  }
 0x120   :  { %5333 = vmatpush3.bf16.msra.mxu1 %v5947_v4  ;;  %v3836_v4 = vcombine.high %v3820_v61, %v3820_v61 }
 0x121   :  { %5334 = vmatprep.subr.bf16.mxu1 %v5948_v6  ;;  %5313 = vmatpush3.bf16.msra.mxu0 %v5949_v55  ;;  %v5984_v55 = vld [vmem:[%s8101_s2 + $0x2c0] sm:$0xff]  }
 0x122   :  { %5342 = vmatprep.subr.bf16.mxu0 %v5950_v46  ;;  %v5985_v46 = vld [vmem:[%s8101_s2 + $0x200] sm:$0xff]  }
 0x124   :  { %5335 = vmatpush3.bf16.msra.mxu1 %v5951_v7  ;;  %4051 = vmatmul.mubr.bf16.vlgmr.msra.gmra.mrb[32].mxu0 %v3813_v1  ;;  %v5981_v1 = vld [vmem:[%s8101_s2 + $0x138] sm:$0xff]   ;;  %v5987_v7 = vld [vmem:[%s8101_s2 + $0x280] sm:$0xff]  }
 0x125   :  { %5364 = vmatprep.subr.bf16.mxu1 %v5952_v10  ;;  %5343 = vmatpush3.bf16.msra.mxu0 %v5953_v9  ;;  %v5989_v10 = vld [vmem:[%s8101_s2 + $0x208] sm:$0xff]   ;;  %v5990_v9 = vld [vmem:[%s8101_s2 + $0x250] sm:$0xff]  }
 0x126   :  { %4130 = vmatprep.mubr.bf16.mxu0 %v3834_v5  ;;  %5344 = vmatprep.subr.bf16.mxu0 %v5954_v11  ;;  %v5983_v5 = vld [vmem:[%s8101_s2 + $0x1b8] sm:$0xff]   ;;  %v5991_v11 = vld [vmem:[%s8101_s2 + $0x288] sm:$0xff]  }
 0x127   :  { %4091 = vmatmul.mubr.bf16.vlgmr.msra.gmra.mrb[32].mxu1 %v3835_v59  ;;  %v5986_v59 = vld [vmem:[%s8101_s2 + $0x248] sm:$0xff]  }
 0x128   :  { %5365 = vmatpush3.bf16.msra.mxu1 %v5955_v15  ;;  %4170 = vmatprep.mubr.bf16.mxu1 %v3838_v8  ;;  %v5988_v8 = vld [vmem:[%s8101_s2 + $0x2c8] sm:$0xff]   ;;  %v5992_v15 = vld [vmem:[%s8101_s2 + $0x2d0] sm:$0xff]  }
 0x129   :  { %5366 = vmatprep.subr.bf16.mxu1 %v5956_v17  ;;  %5345 = vmatpush3.bf16.msra.mxu0 %v5957_v18  ;;  %v5993_v17 = vld [vmem:[%s8101_s2 + $0x210] sm:$0xff]   ;;  %v5994_v18 = vld [vmem:[%s8101_s2 + $0x258] sm:$0xff]  }
 0x12a   :  { %5346 = vmatprep.subr.bf16.mxu0 %v5958_v19  ;;  %v343_v19 = vcombine.high %v7228_v12, %v7228_v12 }
 0x12c   :  { %5367 = vmatpush3.bf16.msra.mxu1 %v5959_v20  ;;  %v344_v20 = vcombine.high %v7231_v13, %v7231_v13 }
 0x12d   :  { %5368 = vmatprep.subr.bf16.mxu1 %v5960_v21  ;;  %5347 = vmatpush3.bf16.msra.mxu0 %v5961_v22  ;;  %v345_v21 = vcombine.high %v7234_v14, %v7234_v14  ;;  %v346_v22 = vcombine.high %v7240_v16, %v7240_v16 }
 0x12e   :  { %5348 = vmatprep.subr.bf16.mxu0 %v5962_v23  ;;  %v5995_v23 = vld [vmem:[%s8101_s2 + $0x290] sm:$0xff]  }
 0x130   :  { %5369 = vmatpush3.bf16.msra.mxu1 %v5963_v24  ;;  %v5996_v24 = vld [vmem:[%s8101_s2 + $0x2d8] sm:$0xff]  }
 0x131   :  { %5370 = vmatprep.subr.bf16.mxu1 %v5964_v25  ;;  %5349 = vmatpush3.bf16.msra.mxu0 %v5965_v26  ;;  %v372_v25 = vshrl.u32 %v7228_v12, 16  ;;  %v375_v26 = vshrl.u32 %v7234_v14, 16 }
 0x132   :  { %5350 = vmatprep.subr.bf16.mxu0 %v5966_v27  ;;  %v378_v27 = vshrl.u32 %v343_v19, 16  ;;  %v6011_v19 = vld [vmem:[%s8101_s2 + $0x2b0] sm:$0xff]  }
 0x133   :  { %v738_v12 = vcombine.low %v372_v25, %v375_v26  ;;  %v6016_v25 = vld [vmem:[%s8101_s2 + $0x3c0] sm:$0xff]  }
 0x134   :  { %5371 = vmatpush3.bf16.msra.mxu1 %v5967_v28  ;;  %v381_v28 = vshrl.u32 %v345_v21, 16  ;;  %v6013_v21 = vld [vmem:[%s8101_s2 + $0x238] sm:$0xff]   ;;  %v6017_v26 = vld [vmem:[%s8101_s2 + $0x300] sm:$0xff]  }
 0x135   :  { %5372 = vmatprep.subr.bf16.mxu1 %v5968_v29  ;;  %5351 = vmatpush3.bf16.msra.mxu0 %v5969_v30  ;;  %v5997_v29 = vld [vmem:[%s8101_s2 + $0x218] sm:$0xff]   ;;  %v384_v30 = vshrl.u32 %v7231_v13, 16 }
 0x136   :  { %5352 = vmatprep.subr.bf16.mxu0 %v5970_v34  ;;  %v393_v34 = vshrl.u32 %v346_v22, 16  ;;  %v739_v14 = vcombine.low %v378_v27, %v381_v28  ;;  %v6018_v27 = vld [vmem:[%s8101_s2 + $0x348] sm:$0xff]   ;;  %v6019_v28 = vld [vmem:[%s8101_s2 + $0x380] sm:$0xff]  }
 0x137   :  { %v5050_v31 = vpop.f32.mrb[8].mxu0 }
 0x138   :  { %v5051_v33 = vpop.f32.mrb[9].mxu0  ;;  %5373 = vmatpush3.bf16.msra.mxu1 %v5971_v35  ;;  %v5998_v35 = vld [vmem:[%s8101_s2 + $0x260] sm:$0xff]  }
 0x139   :  { %v5052_v36 = vadd.f32 %v5051_v33, %v5050_v31  ;;  %v5053_v37 = vpop.f32.mrb[10].mxu0  ;;  %v5072_v38 = vpop.f32.mrb[8].mxu1  ;;  %5374 = vmatprep.subr.bf16.mxu1 %v5972_v44  ;;  %5353 = vmatpush3.bf16.msra.mxu0 %v5973_v3  ;;  %v387_v31 = vshrl.u32 %v7240_v16, 16  ;;  %v390_v33 = vshrl.u32 %v344_v20, 16  ;;  %v6000_v16 = vld [vmem:[%s8101_s2 + $0x2e0] sm:$0xff]  }
 0x13a   :  { %v5054_v42 = vpop.f32.mrb[11].mxu0  ;;  %v5073_v43 = vpop.f32.mrb[9].mxu1  ;;  %5354 = vmatprep.subr.bf16.mxu0 %v5974_v52  ;;  %v3839_v37 = vcombine.high %v7183_v57, %v7183_v57  ;;  %v6001_v44 = vld [vmem:[%s8101_s2 + $0x220] sm:$0xff]  }
 0x13b   :  { %v3329_v47 = vadd.f32 %v5052_v36, %v7289_v58  ;;  %v5074_v48 = vadd.f32 %v5073_v43, %v5072_v38  ;;  %v5075_v49 = vpop.f32.mrb[10].mxu1  ;;  %v3854_v58 = vcombine.high %v7390_v41, %v7390_v41  ;;  %v5999_v36 = vld [vmem:[%s8101_s2 + $0x298] sm:$0xff]   ;;  %v740_v13 = vcombine.low %v384_v30, %v387_v31  ;;  %v6003_v52 = vld [vmem:[%s8101_s2 + $0x2a0] sm:$0xff]   ;;  %v6021_v30 = vld [vmem:[%s8101_s2 + $0x308] sm:$0xff]  }
 0x13c   :  { %v5076_v50 = vpop.f32.mrb[11].mxu1  ;;  %5375 = vmatpush3.bf16.msra.mxu1 %v5975_v54  ;;  %v741_v38 = vcombine.low %v390_v33, %v393_v34  ;;  %v748_v42 = vrot.slane %v738_v12, %v6297_v40  ;;  %v755_v43 = vrot.slane %v739_v14, %v6297_v40  ;;  %v6002_v49 = vld [vmem:[%s8101_s2 + $0x268] sm:$0xff]   ;;  %v6022_v31 = vld [vmem:[%s8101_s2 + $0x350] sm:$0xff]   ;;  %v6026_v12 = vld [vmem:[%s8101_s2 + $0x358] sm:$0xff]  }
 0x13d   :  { %v7402_v53 = vadd.f32 %v5074_v48, %v3329_v47  ;;  %5376 = vmatprep.subr.bf16.mxu1 %v5976_v32  ;;  %5355 = vmatpush3.bf16.msra.mxu0 %v5977_v60  ;;  %v3876_v56 = vrot.slane %v3854_v58, %v6297_v40  ;;  %v762_v3 = vrot.slane %v740_v13, %v6297_v40  ;;  %v6023_v33 = vld [vmem:[%s8101_s2 + $0x388] sm:$0xff]   ;;  %v6024_v34 = vld [vmem:[%s8101_s2 + $0x3d0] sm:$0xff]   ;;  %v6030_v13 = vld [vmem:[%s8101_s2 + $0x360] sm:$0xff]  }
 0x13e   :  { %5356 = vmatprep.subr.bf16.mxu0 %v5978_v51  ;;  %v769_v57 = vrot.slane %v741_v38, %v6297_v40  ;;  %v770_v50 = vcombine.low %v748_v42, %v755_v43  ;;  %v7515_v60 = vrot.slane %v3839_v37, %v6297_v40  ;;  %v6027_v14 = vld [vmem:[%s8101_s2 + $0x390] sm:$0xff]   ;;  %v6029_v37 = vld [vmem:[%s8101_s2 + $0x318] sm:$0xff]   ;;  %v6033_v42 = vld [vmem:[%s8101_s2 + $0x320] sm:$0xff]  }
 0x13f   :  { %v3886_v6 = vcombine.high %v3876_v56, %v3876_v56  ;;  %v6031_v38 = vld [vmem:[%s8101_s2 + $0x398] sm:$0xff]   ;;  %v6034_v43 = vld [vmem:[%s8101_s2 + $0x368] sm:$0xff]  }
 0x140   :  { %5377 = vmatpush3.bf16.msra.mxu1 %v5979_v62  ;;  %v771_v51 = vcombine.low %v762_v3, %v769_v57  ;;  %v7630_v3 = vrot.slane %v7304_v63, %v6297_v40 }
 0x141   :  { %5378 = vmatprep.subr.bf16.mxu1 %v5980_v0  ;;  %5357 = vmatpush3.bf16.msra.mxu0 %v5981_v1  ;;  %v778_v0 = vrot.slane %v770_v50, %v6297_v40 }
 0x142   :  { %5386 = vmatprep.subr.bf16.mxu0 %v5982_v39  ;;  %v6005_v39 = vld [vmem:[%s8101_s2 + $0x228] sm:$0xff]  }
 0x144   :  { %5379 = vmatpush3.bf16.msra.mxu1 %v5983_v5  ;;  %4131 = vmatmul.mubr.bf16.vlgmr.msra.gmra.mrb[36].mxu0 %v3820_v61 }
 0x145   :  { %5408 = vmatprep.subr.bf16.mxu1 %v5984_v55  ;;  %5387 = vmatpush3.bf16.msra.mxu0 %v5985_v46  ;;  %v6006_v46 = vld [vmem:[%s8101_s2 + $0x270] sm:$0xff]  }
 0x146   :  { %4210 = vmatprep.mubr.bf16.mxu0 %v3876_v56  ;;  %5388 = vmatprep.subr.bf16.mxu0 %v5986_v59  ;;  %v6004_v56 = vld [vmem:[%s8101_s2 + $0x2e8] sm:$0xff]  }
 0x147   :  { %4171 = vmatmul.mubr.bf16.vlgmr.msra.gmra.mrb[36].mxu1 %v3836_v4 }
 0x148   :  { %5409 = vmatpush3.bf16.msra.mxu1 %v5987_v7  ;;  %4250 = vmatprep.mubr.bf16.mxu1 %v3886_v6  ;;  %v785_v6 = vrot.slane %v771_v51, %v6297_v40  ;;  %v3855_v7 = vcombine.high %v7515_v60, %v7515_v60  ;;  %v6038_v51 = vld [vmem:[%s8101_s2 + $0x370] sm:$0xff]  }
 0x149   :  { %5410 = vmatprep.subr.bf16.mxu1 %v5988_v8  ;;  %5389 = vmatpush3.bf16.msra.mxu0 %v5989_v10  ;;  %v847_v10 = vld [vmem:[#allocation2 + $0x38] sm:$0xff] }
 0x14a   :  { %5390 = vmatprep.subr.bf16.mxu0 %v5990_v9  ;;  %v786_v8 = vcombine.low %v778_v0, %v785_v6  ;;  %v6008_v9 = vld [vmem:[%s8101_s2 + $0x2f0] sm:$0xff]   ;;  %v3883_v20 = vrot.slane %v3855_v7, %v6297_v40  ;;  %v6039_v0 = vld [vmem:[%s8101_s2 + $0x3a8] sm:$0xff]   ;;  %v6044_v7 = vld [vmem:[%s8101_s2 + $0x3f8] sm:$0xff]  }
 0x14b   :  { %v6041_v6 = vld [vmem:[%s8101_s2 + $0x330] sm:$0xff]  }
 0x14c   :  { %5411 = vmatpush3.bf16.msra.mxu1 %v5991_v11  ;;  %v6009_v11 = vld [vmem:[%s8101_s2 + $0x230] sm:$0xff]  }
 0x14d   :  { %5412 = vmatprep.subr.bf16.mxu1 %v5992_v15  ;;  %5391 = vmatpush3.bf16.msra.mxu0 %v5993_v17  ;;  %v7544_v15 = vsel %vm6348_vm14, %v786_v8, %v847_v10  ;;  %v6010_v17 = vld [vmem:[%s8101_s2 + $0x278] sm:$0xff]  }
 0x14e   :  { %5392 = vmatprep.subr.bf16.mxu0 %v5994_v18  ;;  %v3862_v18 = vrot.slane %v7390_v41, %v6297_v40  ;;  %849 = vst [vmem:[#allocation2 + $0x38] sm:$0xff] %v7544_v15  ;;  %v6014_v41 = vld [vmem:[%s8101_s2 + $0x340] sm:$0xff]   ;;  %v6045_v8 = vld [vmem:[%s8101_s2 + $0x338] sm:$0xff]  }
 0x150   :  { %5413 = vmatpush3.bf16.msra.mxu1 %v5995_v23  ;;  %v3884_v22 = vcombine.high %v3862_v18, %v3862_v18  ;;  %v6015_v23 = vld [vmem:[%s8101_s2 + $0x2b8] sm:$0xff]  }
 0x151   :  { %5414 = vmatprep.subr.bf16.mxu1 %v5996_v24  ;;  %5393 = vmatpush3.bf16.msra.mxu0 %v5997_v29  ;;  %v3887_v24 = vcombine.high %v3883_v20, %v3883_v20  ;;  %v6020_v29 = vld [vmem:[%s8101_s2 + $0x3c8] sm:$0xff]  }
 0x152   :  { %5394 = vmatprep.subr.bf16.mxu0 %v5998_v35  ;;  %v6025_v35 = vld [vmem:[%s8101_s2 + $0x310] sm:$0xff]  }
 0x154   :  { %5415 = vmatpush3.bf16.msra.mxu1 %v5999_v36  ;;  %v6028_v36 = vld [vmem:[%s8101_s2 + $0x3d8] sm:$0xff]  }
 0x155   :  { %5416 = vmatprep.subr.bf16.mxu1 %v6000_v16  ;;  %5395 = vmatpush3.bf16.msra.mxu0 %v6001_v44  ;;  %v6032_v16 = vld [vmem:[%s8101_s2 + $0x3e0] sm:$0xff]  }
 0x156   :  { %5396 = vmatprep.subr.bf16.mxu0 %v6002_v49 }
 0x157   :  { %v5094_v47 = vpop.f32.mrb[12].mxu0 }
 0x158   :  { %v5095_v48 = vpop.f32.mrb[13].mxu0  ;;  %5417 = vmatpush3.bf16.msra.mxu1 %v6003_v52 }
 0x159   :  { %v5096_v54 = vadd.f32 %v5095_v48, %v5094_v47  ;;  %v5097_v58 = vpop.f32.mrb[14].mxu0  ;;  %v5116_v32 = vpop.f32.mrb[12].mxu1  ;;  %5418 = vmatprep.subr.bf16.mxu1 %v6004_v56  ;;  %5397 = vmatpush3.bf16.msra.mxu0 %v6005_v39  ;;  %v6035_v47 = vld [vmem:[%s8101_s2 + $0x3a0] sm:$0xff]   ;;  %v6036_v48 = vld [vmem:[%s8101_s2 + $0x3e8] sm:$0xff]  }
 0x15a   :  { %v5098_v61 = vpop.f32.mrb[15].mxu0  ;;  %v5117_v62 = vpop.f32.mrb[13].mxu1  ;;  %5398 = vmatprep.subr.bf16.mxu0 %v6006_v46  ;;  %v3869_v46 = vrot.slane %v7515_v60, %v6297_v40  ;;  %v6046_v60 = vld [vmem:[%s8101_s2 + $0x440] sm:$0xff]  }
 0x15b   :  { %v3409_v1 = vadd.f32 %v5096_v54, %v7402_v53  ;;  %v5118_v4 = vadd.f32 %v5117_v62, %v5116_v32  ;;  %v5119_v5 = vpop.f32.mrb[14].mxu1  ;;  %v6007_v53 = vld [vmem:[%s8101_s2 + $0x2a8] sm:$0xff]  }
 0x15c   :  { %v5120_v55 = vpop.f32.mrb[15].mxu1  ;;  %5419 = vmatpush3.bf16.msra.mxu1 %v6007_v53  ;;  %v6037_v54 = vld [vmem:[%s8101_s2 + $0x328] sm:$0xff]   ;;  %v3885_v10 = vcombine.high %v3869_v46, %v3869_v46 }
 0x15d   :  { %v7529_v59 = vadd.f32 %v5118_v4, %v3409_v1  ;;  %5420 = vmatprep.subr.bf16.mxu1 %v6008_v9  ;;  %5399 = vmatpush3.bf16.msra.mxu0 %v6009_v11  ;;  %v3903_v1 = vcombine.high %v7630_v3, %v7630_v3  ;;  %v6040_v4 = vld [vmem:[%s8101_s2 + $0x3f0] sm:$0xff]   ;;  %v6042_v55 = vld [vmem:[%s8101_s2 + $0x378] sm:$0xff]  }
 0x15e   :  { %5400 = vmatprep.subr.bf16.mxu0 %v6010_v17  ;;  %v6047_v9 = vld [vmem:[%s8101_s2 + $0x3b8] sm:$0xff]   ;;  %v6048_v17 = vld [vmem:[%s8101_s2 + $0x4c0] sm:$0xff]  }
 0x15f   :  { %v3925_v53 = vrot.slane %v3903_v1, %v6297_v40  ;;  %v6076_v1 = vld [vmem:[%s8101_s2 + $0x4f8] sm:$0xff]  }
 0x160   :  { %5421 = vmatpush3.bf16.msra.mxu1 %v6011_v19  ;;  %v6050_v19 = vld [vmem:[%s8101_s2 + $0x448] sm:$0xff]  }
 0x161   :  { %5422 = vmatprep.subr.bf16.mxu1 %v6012_v2  ;;  %5401 = vmatpush3.bf16.msra.mxu0 %v6013_v21  ;;  %v3935_v11 = vcombine.high %v3925_v53, %v3925_v53  ;;  %v6052_v2 = vld [vmem:[%s8101_s2 + $0x4c8] sm:$0xff]  }
 0x162   :  { %5430 = vmatprep.subr.bf16.mxu0 %v6014_v41  ;;  %v6053_v21 = vld [vmem:[%s8101_s2 + $0x408] sm:$0xff]   ;;  %v6054_v41 = vld [vmem:[%s8101_s2 + $0x450] sm:$0xff]  }
 0x164   :  { %5423 = vmatpush3.bf16.msra.mxu1 %v6015_v23  ;;  %4211 = vmatmul.mubr.bf16.vlgmr.msra.gmra.mrb[40].mxu0 %v3862_v18  ;;  %v6049_v18 = vld [vmem:[%s8101_s2 + $0x400] sm:$0xff]   ;;  %v6056_v23 = vld [vmem:[%s8101_s2 + $0x4d0] sm:$0xff]  }
 0x165   :  { %5452 = vmatprep.subr.bf16.mxu1 %v6016_v25  ;;  %5431 = vmatpush3.bf16.msra.mxu0 %v6017_v26  ;;  %v6058_v25 = vld [vmem:[%s8101_s2 + $0x458] sm:$0xff]   ;;  %v6059_v26 = vld [vmem:[%s8101_s2 + $0x490] sm:$0xff]  }
 0x166   :  { %4290 = vmatprep.mubr.bf16.mxu0 %v3883_v20  ;;  %5432 = vmatprep.subr.bf16.mxu0 %v6018_v27  ;;  %v6051_v20 = vld [vmem:[%s8101_s2 + $0x480] sm:$0xff]   ;;  %v6060_v27 = vld [vmem:[%s8101_s2 + $0x4d8] sm:$0xff]  }
 0x167   :  { %4251 = vmatmul.mubr.bf16.vlgmr.msra.gmra.mrb[40].mxu1 %v3884_v22  ;;  %v6055_v22 = vld [vmem:[%s8101_s2 + $0x488] sm:$0xff]  }
 0x168   :  { %5453 = vmatpush3.bf16.msra.mxu1 %v6019_v28  ;;  %4330 = vmatprep.mubr.bf16.mxu1 %v3887_v24  ;;  %v6057_v24 = vld [vmem:[%s8101_s2 + $0x410] sm:$0xff]   ;;  %v6061_v28 = vld [vmem:[%s8101_s2 + $0x418] sm:$0xff]  }
 0x169   :  { %5454 = vmatprep.subr.bf16.mxu1 %v6020_v29  ;;  %5433 = vmatpush3.bf16.msra.mxu0 %v6021_v30  ;;  %v6062_v29 = vld [vmem:[%s8101_s2 + $0x460] sm:$0xff]   ;;  %v6063_v30 = vld [vmem:[%s8101_s2 + $0x498] sm:$0xff]  }
 0x16a   :  { %5434 = vmatprep.subr.bf16.mxu0 %v6022_v31  ;;  %v3888_v31 = vcombine.high %v7304_v63, %v7304_v63  ;;  %v6067_v63 = vld [vmem:[%s8101_s2 + $0x4a0] sm:$0xff]  }
 0x16c   :  { %5455 = vmatpush3.bf16.msra.mxu1 %v6023_v33  ;;  %v6064_v33 = vld [vmem:[%s8101_s2 + $0x4e0] sm:$0xff]  }
 0x16d   :  { %5456 = vmatprep.subr.bf16.mxu1 %v6024_v34  ;;  %5435 = vmatpush3.bf16.msra.mxu0 %v6025_v35  ;;  %v6065_v34 = vld [vmem:[%s8101_s2 + $0x420] sm:$0xff]   ;;  %v6066_v35 = vld [vmem:[%s8101_s2 + $0x468] sm:$0xff]  }
 0x16e   :  { %5436 = vmatprep.subr.bf16.mxu0 %v6026_v12 }
 0x170   :  { %5457 = vmatpush3.bf16.msra.mxu1 %v6027_v14  ;;  %v7739_v14 = vrot.slane %v3888_v31, %v6297_v40 }
 0x171   :  { %5458 = vmatprep.subr.bf16.mxu1 %v6028_v36  ;;  %5437 = vmatpush3.bf16.msra.mxu0 %v6029_v37  ;;  %v6068_v37 = vld [vmem:[%s8101_s2 + $0x4e8] sm:$0xff]  }
 0x172   :  { %5438 = vmatprep.subr.bf16.mxu0 %v6030_v13 }
 0x174   :  { %5459 = vmatpush3.bf16.msra.mxu1 %v6031_v38 }
 0x175   :  { %5460 = vmatprep.subr.bf16.mxu1 %v6032_v16  ;;  %5439 = vmatpush3.bf16.msra.mxu0 %v6033_v42  ;;  %v6069_v42 = vld [vmem:[%s8101_s2 + $0x428] sm:$0xff]  }
 0x176   :  { %5440 = vmatprep.subr.bf16.mxu0 %v6034_v43 }
 0x177   :  { %v5138_v44 = vpop.f32.mrb[16].mxu0 }
 0x178   :  { %5461 = vmatpush3.bf16.msra.mxu1 %v6035_v47  ;;  %v5139_v57 = vpop.f32.mrb[17].mxu0  ;;  %v6070_v47 = vld [vmem:[%s8101_s2 + $0x470] sm:$0xff]  }
 0x179   :  { %5462 = vmatprep.subr.bf16.mxu1 %v6036_v48  ;;  %v5140_v49 = vadd.f32 %v5139_v57, %v5138_v44  ;;  %v5141_v50 = vpop.f32.mrb[18].mxu0  ;;  %v5160_v52 = vpop.f32.mrb[16].mxu1  ;;  %5441 = vmatpush3.bf16.msra.mxu0 %v6037_v54 }
 0x17a   :  { %v5142_v58 = vpop.f32.mrb[19].mxu0  ;;  %v5161_v32 = vpop.f32.mrb[17].mxu1  ;;  %5442 = vmatprep.subr.bf16.mxu0 %v6038_v51  ;;  %v6071_v50 = vld [vmem:[%s8101_s2 + $0x4a8] sm:$0xff]   ;;  %v6073_v51 = vld [vmem:[%s8101_s2 + $0x430] sm:$0xff]  }
 0x17b   :  { %v3489_v61 = vadd.f32 %v5140_v49, %v7529_v59  ;;  %v5162_v62 = vadd.f32 %v5161_v32, %v5160_v52  ;;  %v5163_v56 = vpop.f32.mrb[18].mxu1  ;;  %v6043_v59 = vld [vmem:[%s8101_s2 + $0x3b0] sm:$0xff]   ;;  %v3904_v52 = vcombine.high %v7739_v14, %v7739_v14 }
 0x17c   :  { %5463 = vmatpush3.bf16.msra.mxu1 %v6039_v0  ;;  %v5164_v39 = vpop.f32.mrb[19].mxu1  ;;  %v6072_v58 = vld [vmem:[%s8101_s2 + $0x4f0] sm:$0xff]  }
 0x17d   :  { %5464 = vmatprep.subr.bf16.mxu1 %v6040_v4  ;;  %v7650_v5 = vadd.f32 %v5162_v62, %v3489_v61  ;;  %5443 = vmatpush3.bf16.msra.mxu0 %v6041_v6  ;;  %v6074_v61 = vld [vmem:[%s8101_s2 + $0x478] sm:$0xff]   ;;  %v3911_v62 = vrot.slane %v7630_v3, %v6297_v40  ;;  %v6075_v56 = vld [vmem:[%s8101_s2 + $0x4b0] sm:$0xff]   ;;  %v3932_v0 = vrot.slane %v3904_v52, %v6297_v40  ;;  %v6078_v3 = vld [vmem:[%s8101_s2 + $0x540] sm:$0xff]  }
 0x17e   :  { %5444 = vmatprep.subr.bf16.mxu0 %v6042_v55  ;;  %v6077_v39 = vld [vmem:[%s8101_s2 + $0x438] sm:$0xff]   ;;  %v6080_v55 = vld [vmem:[%s8101_s2 + $0x5c0] sm:$0xff]  }
 0x17f   :  { %v3933_v4 = vcombine.high %v3911_v62, %v3911_v62  ;;  %v3936_v6 = vcombine.high %v3932_v0, %v3932_v0  ;;  %v6109_v52 = vld [vmem:[%s8101_s2 + $0x538] sm:$0xff]  }
 0x180   :  { %5465 = vmatpush3.bf16.msra.mxu1 %v6043_v59  ;;  %v6082_v59 = vld [vmem:[%s8101_s2 + $0x548] sm:$0xff]  }
 0x181   :  { %5466 = vmatprep.subr.bf16.mxu1 %v6044_v7  ;;  %5445 = vmatpush3.bf16.msra.mxu0 %v6045_v8  ;;  %v6084_v7 = vld [vmem:[%s8101_s2 + $0x5c8] sm:$0xff]  }
 0x182   :  { %5474 = vmatprep.subr.bf16.mxu0 %v6046_v60  ;;  %v6085_v8 = vld [vmem:[%s8101_s2 + $0x508] sm:$0xff]   ;;  %v6086_v60 = vld [vmem:[%s8101_s2 + $0x550] sm:$0xff]  }
 0x184   :  { %5467 = vmatpush3.bf16.msra.mxu1 %v6047_v9  ;;  %4291 = vmatmul.mubr.bf16.vlgmr.msra.gmra.mrb[44].mxu0 %v3869_v46  ;;  %v6081_v46 = vld [vmem:[%s8101_s2 + $0x500] sm:$0xff]   ;;  %v6088_v9 = vld [vmem:[%s8101_s2 + $0x5d0] sm:$0xff]  }
 0x185   :  { %5496 = vmatprep.subr.bf16.mxu1 %v6048_v17  ;;  %5475 = vmatpush3.bf16.msra.mxu0 %v6049_v18  ;;  %v6090_v17 = vld [vmem:[%s8101_s2 + $0x558] sm:$0xff]   ;;  %v6091_v18 = vld [vmem:[%s8101_s2 + $0x590] sm:$0xff]  }
 0x186   :  { %4370 = vmatprep.mubr.bf16.mxu0 %v3925_v53  ;;  %5476 = vmatprep.subr.bf16.mxu0 %v6050_v19  ;;  %v6083_v53 = vld [vmem:[%s8101_s2 + $0x580] sm:$0xff]   ;;  %v6092_v19 = vld [vmem:[%s8101_s2 + $0x5d8] sm:$0xff]  }
 0x187   :  { %4331 = vmatmul.mubr.bf16.vlgmr.msra.gmra.mrb[44].mxu1 %v3885_v10  ;;  %v6087_v10 = vld [vmem:[%s8101_s2 + $0x588] sm:$0xff]  }
 0x188   :  { %5497 = vmatpush3.bf16.msra.mxu1 %v6051_v20  ;;  %4410 = vmatprep.mubr.bf16.mxu1 %v3935_v11  ;;  %v6089_v11 = vld [vmem:[%s8101_s2 + $0x510] sm:$0xff]   ;;  %v6093_v20 = vld [vmem:[%s8101_s2 + $0x518] sm:$0xff]  }
 0x189   :  { %5498 = vmatprep.subr.bf16.mxu1 %v6052_v2  ;;  %5477 = vmatpush3.bf16.msra.mxu0 %v6053_v21  ;;  %v6094_v2 = vld [vmem:[%s8101_s2 + $0x560] sm:$0xff]   ;;  %v6095_v21 = vld [vmem:[%s8101_s2 + $0x598] sm:$0xff]  }
 0x18a   :  { %5478 = vmatprep.subr.bf16.mxu0 %v6054_v41  ;;  %v6096_v41 = vld [vmem:[%s8101_s2 + $0x5e0] sm:$0xff]  }
 0x18c   :  { %5499 = vmatpush3.bf16.msra.mxu1 %v6055_v22  ;;  %v6097_v22 = vld [vmem:[%s8101_s2 + $0x520] sm:$0xff]  }
 0x18d   :  { %5500 = vmatprep.subr.bf16.mxu1 %v6056_v23  ;;  %5479 = vmatpush3.bf16.msra.mxu0 %v6057_v24  ;;  %v6098_v23 = vld [vmem:[%s8101_s2 + $0x568] sm:$0xff]  }
 0x18e   :  { %5480 = vmatprep.subr.bf16.mxu0 %v6058_v25  ;;  %v6099_v25 = vld [vmem:[%s8101_s2 + $0x5a0] sm:$0xff]  }
 0x190   :  { %5501 = vmatpush3.bf16.msra.mxu1 %v6059_v26  ;;  %v7847_v26 = vrot.slane %v7544_v15, %v6297_v40 }
 0x191   :  { %5502 = vmatprep.subr.bf16.mxu1 %v6060_v27  ;;  %5481 = vmatpush3.bf16.msra.mxu0 %v6061_v28  ;;  %v6100_v28 = vld [vmem:[%s8101_s2 + $0x5e8] sm:$0xff]  }
 0x192   :  { %5482 = vmatprep.subr.bf16.mxu0 %v6062_v29 }
 0x194   :  { %5503 = vmatpush3.bf16.msra.mxu1 %v6063_v30 }
 0x195   :  { %5504 = vmatprep.subr.bf16.mxu1 %v6064_v33  ;;  %5483 = vmatpush3.bf16.msra.mxu0 %v6065_v34  ;;  %v6101_v33 = vld [vmem:[%s8101_s2 + $0x528] sm:$0xff]  }
 0x196   :  { %5484 = vmatprep.subr.bf16.mxu0 %v6066_v35 }
 0x197   :  { %v5182_v12 = vpop.f32.mrb[20].mxu0 }
 0x198   :  { %5505 = vmatpush3.bf16.msra.mxu1 %v6067_v63  ;;  %v5183_v36 = vpop.f32.mrb[21].mxu0 }
 0x199   :  { %5506 = vmatprep.subr.bf16.mxu1 %v6068_v37  ;;  %v5184_v13 = vadd.f32 %v5183_v36, %v5182_v12  ;;  %v5185_v38 = vpop.f32.mrb[22].mxu0  ;;  %v5204_v16 = vpop.f32.mrb[20].mxu1  ;;  %5485 = vmatpush3.bf16.msra.mxu0 %v6069_v42  ;;  %v6102_v12 = vld [vmem:[%s8101_s2 + $0x570] sm:$0xff]  }
 0x19a   :  { %v5186_v43 = vpop.f32.mrb[23].mxu0  ;;  %v5205_v44 = vpop.f32.mrb[21].mxu1  ;;  %5486 = vmatprep.subr.bf16.mxu0 %v6070_v47  ;;  %v3952_v38 = vcombine.high %v7847_v26, %v7847_v26  ;;  %v6104_v42 = vld [vmem:[%s8101_s2 + $0x5f0] sm:$0xff]   ;;  %v6106_v47 = vld [vmem:[%s8101_s2 + $0x578] sm:$0xff]  }
 0x19b   :  { %v3569_v57 = vadd.f32 %v5184_v13, %v7650_v5  ;;  %v5206_v48 = vadd.f32 %v5205_v44, %v5204_v16  ;;  %v5207_v49 = vpop.f32.mrb[22].mxu1  ;;  %v6079_v5 = vld [vmem:[%s8101_s2 + $0x4b8] sm:$0xff]   ;;  %v6103_v13 = vld [vmem:[%s8101_s2 + $0x5a8] sm:$0xff]   ;;  %v6105_v44 = vld [vmem:[%s8101_s2 + $0x530] sm:$0xff]  }
 0x19c   :  { %5507 = vmatpush3.bf16.msra.mxu1 %v6071_v50  ;;  %v5208_v54 = vpop.f32.mrb[23].mxu1  ;;  %v3974_v49 = vrot.slane %v3952_v38, %v6297_v40  ;;  %v6108_v50 = vld [vmem:[%s8101_s2 + $0x5f8] sm:$0xff]  }
 0x19d   :  { %5508 = vmatprep.subr.bf16.mxu1 %v6072_v58  ;;  %v7759_v32 = vadd.f32 %v5206_v48, %v3569_v57  ;;  %5487 = vmatpush3.bf16.msra.mxu0 %v6073_v51  ;;  %v3918_v57 = vrot.slane %v7739_v14, %v6297_v40  ;;  %v6107_v48 = vld [vmem:[%s8101_s2 + $0x5b0] sm:$0xff]   ;;  %v6110_v14 = vld [vmem:[%s8101_s2 + $0x640] sm:$0xff]   ;;  %v6111_v58 = vld [vmem:[%s8101_s2 + $0x5b8] sm:$0xff]  }
 0x19e   :  { %5488 = vmatprep.subr.bf16.mxu0 %v6074_v61  ;;  %v6112_v51 = vld [vmem:[%s8101_s2 + $0x6c0] sm:$0xff]   ;;  %v6140_v38 = vld [vmem:[%s8101_s2 + $0x6f8] sm:$0xff]  }
 0x19f   :  { %v3934_v54 = vcombine.high %v3918_v57, %v3918_v57  ;;  %v6113_v61 = vld [vmem:[%s8101_s2 + $0x600] sm:$0xff]  }
 0x1a0   :  { %5509 = vmatpush3.bf16.msra.mxu1 %v6075_v56  ;;  %v6115_v56 = vld [vmem:[%s8101_s2 + $0x680] sm:$0xff]  }
 0x1a1   :  { %5510 = vmatprep.subr.bf16.mxu1 %v6076_v1  ;;  %5489 = vmatpush3.bf16.msra.mxu0 %v6077_v39  ;;  %v6117_v1 = vld [vmem:[%s8101_s2 + $0x608] sm:$0xff]   ;;  %v6118_v39 = vld [vmem:[%s8101_s2 + $0x650] sm:$0xff]  }
 0x1a2   :  { %5518 = vmatprep.subr.bf16.mxu0 %v6078_v3  ;;  %v6119_v3 = vld [vmem:[%s8101_s2 + $0x688] sm:$0xff]  }
 0x1a4   :  { %5511 = vmatpush3.bf16.msra.mxu1 %v6079_v5  ;;  %4371 = vmatmul.mubr.bf16.vlgmr.msra.gmra.mrb[48].mxu0 %v3911_v62  ;;  %v6114_v62 = vld [vmem:[%s8101_s2 + $0x648] sm:$0xff]   ;;  %v6121_v5 = vld [vmem:[%s8101_s2 + $0x610] sm:$0xff]  }
 0x1a5   :  { %5540 = vmatprep.subr.bf16.mxu1 %v6080_v55  ;;  %5519 = vmatpush3.bf16.msra.mxu0 %v6081_v46  ;;  %v6123_v55 = vld [vmem:[%s8101_s2 + $0x690] sm:$0xff]   ;;  %v6124_v46 = vld [vmem:[%s8101_s2 + $0x6d8] sm:$0xff]  }
 0x1a6   :  { %4450 = vmatprep.mubr.bf16.mxu0 %v3932_v0  ;;  %5520 = vmatprep.subr.bf16.mxu0 %v6082_v59  ;;  %v6116_v0 = vld [vmem:[%s8101_s2 + $0x6c8] sm:$0xff]   ;;  %v6125_v59 = vld [vmem:[%s8101_s2 + $0x618] sm:$0xff]  }
 0x1a7   :  { %4411 = vmatmul.mubr.bf16.vlgmr.msra.gmra.mrb[48].mxu1 %v3933_v4  ;;  %v6120_v4 = vld [vmem:[%s8101_s2 + $0x6d0] sm:$0xff]  }
 0x1a8   :  { %5541 = vmatpush3.bf16.msra.mxu1 %v6083_v53  ;;  %4490 = vmatprep.mubr.bf16.mxu1 %v3936_v6  ;;  %v6122_v6 = vld [vmem:[%s8101_s2 + $0x658] sm:$0xff]   ;;  %v6126_v53 = vld [vmem:[%s8101_s2 + $0x660] sm:$0xff]  }
 0x1a9   :  { %5542 = vmatprep.subr.bf16.mxu1 %v6084_v7  ;;  %5521 = vmatpush3.bf16.msra.mxu0 %v6085_v8  ;;  %v6127_v7 = vld [vmem:[%s8101_s2 + $0x698] sm:$0xff]   ;;  %v3937_v8 = vcombine.high %v7544_v15, %v7544_v15  ;;  %v6131_v15 = vld [vmem:[%s8101_s2 + $0x6a0] sm:$0xff]  }
 0x1aa   :  { %5522 = vmatprep.subr.bf16.mxu0 %v6086_v60  ;;  %v6128_v60 = vld [vmem:[%s8101_s2 + $0x6e0] sm:$0xff]  }
 0x1ac   :  { %5543 = vmatpush3.bf16.msra.mxu1 %v6087_v10  ;;  %v6129_v10 = vld [vmem:[%s8101_s2 + $0x620] sm:$0xff]  }
 0x1ad   :  { %5544 = vmatprep.subr.bf16.mxu1 %v6088_v9  ;;  %5523 = vmatpush3.bf16.msra.mxu0 %v6089_v11  ;;  %v6130_v9 = vld [vmem:[%s8101_s2 + $0x668] sm:$0xff]  }
 0x1ae   :  { %5524 = vmatprep.subr.bf16.mxu0 %v6090_v17  ;;  %v7956_v17 = vrot.slane %v3937_v8, %v6297_v40 }
 0x1b0   :  { %5545 = vmatpush3.bf16.msra.mxu1 %v6091_v18 }
 0x1b1   :  { %5546 = vmatprep.subr.bf16.mxu1 %v6092_v19  ;;  %5525 = vmatpush3.bf16.msra.mxu0 %v6093_v20  ;;  %v6132_v19 = vld [vmem:[%s8101_s2 + $0x6e8] sm:$0xff]  }
 0x1b2   :  { %5526 = vmatprep.subr.bf16.mxu0 %v6094_v2 }
 0x1b4   :  { %5547 = vmatpush3.bf16.msra.mxu1 %v6095_v21 }
 0x1b5   :  { %5548 = vmatprep.subr.bf16.mxu1 %v6096_v41  ;;  %5527 = vmatpush3.bf16.msra.mxu0 %v6097_v22  ;;  %v6133_v41 = vld [vmem:[%s8101_s2 + $0x628] sm:$0xff]  }
 0x1b6   :  { %5528 = vmatprep.subr.bf16.mxu0 %v6098_v23 }
 0x1b7   :  { %v5226_v24 = vpop.f32.mrb[24].mxu0 }
 0x1b8   :  { %5549 = vmatpush3.bf16.msra.mxu1 %v6099_v25  ;;  %v5227_v27 = vpop.f32.mrb[25].mxu0 }
 0x1b9   :  { %5550 = vmatprep.subr.bf16.mxu1 %v6100_v28  ;;  %v5228_v29 = vadd.f32 %v5227_v27, %v5226_v24  ;;  %v5229_v30 = vpop.f32.mrb[26].mxu0  ;;  %v5248_v31 = vpop.f32.mrb[24].mxu1  ;;  %5529 = vmatpush3.bf16.msra.mxu0 %v6101_v33  ;;  %v6134_v24 = vld [vmem:[%s8101_s2 + $0x670] sm:$0xff]  }
 0x1ba   :  { %v5230_v34 = vpop.f32.mrb[27].mxu0  ;;  %v5249_v35 = vpop.f32.mrb[25].mxu1  ;;  %5530 = vmatprep.subr.bf16.mxu0 %v6102_v12  ;;  %v3953_v30 = vcombine.high %v7956_v17, %v7956_v17  ;;  %v6136_v33 = vld [vmem:[%s8101_s2 + $0x6f0] sm:$0xff]   ;;  %v6138_v12 = vld [vmem:[%s8101_s2 + $0x678] sm:$0xff]  }
 0x1bb   :  { %v3649_v63 = vadd.f32 %v5228_v29, %v7759_v32  ;;  %v5250_v36 = vadd.f32 %v5249_v35, %v5248_v31  ;;  %v5251_v37 = vpop.f32.mrb[26].mxu1  ;;  %v3984_v32 = vcombine.high %v3974_v49, %v3974_v49  ;;  %v6135_v29 = vld [vmem:[%s8101_s2 + $0x6a8] sm:$0xff]   ;;  %v6137_v35 = vld [vmem:[%s8101_s2 + $0x630] sm:$0xff]  }
 0x1bc   :  { %5551 = vmatpush3.bf16.msra.mxu1 %v6103_v13  ;;  %v5252_v16 = vpop.f32.mrb[27].mxu1  ;;  %v6139_v37 = vld [vmem:[%s8101_s2 + $0x6b0] sm:$0xff]   ;;  %v3981_v13 = vrot.slane %v3953_v30, %v6297_v40  ;;  %v6173_v30 = vld [vmem:[%s8101_s2 + $0x738] sm:$0xff]  }
 0x1bd   :  { %5552 = vmatprep.subr.bf16.mxu1 %v6104_v42  ;;  %v7867_v43 = vadd.f32 %v5250_v36, %v3649_v63  ;;  %5531 = vmatpush3.bf16.msra.mxu0 %v6105_v44  ;;  %v3960_v63 = vrot.slane %v7847_v26, %v6297_v40  ;;  %v6141_v42 = vld [vmem:[%s8101_s2 + $0x638] sm:$0xff]   ;;  %v6142_v26 = vld [vmem:[%s8101_s2 + $0x740] sm:$0xff]  }
 0x1be   :  { %5532 = vmatprep.subr.bf16.mxu0 %v6106_v47  ;;  %v6143_v44 = vld [vmem:[%s8101_s2 + $0x6b8] sm:$0xff]   ;;  %v3985_v47 = vcombine.high %v3981_v13, %v3981_v13 }
 0x1c0   :  { %5553 = vmatpush3.bf16.msra.mxu1 %v6107_v48  ;;  %v6145_v48 = vld [vmem:[%s8101_s2 + $0x700] sm:$0xff]  }
 0x1c1   :  { %5554 = vmatprep.subr.bf16.mxu1 %v6108_v50  ;;  %5533 = vmatpush3.bf16.msra.mxu0 %v6109_v52  ;;  %v6147_v50 = vld [vmem:[%s8101_s2 + $0x780] sm:$0xff]   ;;  %v6148_v52 = vld [vmem:[%s8101_s2 + $0x7c8] sm:$0xff]  }
 0x1c2   :  { %5562 = vmatprep.subr.bf16.mxu0 %v6110_v14  ;;  %v6149_v14 = vld [vmem:[%s8101_s2 + $0x708] sm:$0xff]  }
 0x1c4   :  { %5555 = vmatpush3.bf16.msra.mxu1 %v6111_v58  ;;  %4451 = vmatmul.mubr.bf16.vlgmr.msra.gmra.mrb[52].mxu0 %v3918_v57  ;;  %v6144_v57 = vld [vmem:[%s8101_s2 + $0x7c0] sm:$0xff]   ;;  %v6151_v58 = vld [vmem:[%s8101_s2 + $0x788] sm:$0xff]  }
 0x1c5   :  { %5584 = vmatprep.subr.bf16.mxu1 %v6112_v51  ;;  %5563 = vmatpush3.bf16.msra.mxu0 %v6113_v61  ;;  %v6153_v61 = vld [vmem:[%s8101_s2 + $0x710] sm:$0xff]  }
 0x1c6   :  { %4530 = vmatprep.mubr.bf16.mxu0 %v3974_v49  ;;  %5564 = vmatprep.subr.bf16.mxu0 %v6114_v62  ;;  %v6146_v49 = vld [vmem:[%s8101_s2 + $0x748] sm:$0xff]  }
 0x1c7   :  { %4491 = vmatmul.mubr.bf16.vlgmr.msra.gmra.mrb[52].mxu1 %v3934_v54  ;;  %v6150_v54 = vld [vmem:[%s8101_s2 + $0x750] sm:$0xff]  }
 0x1c8   :  { %5585 = vmatpush3.bf16.msra.mxu1 %v6115_v56  ;;  %4570 = vmatprep.mubr.bf16.mxu1 %v3984_v32  ;;  %v6152_v32 = vld [vmem:[%s8101_s2 + $0x7d0] sm:$0xff]   ;;  %v6154_v56 = vld [vmem:[%s8101_s2 + $0x758] sm:$0xff]  }
 0x1c9   :  { %5586 = vmatprep.subr.bf16.mxu1 %v6116_v0  ;;  %5565 = vmatpush3.bf16.msra.mxu0 %v6117_v1  ;;  %v6155_v0 = vld [vmem:[%s8101_s2 + $0x790] sm:$0xff]   ;;  %v6156_v1 = vld [vmem:[%s8101_s2 + $0x7d8] sm:$0xff]  }
 0x1ca   :  { %5566 = vmatprep.subr.bf16.mxu0 %v6118_v39  ;;  %v6157_v39 = vld [vmem:[%s8101_s2 + $0x718] sm:$0xff]  }
 0x1cc   :  { %5587 = vmatpush3.bf16.msra.mxu1 %v6119_v3  ;;  %v6158_v3 = vld [vmem:[%s8101_s2 + $0x760] sm:$0xff]  }
 0x1cd   :  { %5588 = vmatprep.subr.bf16.mxu1 %v6120_v4  ;;  %5567 = vmatpush3.bf16.msra.mxu0 %v6121_v5  ;;  %v6159_v4 = vld [vmem:[%s8101_s2 + $0x798] sm:$0xff]   ;;  %v6160_v5 = vld [vmem:[%s8101_s2 + $0x7e0] sm:$0xff]  }
 0x1ce   :  { %5568 = vmatprep.subr.bf16.mxu0 %v6122_v6  ;;  %v6161_v6 = vld [vmem:[%s8101_s2 + $0x720] sm:$0xff]  }
 0x1d0   :  { %5589 = vmatpush3.bf16.msra.mxu1 %v6123_v55  ;;  %v6162_v55 = vld [vmem:[%s8101_s2 + $0x768] sm:$0xff]  }
 0x1d1   :  { %5590 = vmatprep.subr.bf16.mxu1 %v6124_v46  ;;  %5569 = vmatpush3.bf16.msra.mxu0 %v6125_v59  ;;  %v6163_v59 = vld [vmem:[%s8101_s2 + $0x7a0] sm:$0xff]  }
 0x1d2   :  { %5570 = vmatprep.subr.bf16.mxu0 %v6126_v53 }
 0x1d4   :  { %5591 = vmatpush3.bf16.msra.mxu1 %v6127_v7  ;;  %v6164_v7 = vld [vmem:[%s8101_s2 + $0x7e8] sm:$0xff]  }
 0x1d5   :  { %5592 = vmatprep.subr.bf16.mxu1 %v6128_v60  ;;  %5571 = vmatpush3.bf16.msra.mxu0 %v6129_v10 }
 0x1d6   :  { %5572 = vmatprep.subr.bf16.mxu0 %v6130_v9  ;;  %v6165_v9 = vld [vmem:[%s8101_s2 + $0x728] sm:$0xff]  }
 0x1d7   :  { %v5270_v11 = vpop.f32.mrb[28].mxu0 }
 0x1d8   :  { %5593 = vmatpush3.bf16.msra.mxu1 %v6131_v15  ;;  %v5271_v18 = vpop.f32.mrb[29].mxu0 }
 0x1d9   :  { %5594 = vmatprep.subr.bf16.mxu1 %v6132_v19  ;;  %v5272_v20 = vadd.f32 %v5271_v18, %v5270_v11  ;;  %v5273_v2 = vpop.f32.mrb[30].mxu0  ;;  %v5292_v21 = vpop.f32.mrb[28].mxu1  ;;  %5573 = vmatpush3.bf16.msra.mxu0 %v6133_v41  ;;  %v6166_v19 = vld [vmem:[%s8101_s2 + $0x770] sm:$0xff]  }
 0x1da   :  { %v5274_v22 = vpop.f32.mrb[31].mxu0  ;;  %v5293_v23 = vpop.f32.mrb[29].mxu1  ;;  %5574 = vmatprep.subr.bf16.mxu0 %v6134_v24  ;;  %v6169_v24 = vld [vmem:[%s8101_s2 + $0x730] sm:$0xff]  }
 0x1db   :  { %v3729_v25 = vadd.f32 %v5272_v20, %v7867_v43  ;;  %v5294_v27 = vadd.f32 %v5293_v23, %v5292_v21  ;;  %v5295_v28 = vpop.f32.mrb[30].mxu1  ;;  %v3982_v43 = vcombine.high %v3960_v63, %v3960_v63  ;;  %v6167_v21 = vld [vmem:[%s8101_s2 + $0x7a8] sm:$0xff]   ;;  %v6168_v22 = vld [vmem:[%s8101_s2 + $0x7f0] sm:$0xff]  }
 0x1dc   :  { %5595 = vmatpush3.bf16.msra.mxu1 %v6135_v29  ;;  %v5296_v31 = vpop.f32.mrb[31].mxu1  ;;  %v6171_v28 = vld [vmem:[%s8101_s2 + $0x7b0] sm:$0xff]   ;;  %v6172_v29 = vld [vmem:[%s8101_s2 + $0x7f8] sm:$0xff]  }
 0x1dd   :  { %5596 = vmatprep.subr.bf16.mxu1 %v6136_v33  ;;  %v3769_v34 = vadd.f32 %v5294_v27, %v3729_v25  ;;  %5575 = vmatpush3.bf16.msra.mxu0 %v6137_v35  ;;  %v6170_v25 = vld [vmem:[%s8101_s2 + $0x778] sm:$0xff]   ;;  %v3967_v27 = vrot.slane %v7956_v17, %v6297_v40 }
 0x1de   :  { %5576 = vmatprep.subr.bf16.mxu0 %v6138_v12 }
 0x1df   :  { %v3774_v36 = vsub.f32 0.0, %v3769_v34  ;;  %v3983_v31 = vcombine.high %v3967_v27, %v3967_v27 }
 0x1e0   :  { %5597 = vmatpush3.bf16.msra.mxu1 %v6139_v37 }
 0x1e1   :  { %5598 = vmatprep.subr.bf16.mxu1 %v6140_v38  ;;  %v3775_v16 = vmul.f32 1.442695, %v3774_v36  ;;  %5577 = vmatpush3.bf16.msra.mxu0 %v6141_v42 }
 0x1e2   :  { %5606 = vmatprep.subr.bf16.mxu0 %v6142_v26 }
 0x1e3   :  { %5911 = vpow2.f32 %v3775_v16 }
 0x1e4   :  { %5599 = vmatpush3.bf16.msra.mxu1 %v6143_v44  ;;  %4531 = vmatmul.mubr.bf16.vlgmr.msra.gmra.mrb[56].mxu0 %v3960_v63 }
 0x1e5   :  { %5628 = vmatprep.subr.bf16.mxu1 %v6144_v57  ;;  %5607 = vmatpush3.bf16.msra.mxu0 %v6145_v48 }
 0x1e6   :  { %4610 = vmatprep.mubr.bf16.mxu0 %v3981_v13  ;;  %5608 = vmatprep.subr.bf16.mxu0 %v6146_v49 }
 0x1e7   :  { %4571 = vmatmul.mubr.bf16.vlgmr.msra.gmra.mrb[56].mxu1 %v3982_v43 }
 0x1e8   :  { %5629 = vmatpush3.bf16.msra.mxu1 %v6147_v50  ;;  %4650 = vmatprep.mubr.bf16.mxu1 %v3985_v47 }
 0x1e9   :  { %5630 = vmatprep.subr.bf16.mxu1 %v6148_v52  ;;  %5609 = vmatpush3.bf16.msra.mxu0 %v6149_v14 }
 0x1ea   :  { %5610 = vmatprep.subr.bf16.mxu0 %v6150_v54 }
 0x1ec   :  { %5631 = vmatpush3.bf16.msra.mxu1 %v6151_v58 }
 0x1ed   :  { %5632 = vmatprep.subr.bf16.mxu1 %v6152_v32  ;;  %v5912_v51 = vpop.eup %5911  ;;  %5611 = vmatpush3.bf16.msra.mxu0 %v6153_v61 }
 0x1ee   :  { %v3777_v62 = vadd.f32 1.0, %v5912_v51  ;;  %5612 = vmatprep.subr.bf16.mxu0 %v6154_v56 }
 0x1f0   :  { %5633 = vmatpush3.bf16.msra.mxu1 %v6155_v0  ;;  %5913 = vrcp.f32 %v3777_v62 }
 0x1f1   :  { %5634 = vmatprep.subr.bf16.mxu1 %v6156_v1  ;;  %5613 = vmatpush3.bf16.msra.mxu0 %v6157_v39 }
 0x1f2   :  { %5614 = vmatprep.subr.bf16.mxu0 %v6158_v3 }
 0x1f4   :  { %5635 = vmatpush3.bf16.msra.mxu1 %v6159_v4 }
 0x1f5   :  { %5636 = vmatprep.subr.bf16.mxu1 %v6160_v5  ;;  %5615 = vmatpush3.bf16.msra.mxu0 %v6161_v6 }
 0x1f6   :  { %5616 = vmatprep.subr.bf16.mxu0 %v6162_v55 }
 0x1f7   :  { %v5314_v46 = vpop.f32.mrb[32].mxu0 }
 0x1f8   :  { %5637 = vmatpush3.bf16.msra.mxu1 %v6163_v59  ;;  %v5315_v53 = vpop.f32.mrb[33].mxu0 }
 0x1f9   :  { %5638 = vmatprep.subr.bf16.mxu1 %v6164_v7  ;;  %v5316_v8 = vadd.f32 %v5315_v53, %v5314_v46  ;;  %v5317_v60 = vpop.f32.mrb[34].mxu0  ;;  %5617 = vmatpush3.bf16.msra.mxu0 %v6165_v9 }
 0x1fa   :  { %v5336_v10 = vpop.f32.mrb[32].mxu1  ;;  %v5914_v11 = vpop.eup %5913  ;;  %5618 = vmatprep.subr.bf16.mxu0 %v6166_v19 }
 0x1fb   :  { %v5318_v15 = vpop.f32.mrb[35].mxu0  ;;  %v5337_v18 = vpop.f32.mrb[33].mxu1  ;;  %3780 = vst [vmem:[%s8102_s3] sm:$0x1] %v5914_v11 }
 0x1fc   :  { %v5338_v20 = vadd.f32 %v5337_v18, %v5336_v10  ;;  %v5339_v2 = vpop.f32.mrb[34].mxu1  ;;  %5639 = vmatpush3.bf16.msra.mxu1 %v6167_v21 }
 0x1fd   :  { %v5340_v41 = vpop.f32.mrb[35].mxu1  ;;  %5640 = vmatprep.subr.bf16.mxu1 %v6168_v22  ;;  %5619 = vmatpush3.bf16.msra.mxu0 %v6169_v24 }
 0x1fe   :  { %v4093_v23 = vadd.f32 %v5338_v20, %v5316_v8  ;;  %5620 = vmatprep.subr.bf16.mxu0 %v6170_v25 }
 0x200   :  { %5641 = vmatpush3.bf16.msra.mxu1 %v6171_v28 }
 0x201   :  { %5642 = vmatprep.subr.bf16.mxu1 %v6172_v29  ;;  %5621 = vmatpush3.bf16.msra.mxu0 %v6173_v30 }
 0x204   :  { %5643 = vmatpush3.bf16.msra.mxu1 %v7163_v45  ;;  %4611 = vmatmul.mubr.bf16.vlgmr.msra.gmra.mrb[60].mxu0 %v3967_v27 }
 0x207   :  { %4651 = vmatmul.mubr.bf16.vlgmr.msra.gmra.mrb[60].mxu1 %v3983_v31 }
 0x217   :  { %v5358_v40 = vpop.f32.mrb[36].mxu0 }
 0x218   :  { %v5359_v17 = vpop.f32.mrb[37].mxu0 }
 0x219   :  { %v5360_v33 = vadd.f32 %v5359_v17, %v5358_v40  ;;  %v5361_v34 = vpop.f32.mrb[38].mxu0 }
 0x21a   :  { %v5380_v35 = vpop.f32.mrb[36].mxu1  ;;  %v5362_v12 = vpop.f32.mrb[39].mxu0 }
 0x21b   :  { %v5381_v63 = vpop.f32.mrb[37].mxu1  ;;  %v4133_v36 = vadd.f32 %v5360_v33, %v4093_v23 }
 0x21c   :  { %v5382_v37 = vadd.f32 %v5381_v63, %v5380_v35  ;;  %v5383_v13 = vpop.f32.mrb[38].mxu1 }
 0x21d   :  { %v5384_v38 = vpop.f32.mrb[39].mxu1 }
 0x21e   :  { %v4173_v16 = vadd.f32 %v5382_v37, %v4133_v36 }
 0x237   :  { %v5402_v42 = vpop.f32.mrb[40].mxu0 }
 0x238   :  { %v5403_v26 = vpop.f32.mrb[41].mxu0 }
 0x239   :  { %v5404_v43 = vadd.f32 %v5403_v26, %v5402_v42  ;;  %v5405_v44 = vpop.f32.mrb[42].mxu0 }
 0x23a   :  { %v5424_v47 = vpop.f32.mrb[40].mxu1  ;;  %v5406_v45 = vpop.f32.mrb[43].mxu0 }
 0x23b   :  { %v5425_v57 = vpop.f32.mrb[41].mxu1  ;;  %v4213_v48 = vadd.f32 %v5404_v43, %v4173_v16 }
 0x23c   :  { %v5426_v49 = vadd.f32 %v5425_v57, %v5424_v47  ;;  %v5427_v50 = vpop.f32.mrb[42].mxu1 }
 0x23d   :  { %v5428_v52 = vpop.f32.mrb[43].mxu1 }
 0x23e   :  { %v4253_v14 = vadd.f32 %v5426_v49, %v4213_v48 }
 0x257   :  { %v5446_v54 = vpop.f32.mrb[44].mxu0 }
 0x258   :  { %v5447_v58 = vpop.f32.mrb[45].mxu0 }
 0x259   :  { %v5448_v32 = vadd.f32 %v5447_v58, %v5446_v54  ;;  %v5449_v51 = vpop.f32.mrb[46].mxu0 }
 0x25a   :  { %v5468_v61 = vpop.f32.mrb[44].mxu1  ;;  %v5450_v62 = vpop.f32.mrb[47].mxu0 }
 0x25b   :  { %v5469_v56 = vpop.f32.mrb[45].mxu1  ;;  %v4293_v0 = vadd.f32 %v5448_v32, %v4253_v14 }
 0x25c   :  { %v5470_v1 = vadd.f32 %v5469_v56, %v5468_v61  ;;  %v5471_v39 = vpop.f32.mrb[46].mxu1 }
 0x25d   :  { %v5472_v3 = vpop.f32.mrb[47].mxu1 }
 0x25e   :  { %v4333_v4 = vadd.f32 %v5470_v1, %v4293_v0 }
 0x277   :  { %v5490_v5 = vpop.f32.mrb[48].mxu0 }
 0x278   :  { %v5491_v6 = vpop.f32.mrb[49].mxu0 }
 0x279   :  { %v5492_v55 = vadd.f32 %v5491_v6, %v5490_v5  ;;  %v5493_v46 = vpop.f32.mrb[50].mxu0 }
 0x27a   :  { %v5512_v59 = vpop.f32.mrb[48].mxu1  ;;  %v5494_v53 = vpop.f32.mrb[51].mxu0 }
 0x27b   :  { %v5513_v7 = vpop.f32.mrb[49].mxu1  ;;  %v4373_v8 = vadd.f32 %v5492_v55, %v4333_v4 }
 0x27c   :  { %v5514_v60 = vadd.f32 %v5513_v7, %v5512_v59  ;;  %v5515_v10 = vpop.f32.mrb[50].mxu1 }
 0x27d   :  { %v5516_v9 = vpop.f32.mrb[51].mxu1 }
 0x27e   :  { %v4413_v11 = vadd.f32 %v5514_v60, %v4373_v8 }
 0x297   :  { %v5534_v15 = vpop.f32.mrb[52].mxu0 }
 0x298   :  { %v5535_v18 = vpop.f32.mrb[53].mxu0 }
 0x299   :  { %v5536_v19 = vadd.f32 %v5535_v18, %v5534_v15  ;;  %v5537_v20 = vpop.f32.mrb[54].mxu0 }
 0x29a   :  { %v5556_v2 = vpop.f32.mrb[52].mxu1  ;;  %v5538_v21 = vpop.f32.mrb[55].mxu0 }
 0x29b   :  { %v5557_v41 = vpop.f32.mrb[53].mxu1  ;;  %v4453_v22 = vadd.f32 %v5536_v19, %v4413_v11 }
 0x29c   :  { %v5558_v23 = vadd.f32 %v5557_v41, %v5556_v2  ;;  %v5559_v24 = vpop.f32.mrb[54].mxu1 }
 0x29d   :  { %v5560_v25 = vpop.f32.mrb[55].mxu1 }
 0x29e   :  { %v4493_v27 = vadd.f32 %v5558_v23, %v4453_v22 }
 0x2b7   :  { %v5578_v28 = vpop.f32.mrb[56].mxu0 }
 0x2b8   :  { %v5579_v29 = vpop.f32.mrb[57].mxu0 }
 0x2b9   :  { %v5580_v30 = vadd.f32 %v5579_v29, %v5578_v28  ;;  %v5581_v31 = vpop.f32.mrb[58].mxu0 }
 0x2ba   :  { %v5600_v40 = vpop.f32.mrb[56].mxu1  ;;  %v5582_v17 = vpop.f32.mrb[59].mxu0 }
 0x2bb   :  { %v5601_v33 = vpop.f32.mrb[57].mxu1  ;;  %v4533_v34 = vadd.f32 %v5580_v30, %v4493_v27 }
 0x2bc   :  { %v5602_v35 = vadd.f32 %v5601_v33, %v5600_v40  ;;  %v5603_v12 = vpop.f32.mrb[58].mxu1 }
 0x2bd   :  { %v5604_v63 = vpop.f32.mrb[59].mxu1 }
 0x2be   :  { %v4573_v36 = vadd.f32 %v5602_v35, %v4533_v34 }
 0x2d7   :  { %v5622_v37 = vpop.f32.mrb[60].mxu0 }
 0x2d8   :  { %v5623_v13 = vpop.f32.mrb[61].mxu0 }
 0x2d9   :  { %v5624_v38 = vadd.f32 %v5623_v13, %v5622_v37  ;;  %v5625_v16 = vpop.f32.mrb[62].mxu0 }
 0x2da   :  { %v5644_v42 = vpop.f32.mrb[60].mxu1  ;;  %v5626_v26 = vpop.f32.mrb[63].mxu0 }
 0x2db   :  { %v5645_v43 = vpop.f32.mrb[61].mxu1  ;;  %v4613_v44 = vadd.f32 %v5624_v38, %v4573_v36 }
 0x2dc   :  { %v5646_v47 = vadd.f32 %v5645_v43, %v5644_v42  ;;  %v5647_v45 = vpop.f32.mrb[62].mxu1 }
 0x2dd   :  { %v5648_v57 = vpop.f32.mrb[63].mxu1 }
 0x2de   :  { %v4653_v48 = vadd.f32 %v5646_v47, %v4613_v44 }
 0x2e0   :  { %v4658_v49 = vsub.f32 0.0, %v4653_v48 }
 0x2e2   :  { %v4659_v50 = vmul.f32 1.442695, %v4658_v49 }
 0x2e4   :  { %5915 = vpow2.f32 %v4659_v50 }
 0x2ee   :  { %v5916_v52 = vpop.eup %5915 }
 0x2ef   :  { %v4661_v14 = vadd.f32 1.0, %v5916_v52 }
 0x2f1   :  { %5917 = vrcp.f32 %v4661_v14 }
 0x2fb   :  { %v5918_v54 = vpop.eup %5917 }
 0x2fc   :  { %4945 = vst [vmem:[%s8102_s3 + $0x1] sm:$0x1] %v5918_v54 }

</bundles_post_ra>
